<compile_context>
chip_gen: v7x
topology: tpu7x:2x2x1
jax: 0.10.0
libtpu: 0.0.40
codegen_flags: <defaults>
</compile_context>

<pallas_src>
import functools

import jax
import jax.numpy as jnp
from jax.experimental import pallas as pl
from jax.experimental.pallas import tpu as pltpu


def _ru(x, m):
    return (x + m - 1) // m * m


_SMEM = pl.BlockSpec(memory_space=pltpu.MemorySpace.SMEM)


# -----------------------------------------------------------------------------
# Fused conv(5x5, valid) + bias + PReLU + MaxPool(2, stride 2) kernel
# -----------------------------------------------------------------------------
def _conv_pool_kernel(ph_ref, w_ref, b_ref, a_ref, o_ref, cols_ref, *,
                      cin, wh, lm, kh, kw):
    """One batch tile of a conv+PReLU+pool stage.

    ph_ref  : (1, 4, Cin, Lblk) bf16 -- 2x2 phase-split input, positions flattened
              as (n, u, v) per phase; Lblk = Lm + tap-overreach pad.
    w_ref   : (Cout, KH*KW*Cin) bf16 -- K ordered (tap, cin).
    b_ref   : (Cout, 1) f32
    a_ref   : (1, 1) f32 (SMEM)      -- PReLU slope.
    o_ref   : (1, Cout, Lm) bf16     -- pooled output on the half-res phase grid;
              positions with u >= Hp or v >= Wp are garbage, cropped outside.
    cols_ref: (KH*KW*Cin, 4*Lm) bf16 VMEM scratch -- in-kernel im2col, the four
              pool candidates laid out contiguously along lanes.
    """
    # Build the column buffer in VMEM (never round-trips HBM).
    for q in range(4):
        di, dj = q // 2, q % 2
        for t in range(kh * kw):
            ki, kj = t // kw, t % kw
            s, r = di + ki, dj + kj
            ph = (s % 2) * 2 + (r % 2)
            off = (s // 2) * wh + (r // 2)
            cols_ref[t * cin:(t + 1) * cin, q * lm:(q + 1) * lm] = (
                ph_ref[0, ph, :, off:off + lm])

    # Single MXU GEMM covering all four pool-window candidates.
    res = jnp.dot(w_ref[...], cols_ref[...], preferred_element_type=jnp.float32)

    b = b_ref[...]
    alpha = a_ref[0, 0]
    out = None
    for q in range(4):                          # running max: low vreg pressure
        c = res[:, q * lm:(q + 1) * lm] + b     # lane-broadcast bias
        c = jnp.where(c >= 0, c, alpha * c)     # exact per-candidate PReLU
        out = c if out is None else jnp.maximum(out, c)
    o_ref[0] = out.astype(o_ref.dtype)


def _conv_prelu_pool_stage(xb, w, bias, alpha):
    """xb: (nblk, Cin, Nt, Hi, Wi) bf16, Hi/Wi even.

    Valid 5x5 conv (stride 1) + bias + PReLU + 2x2/stride-2 max-pool.
    Returns ((nblk, Cout, Nt, Hh, Wh) bf16, Hp, Wp); valid pooled result is
    [..., :Hp, :Wp] of the half-resolution phase grid.
    """
    nblk, cin, nt, hi, wi = xb.shape
    cout, _, kh, kw = w.shape
    hh, wh = hi // 2, wi // 2
    hp, wp = (hi - kh + 1) // 2, (wi - kw + 1) // 2
    lm = nt * hh * wh
    k = kh * kw * cin

    # 2x2 space-to-depth phase split: pure strided slicing, ~1x the activation
    # size, channel-major layout kept (no transposes).
    phases = jnp.stack([xb[:, :, :, pa::2, pb::2]
                        for pa in range(2) for pb in range(2)], axis=1)
    phases = phases.reshape(nblk, 4, cin, lm)
    pad = (kh // 2) * wh + (kw // 2)            # max in-kernel tap overreach
    lblk = lm + pad
    phases = jnp.pad(phases, ((0, 0), (0, 0), (0, 0), (0, pad)))

    # One-time weight reorder to the (tap, cin) K layout used by the scratch.
    wmat = (w.reshape(cout, cin, kh * kw).transpose(0, 2, 1)
            .reshape(cout, k).astype(jnp.bfloat16))
    bcol = bias.reshape(cout, 1).astype(jnp.float32)
    amat = jnp.asarray(alpha, jnp.float32).reshape(1, 1)

    kern = functools.partial(_conv_pool_kernel,
                             cin=cin, wh=wh, lm=lm, kh=kh, kw=kw)
    out = pl.pallas_call(
        kern,
        out_shape=jax.ShapeDtypeStruct((nblk, cout, lm), jnp.bfloat16),
        grid=(nblk,),
        in_specs=[
            pl.BlockSpec((1, 4, cin, lblk), lambda i: (i, 0, 0, 0)),
            pl.BlockSpec((cout, k), lambda i: (0, 0)),    # resident across steps
            pl.BlockSpec((cout, 1), lambda i: (0, 0)),
            _SMEM,
        ],
        out_specs=pl.BlockSpec((1, cout, lm), lambda i: (i, 0, 0)),
        scratch_shapes=[pltpu.VMEM((k, 4 * lm), jnp.bfloat16)],
        compiler_params=pltpu.CompilerParams(
            dimension_semantics=("parallel",)),
    )(phases, wmat, bcol, amat)
    return out.reshape(nblk, cout, nt, hh, wh), hp, wp


# -----------------------------------------------------------------------------
# Fused FC stack: fc1 + PReLU -> fc2 + PReLU -> fc3 (weights resident in VMEM)
# -----------------------------------------------------------------------------
def _fc_stack_kernel(x_ref, w1_ref, b1_ref, w2_ref, b2_ref, w3_ref, b3_ref,
                     a_ref, o_ref):
    a3 = a_ref[0, 0]
    a4 = a_ref[0, 1]
    h = jnp.dot(x_ref[...], w1_ref[...], preferred_element_type=jnp.float32)
    h = h + b1_ref[...]
    h = jnp.where(h >= 0, h, a3 * h).astype(jnp.bfloat16)
    h = jnp.dot(h, w2_ref[...], preferred_element_type=jnp.float32)
    h = h + b2_ref[...]
    h = jnp.where(h >= 0, h, a4 * h).astype(jnp.bfloat16)
    o = jnp.dot(h, w3_ref[...], preferred_element_type=jnp.float32)
    o_ref[...] = o + b3_ref[...]


def _fc_stack(x, p):
    """x: (N, 1024).  Returns (N, 2) f32."""
    n, kin = x.shape
    if n >= 32:                       # keep >= 2 grid steps (v7x: 2 TensorCores)
        bt = min(512, _ru((n + 1) // 2, 16))
    else:
        bt = _ru(max(n, 1), 16)       # bf16 sublane pack -> multiple of 16
    npad = _ru(n, bt)
    xb = x.astype(jnp.bfloat16)
    if npad != n:
        xb = jnp.pad(xb, ((0, npad - n), (0, 0)))

    nout = 128                        # fc3 lane-padded 2 -> 128 (dense stores)
    w1 = p["fc1_w"].astype(jnp.bfloat16)
    b1 = p["fc1_b"].reshape(1, 256).astype(jnp.float32)
    w2 = p["fc2_w"].astype(jnp.bfloat16)
    b2 = p["fc2_b"].reshape(1, 256).astype(jnp.float32)
    w3 = jnp.zeros((256, nout), jnp.bfloat16).at[:, :2].set(
        p["fc3_w"].astype(jnp.bfloat16))
    b3 = jnp.zeros((1, nout), jnp.float32).at[:, :2].set(
        p["fc3_b"].astype(jnp.float32))
    alphas = jnp.stack([p["a3"], p["a4"]]).reshape(1, 2).astype(jnp.float32)

    out = pl.pallas_call(
        _fc_stack_kernel,
        out_shape=jax.ShapeDtypeStruct((npad, nout), jnp.float32),
        grid=(npad // bt,),
        in_specs=[
            pl.BlockSpec((bt, kin), lambda i: (i, 0)),
            pl.BlockSpec((kin, 256), lambda i: (0, 0)),
            pl.BlockSpec((1, 256), lambda i: (0, 0)),
            pl.BlockSpec((256, 256), lambda i: (0, 0)),
            pl.BlockSpec((1, 256), lambda i: (0, 0)),
            pl.BlockSpec((256, nout), lambda i: (0, 0)),
            pl.BlockSpec((1, nout), lambda i: (0, 0)),
            _SMEM,
        ],
        out_specs=pl.BlockSpec((bt, nout), lambda i: (i, 0)),
        compiler_params=pltpu.CompilerParams(
            dimension_semantics=("parallel",)),
    )(xb, w1, b1, w2, b2, w3, b3, alphas)
    return out[:n, :2]


# -----------------------------------------------------------------------------
# Parameters (deterministic synthetic init; shapes from EmbeddingNet.__init__)
# -----------------------------------------------------------------------------
def init_params(key):
    ks = jax.random.split(key, 10)

    def kaiming(k, shape, fan_in):
        bound = 1.0 / jnp.sqrt(jnp.asarray(fan_in, jnp.float32))
        return jax.random.uniform(k, shape, jnp.float32, -bound, bound)

    p = {}
    p["w1"] = kaiming(ks[0], (32, 1, 5, 5), 1 * 5 * 5)
    p["b1"] = kaiming(ks[1], (32,), 1 * 5 * 5)
    p["w2"] = kaiming(ks[2], (64, 32, 5, 5), 32 * 5 * 5)
    p["b2"] = kaiming(ks[3], (64,), 32 * 5 * 5)
    # FC weights stored (in, out); a real torch nn.Linear weight is (out, in)
    # and must be transposed when porting.  Row order of fc1_w is the NCHW flatten.
    p["fc1_w"] = kaiming(ks[4], (64 * 4 * 4, 256), 64 * 4 * 4)
    p["fc1_b"] = kaiming(ks[5], (256,), 64 * 4 * 4)
    p["fc2_w"] = kaiming(ks[6], (256, 256), 256)
    p["fc2_b"] = kaiming(ks[7], (256,), 256)
    p["fc3_w"] = kaiming(ks[8], (256, 2), 256)
    p["fc3_b"] = kaiming(ks[9], (2,), 256)
    p["a1"] = jnp.float32(0.25)   # nn.PReLU() default single slope
    p["a2"] = jnp.float32(0.25)
    p["a3"] = jnp.float32(0.25)
    p["a4"] = jnp.float32(0.25)
    return p


# -----------------------------------------------------------------------------
# Forward pass (== EmbeddingNet.forward)
# -----------------------------------------------------------------------------
def embedding_net_forward(x, p):
    """x: (N, 1, 28, 28) f32 -> (N, 2) f32."""
    n = x.shape[0]
    # Batch tile shared by both conv stages: grid >= 2 whenever N >= 2 so both
    # v7x TensorCores get work; Nt=16 keeps per-step GEMMs long and VMEM ~5 MB.
    nt = max(1, min(16, n // 2))
    npad = _ru(n, nt)
    nblk = npad // nt
    xb = x.astype(jnp.bfloat16)
    if npad != n:
        xb = jnp.pad(xb, ((0, npad - n), (0, 0), (0, 0), (0, 0)))
    # (nblk, Cin=1, Nt, 28, 28): channel-major per tile (moves only a size-1 axis).
    xb = xb.reshape(nblk, nt, 1, 28, 28).transpose(0, 2, 1, 3, 4)

    y1, hp1, wp1 = _conv_prelu_pool_stage(xb, p["w1"], p["b1"], p["a1"])
    y1 = y1[:, :, :, :hp1, :wp1]                      # (nblk, 32, Nt, 12, 12)

    y2, hp2, wp2 = _conv_prelu_pool_stage(y1, p["w2"], p["b2"], p["a2"])
    y2 = y2[:, :, :, :hp2, :wp2]                      # (nblk, 64, Nt, 4, 4)

    # NCHW flatten (== torch .view(N, -1)); only a tiny (N, 1024) transpose.
    feats = y2.transpose(0, 2, 1, 3, 4).reshape(npad, 64 * hp2 * wp2)[:n]
    return _fc_stack(feats, p)


if __name__ == "__main__":
    key = jax.random.PRNGKey(0)
    pkey, xkey = jax.random.split(key)
    params = init_params(pkey)
    # Architecture implies 1x28x28 inputs (64*4*4 flatten after two conv/pool stages).
    x = jax.random.normal(xkey, (2, 1, 28, 28), jnp.float32)

    out = jax.jit(embedding_net_forward)(x, params)
    out = jax.block_until_ready(out)
    assert out.shape == (2, 2) and out.dtype == jnp.float32
    print("KERNEL_OK")
</pallas_src>

<mosaic_0001>
module attributes {stable_mosaic.version = 11 : i64} {
  func.func @_conv_pool_kernel(%arg0: i32, %arg1: memref<1x4x1x226xbf16, #tpu.memory_space<vmem>>, %arg2: memref<32x25xbf16, #tpu.memory_space<vmem>>, %arg3: memref<32x1xf32, #tpu.memory_space<vmem>>, %arg4: memref<1x1xf32, #tpu.memory_space<smem>>, %arg5: memref<1x32x196xbf16, #tpu.memory_space<vmem>>, %arg6: memref<25x784xbf16, #tpu.memory_space<vmem>>) attributes {dimension_semantics = [#tpu.dimension_semantics<parallel>], iteration_bounds = array<i64: 2>, scalar_prefetch = 0 : i64, scratch_operands = 1 : i64, tpu.core_type = #tpu.core_type<tc>, window_params = [{transform_indices = @transform_0, window_bounds = array<i64: 1, 4, 1, 226>}, {pipeline_mode = #tpu.pipeline_mode<synchronous>, transform_indices = @transform_1, window_bounds = array<i64: 32, 25>}, {pipeline_mode = #tpu.pipeline_mode<synchronous>, transform_indices = @transform_2, window_bounds = array<i64: 32, 1>}, {transform_indices = @transform_3, window_bounds = array<i64: 1, 1>}, {transform_indices = @transform_4, window_bounds = array<i64: 1, 32, 196>}]} {
    %c0 = arith.constant 0 : index
    %c0_0 = arith.constant 0 : index
    %c0_1 = arith.constant 0 : index
    %c0_2 = arith.constant 0 : index
    %0 = vector.load %arg1[%c0, %c0_0, %c0_1, %c0_2] : memref<1x4x1x226xbf16, #tpu.memory_space<vmem>>, vector<1x1x1x196xbf16>
    %1 = vector.shape_cast %0 : vector<1x1x1x196xbf16> to vector<1x196xbf16>
    %c0_3 = arith.constant 0 : index
    %c0_4 = arith.constant 0 : index
    %2 = vector.load %arg6[%c0_3, %c0_4] : memref<25x784xbf16, #tpu.memory_space<vmem>>, vector<1x196xbf16>
    tpu.vector_store %arg6[%c0_3, %c0_4], %1 {strides = array<i32>} : memref<25x784xbf16, #tpu.memory_space<vmem>>, vector<1x196xbf16>,
    %c0_5 = arith.constant 0 : index
    %c1 = arith.constant 1 : index
    %c0_6 = arith.constant 0 : index
    %c0_7 = arith.constant 0 : index
    %3 = vector.load %arg1[%c0_5, %c1, %c0_6, %c0_7] : memref<1x4x1x226xbf16, #tpu.memory_space<vmem>>, vector<1x1x1x196xbf16>
    %4 = vector.shape_cast %3 : vector<1x1x1x196xbf16> to vector<1x196xbf16>
    %c1_8 = arith.constant 1 : index
    %c0_9 = arith.constant 0 : index
    %5 = vector.load %arg6[%c1_8, %c0_9] : memref<25x784xbf16, #tpu.memory_space<vmem>>, vector<1x196xbf16>
    tpu.vector_store %arg6[%c1_8, %c0_9], %4 {strides = array<i32>} : memref<25x784xbf16, #tpu.memory_space<vmem>>, vector<1x196xbf16>,
    %c0_10 = arith.constant 0 : index
    %c0_11 = arith.constant 0 : index
    %c0_12 = arith.constant 0 : index
    %c1_13 = arith.constant 1 : index
    %6 = vector.load %arg1[%c0_10, %c0_11, %c0_12, %c1_13] : memref<1x4x1x226xbf16, #tpu.memory_space<vmem>>, vector<1x1x1x196xbf16>
    %7 = vector.shape_cast %6 : vector<1x1x1x196xbf16> to vector<1x196xbf16>
    %c2 = arith.constant 2 : index
    %c0_14 = arith.constant 0 : index
    %8 = vector.load %arg6[%c2, %c0_14] : memref<25x784xbf16, #tpu.memory_space<vmem>>, vector<1x196xbf16>
    tpu.vector_store %arg6[%c2, %c0_14], %7 {strides = array<i32>} : memref<25x784xbf16, #tpu.memory_space<vmem>>, vector<1x196xbf16>,
    %c0_15 = arith.constant 0 : index
    %c1_16 = arith.constant 1 : index
    %c0_17 = arith.constant 0 : index
    %c1_18 = arith.constant 1 : index
    %9 = vector.load %arg1[%c0_15, %c1_16, %c0_17, %c1_18] : memref<1x4x1x226xbf16, #tpu.memory_space<vmem>>, vector<1x1x1x196xbf16>
    %10 = vector.shape_cast %9 : vector<1x1x1x196xbf16> to vector<1x196xbf16>
    %c3 = arith.constant 3 : index
    %c0_19 = arith.constant 0 : index
    %11 = vector.load %arg6[%c3, %c0_19] : memref<25x784xbf16, #tpu.memory_space<vmem>>, vector<1x196xbf16>
    tpu.vector_store %arg6[%c3, %c0_19], %10 {strides = array<i32>} : memref<25x784xbf16, #tpu.memory_space<vmem>>, vector<1x196xbf16>,
    %c0_20 = arith.constant 0 : index
    %c0_21 = arith.constant 0 : index
    %c0_22 = arith.constant 0 : index
    %c2_23 = arith.constant 2 : index
    %12 = vector.load %arg1[%c0_20, %c0_21, %c0_22, %c2_23] : memref<1x4x1x226xbf16, #tpu.memory_space<vmem>>, vector<1x1x1x196xbf16>
    %13 = vector.shape_cast %12 : vector<1x1x1x196xbf16> to vector<1x196xbf16>
    %c4 = arith.constant 4 : index
    %c0_24 = arith.constant 0 : index
    %14 = vector.load %arg6[%c4, %c0_24] : memref<25x784xbf16, #tpu.memory_space<vmem>>, vector<1x196xbf16>
    tpu.vector_store %arg6[%c4, %c0_24], %13 {strides = array<i32>} : memref<25x784xbf16, #tpu.memory_space<vmem>>, vector<1x196xbf16>,
    %c0_25 = arith.constant 0 : index
    %c2_26 = arith.constant 2 : index
    %c0_27 = arith.constant 0 : index
    %c0_28 = arith.constant 0 : index
    %15 = vector.load %arg1[%c0_25, %c2_26, %c0_27, %c0_28] : memref<1x4x1x226xbf16, #tpu.memory_space<vmem>>, vector<1x1x1x196xbf16>
    %16 = vector.shape_cast %15 : vector<1x1x1x196xbf16> to vector<1x196xbf16>
    %c5 = arith.constant 5 : index
    %c0_29 = arith.constant 0 : index
    %17 = vector.load %arg6[%c5, %c0_29] : memref<25x784xbf16, #tpu.memory_space<vmem>>, vector<1x196xbf16>
    tpu.vector_store %arg6[%c5, %c0_29], %16 {strides = array<i32>} : memref<25x784xbf16, #tpu.memory_space<vmem>>, vector<1x196xbf16>,
    %c0_30 = arith.constant 0 : index
    %c3_31 = arith.constant 3 : index
    %c0_32 = arith.constant 0 : index
    %c0_33 = arith.constant 0 : index
    %18 = vector.load %arg1[%c0_30, %c3_31, %c0_32, %c0_33] : memref<1x4x1x226xbf16, #tpu.memory_space<vmem>>, vector<1x1x1x196xbf16>
    %19 = vector.shape_cast %18 : vector<1x1x1x196xbf16> to vector<1x196xbf16>
    %c6 = arith.constant 6 : index
    %c0_34 = arith.constant 0 : index
    %20 = vector.load %arg6[%c6, %c0_34] : memref<25x784xbf16, #tpu.memory_space<vmem>>, vector<1x196xbf16>
    tpu.vector_store %arg6[%c6, %c0_34], %19 {strides = array<i32>} : memref<25x784xbf16, #tpu.memory_space<vmem>>, vector<1x196xbf16>,
    %c0_35 = arith.constant 0 : index
    %c2_36 = arith.constant 2 : index
    %c0_37 = arith.constant 0 : index
    %c1_38 = arith.constant 1 : index
    %21 = vector.load %arg1[%c0_35, %c2_36, %c0_37, %c1_38] : memref<1x4x1x226xbf16, #tpu.memory_space<vmem>>, vector<1x1x1x196xbf16>
    %22 = vector.shape_cast %21 : vector<1x1x1x196xbf16> to vector<1x196xbf16>
    %c7 = arith.constant 7 : index
    %c0_39 = arith.constant 0 : index
    %23 = vector.load %arg6[%c7, %c0_39] : memref<25x784xbf16, #tpu.memory_space<vmem>>, vector<1x196xbf16>
    tpu.vector_store %arg6[%c7, %c0_39], %22 {strides = array<i32>} : memref<25x784xbf16, #tpu.memory_space<vmem>>, vector<1x196xbf16>,
    %c0_40 = arith.constant 0 : index
    %c3_41 = arith.constant 3 : index
    %c0_42 = arith.constant 0 : index
    %c1_43 = arith.constant 1 : index
    %24 = vector.load %arg1[%c0_40, %c3_41, %c0_42, %c1_43] : memref<1x4x1x226xbf16, #tpu.memory_space<vmem>>, vector<1x1x1x196xbf16>
    %25 = vector.shape_cast %24 : vector<1x1x1x196xbf16> to vector<1x196xbf16>
    %c8 = arith.constant 8 : index
    %c0_44 = arith.constant 0 : index
    %26 = vector.load %arg6[%c8, %c0_44] : memref<25x784xbf16, #tpu.memory_space<vmem>>, vector<1x196xbf16>
    tpu.vector_store %arg6[%c8, %c0_44], %25 {strides = array<i32>} : memref<25x784xbf16, #tpu.memory_space<vmem>>, vector<1x196xbf16>,
    %c0_45 = arith.constant 0 : index
    %c2_46 = arith.constant 2 : index
    %c0_47 = arith.constant 0 : index
    %c2_48 = arith.constant 2 : index
    %27 = vector.load %arg1[%c0_45, %c2_46, %c0_47, %c2_48] : memref<1x4x1x226xbf16, #tpu.memory_space<vmem>>, vector<1x1x1x196xbf16>
    %28 = vector.shape_cast %27 : vector<1x1x1x196xbf16> to vector<1x196xbf16>
    %c9 = arith.constant 9 : index
    %c0_49 = arith.constant 0 : index
    %29 = vector.load %arg6[%c9, %c0_49] : memref<25x784xbf16, #tpu.memory_space<vmem>>, vector<1x196xbf16>
    tpu.vector_store %arg6[%c9, %c0_49], %28 {strides = array<i32>} : memref<25x784xbf16, #tpu.memory_space<vmem>>, vector<1x196xbf16>,
    %c0_50 = arith.constant 0 : index
    %c0_51 = arith.constant 0 : index
    %c0_52 = arith.constant 0 : index
    %c14 = arith.constant 14 : index
    %30 = vector.load %arg1[%c0_50, %c0_51, %c0_52, %c14] : memref<1x4x1x226xbf16, #tpu.memory_space<vmem>>, vector<1x1x1x196xbf16>
    %31 = vector.shape_cast %30 : vector<1x1x1x196xbf16> to vector<1x196xbf16>
    %c10 = arith.constant 10 : index
    %c0_53 = arith.constant 0 : index
    %32 = vector.load %arg6[%c10, %c0_53] : memref<25x784xbf16, #tpu.memory_space<vmem>>, vector<1x196xbf16>
    tpu.vector_store %arg6[%c10, %c0_53], %31 {strides = array<i32>} : memref<25x784xbf16, #tpu.memory_space<vmem>>, vector<1x196xbf16>,
    %c0_54 = arith.constant 0 : index
    %c1_55 = arith.constant 1 : index
    %c0_56 = arith.constant 0 : index
    %c14_57 = arith.constant 14 : index
    %33 = vector.load %arg1[%c0_54, %c1_55, %c0_56, %c14_57] : memref<1x4x1x226xbf16, #tpu.memory_space<vmem>>, vector<1x1x1x196xbf16>
    %34 = vector.shape_cast %33 : vector<1x1x1x196xbf16> to vector<1x196xbf16>
    %c11 = arith.constant 11 : index
    %c0_58 = arith.constant 0 : index
    %35 = vector.load %arg6[%c11, %c0_58] : memref<25x784xbf16, #tpu.memory_space<vmem>>, vector<1x196xbf16>
    tpu.vector_store %arg6[%c11, %c0_58], %34 {strides = array<i32>} : memref<25x784xbf16, #tpu.memory_space<vmem>>, vector<1x196xbf16>,
    %c0_59 = arith.constant 0 : index
    %c0_60 = arith.constant 0 : index
    %c0_61 = arith.constant 0 : index
    %c15 = arith.constant 15 : index
    %36 = vector.load %arg1[%c0_59, %c0_60, %c0_61, %c15] : memref<1x4x1x226xbf16, #tpu.memory_space<vmem>>, vector<1x1x1x196xbf16>
    %37 = vector.shape_cast %36 : vector<1x1x1x196xbf16> to vector<1x196xbf16>
    %c12 = arith.constant 12 : index
    %c0_62 = arith.constant 0 : index
    %38 = vector.load %arg6[%c12, %c0_62] : memref<25x784xbf16, #tpu.memory_space<vmem>>, vector<1x196xbf16>
    tpu.vector_store %arg6[%c12, %c0_62], %37 {strides = array<i32>} : memref<25x784xbf16, #tpu.memory_space<vmem>>, vector<1x196xbf16>,
    %c0_63 = arith.constant 0 : index
    %c1_64 = arith.constant 1 : index
    %c0_65 = arith.constant 0 : index
    %c15_66 = arith.constant 15 : index
    %39 = vector.load %arg1[%c0_63, %c1_64, %c0_65, %c15_66] : memref<1x4x1x226xbf16, #tpu.memory_space<vmem>>, vector<1x1x1x196xbf16>
    %40 = vector.shape_cast %39 : vector<1x1x1x196xbf16> to vector<1x196xbf16>
    %c13 = arith.constant 13 : index
    %c0_67 = arith.constant 0 : index
    %41 = vector.load %arg6[%c13, %c0_67] : memref<25x784xbf16, #tpu.memory_space<vmem>>, vector<1x196xbf16>
    tpu.vector_store %arg6[%c13, %c0_67], %40 {strides = array<i32>} : memref<25x784xbf16, #tpu.memory_space<vmem>>, vector<1x196xbf16>,
    %c0_68 = arith.constant 0 : index
    %c0_69 = arith.constant 0 : index
    %c0_70 = arith.constant 0 : index
    %c16 = arith.constant 16 : index
    %42 = vector.load %arg1[%c0_68, %c0_69, %c0_70, %c16] : memref<1x4x1x226xbf16, #tpu.memory_space<vmem>>, vector<1x1x1x196xbf16>
    %43 = vector.shape_cast %42 : vector<1x1x1x196xbf16> to vector<1x196xbf16>
    %c14_71 = arith.constant 14 : index
    %c0_72 = arith.constant 0 : index
    %44 = vector.load %arg6[%c14_71, %c0_72] : memref<25x784xbf16, #tpu.memory_space<vmem>>, vector<1x196xbf16>
    tpu.vector_store %arg6[%c14_71, %c0_72], %43 {strides = array<i32>} : memref<25x784xbf16, #tpu.memory_space<vmem>>, vector<1x196xbf16>,
    %c0_73 = arith.constant 0 : index
    %c2_74 = arith.constant 2 : index
    %c0_75 = arith.constant 0 : index
    %c14_76 = arith.constant 14 : index
    %45 = vector.load %arg1[%c0_73, %c2_74, %c0_75, %c14_76] : memref<1x4x1x226xbf16, #tpu.memory_space<vmem>>, vector<1x1x1x196xbf16>
    %46 = vector.shape_cast %45 : vector<1x1x1x196xbf16> to vector<1x196xbf16>
    %c15_77 = arith.constant 15 : index
    %c0_78 = arith.constant 0 : index
    %47 = vector.load %arg6[%c15_77, %c0_78] : memref<25x784xbf16, #tpu.memory_space<vmem>>, vector<1x196xbf16>
    tpu.vector_store %arg6[%c15_77, %c0_78], %46 {strides = array<i32>} : memref<25x784xbf16, #tpu.memory_space<vmem>>, vector<1x196xbf16>,
    %c0_79 = arith.constant 0 : index
    %c3_80 = arith.constant 3 : index
    %c0_81 = arith.constant 0 : index
    %c14_82 = arith.constant 14 : index
    %48 = vector.load %arg1[%c0_79, %c3_80, %c0_81, %c14_82] : memref<1x4x1x226xbf16, #tpu.memory_space<vmem>>, vector<1x1x1x196xbf16>
    %49 = vector.shape_cast %48 : vector<1x1x1x196xbf16> to vector<1x196xbf16>
    %c16_83 = arith.constant 16 : index
    %c0_84 = arith.constant 0 : index
    %50 = vector.load %arg6[%c16_83, %c0_84] : memref<25x784xbf16, #tpu.memory_space<vmem>>, vector<1x196xbf16>
    tpu.vector_store %arg6[%c16_83, %c0_84], %49 {strides = array<i32>} : memref<25x784xbf16, #tpu.memory_space<vmem>>, vector<1x196xbf16>,
    %c0_85 = arith.constant 0 : index
    %c2_86 = arith.constant 2 : index
    %c0_87 = arith.constant 0 : index
    %c15_88 = arith.constant 15 : index
    %51 = vector.load %arg1[%c0_85, %c2_86, %c0_87, %c15_88] : memref<1x4x1x226xbf16, #tpu.memory_space<vmem>>, vector<1x1x1x196xbf16>
    %52 = vector.shape_cast %51 : vector<1x1x1x196xbf16> to vector<1x196xbf16>
    %c17 = arith.constant 17 : index
    %c0_89 = arith.constant 0 : index
    %53 = vector.load %arg6[%c17, %c0_89] : memref<25x784xbf16, #tpu.memory_space<vmem>>, vector<1x196xbf16>
    tpu.vector_store %arg6[%c17, %c0_89], %52 {strides = array<i32>} : memref<25x784xbf16, #tpu.memory_space<vmem>>, vector<1x196xbf16>,
    %c0_90 = arith.constant 0 : index
    %c3_91 = arith.constant 3 : index
    %c0_92 = arith.constant 0 : index
    %c15_93 = arith.constant 15 : index
    %54 = vector.load %arg1[%c0_90, %c3_91, %c0_92, %c15_93] : memref<1x4x1x226xbf16, #tpu.memory_space<vmem>>, vector<1x1x1x196xbf16>
    %55 = vector.shape_cast %54 : vector<1x1x1x196xbf16> to vector<1x196xbf16>
    %c18 = arith.constant 18 : index
    %c0_94 = arith.constant 0 : index
    %56 = vector.load %arg6[%c18, %c0_94] : memref<25x784xbf16, #tpu.memory_space<vmem>>, vector<1x196xbf16>
    tpu.vector_store %arg6[%c18, %c0_94], %55 {strides = array<i32>} : memref<25x784xbf16, #tpu.memory_space<vmem>>, vector<1x196xbf16>,
    %c0_95 = arith.constant 0 : index
    %c2_96 = arith.constant 2 : index
    %c0_97 = arith.constant 0 : index
    %c16_98 = arith.constant 16 : index
    %57 = vector.load %arg1[%c0_95, %c2_96, %c0_97, %c16_98] : memref<1x4x1x226xbf16, #tpu.memory_space<vmem>>, vector<1x1x1x196xbf16>
    %58 = vector.shape_cast %57 : vector<1x1x1x196xbf16> to vector<1x196xbf16>
    %c19 = arith.constant 19 : index
    %c0_99 = arith.constant 0 : index
    %59 = vector.load %arg6[%c19, %c0_99] : memref<25x784xbf16, #tpu.memory_space<vmem>>, vector<1x196xbf16>
    tpu.vector_store %arg6[%c19, %c0_99], %58 {strides = array<i32>} : memref<25x784xbf16, #tpu.memory_space<vmem>>, vector<1x196xbf16>,
    %c0_100 = arith.constant 0 : index
    %c0_101 = arith.constant 0 : index
    %c0_102 = arith.constant 0 : index
    %c28 = arith.constant 28 : index
    %60 = vector.load %arg1[%c0_100, %c0_101, %c0_102, %c28] : memref<1x4x1x226xbf16, #tpu.memory_space<vmem>>, vector<1x1x1x196xbf16>
    %61 = vector.shape_cast %60 : vector<1x1x1x196xbf16> to vector<1x196xbf16>
    %c20 = arith.constant 20 : index
    %c0_103 = arith.constant 0 : index
    %62 = vector.load %arg6[%c20, %c0_103] : memref<25x784xbf16, #tpu.memory_space<vmem>>, vector<1x196xbf16>
    tpu.vector_store %arg6[%c20, %c0_103], %61 {strides = array<i32>} : memref<25x784xbf16, #tpu.memory_space<vmem>>, vector<1x196xbf16>,
    %c0_104 = arith.constant 0 : index
    %c1_105 = arith.constant 1 : index
    %c0_106 = arith.constant 0 : index
    %c28_107 = arith.constant 28 : index
    %63 = vector.load %arg1[%c0_104, %c1_105, %c0_106, %c28_107] : memref<1x4x1x226xbf16, #tpu.memory_space<vmem>>, vector<1x1x1x196xbf16>
    %64 = vector.shape_cast %63 : vector<1x1x1x196xbf16> to vector<1x196xbf16>
    %c21 = arith.constant 21 : index
    %c0_108 = arith.constant 0 : index
    %65 = vector.load %arg6[%c21, %c0_108] : memref<25x784xbf16, #tpu.memory_space<vmem>>, vector<1x196xbf16>
    tpu.vector_store %arg6[%c21, %c0_108], %64 {strides = array<i32>} : memref<25x784xbf16, #tpu.memory_space<vmem>>, vector<1x196xbf16>,
    %c0_109 = arith.constant 0 : index
    %c0_110 = arith.constant 0 : index
    %c0_111 = arith.constant 0 : index
    %c29 = arith.constant 29 : index
    %66 = vector.load %arg1[%c0_109, %c0_110, %c0_111, %c29] : memref<1x4x1x226xbf16, #tpu.memory_space<vmem>>, vector<1x1x1x196xbf16>
    %67 = vector.shape_cast %66 : vector<1x1x1x196xbf16> to vector<1x196xbf16>
    %c22 = arith.constant 22 : index
    %c0_112 = arith.constant 0 : index
    %68 = vector.load %arg6[%c22, %c0_112] : memref<25x784xbf16, #tpu.memory_space<vmem>>, vector<1x196xbf16>
    tpu.vector_store %arg6[%c22, %c0_112], %67 {strides = array<i32>} : memref<25x784xbf16, #tpu.memory_space<vmem>>, vector<1x196xbf16>,
    %c0_113 = arith.constant 0 : index
    %c1_114 = arith.constant 1 : index
    %c0_115 = arith.constant 0 : index
    %c29_116 = arith.constant 29 : index
    %69 = vector.load %arg1[%c0_113, %c1_114, %c0_115, %c29_116] : memref<1x4x1x226xbf16, #tpu.memory_space<vmem>>, vector<1x1x1x196xbf16>
    %70 = vector.shape_cast %69 : vector<1x1x1x196xbf16> to vector<1x196xbf16>
    %c23 = arith.constant 23 : index
    %c0_117 = arith.constant 0 : index
    %71 = vector.load %arg6[%c23, %c0_117] : memref<25x784xbf16, #tpu.memory_space<vmem>>, vector<1x196xbf16>
    tpu.vector_store %arg6[%c23, %c0_117], %70 {strides = array<i32>} : memref<25x784xbf16, #tpu.memory_space<vmem>>, vector<1x196xbf16>,
    %c0_118 = arith.constant 0 : index
    %c0_119 = arith.constant 0 : index
    %c0_120 = arith.constant 0 : index
    %c30 = arith.constant 30 : index
    %72 = vector.load %arg1[%c0_118, %c0_119, %c0_120, %c30] : memref<1x4x1x226xbf16, #tpu.memory_space<vmem>>, vector<1x1x1x196xbf16>
    %73 = vector.shape_cast %72 : vector<1x1x1x196xbf16> to vector<1x196xbf16>
    %c24 = arith.constant 24 : index
    %c0_121 = arith.constant 0 : index
    %74 = vector.load %arg6[%c24, %c0_121] : memref<25x784xbf16, #tpu.memory_space<vmem>>, vector<1x196xbf16>
    tpu.vector_store %arg6[%c24, %c0_121], %73 {strides = array<i32>} : memref<25x784xbf16, #tpu.memory_space<vmem>>, vector<1x196xbf16>,
    %c0_122 = arith.constant 0 : index
    %c1_123 = arith.constant 1 : index
    %c0_124 = arith.constant 0 : index
    %c0_125 = arith.constant 0 : index
    %75 = vector.load %arg1[%c0_122, %c1_123, %c0_124, %c0_125] : memref<1x4x1x226xbf16, #tpu.memory_space<vmem>>, vector<1x1x1x196xbf16>
    %76 = vector.shape_cast %75 : vector<1x1x1x196xbf16> to vector<1x196xbf16>
    %c0_126 = arith.constant 0 : index
    %c196 = arith.constant 196 : index
    %77 = vector.load %arg6[%c0_126, %c196] : memref<25x784xbf16, #tpu.memory_space<vmem>>, vector<1x196xbf16>
    tpu.vector_store %arg6[%c0_126, %c196], %76 {strides = array<i32>} : memref<25x784xbf16, #tpu.memory_space<vmem>>, vector<1x196xbf16>,
    %c0_127 = arith.constant 0 : index
    %c0_128 = arith.constant 0 : index
    %c0_129 = arith.constant 0 : index
    %c1_130 = arith.constant 1 : index
    %78 = vector.load %arg1[%c0_127, %c0_128, %c0_129, %c1_130] : memref<1x4x1x226xbf16, #tpu.memory_space<vmem>>, vector<1x1x1x196xbf16>
    %79 = vector.shape_cast %78 : vector<1x1x1x196xbf16> to vector<1x196xbf16>
    %c1_131 = arith.constant 1 : index
    %c196_132 = arith.constant 196 : index
    %80 = vector.load %arg6[%c1_131, %c196_132] : memref<25x784xbf16, #tpu.memory_space<vmem>>, vector<1x196xbf16>
    tpu.vector_store %arg6[%c1_131, %c196_132], %79 {strides = array<i32>} : memref<25x784xbf16, #tpu.memory_space<vmem>>, vector<1x196xbf16>,
    %c0_133 = arith.constant 0 : index
    %c1_134 = arith.constant 1 : index
    %c0_135 = arith.constant 0 : index
    %c1_136 = arith.constant 1 : index
    %81 = vector.load %arg1[%c0_133, %c1_134, %c0_135, %c1_136] : memref<1x4x1x226xbf16, #tpu.memory_space<vmem>>, vector<1x1x1x196xbf16>
    %82 = vector.shape_cast %81 : vector<1x1x1x196xbf16> to vector<1x196xbf16>
    %c2_137 = arith.constant 2 : index
    %c196_138 = arith.constant 196 : index
    %83 = vector.load %arg6[%c2_137, %c196_138] : memref<25x784xbf16, #tpu.memory_space<vmem>>, vector<1x196xbf16>
    tpu.vector_store %arg6[%c2_137, %c196_138], %82 {strides = array<i32>} : memref<25x784xbf16, #tpu.memory_space<vmem>>, vector<1x196xbf16>,
    %c0_139 = arith.constant 0 : index
    %c0_140 = arith.constant 0 : index
    %c0_141 = arith.constant 0 : index
    %c2_142 = arith.constant 2 : index
    %84 = vector.load %arg1[%c0_139, %c0_140, %c0_141, %c2_142] : memref<1x4x1x226xbf16, #tpu.memory_space<vmem>>, vector<1x1x1x196xbf16>
    %85 = vector.shape_cast %84 : vector<1x1x1x196xbf16> to vector<1x196xbf16>
    %c3_143 = arith.constant 3 : index
    %c196_144 = arith.constant 196 : index
    %86 = vector.load %arg6[%c3_143, %c196_144] : memref<25x784xbf16, #tpu.memory_space<vmem>>, vector<1x196xbf16>
    tpu.vector_store %arg6[%c3_143, %c196_144], %85 {strides = array<i32>} : memref<25x784xbf16, #tpu.memory_space<vmem>>, vector<1x196xbf16>,
    %c0_145 = arith.constant 0 : index
    %c1_146 = arith.constant 1 : index
    %c0_147 = arith.constant 0 : index
    %c2_148 = arith.constant 2 : index
    %87 = vector.load %arg1[%c0_145, %c1_146, %c0_147, %c2_148] : memref<1x4x1x226xbf16, #tpu.memory_space<vmem>>, vector<1x1x1x196xbf16>
    %88 = vector.shape_cast %87 : vector<1x1x1x196xbf16> to vector<1x196xbf16>
    %c4_149 = arith.constant 4 : index
    %c196_150 = arith.constant 196 : index
    %89 = vector.load %arg6[%c4_149, %c196_150] : memref<25x784xbf16, #tpu.memory_space<vmem>>, vector<1x196xbf16>
    tpu.vector_store %arg6[%c4_149, %c196_150], %88 {strides = array<i32>} : memref<25x784xbf16, #tpu.memory_space<vmem>>, vector<1x196xbf16>,
    %c0_151 = arith.constant 0 : index
    %c3_152 = arith.constant 3 : index
    %c0_153 = arith.constant 0 : index
    %c0_154 = arith.constant 0 : index
    %90 = vector.load %arg1[%c0_151, %c3_152, %c0_153, %c0_154] : memref<1x4x1x226xbf16, #tpu.memory_space<vmem>>, vector<1x1x1x196xbf16>
    %91 = vector.shape_cast %90 : vector<1x1x1x196xbf16> to vector<1x196xbf16>
    %c5_155 = arith.constant 5 : index
    %c196_156 = arith.constant 196 : index
    %92 = vector.load %arg6[%c5_155, %c196_156] : memref<25x784xbf16, #tpu.memory_space<vmem>>, vector<1x196xbf16>
    tpu.vector_store %arg6[%c5_155, %c196_156], %91 {strides = array<i32>} : memref<25x784xbf16, #tpu.memory_space<vmem>>, vector<1x196xbf16>,
    %c0_157 = arith.constant 0 : index
    %c2_158 = arith.constant 2 : index
    %c0_159 = arith.constant 0 : index
    %c1_160 = arith.constant 1 : index
    %93 = vector.load %arg1[%c0_157, %c2_158, %c0_159, %c1_160] : memref<1x4x1x226xbf16, #tpu.memory_space<vmem>>, vector<1x1x1x196xbf16>
    %94 = vector.shape_cast %93 : vector<1x1x1x196xbf16> to vector<1x196xbf16>
    %c6_161 = arith.constant 6 : index
    %c196_162 = arith.constant 196 : index
    %95 = vector.load %arg6[%c6_161, %c196_162] : memref<25x784xbf16, #tpu.memory_space<vmem>>, vector<1x196xbf16>
    tpu.vector_store %arg6[%c6_161, %c196_162], %94 {strides = array<i32>} : memref<25x784xbf16, #tpu.memory_space<vmem>>, vector<1x196xbf16>,
    %c0_163 = arith.constant 0 : index
    %c3_164 = arith.constant 3 : index
    %c0_165 = arith.constant 0 : index
    %c1_166 = arith.constant 1 : index
    %96 = vector.load %arg1[%c0_163, %c3_164, %c0_165, %c1_166] : memref<1x4x1x226xbf16, #tpu.memory_space<vmem>>, vector<1x1x1x196xbf16>
    %97 = vector.shape_cast %96 : vector<1x1x1x196xbf16> to vector<1x196xbf16>
    %c7_167 = arith.constant 7 : index
    %c196_168 = arith.constant 196 : index
    %98 = vector.load %arg6[%c7_167, %c196_168] : memref<25x784xbf16, #tpu.memory_space<vmem>>, vector<1x196xbf16>
    tpu.vector_store %arg6[%c7_167, %c196_168], %97 {strides = array<i32>} : memref<25x784xbf16, #tpu.memory_space<vmem>>, vector<1x196xbf16>,
    %c0_169 = arith.constant 0 : index
    %c2_170 = arith.constant 2 : index
    %c0_171 = arith.constant 0 : index
    %c2_172 = arith.constant 2 : index
    %99 = vector.load %arg1[%c0_169, %c2_170, %c0_171, %c2_172] : memref<1x4x1x226xbf16, #tpu.memory_space<vmem>>, vector<1x1x1x196xbf16>
    %100 = vector.shape_cast %99 : vector<1x1x1x196xbf16> to vector<1x196xbf16>
    %c8_173 = arith.constant 8 : index
    %c196_174 = arith.constant 196 : index
    %101 = vector.load %arg6[%c8_173, %c196_174] : memref<25x784xbf16, #tpu.memory_space<vmem>>, vector<1x196xbf16>
    tpu.vector_store %arg6[%c8_173, %c196_174], %100 {strides = array<i32>} : memref<25x784xbf16, #tpu.memory_space<vmem>>, vector<1x196xbf16>,
    %c0_175 = arith.constant 0 : index
    %c3_176 = arith.constant 3 : index
    %c0_177 = arith.constant 0 : index
    %c2_178 = arith.constant 2 : index
    %102 = vector.load %arg1[%c0_175, %c3_176, %c0_177, %c2_178] : memref<1x4x1x226xbf16, #tpu.memory_space<vmem>>, vector<1x1x1x196xbf16>
    %103 = vector.shape_cast %102 : vector<1x1x1x196xbf16> to vector<1x196xbf16>
    %c9_179 = arith.constant 9 : index
    %c196_180 = arith.constant 196 : index
    %104 = vector.load %arg6[%c9_179, %c196_180] : memref<25x784xbf16, #tpu.memory_space<vmem>>, vector<1x196xbf16>
    tpu.vector_store %arg6[%c9_179, %c196_180], %103 {strides = array<i32>} : memref<25x784xbf16, #tpu.memory_space<vmem>>, vector<1x196xbf16>,
    %c0_181 = arith.constant 0 : index
    %c1_182 = arith.constant 1 : index
    %c0_183 = arith.constant 0 : index
    %c14_184 = arith.constant 14 : index
    %105 = vector.load %arg1[%c0_181, %c1_182, %c0_183, %c14_184] : memref<1x4x1x226xbf16, #tpu.memory_space<vmem>>, vector<1x1x1x196xbf16>
    %106 = vector.shape_cast %105 : vector<1x1x1x196xbf16> to vector<1x196xbf16>
    %c10_185 = arith.constant 10 : index
    %c196_186 = arith.constant 196 : index
    %107 = vector.load %arg6[%c10_185, %c196_186] : memref<25x784xbf16, #tpu.memory_space<vmem>>, vector<1x196xbf16>
    tpu.vector_store %arg6[%c10_185, %c196_186], %106 {strides = array<i32>} : memref<25x784xbf16, #tpu.memory_space<vmem>>, vector<1x196xbf16>,
    %c0_187 = arith.constant 0 : index
    %c0_188 = arith.constant 0 : index
    %c0_189 = arith.constant 0 : index
    %c15_190 = arith.constant 15 : index
    %108 = vector.load %arg1[%c0_187, %c0_188, %c0_189, %c15_190] : memref<1x4x1x226xbf16, #tpu.memory_space<vmem>>, vector<1x1x1x196xbf16>
    %109 = vector.shape_cast %108 : vector<1x1x1x196xbf16> to vector<1x196xbf16>
    %c11_191 = arith.constant 11 : index
    %c196_192 = arith.constant 196 : index
    %110 = vector.load %arg6[%c11_191, %c196_192] : memref<25x784xbf16, #tpu.memory_space<vmem>>, vector<1x196xbf16>
    tpu.vector_store %arg6[%c11_191, %c196_192], %109 {strides = array<i32>} : memref<25x784xbf16, #tpu.memory_space<vmem>>, vector<1x196xbf16>,
    %c0_193 = arith.constant 0 : index
    %c1_194 = arith.constant 1 : index
    %c0_195 = arith.constant 0 : index
    %c15_196 = arith.constant 15 : index
    %111 = vector.load %arg1[%c0_193, %c1_194, %c0_195, %c15_196] : memref<1x4x1x226xbf16, #tpu.memory_space<vmem>>, vector<1x1x1x196xbf16>
    %112 = vector.shape_cast %111 : vector<1x1x1x196xbf16> to vector<1x196xbf16>
    %c12_197 = arith.constant 12 : index
    %c196_198 = arith.constant 196 : index
    %113 = vector.load %arg6[%c12_197, %c196_198] : memref<25x784xbf16, #tpu.memory_space<vmem>>, vector<1x196xbf16>
    tpu.vector_store %arg6[%c12_197, %c196_198], %112 {strides = array<i32>} : memref<25x784xbf16, #tpu.memory_space<vmem>>, vector<1x196xbf16>,
    %c0_199 = arith.constant 0 : index
    %c0_200 = arith.constant 0 : index
    %c0_201 = arith.constant 0 : index
    %c16_202 = arith.constant 16 : index
    %114 = vector.load %arg1[%c0_199, %c0_200, %c0_201, %c16_202] : memref<1x4x1x226xbf16, #tpu.memory_space<vmem>>, vector<1x1x1x196xbf16>
    %115 = vector.shape_cast %114 : vector<1x1x1x196xbf16> to vector<1x196xbf16>
    %c13_203 = arith.constant 13 : index
    %c196_204 = arith.constant 196 : index
    %116 = vector.load %arg6[%c13_203, %c196_204] : memref<25x784xbf16, #tpu.memory_space<vmem>>, vector<1x196xbf16>
    tpu.vector_store %arg6[%c13_203, %c196_204], %115 {strides = array<i32>} : memref<25x784xbf16, #tpu.memory_space<vmem>>, vector<1x196xbf16>,
    %c0_205 = arith.constant 0 : index
    %c1_206 = arith.constant 1 : index
    %c0_207 = arith.constant 0 : index
    %c16_208 = arith.constant 16 : index
    %117 = vector.load %arg1[%c0_205, %c1_206, %c0_207, %c16_208] : memref<1x4x1x226xbf16, #tpu.memory_space<vmem>>, vector<1x1x1x196xbf16>
    %118 = vector.shape_cast %117 : vector<1x1x1x196xbf16> to vector<1x196xbf16>
    %c14_209 = arith.constant 14 : index
    %c196_210 = arith.constant 196 : index
    %119 = vector.load %arg6[%c14_209, %c196_210] : memref<25x784xbf16, #tpu.memory_space<vmem>>, vector<1x196xbf16>
    tpu.vector_store %arg6[%c14_209, %c196_210], %118 {strides = array<i32>} : memref<25x784xbf16, #tpu.memory_space<vmem>>, vector<1x196xbf16>,
    %c0_211 = arith.constant 0 : index
    %c3_212 = arith.constant 3 : index
    %c0_213 = arith.constant 0 : index
    %c14_214 = arith.constant 14 : index
    %120 = vector.load %arg1[%c0_211, %c3_212, %c0_213, %c14_214] : memref<1x4x1x226xbf16, #tpu.memory_space<vmem>>, vector<1x1x1x196xbf16>
    %121 = vector.shape_cast %120 : vector<1x1x1x196xbf16> to vector<1x196xbf16>
    %c15_215 = arith.constant 15 : index
    %c196_216 = arith.constant 196 : index
    %122 = vector.load %arg6[%c15_215, %c196_216] : memref<25x784xbf16, #tpu.memory_space<vmem>>, vector<1x196xbf16>
    tpu.vector_store %arg6[%c15_215, %c196_216], %121 {strides = array<i32>} : memref<25x784xbf16, #tpu.memory_space<vmem>>, vector<1x196xbf16>,
    %c0_217 = arith.constant 0 : index
    %c2_218 = arith.constant 2 : index
    %c0_219 = arith.constant 0 : index
    %c15_220 = arith.constant 15 : index
    %123 = vector.load %arg1[%c0_217, %c2_218, %c0_219, %c15_220] : memref<1x4x1x226xbf16, #tpu.memory_space<vmem>>, vector<1x1x1x196xbf16>
    %124 = vector.shape_cast %123 : vector<1x1x1x196xbf16> to vector<1x196xbf16>
    %c16_221 = arith.constant 16 : index
    %c196_222 = arith.constant 196 : index
    %125 = vector.load %arg6[%c16_221, %c196_222] : memref<25x784xbf16, #tpu.memory_space<vmem>>, vector<1x196xbf16>
    tpu.vector_store %arg6[%c16_221, %c196_222], %124 {strides = array<i32>} : memref<25x784xbf16, #tpu.memory_space<vmem>>, vector<1x196xbf16>,
    %c0_223 = arith.constant 0 : index
    %c3_224 = arith.constant 3 : index
    %c0_225 = arith.constant 0 : index
    %c15_226 = arith.constant 15 : index
    %126 = vector.load %arg1[%c0_223, %c3_224, %c0_225, %c15_226] : memref<1x4x1x226xbf16, #tpu.memory_space<vmem>>, vector<1x1x1x196xbf16>
    %127 = vector.shape_cast %126 : vector<1x1x1x196xbf16> to vector<1x196xbf16>
    %c17_227 = arith.constant 17 : index
    %c196_228 = arith.constant 196 : index
    %128 = vector.load %arg6[%c17_227, %c196_228] : memref<25x784xbf16, #tpu.memory_space<vmem>>, vector<1x196xbf16>
    tpu.vector_store %arg6[%c17_227, %c196_228], %127 {strides = array<i32>} : memref<25x784xbf16, #tpu.memory_space<vmem>>, vector<1x196xbf16>,
    %c0_229 = arith.constant 0 : index
    %c2_230 = arith.constant 2 : index
    %c0_231 = arith.constant 0 : index
    %c16_232 = arith.constant 16 : index
    %129 = vector.load %arg1[%c0_229, %c2_230, %c0_231, %c16_232] : memref<1x4x1x226xbf16, #tpu.memory_space<vmem>>, vector<1x1x1x196xbf16>
    %130 = vector.shape_cast %129 : vector<1x1x1x196xbf16> to vector<1x196xbf16>
    %c18_233 = arith.constant 18 : index
    %c196_234 = arith.constant 196 : index
    %131 = vector.load %arg6[%c18_233, %c196_234] : memref<25x784xbf16, #tpu.memory_space<vmem>>, vector<1x196xbf16>
    tpu.vector_store %arg6[%c18_233, %c196_234], %130 {strides = array<i32>} : memref<25x784xbf16, #tpu.memory_space<vmem>>, vector<1x196xbf16>,
    %c0_235 = arith.constant 0 : index
    %c3_236 = arith.constant 3 : index
    %c0_237 = arith.constant 0 : index
    %c16_238 = arith.constant 16 : index
    %132 = vector.load %arg1[%c0_235, %c3_236, %c0_237, %c16_238] : memref<1x4x1x226xbf16, #tpu.memory_space<vmem>>, vector<1x1x1x196xbf16>
    %133 = vector.shape_cast %132 : vector<1x1x1x196xbf16> to vector<1x196xbf16>
    %c19_239 = arith.constant 19 : index
    %c196_240 = arith.constant 196 : index
    %134 = vector.load %arg6[%c19_239, %c196_240] : memref<25x784xbf16, #tpu.memory_space<vmem>>, vector<1x196xbf16>
    tpu.vector_store %arg6[%c19_239, %c196_240], %133 {strides = array<i32>} : memref<25x784xbf16, #tpu.memory_space<vmem>>, vector<1x196xbf16>,
    %c0_241 = arith.constant 0 : index
    %c1_242 = arith.constant 1 : index
    %c0_243 = arith.constant 0 : index
    %c28_244 = arith.constant 28 : index
    %135 = vector.load %arg1[%c0_241, %c1_242, %c0_243, %c28_244] : memref<1x4x1x226xbf16, #tpu.memory_space<vmem>>, vector<1x1x1x196xbf16>
    %136 = vector.shape_cast %135 : vector<1x1x1x196xbf16> to vector<1x196xbf16>
    %c20_245 = arith.constant 20 : index
    %c196_246 = arith.constant 196 : index
    %137 = vector.load %arg6[%c20_245, %c196_246] : memref<25x784xbf16, #tpu.memory_space<vmem>>, vector<1x196xbf16>
    tpu.vector_store %arg6[%c20_245, %c196_246], %136 {strides = array<i32>} : memref<25x784xbf16, #tpu.memory_space<vmem>>, vector<1x196xbf16>,
    %c0_247 = arith.constant 0 : index
    %c0_248 = arith.constant 0 : index
    %c0_249 = arith.constant 0 : index
    %c29_250 = arith.constant 29 : index
    %138 = vector.load %arg1[%c0_247, %c0_248, %c0_249, %c29_250] : memref<1x4x1x226xbf16, #tpu.memory_space<vmem>>, vector<1x1x1x196xbf16>
    %139 = vector.shape_cast %138 : vector<1x1x1x196xbf16> to vector<1x196xbf16>
    %c21_251 = arith.constant 21 : index
    %c196_252 = arith.constant 196 : index
    %140 = vector.load %arg6[%c21_251, %c196_252] : memref<25x784xbf16, #tpu.memory_space<vmem>>, vector<1x196xbf16>
    tpu.vector_store %arg6[%c21_251, %c196_252], %139 {strides = array<i32>} : memref<25x784xbf16, #tpu.memory_space<vmem>>, vector<1x196xbf16>,
    %c0_253 = arith.constant 0 : index
    %c1_254 = arith.constant 1 : index
    %c0_255 = arith.constant 0 : index
    %c29_256 = arith.constant 29 : index
    %141 = vector.load %arg1[%c0_253, %c1_254, %c0_255, %c29_256] : memref<1x4x1x226xbf16, #tpu.memory_space<vmem>>, vector<1x1x1x196xbf16>
    %142 = vector.shape_cast %141 : vector<1x1x1x196xbf16> to vector<1x196xbf16>
    %c22_257 = arith.constant 22 : index
    %c196_258 = arith.constant 196 : index
    %143 = vector.load %arg6[%c22_257, %c196_258] : memref<25x784xbf16, #tpu.memory_space<vmem>>, vector<1x196xbf16>
    tpu.vector_store %arg6[%c22_257, %c196_258], %142 {strides = array<i32>} : memref<25x784xbf16, #tpu.memory_space<vmem>>, vector<1x196xbf16>,
    %c0_259 = arith.constant 0 : index
    %c0_260 = arith.constant 0 : index
    %c0_261 = arith.constant 0 : index
    %c30_262 = arith.constant 30 : index
    %144 = vector.load %arg1[%c0_259, %c0_260, %c0_261, %c30_262] : memref<1x4x1x226xbf16, #tpu.memory_space<vmem>>, vector<1x1x1x196xbf16>
    %145 = vector.shape_cast %144 : vector<1x1x1x196xbf16> to vector<1x196xbf16>
    %c23_263 = arith.constant 23 : index
    %c196_264 = arith.constant 196 : index
    %146 = vector.load %arg6[%c23_263, %c196_264] : memref<25x784xbf16, #tpu.memory_space<vmem>>, vector<1x196xbf16>
    tpu.vector_store %arg6[%c23_263, %c196_264], %145 {strides = array<i32>} : memref<25x784xbf16, #tpu.memory_space<vmem>>, vector<1x196xbf16>,
    %c0_265 = arith.constant 0 : index
    %c1_266 = arith.constant 1 : index
    %c0_267 = arith.constant 0 : index
    %c30_268 = arith.constant 30 : index
    %147 = vector.load %arg1[%c0_265, %c1_266, %c0_267, %c30_268] : memref<1x4x1x226xbf16, #tpu.memory_space<vmem>>, vector<1x1x1x196xbf16>
    %148 = vector.shape_cast %147 : vector<1x1x1x196xbf16> to vector<1x196xbf16>
    %c24_269 = arith.constant 24 : index
    %c196_270 = arith.constant 196 : index
    %149 = vector.load %arg6[%c24_269, %c196_270] : memref<25x784xbf16, #tpu.memory_space<vmem>>, vector<1x196xbf16>
    tpu.vector_store %arg6[%c24_269, %c196_270], %148 {strides = array<i32>} : memref<25x784xbf16, #tpu.memory_space<vmem>>, vector<1x196xbf16>,
    %c0_271 = arith.constant 0 : index
    %c2_272 = arith.constant 2 : index
    %c0_273 = arith.constant 0 : index
    %c0_274 = arith.constant 0 : index
    %150 = vector.load %arg1[%c0_271, %c2_272, %c0_273, %c0_274] : memref<1x4x1x226xbf16, #tpu.memory_space<vmem>>, vector<1x1x1x196xbf16>
    %151 = vector.shape_cast %150 : vector<1x1x1x196xbf16> to vector<1x196xbf16>
    %c0_275 = arith.constant 0 : index
    %c392 = arith.constant 392 : index
    %152 = vector.load %arg6[%c0_275, %c392] : memref<25x784xbf16, #tpu.memory_space<vmem>>, vector<1x196xbf16>
    tpu.vector_store %arg6[%c0_275, %c392], %151 {strides = array<i32>} : memref<25x784xbf16, #tpu.memory_space<vmem>>, vector<1x196xbf16>,
    %c0_276 = arith.constant 0 : index
    %c3_277 = arith.constant 3 : index
    %c0_278 = arith.constant 0 : index
    %c0_279 = arith.constant 0 : index
    %153 = vector.load %arg1[%c0_276, %c3_277, %c0_278, %c0_279] : memref<1x4x1x226xbf16, #tpu.memory_space<vmem>>, vector<1x1x1x196xbf16>
    %154 = vector.shape_cast %153 : vector<1x1x1x196xbf16> to vector<1x196xbf16>
    %c1_280 = arith.constant 1 : index
    %c392_281 = arith.constant 392 : index
    %155 = vector.load %arg6[%c1_280, %c392_281] : memref<25x784xbf16, #tpu.memory_space<vmem>>, vector<1x196xbf16>
    tpu.vector_store %arg6[%c1_280, %c392_281], %154 {strides = array<i32>} : memref<25x784xbf16, #tpu.memory_space<vmem>>, vector<1x196xbf16>,
    %c0_282 = arith.constant 0 : index
    %c2_283 = arith.constant 2 : index
    %c0_284 = arith.constant 0 : index
    %c1_285 = arith.constant 1 : index
    %156 = vector.load %arg1[%c0_282, %c2_283, %c0_284, %c1_285] : memref<1x4x1x226xbf16, #tpu.memory_space<vmem>>, vector<1x1x1x196xbf16>
    %157 = vector.shape_cast %156 : vector<1x1x1x196xbf16> to vector<1x196xbf16>
    %c2_286 = arith.constant 2 : index
    %c392_287 = arith.constant 392 : index
    %158 = vector.load %arg6[%c2_286, %c392_287] : memref<25x784xbf16, #tpu.memory_space<vmem>>, vector<1x196xbf16>
    tpu.vector_store %arg6[%c2_286, %c392_287], %157 {strides = array<i32>} : memref<25x784xbf16, #tpu.memory_space<vmem>>, vector<1x196xbf16>,
    %c0_288 = arith.constant 0 : index
    %c3_289 = arith.constant 3 : index
    %c0_290 = arith.constant 0 : index
    %c1_291 = arith.constant 1 : index
    %159 = vector.load %arg1[%c0_288, %c3_289, %c0_290, %c1_291] : memref<1x4x1x226xbf16, #tpu.memory_space<vmem>>, vector<1x1x1x196xbf16>
    %160 = vector.shape_cast %159 : vector<1x1x1x196xbf16> to vector<1x196xbf16>
    %c3_292 = arith.constant 3 : index
    %c392_293 = arith.constant 392 : index
    %161 = vector.load %arg6[%c3_292, %c392_293] : memref<25x784xbf16, #tpu.memory_space<vmem>>, vector<1x196xbf16>
    tpu.vector_store %arg6[%c3_292, %c392_293], %160 {strides = array<i32>} : memref<25x784xbf16, #tpu.memory_space<vmem>>, vector<1x196xbf16>,
    %c0_294 = arith.constant 0 : index
    %c2_295 = arith.constant 2 : index
    %c0_296 = arith.constant 0 : index
    %c2_297 = arith.constant 2 : index
    %162 = vector.load %arg1[%c0_294, %c2_295, %c0_296, %c2_297] : memref<1x4x1x226xbf16, #tpu.memory_space<vmem>>, vector<1x1x1x196xbf16>
    %163 = vector.shape_cast %162 : vector<1x1x1x196xbf16> to vector<1x196xbf16>
    %c4_298 = arith.constant 4 : index
    %c392_299 = arith.constant 392 : index
    %164 = vector.load %arg6[%c4_298, %c392_299] : memref<25x784xbf16, #tpu.memory_space<vmem>>, vector<1x196xbf16>
    tpu.vector_store %arg6[%c4_298, %c392_299], %163 {strides = array<i32>} : memref<25x784xbf16, #tpu.memory_space<vmem>>, vector<1x196xbf16>,
    %c0_300 = arith.constant 0 : index
    %c0_301 = arith.constant 0 : index
    %c0_302 = arith.constant 0 : index
    %c14_303 = arith.constant 14 : index
    %165 = vector.load %arg1[%c0_300, %c0_301, %c0_302, %c14_303] : memref<1x4x1x226xbf16, #tpu.memory_space<vmem>>, vector<1x1x1x196xbf16>
    %166 = vector.shape_cast %165 : vector<1x1x1x196xbf16> to vector<1x196xbf16>
    %c5_304 = arith.constant 5 : index
    %c392_305 = arith.constant 392 : index
    %167 = vector.load %arg6[%c5_304, %c392_305] : memref<25x784xbf16, #tpu.memory_space<vmem>>, vector<1x196xbf16>
    tpu.vector_store %arg6[%c5_304, %c392_305], %166 {strides = array<i32>} : memref<25x784xbf16, #tpu.memory_space<vmem>>, vector<1x196xbf16>,
    %c0_306 = arith.constant 0 : index
    %c1_307 = arith.constant 1 : index
    %c0_308 = arith.constant 0 : index
    %c14_309 = arith.constant 14 : index
    %168 = vector.load %arg1[%c0_306, %c1_307, %c0_308, %c14_309] : memref<1x4x1x226xbf16, #tpu.memory_space<vmem>>, vector<1x1x1x196xbf16>
    %169 = vector.shape_cast %168 : vector<1x1x1x196xbf16> to vector<1x196xbf16>
    %c6_310 = arith.constant 6 : index
    %c392_311 = arith.constant 392 : index
    %170 = vector.load %arg6[%c6_310, %c392_311] : memref<25x784xbf16, #tpu.memory_space<vmem>>, vector<1x196xbf16>
    tpu.vector_store %arg6[%c6_310, %c392_311], %169 {strides = array<i32>} : memref<25x784xbf16, #tpu.memory_space<vmem>>, vector<1x196xbf16>,
    %c0_312 = arith.constant 0 : index
    %c0_313 = arith.constant 0 : index
    %c0_314 = arith.constant 0 : index
    %c15_315 = arith.constant 15 : index
    %171 = vector.load %arg1[%c0_312, %c0_313, %c0_314, %c15_315] : memref<1x4x1x226xbf16, #tpu.memory_space<vmem>>, vector<1x1x1x196xbf16>
    %172 = vector.shape_cast %171 : vector<1x1x1x196xbf16> to vector<1x196xbf16>
    %c7_316 = arith.constant 7 : index
    %c392_317 = arith.constant 392 : index
    %173 = vector.load %arg6[%c7_316, %c392_317] : memref<25x784xbf16, #tpu.memory_space<vmem>>, vector<1x196xbf16>
    tpu.vector_store %arg6[%c7_316, %c392_317], %172 {strides = array<i32>} : memref<25x784xbf16, #tpu.memory_space<vmem>>, vector<1x196xbf16>,
    %c0_318 = arith.constant 0 : index
    %c1_319 = arith.constant 1 : index
    %c0_320 = arith.constant 0 : index
    %c15_321 = arith.constant 15 : index
    %174 = vector.load %arg1[%c0_318, %c1_319, %c0_320, %c15_321] : memref<1x4x1x226xbf16, #tpu.memory_space<vmem>>, vector<1x1x1x196xbf16>
    %175 = vector.shape_cast %174 : vector<1x1x1x196xbf16> to vector<1x196xbf16>
    %c8_322 = arith.constant 8 : index
    %c392_323 = arith.constant 392 : index
    %176 = vector.load %arg6[%c8_322, %c392_323] : memref<25x784xbf16, #tpu.memory_space<vmem>>, vector<1x196xbf16>
    tpu.vector_store %arg6[%c8_322, %c392_323], %175 {strides = array<i32>} : memref<25x784xbf16, #tpu.memory_space<vmem>>, vector<1x196xbf16>,
    %c0_324 = arith.constant 0 : index
    %c0_325 = arith.constant 0 : index
    %c0_326 = arith.constant 0 : index
    %c16_327 = arith.constant 16 : index
    %177 = vector.load %arg1[%c0_324, %c0_325, %c0_326, %c16_327] : memref<1x4x1x226xbf16, #tpu.memory_space<vmem>>, vector<1x1x1x196xbf16>
    %178 = vector.shape_cast %177 : vector<1x1x1x196xbf16> to vector<1x196xbf16>
    %c9_328 = arith.constant 9 : index
    %c392_329 = arith.constant 392 : index
    %179 = vector.load %arg6[%c9_328, %c392_329] : memref<25x784xbf16, #tpu.memory_space<vmem>>, vector<1x196xbf16>
    tpu.vector_store %arg6[%c9_328, %c392_329], %178 {strides = array<i32>} : memref<25x784xbf16, #tpu.memory_space<vmem>>, vector<1x196xbf16>,
    %c0_330 = arith.constant 0 : index
    %c2_331 = arith.constant 2 : index
    %c0_332 = arith.constant 0 : index
    %c14_333 = arith.constant 14 : index
    %180 = vector.load %arg1[%c0_330, %c2_331, %c0_332, %c14_333] : memref<1x4x1x226xbf16, #tpu.memory_space<vmem>>, vector<1x1x1x196xbf16>
    %181 = vector.shape_cast %180 : vector<1x1x1x196xbf16> to vector<1x196xbf16>
    %c10_334 = arith.constant 10 : index
    %c392_335 = arith.constant 392 : index
    %182 = vector.load %arg6[%c10_334, %c392_335] : memref<25x784xbf16, #tpu.memory_space<vmem>>, vector<1x196xbf16>
    tpu.vector_store %arg6[%c10_334, %c392_335], %181 {strides = array<i32>} : memref<25x784xbf16, #tpu.memory_space<vmem>>, vector<1x196xbf16>,
    %c0_336 = arith.constant 0 : index
    %c3_337 = arith.constant 3 : index
    %c0_338 = arith.constant 0 : index
    %c14_339 = arith.constant 14 : index
    %183 = vector.load %arg1[%c0_336, %c3_337, %c0_338, %c14_339] : memref<1x4x1x226xbf16, #tpu.memory_space<vmem>>, vector<1x1x1x196xbf16>
    %184 = vector.shape_cast %183 : vector<1x1x1x196xbf16> to vector<1x196xbf16>
    %c11_340 = arith.constant 11 : index
    %c392_341 = arith.constant 392 : index
    %185 = vector.load %arg6[%c11_340, %c392_341] : memref<25x784xbf16, #tpu.memory_space<vmem>>, vector<1x196xbf16>
    tpu.vector_store %arg6[%c11_340, %c392_341], %184 {strides = array<i32>} : memref<25x784xbf16, #tpu.memory_space<vmem>>, vector<1x196xbf16>,
    %c0_342 = arith.constant 0 : index
    %c2_343 = arith.constant 2 : index
    %c0_344 = arith.constant 0 : index
    %c15_345 = arith.constant 15 : index
    %186 = vector.load %arg1[%c0_342, %c2_343, %c0_344, %c15_345] : memref<1x4x1x226xbf16, #tpu.memory_space<vmem>>, vector<1x1x1x196xbf16>
    %187 = vector.shape_cast %186 : vector<1x1x1x196xbf16> to vector<1x196xbf16>
    %c12_346 = arith.constant 12 : index
    %c392_347 = arith.constant 392 : index
    %188 = vector.load %arg6[%c12_346, %c392_347] : memref<25x784xbf16, #tpu.memory_space<vmem>>, vector<1x196xbf16>
    tpu.vector_store %arg6[%c12_346, %c392_347], %187 {strides = array<i32>} : memref<25x784xbf16, #tpu.memory_space<vmem>>, vector<1x196xbf16>,
    %c0_348 = arith.constant 0 : index
    %c3_349 = arith.constant 3 : index
    %c0_350 = arith.constant 0 : index
    %c15_351 = arith.constant 15 : index
    %189 = vector.load %arg1[%c0_348, %c3_349, %c0_350, %c15_351] : memref<1x4x1x226xbf16, #tpu.memory_space<vmem>>, vector<1x1x1x196xbf16>
    %190 = vector.shape_cast %189 : vector<1x1x1x196xbf16> to vector<1x196xbf16>
    %c13_352 = arith.constant 13 : index
    %c392_353 = arith.constant 392 : index
    %191 = vector.load %arg6[%c13_352, %c392_353] : memref<25x784xbf16, #tpu.memory_space<vmem>>, vector<1x196xbf16>
    tpu.vector_store %arg6[%c13_352, %c392_353], %190 {strides = array<i32>} : memref<25x784xbf16, #tpu.memory_space<vmem>>, vector<1x196xbf16>,
    %c0_354 = arith.constant 0 : index
    %c2_355 = arith.constant 2 : index
    %c0_356 = arith.constant 0 : index
    %c16_357 = arith.constant 16 : index
    %192 = vector.load %arg1[%c0_354, %c2_355, %c0_356, %c16_357] : memref<1x4x1x226xbf16, #tpu.memory_space<vmem>>, vector<1x1x1x196xbf16>
    %193 = vector.shape_cast %192 : vector<1x1x1x196xbf16> to vector<1x196xbf16>
    %c14_358 = arith.constant 14 : index
    %c392_359 = arith.constant 392 : index
    %194 = vector.load %arg6[%c14_358, %c392_359] : memref<25x784xbf16, #tpu.memory_space<vmem>>, vector<1x196xbf16>
    tpu.vector_store %arg6[%c14_358, %c392_359], %193 {strides = array<i32>} : memref<25x784xbf16, #tpu.memory_space<vmem>>, vector<1x196xbf16>,
    %c0_360 = arith.constant 0 : index
    %c0_361 = arith.constant 0 : index
    %c0_362 = arith.constant 0 : index
    %c28_363 = arith.constant 28 : index
    %195 = vector.load %arg1[%c0_360, %c0_361, %c0_362, %c28_363] : memref<1x4x1x226xbf16, #tpu.memory_space<vmem>>, vector<1x1x1x196xbf16>
    %196 = vector.shape_cast %195 : vector<1x1x1x196xbf16> to vector<1x196xbf16>
    %c15_364 = arith.constant 15 : index
    %c392_365 = arith.constant 392 : index
    %197 = vector.load %arg6[%c15_364, %c392_365] : memref<25x784xbf16, #tpu.memory_space<vmem>>, vector<1x196xbf16>
    tpu.vector_store %arg6[%c15_364, %c392_365], %196 {strides = array<i32>} : memref<25x784xbf16, #tpu.memory_space<vmem>>, vector<1x196xbf16>,
    %c0_366 = arith.constant 0 : index
    %c1_367 = arith.constant 1 : index
    %c0_368 = arith.constant 0 : index
    %c28_369 = arith.constant 28 : index
    %198 = vector.load %arg1[%c0_366, %c1_367, %c0_368, %c28_369] : memref<1x4x1x226xbf16, #tpu.memory_space<vmem>>, vector<1x1x1x196xbf16>
    %199 = vector.shape_cast %198 : vector<1x1x1x196xbf16> to vector<1x196xbf16>
    %c16_370 = arith.constant 16 : index
    %c392_371 = arith.constant 392 : index
    %200 = vector.load %arg6[%c16_370, %c392_371] : memref<25x784xbf16, #tpu.memory_space<vmem>>, vector<1x196xbf16>
    tpu.vector_store %arg6[%c16_370, %c392_371], %199 {strides = array<i32>} : memref<25x784xbf16, #tpu.memory_space<vmem>>, vector<1x196xbf16>,
    %c0_372 = arith.constant 0 : index
    %c0_373 = arith.constant 0 : index
    %c0_374 = arith.constant 0 : index
    %c29_375 = arith.constant 29 : index
    %201 = vector.load %arg1[%c0_372, %c0_373, %c0_374, %c29_375] : memref<1x4x1x226xbf16, #tpu.memory_space<vmem>>, vector<1x1x1x196xbf16>
    %202 = vector.shape_cast %201 : vector<1x1x1x196xbf16> to vector<1x196xbf16>
    %c17_376 = arith.constant 17 : index
    %c392_377 = arith.constant 392 : index
    %203 = vector.load %arg6[%c17_376, %c392_377] : memref<25x784xbf16, #tpu.memory_space<vmem>>, vector<1x196xbf16>
    tpu.vector_store %arg6[%c17_376, %c392_377], %202 {strides = array<i32>} : memref<25x784xbf16, #tpu.memory_space<vmem>>, vector<1x196xbf16>,
    %c0_378 = arith.constant 0 : index
    %c1_379 = arith.constant 1 : index
    %c0_380 = arith.constant 0 : index
    %c29_381 = arith.constant 29 : index
    %204 = vector.load %arg1[%c0_378, %c1_379, %c0_380, %c29_381] : memref<1x4x1x226xbf16, #tpu.memory_space<vmem>>, vector<1x1x1x196xbf16>
    %205 = vector.shape_cast %204 : vector<1x1x1x196xbf16> to vector<1x196xbf16>
    %c18_382 = arith.constant 18 : index
    %c392_383 = arith.constant 392 : index
    %206 = vector.load %arg6[%c18_382, %c392_383] : memref<25x784xbf16, #tpu.memory_space<vmem>>, vector<1x196xbf16>
    tpu.vector_store %arg6[%c18_382, %c392_383], %205 {strides = array<i32>} : memref<25x784xbf16, #tpu.memory_space<vmem>>, vector<1x196xbf16>,
    %c0_384 = arith.constant 0 : index
    %c0_385 = arith.constant 0 : index
    %c0_386 = arith.constant 0 : index
    %c30_387 = arith.constant 30 : index
    %207 = vector.load %arg1[%c0_384, %c0_385, %c0_386, %c30_387] : memref<1x4x1x226xbf16, #tpu.memory_space<vmem>>, vector<1x1x1x196xbf16>
    %208 = vector.shape_cast %207 : vector<1x1x1x196xbf16> to vector<1x196xbf16>
    %c19_388 = arith.constant 19 : index
    %c392_389 = arith.constant 392 : index
    %209 = vector.load %arg6[%c19_388, %c392_389] : memref<25x784xbf16, #tpu.memory_space<vmem>>, vector<1x196xbf16>
    tpu.vector_store %arg6[%c19_388, %c392_389], %208 {strides = array<i32>} : memref<25x784xbf16, #tpu.memory_space<vmem>>, vector<1x196xbf16>,
    %c0_390 = arith.constant 0 : index
    %c2_391 = arith.constant 2 : index
    %c0_392 = arith.constant 0 : index
    %c28_393 = arith.constant 28 : index
    %210 = vector.load %arg1[%c0_390, %c2_391, %c0_392, %c28_393] : memref<1x4x1x226xbf16, #tpu.memory_space<vmem>>, vector<1x1x1x196xbf16>
    %211 = vector.shape_cast %210 : vector<1x1x1x196xbf16> to vector<1x196xbf16>
    %c20_394 = arith.constant 20 : index
    %c392_395 = arith.constant 392 : index
    %212 = vector.load %arg6[%c20_394, %c392_395] : memref<25x784xbf16, #tpu.memory_space<vmem>>, vector<1x196xbf16>
    tpu.vector_store %arg6[%c20_394, %c392_395], %211 {strides = array<i32>} : memref<25x784xbf16, #tpu.memory_space<vmem>>, vector<1x196xbf16>,
    %c0_396 = arith.constant 0 : index
    %c3_397 = arith.constant 3 : index
    %c0_398 = arith.constant 0 : index
    %c28_399 = arith.constant 28 : index
    %213 = vector.load %arg1[%c0_396, %c3_397, %c0_398, %c28_399] : memref<1x4x1x226xbf16, #tpu.memory_space<vmem>>, vector<1x1x1x196xbf16>
    %214 = vector.shape_cast %213 : vector<1x1x1x196xbf16> to vector<1x196xbf16>
    %c21_400 = arith.constant 21 : index
    %c392_401 = arith.constant 392 : index
    %215 = vector.load %arg6[%c21_400, %c392_401] : memref<25x784xbf16, #tpu.memory_space<vmem>>, vector<1x196xbf16>
    tpu.vector_store %arg6[%c21_400, %c392_401], %214 {strides = array<i32>} : memref<25x784xbf16, #tpu.memory_space<vmem>>, vector<1x196xbf16>,
    %c0_402 = arith.constant 0 : index
    %c2_403 = arith.constant 2 : index
    %c0_404 = arith.constant 0 : index
    %c29_405 = arith.constant 29 : index
    %216 = vector.load %arg1[%c0_402, %c2_403, %c0_404, %c29_405] : memref<1x4x1x226xbf16, #tpu.memory_space<vmem>>, vector<1x1x1x196xbf16>
    %217 = vector.shape_cast %216 : vector<1x1x1x196xbf16> to vector<1x196xbf16>
    %c22_406 = arith.constant 22 : index
    %c392_407 = arith.constant 392 : index
    %218 = vector.load %arg6[%c22_406, %c392_407] : memref<25x784xbf16, #tpu.memory_space<vmem>>, vector<1x196xbf16>
    tpu.vector_store %arg6[%c22_406, %c392_407], %217 {strides = array<i32>} : memref<25x784xbf16, #tpu.memory_space<vmem>>, vector<1x196xbf16>,
    %c0_408 = arith.constant 0 : index
    %c3_409 = arith.constant 3 : index
    %c0_410 = arith.constant 0 : index
    %c29_411 = arith.constant 29 : index
    %219 = vector.load %arg1[%c0_408, %c3_409, %c0_410, %c29_411] : memref<1x4x1x226xbf16, #tpu.memory_space<vmem>>, vector<1x1x1x196xbf16>
    %220 = vector.shape_cast %219 : vector<1x1x1x196xbf16> to vector<1x196xbf16>
    %c23_412 = arith.constant 23 : index
    %c392_413 = arith.constant 392 : index
    %221 = vector.load %arg6[%c23_412, %c392_413] : memref<25x784xbf16, #tpu.memory_space<vmem>>, vector<1x196xbf16>
    tpu.vector_store %arg6[%c23_412, %c392_413], %220 {strides = array<i32>} : memref<25x784xbf16, #tpu.memory_space<vmem>>, vector<1x196xbf16>,
    %c0_414 = arith.constant 0 : index
    %c2_415 = arith.constant 2 : index
    %c0_416 = arith.constant 0 : index
    %c30_417 = arith.constant 30 : index
    %222 = vector.load %arg1[%c0_414, %c2_415, %c0_416, %c30_417] : memref<1x4x1x226xbf16, #tpu.memory_space<vmem>>, vector<1x1x1x196xbf16>
    %223 = vector.shape_cast %222 : vector<1x1x1x196xbf16> to vector<1x196xbf16>
    %c24_418 = arith.constant 24 : index
    %c392_419 = arith.constant 392 : index
    %224 = vector.load %arg6[%c24_418, %c392_419] : memref<25x784xbf16, #tpu.memory_space<vmem>>, vector<1x196xbf16>
    tpu.vector_store %arg6[%c24_418, %c392_419], %223 {strides = array<i32>} : memref<25x784xbf16, #tpu.memory_space<vmem>>, vector<1x196xbf16>,
    %c0_420 = arith.constant 0 : index
    %c3_421 = arith.constant 3 : index
    %c0_422 = arith.constant 0 : index
    %c0_423 = arith.constant 0 : index
    %225 = vector.load %arg1[%c0_420, %c3_421, %c0_422, %c0_423] : memref<1x4x1x226xbf16, #tpu.memory_space<vmem>>, vector<1x1x1x196xbf16>
    %226 = vector.shape_cast %225 : vector<1x1x1x196xbf16> to vector<1x196xbf16>
    %c0_424 = arith.constant 0 : index
    %c588 = arith.constant 588 : index
    %227 = vector.load %arg6[%c0_424, %c588] : memref<25x784xbf16, #tpu.memory_space<vmem>>, vector<1x196xbf16>
    tpu.vector_store %arg6[%c0_424, %c588], %226 {strides = array<i32>} : memref<25x784xbf16, #tpu.memory_space<vmem>>, vector<1x196xbf16>,
    %c0_425 = arith.constant 0 : index
    %c2_426 = arith.constant 2 : index
    %c0_427 = arith.constant 0 : index
    %c1_428 = arith.constant 1 : index
    %228 = vector.load %arg1[%c0_425, %c2_426, %c0_427, %c1_428] : memref<1x4x1x226xbf16, #tpu.memory_space<vmem>>, vector<1x1x1x196xbf16>
    %229 = vector.shape_cast %228 : vector<1x1x1x196xbf16> to vector<1x196xbf16>
    %c1_429 = arith.constant 1 : index
    %c588_430 = arith.constant 588 : index
    %230 = vector.load %arg6[%c1_429, %c588_430] : memref<25x784xbf16, #tpu.memory_space<vmem>>, vector<1x196xbf16>
    tpu.vector_store %arg6[%c1_429, %c588_430], %229 {strides = array<i32>} : memref<25x784xbf16, #tpu.memory_space<vmem>>, vector<1x196xbf16>,
    %c0_431 = arith.constant 0 : index
    %c3_432 = arith.constant 3 : index
    %c0_433 = arith.constant 0 : index
    %c1_434 = arith.constant 1 : index
    %231 = vector.load %arg1[%c0_431, %c3_432, %c0_433, %c1_434] : memref<1x4x1x226xbf16, #tpu.memory_space<vmem>>, vector<1x1x1x196xbf16>
    %232 = vector.shape_cast %231 : vector<1x1x1x196xbf16> to vector<1x196xbf16>
    %c2_435 = arith.constant 2 : index
    %c588_436 = arith.constant 588 : index
    %233 = vector.load %arg6[%c2_435, %c588_436] : memref<25x784xbf16, #tpu.memory_space<vmem>>, vector<1x196xbf16>
    tpu.vector_store %arg6[%c2_435, %c588_436], %232 {strides = array<i32>} : memref<25x784xbf16, #tpu.memory_space<vmem>>, vector<1x196xbf16>,
    %c0_437 = arith.constant 0 : index
    %c2_438 = arith.constant 2 : index
    %c0_439 = arith.constant 0 : index
    %c2_440 = arith.constant 2 : index
    %234 = vector.load %arg1[%c0_437, %c2_438, %c0_439, %c2_440] : memref<1x4x1x226xbf16, #tpu.memory_space<vmem>>, vector<1x1x1x196xbf16>
    %235 = vector.shape_cast %234 : vector<1x1x1x196xbf16> to vector<1x196xbf16>
    %c3_441 = arith.constant 3 : index
    %c588_442 = arith.constant 588 : index
    %236 = vector.load %arg6[%c3_441, %c588_442] : memref<25x784xbf16, #tpu.memory_space<vmem>>, vector<1x196xbf16>
    tpu.vector_store %arg6[%c3_441, %c588_442], %235 {strides = array<i32>} : memref<25x784xbf16, #tpu.memory_space<vmem>>, vector<1x196xbf16>,
    %c0_443 = arith.constant 0 : index
    %c3_444 = arith.constant 3 : index
    %c0_445 = arith.constant 0 : index
    %c2_446 = arith.constant 2 : index
    %237 = vector.load %arg1[%c0_443, %c3_444, %c0_445, %c2_446] : memref<1x4x1x226xbf16, #tpu.memory_space<vmem>>, vector<1x1x1x196xbf16>
    %238 = vector.shape_cast %237 : vector<1x1x1x196xbf16> to vector<1x196xbf16>
    %c4_447 = arith.constant 4 : index
    %c588_448 = arith.constant 588 : index
    %239 = vector.load %arg6[%c4_447, %c588_448] : memref<25x784xbf16, #tpu.memory_space<vmem>>, vector<1x196xbf16>
    tpu.vector_store %arg6[%c4_447, %c588_448], %238 {strides = array<i32>} : memref<25x784xbf16, #tpu.memory_space<vmem>>, vector<1x196xbf16>,
    %c0_449 = arith.constant 0 : index
    %c1_450 = arith.constant 1 : index
    %c0_451 = arith.constant 0 : index
    %c14_452 = arith.constant 14 : index
    %240 = vector.load %arg1[%c0_449, %c1_450, %c0_451, %c14_452] : memref<1x4x1x226xbf16, #tpu.memory_space<vmem>>, vector<1x1x1x196xbf16>
    %241 = vector.shape_cast %240 : vector<1x1x1x196xbf16> to vector<1x196xbf16>
    %c5_453 = arith.constant 5 : index
    %c588_454 = arith.constant 588 : index
    %242 = vector.load %arg6[%c5_453, %c588_454] : memref<25x784xbf16, #tpu.memory_space<vmem>>, vector<1x196xbf16>
    tpu.vector_store %arg6[%c5_453, %c588_454], %241 {strides = array<i32>} : memref<25x784xbf16, #tpu.memory_space<vmem>>, vector<1x196xbf16>,
    %c0_455 = arith.constant 0 : index
    %c0_456 = arith.constant 0 : index
    %c0_457 = arith.constant 0 : index
    %c15_458 = arith.constant 15 : index
    %243 = vector.load %arg1[%c0_455, %c0_456, %c0_457, %c15_458] : memref<1x4x1x226xbf16, #tpu.memory_space<vmem>>, vector<1x1x1x196xbf16>
    %244 = vector.shape_cast %243 : vector<1x1x1x196xbf16> to vector<1x196xbf16>
    %c6_459 = arith.constant 6 : index
    %c588_460 = arith.constant 588 : index
    %245 = vector.load %arg6[%c6_459, %c588_460] : memref<25x784xbf16, #tpu.memory_space<vmem>>, vector<1x196xbf16>
    tpu.vector_store %arg6[%c6_459, %c588_460], %244 {strides = array<i32>} : memref<25x784xbf16, #tpu.memory_space<vmem>>, vector<1x196xbf16>,
    %c0_461 = arith.constant 0 : index
    %c1_462 = arith.constant 1 : index
    %c0_463 = arith.constant 0 : index
    %c15_464 = arith.constant 15 : index
    %246 = vector.load %arg1[%c0_461, %c1_462, %c0_463, %c15_464] : memref<1x4x1x226xbf16, #tpu.memory_space<vmem>>, vector<1x1x1x196xbf16>
    %247 = vector.shape_cast %246 : vector<1x1x1x196xbf16> to vector<1x196xbf16>
    %c7_465 = arith.constant 7 : index
    %c588_466 = arith.constant 588 : index
    %248 = vector.load %arg6[%c7_465, %c588_466] : memref<25x784xbf16, #tpu.memory_space<vmem>>, vector<1x196xbf16>
    tpu.vector_store %arg6[%c7_465, %c588_466], %247 {strides = array<i32>} : memref<25x784xbf16, #tpu.memory_space<vmem>>, vector<1x196xbf16>,
    %c0_467 = arith.constant 0 : index
    %c0_468 = arith.constant 0 : index
    %c0_469 = arith.constant 0 : index
    %c16_470 = arith.constant 16 : index
    %249 = vector.load %arg1[%c0_467, %c0_468, %c0_469, %c16_470] : memref<1x4x1x226xbf16, #tpu.memory_space<vmem>>, vector<1x1x1x196xbf16>
    %250 = vector.shape_cast %249 : vector<1x1x1x196xbf16> to vector<1x196xbf16>
    %c8_471 = arith.constant 8 : index
    %c588_472 = arith.constant 588 : index
    %251 = vector.load %arg6[%c8_471, %c588_472] : memref<25x784xbf16, #tpu.memory_space<vmem>>, vector<1x196xbf16>
    tpu.vector_store %arg6[%c8_471, %c588_472], %250 {strides = array<i32>} : memref<25x784xbf16, #tpu.memory_space<vmem>>, vector<1x196xbf16>,
    %c0_473 = arith.constant 0 : index
    %c1_474 = arith.constant 1 : index
    %c0_475 = arith.constant 0 : index
    %c16_476 = arith.constant 16 : index
    %252 = vector.load %arg1[%c0_473, %c1_474, %c0_475, %c16_476] : memref<1x4x1x226xbf16, #tpu.memory_space<vmem>>, vector<1x1x1x196xbf16>
    %253 = vector.shape_cast %252 : vector<1x1x1x196xbf16> to vector<1x196xbf16>
    %c9_477 = arith.constant 9 : index
    %c588_478 = arith.constant 588 : index
    %254 = vector.load %arg6[%c9_477, %c588_478] : memref<25x784xbf16, #tpu.memory_space<vmem>>, vector<1x196xbf16>
    tpu.vector_store %arg6[%c9_477, %c588_478], %253 {strides = array<i32>} : memref<25x784xbf16, #tpu.memory_space<vmem>>, vector<1x196xbf16>,
    %c0_479 = arith.constant 0 : index
    %c3_480 = arith.constant 3 : index
    %c0_481 = arith.constant 0 : index
    %c14_482 = arith.constant 14 : index
    %255 = vector.load %arg1[%c0_479, %c3_480, %c0_481, %c14_482] : memref<1x4x1x226xbf16, #tpu.memory_space<vmem>>, vector<1x1x1x196xbf16>
    %256 = vector.shape_cast %255 : vector<1x1x1x196xbf16> to vector<1x196xbf16>
    %c10_483 = arith.constant 10 : index
    %c588_484 = arith.constant 588 : index
    %257 = vector.load %arg6[%c10_483, %c588_484] : memref<25x784xbf16, #tpu.memory_space<vmem>>, vector<1x196xbf16>
    tpu.vector_store %arg6[%c10_483, %c588_484], %256 {strides = array<i32>} : memref<25x784xbf16, #tpu.memory_space<vmem>>, vector<1x196xbf16>,
    %c0_485 = arith.constant 0 : index
    %c2_486 = arith.constant 2 : index
    %c0_487 = arith.constant 0 : index
    %c15_488 = arith.constant 15 : index
    %258 = vector.load %arg1[%c0_485, %c2_486, %c0_487, %c15_488] : memref<1x4x1x226xbf16, #tpu.memory_space<vmem>>, vector<1x1x1x196xbf16>
    %259 = vector.shape_cast %258 : vector<1x1x1x196xbf16> to vector<1x196xbf16>
    %c11_489 = arith.constant 11 : index
    %c588_490 = arith.constant 588 : index
    %260 = vector.load %arg6[%c11_489, %c588_490] : memref<25x784xbf16, #tpu.memory_space<vmem>>, vector<1x196xbf16>
    tpu.vector_store %arg6[%c11_489, %c588_490], %259 {strides = array<i32>} : memref<25x784xbf16, #tpu.memory_space<vmem>>, vector<1x196xbf16>,
    %c0_491 = arith.constant 0 : index
    %c3_492 = arith.constant 3 : index
    %c0_493 = arith.constant 0 : index
    %c15_494 = arith.constant 15 : index
    %261 = vector.load %arg1[%c0_491, %c3_492, %c0_493, %c15_494] : memref<1x4x1x226xbf16, #tpu.memory_space<vmem>>, vector<1x1x1x196xbf16>
    %262 = vector.shape_cast %261 : vector<1x1x1x196xbf16> to vector<1x196xbf16>
    %c12_495 = arith.constant 12 : index
    %c588_496 = arith.constant 588 : index
    %263 = vector.load %arg6[%c12_495, %c588_496] : memref<25x784xbf16, #tpu.memory_space<vmem>>, vector<1x196xbf16>
    tpu.vector_store %arg6[%c12_495, %c588_496], %262 {strides = array<i32>} : memref<25x784xbf16, #tpu.memory_space<vmem>>, vector<1x196xbf16>,
    %c0_497 = arith.constant 0 : index
    %c2_498 = arith.constant 2 : index
    %c0_499 = arith.constant 0 : index
    %c16_500 = arith.constant 16 : index
    %264 = vector.load %arg1[%c0_497, %c2_498, %c0_499, %c16_500] : memref<1x4x1x226xbf16, #tpu.memory_space<vmem>>, vector<1x1x1x196xbf16>
    %265 = vector.shape_cast %264 : vector<1x1x1x196xbf16> to vector<1x196xbf16>
    %c13_501 = arith.constant 13 : index
    %c588_502 = arith.constant 588 : index
    %266 = vector.load %arg6[%c13_501, %c588_502] : memref<25x784xbf16, #tpu.memory_space<vmem>>, vector<1x196xbf16>
    tpu.vector_store %arg6[%c13_501, %c588_502], %265 {strides = array<i32>} : memref<25x784xbf16, #tpu.memory_space<vmem>>, vector<1x196xbf16>,
    %c0_503 = arith.constant 0 : index
    %c3_504 = arith.constant 3 : index
    %c0_505 = arith.constant 0 : index
    %c16_506 = arith.constant 16 : index
    %267 = vector.load %arg1[%c0_503, %c3_504, %c0_505, %c16_506] : memref<1x4x1x226xbf16, #tpu.memory_space<vmem>>, vector<1x1x1x196xbf16>
    %268 = vector.shape_cast %267 : vector<1x1x1x196xbf16> to vector<1x196xbf16>
    %c14_507 = arith.constant 14 : index
    %c588_508 = arith.constant 588 : index
    %269 = vector.load %arg6[%c14_507, %c588_508] : memref<25x784xbf16, #tpu.memory_space<vmem>>, vector<1x196xbf16>
    tpu.vector_store %arg6[%c14_507, %c588_508], %268 {strides = array<i32>} : memref<25x784xbf16, #tpu.memory_space<vmem>>, vector<1x196xbf16>,
    %c0_509 = arith.constant 0 : index
    %c1_510 = arith.constant 1 : index
    %c0_511 = arith.constant 0 : index
    %c28_512 = arith.constant 28 : index
    %270 = vector.load %arg1[%c0_509, %c1_510, %c0_511, %c28_512] : memref<1x4x1x226xbf16, #tpu.memory_space<vmem>>, vector<1x1x1x196xbf16>
    %271 = vector.shape_cast %270 : vector<1x1x1x196xbf16> to vector<1x196xbf16>
    %c15_513 = arith.constant 15 : index
    %c588_514 = arith.constant 588 : index
    %272 = vector.load %arg6[%c15_513, %c588_514] : memref<25x784xbf16, #tpu.memory_space<vmem>>, vector<1x196xbf16>
    tpu.vector_store %arg6[%c15_513, %c588_514], %271 {strides = array<i32>} : memref<25x784xbf16, #tpu.memory_space<vmem>>, vector<1x196xbf16>,
    %c0_515 = arith.constant 0 : index
    %c0_516 = arith.constant 0 : index
    %c0_517 = arith.constant 0 : index
    %c29_518 = arith.constant 29 : index
    %273 = vector.load %arg1[%c0_515, %c0_516, %c0_517, %c29_518] : memref<1x4x1x226xbf16, #tpu.memory_space<vmem>>, vector<1x1x1x196xbf16>
    %274 = vector.shape_cast %273 : vector<1x1x1x196xbf16> to vector<1x196xbf16>
    %c16_519 = arith.constant 16 : index
    %c588_520 = arith.constant 588 : index
    %275 = vector.load %arg6[%c16_519, %c588_520] : memref<25x784xbf16, #tpu.memory_space<vmem>>, vector<1x196xbf16>
    tpu.vector_store %arg6[%c16_519, %c588_520], %274 {strides = array<i32>} : memref<25x784xbf16, #tpu.memory_space<vmem>>, vector<1x196xbf16>,
    %c0_521 = arith.constant 0 : index
    %c1_522 = arith.constant 1 : index
    %c0_523 = arith.constant 0 : index
    %c29_524 = arith.constant 29 : index
    %276 = vector.load %arg1[%c0_521, %c1_522, %c0_523, %c29_524] : memref<1x4x1x226xbf16, #tpu.memory_space<vmem>>, vector<1x1x1x196xbf16>
    %277 = vector.shape_cast %276 : vector<1x1x1x196xbf16> to vector<1x196xbf16>
    %c17_525 = arith.constant 17 : index
    %c588_526 = arith.constant 588 : index
    %278 = vector.load %arg6[%c17_525, %c588_526] : memref<25x784xbf16, #tpu.memory_space<vmem>>, vector<1x196xbf16>
    tpu.vector_store %arg6[%c17_525, %c588_526], %277 {strides = array<i32>} : memref<25x784xbf16, #tpu.memory_space<vmem>>, vector<1x196xbf16>,
    %c0_527 = arith.constant 0 : index
    %c0_528 = arith.constant 0 : index
    %c0_529 = arith.constant 0 : index
    %c30_530 = arith.constant 30 : index
    %279 = vector.load %arg1[%c0_527, %c0_528, %c0_529, %c30_530] : memref<1x4x1x226xbf16, #tpu.memory_space<vmem>>, vector<1x1x1x196xbf16>
    %280 = vector.shape_cast %279 : vector<1x1x1x196xbf16> to vector<1x196xbf16>
    %c18_531 = arith.constant 18 : index
    %c588_532 = arith.constant 588 : index
    %281 = vector.load %arg6[%c18_531, %c588_532] : memref<25x784xbf16, #tpu.memory_space<vmem>>, vector<1x196xbf16>
    tpu.vector_store %arg6[%c18_531, %c588_532], %280 {strides = array<i32>} : memref<25x784xbf16, #tpu.memory_space<vmem>>, vector<1x196xbf16>,
    %c0_533 = arith.constant 0 : index
    %c1_534 = arith.constant 1 : index
    %c0_535 = arith.constant 0 : index
    %c30_536 = arith.constant 30 : index
    %282 = vector.load %arg1[%c0_533, %c1_534, %c0_535, %c30_536] : memref<1x4x1x226xbf16, #tpu.memory_space<vmem>>, vector<1x1x1x196xbf16>
    %283 = vector.shape_cast %282 : vector<1x1x1x196xbf16> to vector<1x196xbf16>
    %c19_537 = arith.constant 19 : index
    %c588_538 = arith.constant 588 : index
    %284 = vector.load %arg6[%c19_537, %c588_538] : memref<25x784xbf16, #tpu.memory_space<vmem>>, vector<1x196xbf16>
    tpu.vector_store %arg6[%c19_537, %c588_538], %283 {strides = array<i32>} : memref<25x784xbf16, #tpu.memory_space<vmem>>, vector<1x196xbf16>,
    %c0_539 = arith.constant 0 : index
    %c3_540 = arith.constant 3 : index
    %c0_541 = arith.constant 0 : index
    %c28_542 = arith.constant 28 : index
    %285 = vector.load %arg1[%c0_539, %c3_540, %c0_541, %c28_542] : memref<1x4x1x226xbf16, #tpu.memory_space<vmem>>, vector<1x1x1x196xbf16>
    %286 = vector.shape_cast %285 : vector<1x1x1x196xbf16> to vector<1x196xbf16>
    %c20_543 = arith.constant 20 : index
    %c588_544 = arith.constant 588 : index
    %287 = vector.load %arg6[%c20_543, %c588_544] : memref<25x784xbf16, #tpu.memory_space<vmem>>, vector<1x196xbf16>
    tpu.vector_store %arg6[%c20_543, %c588_544], %286 {strides = array<i32>} : memref<25x784xbf16, #tpu.memory_space<vmem>>, vector<1x196xbf16>,
    %c0_545 = arith.constant 0 : index
    %c2_546 = arith.constant 2 : index
    %c0_547 = arith.constant 0 : index
    %c29_548 = arith.constant 29 : index
    %288 = vector.load %arg1[%c0_545, %c2_546, %c0_547, %c29_548] : memref<1x4x1x226xbf16, #tpu.memory_space<vmem>>, vector<1x1x1x196xbf16>
    %289 = vector.shape_cast %288 : vector<1x1x1x196xbf16> to vector<1x196xbf16>
    %c21_549 = arith.constant 21 : index
    %c588_550 = arith.constant 588 : index
    %290 = vector.load %arg6[%c21_549, %c588_550] : memref<25x784xbf16, #tpu.memory_space<vmem>>, vector<1x196xbf16>
    tpu.vector_store %arg6[%c21_549, %c588_550], %289 {strides = array<i32>} : memref<25x784xbf16, #tpu.memory_space<vmem>>, vector<1x196xbf16>,
    %c0_551 = arith.constant 0 : index
    %c3_552 = arith.constant 3 : index
    %c0_553 = arith.constant 0 : index
    %c29_554 = arith.constant 29 : index
    %291 = vector.load %arg1[%c0_551, %c3_552, %c0_553, %c29_554] : memref<1x4x1x226xbf16, #tpu.memory_space<vmem>>, vector<1x1x1x196xbf16>
    %292 = vector.shape_cast %291 : vector<1x1x1x196xbf16> to vector<1x196xbf16>
    %c22_555 = arith.constant 22 : index
    %c588_556 = arith.constant 588 : index
    %293 = vector.load %arg6[%c22_555, %c588_556] : memref<25x784xbf16, #tpu.memory_space<vmem>>, vector<1x196xbf16>
    tpu.vector_store %arg6[%c22_555, %c588_556], %292 {strides = array<i32>} : memref<25x784xbf16, #tpu.memory_space<vmem>>, vector<1x196xbf16>,
    %c0_557 = arith.constant 0 : index
    %c2_558 = arith.constant 2 : index
    %c0_559 = arith.constant 0 : index
    %c30_560 = arith.constant 30 : index
    %294 = vector.load %arg1[%c0_557, %c2_558, %c0_559, %c30_560] : memref<1x4x1x226xbf16, #tpu.memory_space<vmem>>, vector<1x1x1x196xbf16>
    %295 = vector.shape_cast %294 : vector<1x1x1x196xbf16> to vector<1x196xbf16>
    %c23_561 = arith.constant 23 : index
    %c588_562 = arith.constant 588 : index
    %296 = vector.load %arg6[%c23_561, %c588_562] : memref<25x784xbf16, #tpu.memory_space<vmem>>, vector<1x196xbf16>
    tpu.vector_store %arg6[%c23_561, %c588_562], %295 {strides = array<i32>} : memref<25x784xbf16, #tpu.memory_space<vmem>>, vector<1x196xbf16>,
    %c0_563 = arith.constant 0 : index
    %c3_564 = arith.constant 3 : index
    %c0_565 = arith.constant 0 : index
    %c30_566 = arith.constant 30 : index
    %297 = vector.load %arg1[%c0_563, %c3_564, %c0_565, %c30_566] : memref<1x4x1x226xbf16, #tpu.memory_space<vmem>>, vector<1x1x1x196xbf16>
    %298 = vector.shape_cast %297 : vector<1x1x1x196xbf16> to vector<1x196xbf16>
    %c24_567 = arith.constant 24 : index
    %c588_568 = arith.constant 588 : index
    %299 = vector.load %arg6[%c24_567, %c588_568] : memref<25x784xbf16, #tpu.memory_space<vmem>>, vector<1x196xbf16>
    tpu.vector_store %arg6[%c24_567, %c588_568], %298 {strides = array<i32>} : memref<25x784xbf16, #tpu.memory_space<vmem>>, vector<1x196xbf16>,
    %c0_569 = arith.constant 0 : index
    %c0_570 = arith.constant 0 : index
    %300 = vector.load %arg2[%c0_569, %c0_570] : memref<32x25xbf16, #tpu.memory_space<vmem>>, vector<32x25xbf16>
    %c0_571 = arith.constant 0 : index
    %c0_572 = arith.constant 0 : index
    %301 = vector.load %arg6[%c0_571, %c0_572] : memref<25x784xbf16, #tpu.memory_space<vmem>>, vector<25x784xbf16>
    %cst = arith.constant dense<0.000000e+00> : vector<32x784xf32>
    %302 = tpu.matmul %300, %301, %cst {dimension_numbers = #tpu.dot_dimension_numbers<[1], [0], [0], [1], [0, 0, 1, 1], [], []>} : vector<32x25xbf16>, vector<25x784xbf16>, vector<32x784xf32> -> vector<32x784xf32>
    %c0_573 = arith.constant 0 : index
    %c0_574 = arith.constant 0 : index
    %303 = vector.load %arg3[%c0_573, %c0_574] : memref<32x1xf32, #tpu.memory_space<vmem>>, vector<32x1xf32>
    %c0_575 = arith.constant 0 : index
    %c0_576 = arith.constant 0 : index
    %304 = memref.load %arg4[%c0_575, %c0_576] : memref<1x1xf32, #tpu.memory_space<smem>>
    %305 = vector.extract_strided_slice %302 {offsets = [0, 0], sizes = [32, 196], strides = [1, 1]} : vector<32x784xf32> to vector<32x196xf32>
    %306 = vector.broadcast %303 : vector<32x1xf32> to vector<32x196xf32>
    %307 = arith.addf %305, %306 : vector<32x196xf32>
    %cst_577 = arith.constant 0.000000e+00 : f32
    %308 = vector.broadcast %cst_577 : f32 to vector<32x196xf32>
    %309 = arith.cmpf oge, %307, %308 : vector<32x196xf32>
    %310 = vector.broadcast %304 : f32 to vector<32x196xf32>
    %311 = arith.mulf %310, %307 : vector<32x196xf32>
    %312 = arith.select %309, %307, %311 : vector<32x196xi1>, vector<32x196xf32>
    %313 = vector.extract_strided_slice %302 {offsets = [0, 196], sizes = [32, 196], strides = [1, 1]} : vector<32x784xf32> to vector<32x196xf32>
    %314 = vector.broadcast %303 : vector<32x1xf32> to vector<32x196xf32>
    %315 = arith.addf %313, %314 : vector<32x196xf32>
    %cst_578 = arith.constant 0.000000e+00 : f32
    %316 = vector.broadcast %cst_578 : f32 to vector<32x196xf32>
    %317 = arith.cmpf oge, %315, %316 : vector<32x196xf32>
    %318 = vector.broadcast %304 : f32 to vector<32x196xf32>
    %319 = arith.mulf %318, %315 : vector<32x196xf32>
    %320 = arith.select %317, %315, %319 : vector<32x196xi1>, vector<32x196xf32>
    %321 = arith.maximumf %312, %320 : vector<32x196xf32>
    %322 = vector.extract_strided_slice %302 {offsets = [0, 392], sizes = [32, 196], strides = [1, 1]} : vector<32x784xf32> to vector<32x196xf32>
    %323 = vector.broadcast %303 : vector<32x1xf32> to vector<32x196xf32>
    %324 = arith.addf %322, %323 : vector<32x196xf32>
    %cst_579 = arith.constant 0.000000e+00 : f32
    %325 = vector.broadcast %cst_579 : f32 to vector<32x196xf32>
    %326 = arith.cmpf oge, %324, %325 : vector<32x196xf32>
    %327 = vector.broadcast %304 : f32 to vector<32x196xf32>
    %328 = arith.mulf %327, %324 : vector<32x196xf32>
    %329 = arith.select %326, %324, %328 : vector<32x196xi1>, vector<32x196xf32>
    %330 = arith.maximumf %321, %329 : vector<32x196xf32>
    %331 = vector.extract_strided_slice %302 {offsets = [0, 588], sizes = [32, 196], strides = [1, 1]} : vector<32x784xf32> to vector<32x196xf32>
    %332 = vector.broadcast %303 : vector<32x1xf32> to vector<32x196xf32>
    %333 = arith.addf %331, %332 : vector<32x196xf32>
    %cst_580 = arith.constant 0.000000e+00 : f32
    %334 = vector.broadcast %cst_580 : f32 to vector<32x196xf32>
    %335 = arith.cmpf oge, %333, %334 : vector<32x196xf32>
    %336 = vector.broadcast %304 : f32 to vector<32x196xf32>
    %337 = arith.mulf %336, %333 : vector<32x196xf32>
    %338 = arith.select %335, %333, %337 : vector<32x196xi1>, vector<32x196xf32>
    %339 = arith.maximumf %330, %338 : vector<32x196xf32>
    %340 = arith.truncf %339 : vector<32x196xf32> to vector<32x196xbf16>
    %c0_581 = arith.constant 0 : index
    %c0_582 = arith.constant 0 : index
    %c0_583 = arith.constant 0 : index
    %341 = vector.load %arg5[%c0_581, %c0_582, %c0_583] : memref<1x32x196xbf16, #tpu.memory_space<vmem>>, vector<1x32x196xbf16>
    %342 = vector.shape_cast %341 : vector<1x32x196xbf16> to vector<32x196xbf16>
    %343 = vector.shape_cast %340 : vector<32x196xbf16> to vector<1x32x196xbf16>
    tpu.vector_store %arg5[%c0_581, %c0_582, %c0_583], %343 {strides = array<i32>} : memref<1x32x196xbf16, #tpu.memory_space<vmem>>, vector<1x32x196xbf16>,
    return
  }
  func.func @transform_0(%arg0: i32) -> (i32, i32, i32, i32) {
    %c0_i32 = arith.constant 0 : i32
    %c0_i32_0 = arith.constant 0 : i32
    %c0_i32_1 = arith.constant 0 : i32
    %c0_i32_2 = arith.constant 0 : i32
    return %arg0, %c0_i32, %c0_i32_0, %c0_i32_1 : i32, i32, i32, i32
  }
  func.func @transform_1(%arg0: i32) -> (i32, i32) {
    %c0_i32 = arith.constant 0 : i32
    %c0_i32_0 = arith.constant 0 : i32
    %c0_i32_1 = arith.constant 0 : i32
    return %c0_i32, %c0_i32_0 : i32, i32
  }
  func.func @transform_2(%arg0: i32) -> (i32, i32) {
    %c0_i32 = arith.constant 0 : i32
    %c0_i32_0 = arith.constant 0 : i32
    %c0_i32_1 = arith.constant 0 : i32
    return %c0_i32, %c0_i32_0 : i32, i32
  }
  func.func @transform_3(%arg0: i32) -> (i32, i32) {
    %c0_i32 = arith.constant 0 : i32
    %c0_i32_0 = arith.constant 0 : i32
    %c0_i32_1 = arith.constant 0 : i32
    return %c0_i32, %c0_i32_0 : i32, i32
  }
  func.func @transform_4(%arg0: i32) -> (i32, i32, i32) {
    %c0_i32 = arith.constant 0 : i32
    %c0_i32_0 = arith.constant 0 : i32
    %c0_i32_1 = arith.constant 0 : i32
    return %arg0, %c0_i32, %c0_i32_0 : i32, i32, i32
  }
}

module attributes {stable_mosaic.version = 11 : i64} {
  func.func @_conv_pool_kernel(%arg0: i32, %arg1: memref<1x4x32x50xbf16, #tpu.memory_space<vmem>>, %arg2: memref<64x800xbf16, #tpu.memory_space<vmem>>, %arg3: memref<64x1xf32, #tpu.memory_space<vmem>>, %arg4: memref<1x1xf32, #tpu.memory_space<smem>>, %arg5: memref<1x64x36xbf16, #tpu.memory_space<vmem>>, %arg6: memref<800x144xbf16, #tpu.memory_space<vmem>>) attributes {dimension_semantics = [#tpu.dimension_semantics<parallel>], iteration_bounds = array<i64: 2>, scalar_prefetch = 0 : i64, scratch_operands = 1 : i64, tpu.core_type = #tpu.core_type<tc>, window_params = [{transform_indices = @transform_0, window_bounds = array<i64: 1, 4, 32, 50>}, {pipeline_mode = #tpu.pipeline_mode<synchronous>, transform_indices = @transform_1, window_bounds = array<i64: 64, 800>}, {pipeline_mode = #tpu.pipeline_mode<synchronous>, transform_indices = @transform_2, window_bounds = array<i64: 64, 1>}, {transform_indices = @transform_3, window_bounds = array<i64: 1, 1>}, {transform_indices = @transform_4, window_bounds = array<i64: 1, 64, 36>}]} {
    %c0 = arith.constant 0 : index
    %c0_0 = arith.constant 0 : index
    %c0_1 = arith.constant 0 : index
    %c0_2 = arith.constant 0 : index
    %0 = vector.load %arg1[%c0, %c0_0, %c0_1, %c0_2] : memref<1x4x32x50xbf16, #tpu.memory_space<vmem>>, vector<1x1x32x36xbf16>
    %1 = vector.shape_cast %0 : vector<1x1x32x36xbf16> to vector<32x36xbf16>
    %c0_3 = arith.constant 0 : index
    %c0_4 = arith.constant 0 : index
    %2 = vector.load %arg6[%c0_3, %c0_4] : memref<800x144xbf16, #tpu.memory_space<vmem>>, vector<32x36xbf16>
    tpu.vector_store %arg6[%c0_3, %c0_4], %1 {strides = array<i32>} : memref<800x144xbf16, #tpu.memory_space<vmem>>, vector<32x36xbf16>,
    %c0_5 = arith.constant 0 : index
    %c1 = arith.constant 1 : index
    %c0_6 = arith.constant 0 : index
    %c0_7 = arith.constant 0 : index
    %3 = vector.load %arg1[%c0_5, %c1, %c0_6, %c0_7] : memref<1x4x32x50xbf16, #tpu.memory_space<vmem>>, vector<1x1x32x36xbf16>
    %4 = vector.shape_cast %3 : vector<1x1x32x36xbf16> to vector<32x36xbf16>
    %c32 = arith.constant 32 : index
    %c0_8 = arith.constant 0 : index
    %5 = vector.load %arg6[%c32, %c0_8] : memref<800x144xbf16, #tpu.memory_space<vmem>>, vector<32x36xbf16>
    tpu.vector_store %arg6[%c32, %c0_8], %4 {strides = array<i32>} : memref<800x144xbf16, #tpu.memory_space<vmem>>, vector<32x36xbf16>,
    %c0_9 = arith.constant 0 : index
    %c0_10 = arith.constant 0 : index
    %c0_11 = arith.constant 0 : index
    %c1_12 = arith.constant 1 : index
    %6 = vector.load %arg1[%c0_9, %c0_10, %c0_11, %c1_12] : memref<1x4x32x50xbf16, #tpu.memory_space<vmem>>, vector<1x1x32x36xbf16>
    %7 = vector.shape_cast %6 : vector<1x1x32x36xbf16> to vector<32x36xbf16>
    %c64 = arith.constant 64 : index
    %c0_13 = arith.constant 0 : index
    %8 = vector.load %arg6[%c64, %c0_13] : memref<800x144xbf16, #tpu.memory_space<vmem>>, vector<32x36xbf16>
    tpu.vector_store %arg6[%c64, %c0_13], %7 {strides = array<i32>} : memref<800x144xbf16, #tpu.memory_space<vmem>>, vector<32x36xbf16>,
    %c0_14 = arith.constant 0 : index
    %c1_15 = arith.constant 1 : index
    %c0_16 = arith.constant 0 : index
    %c1_17 = arith.constant 1 : index
    %9 = vector.load %arg1[%c0_14, %c1_15, %c0_16, %c1_17] : memref<1x4x32x50xbf16, #tpu.memory_space<vmem>>, vector<1x1x32x36xbf16>
    %10 = vector.shape_cast %9 : vector<1x1x32x36xbf16> to vector<32x36xbf16>
    %c96 = arith.constant 96 : index
    %c0_18 = arith.constant 0 : index
    %11 = vector.load %arg6[%c96, %c0_18] : memref<800x144xbf16, #tpu.memory_space<vmem>>, vector<32x36xbf16>
    tpu.vector_store %arg6[%c96, %c0_18], %10 {strides = array<i32>} : memref<800x144xbf16, #tpu.memory_space<vmem>>, vector<32x36xbf16>,
    %c0_19 = arith.constant 0 : index
    %c0_20 = arith.constant 0 : index
    %c0_21 = arith.constant 0 : index
    %c2 = arith.constant 2 : index
    %12 = vector.load %arg1[%c0_19, %c0_20, %c0_21, %c2] : memref<1x4x32x50xbf16, #tpu.memory_space<vmem>>, vector<1x1x32x36xbf16>
    %13 = vector.shape_cast %12 : vector<1x1x32x36xbf16> to vector<32x36xbf16>
    %c128 = arith.constant 128 : index
    %c0_22 = arith.constant 0 : index
    %14 = vector.load %arg6[%c128, %c0_22] : memref<800x144xbf16, #tpu.memory_space<vmem>>, vector<32x36xbf16>
    tpu.vector_store %arg6[%c128, %c0_22], %13 {strides = array<i32>} : memref<800x144xbf16, #tpu.memory_space<vmem>>, vector<32x36xbf16>,
    %c0_23 = arith.constant 0 : index
    %c2_24 = arith.constant 2 : index
    %c0_25 = arith.constant 0 : index
    %c0_26 = arith.constant 0 : index
    %15 = vector.load %arg1[%c0_23, %c2_24, %c0_25, %c0_26] : memref<1x4x32x50xbf16, #tpu.memory_space<vmem>>, vector<1x1x32x36xbf16>
    %16 = vector.shape_cast %15 : vector<1x1x32x36xbf16> to vector<32x36xbf16>
    %c160 = arith.constant 160 : index
    %c0_27 = arith.constant 0 : index
    %17 = vector.load %arg6[%c160, %c0_27] : memref<800x144xbf16, #tpu.memory_space<vmem>>, vector<32x36xbf16>
    tpu.vector_store %arg6[%c160, %c0_27], %16 {strides = array<i32>} : memref<800x144xbf16, #tpu.memory_space<vmem>>, vector<32x36xbf16>,
    %c0_28 = arith.constant 0 : index
    %c3 = arith.constant 3 : index
    %c0_29 = arith.constant 0 : index
    %c0_30 = arith.constant 0 : index
    %18 = vector.load %arg1[%c0_28, %c3, %c0_29, %c0_30] : memref<1x4x32x50xbf16, #tpu.memory_space<vmem>>, vector<1x1x32x36xbf16>
    %19 = vector.shape_cast %18 : vector<1x1x32x36xbf16> to vector<32x36xbf16>
    %c192 = arith.constant 192 : index
    %c0_31 = arith.constant 0 : index
    %20 = vector.load %arg6[%c192, %c0_31] : memref<800x144xbf16, #tpu.memory_space<vmem>>, vector<32x36xbf16>
    tpu.vector_store %arg6[%c192, %c0_31], %19 {strides = array<i32>} : memref<800x144xbf16, #tpu.memory_space<vmem>>, vector<32x36xbf16>,
    %c0_32 = arith.constant 0 : index
    %c2_33 = arith.constant 2 : index
    %c0_34 = arith.constant 0 : index
    %c1_35 = arith.constant 1 : index
    %21 = vector.load %arg1[%c0_32, %c2_33, %c0_34, %c1_35] : memref<1x4x32x50xbf16, #tpu.memory_space<vmem>>, vector<1x1x32x36xbf16>
    %22 = vector.shape_cast %21 : vector<1x1x32x36xbf16> to vector<32x36xbf16>
    %c224 = arith.constant 224 : index
    %c0_36 = arith.constant 0 : index
    %23 = vector.load %arg6[%c224, %c0_36] : memref<800x144xbf16, #tpu.memory_space<vmem>>, vector<32x36xbf16>
    tpu.vector_store %arg6[%c224, %c0_36], %22 {strides = array<i32>} : memref<800x144xbf16, #tpu.memory_space<vmem>>, vector<32x36xbf16>,
    %c0_37 = arith.constant 0 : index
    %c3_38 = arith.constant 3 : index
    %c0_39 = arith.constant 0 : index
    %c1_40 = arith.constant 1 : index
    %24 = vector.load %arg1[%c0_37, %c3_38, %c0_39, %c1_40] : memref<1x4x32x50xbf16, #tpu.memory_space<vmem>>, vector<1x1x32x36xbf16>
    %25 = vector.shape_cast %24 : vector<1x1x32x36xbf16> to vector<32x36xbf16>
    %c256 = arith.constant 256 : index
    %c0_41 = arith.constant 0 : index
    %26 = vector.load %arg6[%c256, %c0_41] : memref<800x144xbf16, #tpu.memory_space<vmem>>, vector<32x36xbf16>
    tpu.vector_store %arg6[%c256, %c0_41], %25 {strides = array<i32>} : memref<800x144xbf16, #tpu.memory_space<vmem>>, vector<32x36xbf16>,
    %c0_42 = arith.constant 0 : index
    %c2_43 = arith.constant 2 : index
    %c0_44 = arith.constant 0 : index
    %c2_45 = arith.constant 2 : index
    %27 = vector.load %arg1[%c0_42, %c2_43, %c0_44, %c2_45] : memref<1x4x32x50xbf16, #tpu.memory_space<vmem>>, vector<1x1x32x36xbf16>
    %28 = vector.shape_cast %27 : vector<1x1x32x36xbf16> to vector<32x36xbf16>
    %c288 = arith.constant 288 : index
    %c0_46 = arith.constant 0 : index
    %29 = vector.load %arg6[%c288, %c0_46] : memref<800x144xbf16, #tpu.memory_space<vmem>>, vector<32x36xbf16>
    tpu.vector_store %arg6[%c288, %c0_46], %28 {strides = array<i32>} : memref<800x144xbf16, #tpu.memory_space<vmem>>, vector<32x36xbf16>,
    %c0_47 = arith.constant 0 : index
    %c0_48 = arith.constant 0 : index
    %c0_49 = arith.constant 0 : index
    %c6 = arith.constant 6 : index
    %30 = vector.load %arg1[%c0_47, %c0_48, %c0_49, %c6] : memref<1x4x32x50xbf16, #tpu.memory_space<vmem>>, vector<1x1x32x36xbf16>
    %31 = vector.shape_cast %30 : vector<1x1x32x36xbf16> to vector<32x36xbf16>
    %c320 = arith.constant 320 : index
    %c0_50 = arith.constant 0 : index
    %32 = vector.load %arg6[%c320, %c0_50] : memref<800x144xbf16, #tpu.memory_space<vmem>>, vector<32x36xbf16>
    tpu.vector_store %arg6[%c320, %c0_50], %31 {strides = array<i32>} : memref<800x144xbf16, #tpu.memory_space<vmem>>, vector<32x36xbf16>,
    %c0_51 = arith.constant 0 : index
    %c1_52 = arith.constant 1 : index
    %c0_53 = arith.constant 0 : index
    %c6_54 = arith.constant 6 : index
    %33 = vector.load %arg1[%c0_51, %c1_52, %c0_53, %c6_54] : memref<1x4x32x50xbf16, #tpu.memory_space<vmem>>, vector<1x1x32x36xbf16>
    %34 = vector.shape_cast %33 : vector<1x1x32x36xbf16> to vector<32x36xbf16>
    %c352 = arith.constant 352 : index
    %c0_55 = arith.constant 0 : index
    %35 = vector.load %arg6[%c352, %c0_55] : memref<800x144xbf16, #tpu.memory_space<vmem>>, vector<32x36xbf16>
    tpu.vector_store %arg6[%c352, %c0_55], %34 {strides = array<i32>} : memref<800x144xbf16, #tpu.memory_space<vmem>>, vector<32x36xbf16>,
    %c0_56 = arith.constant 0 : index
    %c0_57 = arith.constant 0 : index
    %c0_58 = arith.constant 0 : index
    %c7 = arith.constant 7 : index
    %36 = vector.load %arg1[%c0_56, %c0_57, %c0_58, %c7] : memref<1x4x32x50xbf16, #tpu.memory_space<vmem>>, vector<1x1x32x36xbf16>
    %37 = vector.shape_cast %36 : vector<1x1x32x36xbf16> to vector<32x36xbf16>
    %c384 = arith.constant 384 : index
    %c0_59 = arith.constant 0 : index
    %38 = vector.load %arg6[%c384, %c0_59] : memref<800x144xbf16, #tpu.memory_space<vmem>>, vector<32x36xbf16>
    tpu.vector_store %arg6[%c384, %c0_59], %37 {strides = array<i32>} : memref<800x144xbf16, #tpu.memory_space<vmem>>, vector<32x36xbf16>,
    %c0_60 = arith.constant 0 : index
    %c1_61 = arith.constant 1 : index
    %c0_62 = arith.constant 0 : index
    %c7_63 = arith.constant 7 : index
    %39 = vector.load %arg1[%c0_60, %c1_61, %c0_62, %c7_63] : memref<1x4x32x50xbf16, #tpu.memory_space<vmem>>, vector<1x1x32x36xbf16>
    %40 = vector.shape_cast %39 : vector<1x1x32x36xbf16> to vector<32x36xbf16>
    %c416 = arith.constant 416 : index
    %c0_64 = arith.constant 0 : index
    %41 = vector.load %arg6[%c416, %c0_64] : memref<800x144xbf16, #tpu.memory_space<vmem>>, vector<32x36xbf16>
    tpu.vector_store %arg6[%c416, %c0_64], %40 {strides = array<i32>} : memref<800x144xbf16, #tpu.memory_space<vmem>>, vector<32x36xbf16>,
    %c0_65 = arith.constant 0 : index
    %c0_66 = arith.constant 0 : index
    %c0_67 = arith.constant 0 : index
    %c8 = arith.constant 8 : index
    %42 = vector.load %arg1[%c0_65, %c0_66, %c0_67, %c8] : memref<1x4x32x50xbf16, #tpu.memory_space<vmem>>, vector<1x1x32x36xbf16>
    %43 = vector.shape_cast %42 : vector<1x1x32x36xbf16> to vector<32x36xbf16>
    %c448 = arith.constant 448 : index
    %c0_68 = arith.constant 0 : index
    %44 = vector.load %arg6[%c448, %c0_68] : memref<800x144xbf16, #tpu.memory_space<vmem>>, vector<32x36xbf16>
    tpu.vector_store %arg6[%c448, %c0_68], %43 {strides = array<i32>} : memref<800x144xbf16, #tpu.memory_space<vmem>>, vector<32x36xbf16>,
    %c0_69 = arith.constant 0 : index
    %c2_70 = arith.constant 2 : index
    %c0_71 = arith.constant 0 : index
    %c6_72 = arith.constant 6 : index
    %45 = vector.load %arg1[%c0_69, %c2_70, %c0_71, %c6_72] : memref<1x4x32x50xbf16, #tpu.memory_space<vmem>>, vector<1x1x32x36xbf16>
    %46 = vector.shape_cast %45 : vector<1x1x32x36xbf16> to vector<32x36xbf16>
    %c480 = arith.constant 480 : index
    %c0_73 = arith.constant 0 : index
    %47 = vector.load %arg6[%c480, %c0_73] : memref<800x144xbf16, #tpu.memory_space<vmem>>, vector<32x36xbf16>
    tpu.vector_store %arg6[%c480, %c0_73], %46 {strides = array<i32>} : memref<800x144xbf16, #tpu.memory_space<vmem>>, vector<32x36xbf16>,
    %c0_74 = arith.constant 0 : index
    %c3_75 = arith.constant 3 : index
    %c0_76 = arith.constant 0 : index
    %c6_77 = arith.constant 6 : index
    %48 = vector.load %arg1[%c0_74, %c3_75, %c0_76, %c6_77] : memref<1x4x32x50xbf16, #tpu.memory_space<vmem>>, vector<1x1x32x36xbf16>
    %49 = vector.shape_cast %48 : vector<1x1x32x36xbf16> to vector<32x36xbf16>
    %c512 = arith.constant 512 : index
    %c0_78 = arith.constant 0 : index
    %50 = vector.load %arg6[%c512, %c0_78] : memref<800x144xbf16, #tpu.memory_space<vmem>>, vector<32x36xbf16>
    tpu.vector_store %arg6[%c512, %c0_78], %49 {strides = array<i32>} : memref<800x144xbf16, #tpu.memory_space<vmem>>, vector<32x36xbf16>,
    %c0_79 = arith.constant 0 : index
    %c2_80 = arith.constant 2 : index
    %c0_81 = arith.constant 0 : index
    %c7_82 = arith.constant 7 : index
    %51 = vector.load %arg1[%c0_79, %c2_80, %c0_81, %c7_82] : memref<1x4x32x50xbf16, #tpu.memory_space<vmem>>, vector<1x1x32x36xbf16>
    %52 = vector.shape_cast %51 : vector<1x1x32x36xbf16> to vector<32x36xbf16>
    %c544 = arith.constant 544 : index
    %c0_83 = arith.constant 0 : index
    %53 = vector.load %arg6[%c544, %c0_83] : memref<800x144xbf16, #tpu.memory_space<vmem>>, vector<32x36xbf16>
    tpu.vector_store %arg6[%c544, %c0_83], %52 {strides = array<i32>} : memref<800x144xbf16, #tpu.memory_space<vmem>>, vector<32x36xbf16>,
    %c0_84 = arith.constant 0 : index
    %c3_85 = arith.constant 3 : index
    %c0_86 = arith.constant 0 : index
    %c7_87 = arith.constant 7 : index
    %54 = vector.load %arg1[%c0_84, %c3_85, %c0_86, %c7_87] : memref<1x4x32x50xbf16, #tpu.memory_space<vmem>>, vector<1x1x32x36xbf16>
    %55 = vector.shape_cast %54 : vector<1x1x32x36xbf16> to vector<32x36xbf16>
    %c576 = arith.constant 576 : index
    %c0_88 = arith.constant 0 : index
    %56 = vector.load %arg6[%c576, %c0_88] : memref<800x144xbf16, #tpu.memory_space<vmem>>, vector<32x36xbf16>
    tpu.vector_store %arg6[%c576, %c0_88], %55 {strides = array<i32>} : memref<800x144xbf16, #tpu.memory_space<vmem>>, vector<32x36xbf16>,
    %c0_89 = arith.constant 0 : index
    %c2_90 = arith.constant 2 : index
    %c0_91 = arith.constant 0 : index
    %c8_92 = arith.constant 8 : index
    %57 = vector.load %arg1[%c0_89, %c2_90, %c0_91, %c8_92] : memref<1x4x32x50xbf16, #tpu.memory_space<vmem>>, vector<1x1x32x36xbf16>
    %58 = vector.shape_cast %57 : vector<1x1x32x36xbf16> to vector<32x36xbf16>
    %c608 = arith.constant 608 : index
    %c0_93 = arith.constant 0 : index
    %59 = vector.load %arg6[%c608, %c0_93] : memref<800x144xbf16, #tpu.memory_space<vmem>>, vector<32x36xbf16>
    tpu.vector_store %arg6[%c608, %c0_93], %58 {strides = array<i32>} : memref<800x144xbf16, #tpu.memory_space<vmem>>, vector<32x36xbf16>,
    %c0_94 = arith.constant 0 : index
    %c0_95 = arith.constant 0 : index
    %c0_96 = arith.constant 0 : index
    %c12 = arith.constant 12 : index
    %60 = vector.load %arg1[%c0_94, %c0_95, %c0_96, %c12] : memref<1x4x32x50xbf16, #tpu.memory_space<vmem>>, vector<1x1x32x36xbf16>
    %61 = vector.shape_cast %60 : vector<1x1x32x36xbf16> to vector<32x36xbf16>
    %c640 = arith.constant 640 : index
    %c0_97 = arith.constant 0 : index
    %62 = vector.load %arg6[%c640, %c0_97] : memref<800x144xbf16, #tpu.memory_space<vmem>>, vector<32x36xbf16>
    tpu.vector_store %arg6[%c640, %c0_97], %61 {strides = array<i32>} : memref<800x144xbf16, #tpu.memory_space<vmem>>, vector<32x36xbf16>,
    %c0_98 = arith.constant 0 : index
    %c1_99 = arith.constant 1 : index
    %c0_100 = arith.constant 0 : index
    %c12_101 = arith.constant 12 : index
    %63 = vector.load %arg1[%c0_98, %c1_99, %c0_100, %c12_101] : memref<1x4x32x50xbf16, #tpu.memory_space<vmem>>, vector<1x1x32x36xbf16>
    %64 = vector.shape_cast %63 : vector<1x1x32x36xbf16> to vector<32x36xbf16>
    %c672 = arith.constant 672 : index
    %c0_102 = arith.constant 0 : index
    %65 = vector.load %arg6[%c672, %c0_102] : memref<800x144xbf16, #tpu.memory_space<vmem>>, vector<32x36xbf16>
    tpu.vector_store %arg6[%c672, %c0_102], %64 {strides = array<i32>} : memref<800x144xbf16, #tpu.memory_space<vmem>>, vector<32x36xbf16>,
    %c0_103 = arith.constant 0 : index
    %c0_104 = arith.constant 0 : index
    %c0_105 = arith.constant 0 : index
    %c13 = arith.constant 13 : index
    %66 = vector.load %arg1[%c0_103, %c0_104, %c0_105, %c13] : memref<1x4x32x50xbf16, #tpu.memory_space<vmem>>, vector<1x1x32x36xbf16>
    %67 = vector.shape_cast %66 : vector<1x1x32x36xbf16> to vector<32x36xbf16>
    %c704 = arith.constant 704 : index
    %c0_106 = arith.constant 0 : index
    %68 = vector.load %arg6[%c704, %c0_106] : memref<800x144xbf16, #tpu.memory_space<vmem>>, vector<32x36xbf16>
    tpu.vector_store %arg6[%c704, %c0_106], %67 {strides = array<i32>} : memref<800x144xbf16, #tpu.memory_space<vmem>>, vector<32x36xbf16>,
    %c0_107 = arith.constant 0 : index
    %c1_108 = arith.constant 1 : index
    %c0_109 = arith.constant 0 : index
    %c13_110 = arith.constant 13 : index
    %69 = vector.load %arg1[%c0_107, %c1_108, %c0_109, %c13_110] : memref<1x4x32x50xbf16, #tpu.memory_space<vmem>>, vector<1x1x32x36xbf16>
    %70 = vector.shape_cast %69 : vector<1x1x32x36xbf16> to vector<32x36xbf16>
    %c736 = arith.constant 736 : index
    %c0_111 = arith.constant 0 : index
    %71 = vector.load %arg6[%c736, %c0_111] : memref<800x144xbf16, #tpu.memory_space<vmem>>, vector<32x36xbf16>
    tpu.vector_store %arg6[%c736, %c0_111], %70 {strides = array<i32>} : memref<800x144xbf16, #tpu.memory_space<vmem>>, vector<32x36xbf16>,
    %c0_112 = arith.constant 0 : index
    %c0_113 = arith.constant 0 : index
    %c0_114 = arith.constant 0 : index
    %c14 = arith.constant 14 : index
    %72 = vector.load %arg1[%c0_112, %c0_113, %c0_114, %c14] : memref<1x4x32x50xbf16, #tpu.memory_space<vmem>>, vector<1x1x32x36xbf16>
    %73 = vector.shape_cast %72 : vector<1x1x32x36xbf16> to vector<32x36xbf16>
    %c768 = arith.constant 768 : index
    %c0_115 = arith.constant 0 : index
    %74 = vector.load %arg6[%c768, %c0_115] : memref<800x144xbf16, #tpu.memory_space<vmem>>, vector<32x36xbf16>
    tpu.vector_store %arg6[%c768, %c0_115], %73 {strides = array<i32>} : memref<800x144xbf16, #tpu.memory_space<vmem>>, vector<32x36xbf16>,
    %c0_116 = arith.constant 0 : index
    %c1_117 = arith.constant 1 : index
    %c0_118 = arith.constant 0 : index
    %c0_119 = arith.constant 0 : index
    %75 = vector.load %arg1[%c0_116, %c1_117, %c0_118, %c0_119] : memref<1x4x32x50xbf16, #tpu.memory_space<vmem>>, vector<1x1x32x36xbf16>
    %76 = vector.shape_cast %75 : vector<1x1x32x36xbf16> to vector<32x36xbf16>
    %c0_120 = arith.constant 0 : index
    %c36 = arith.constant 36 : index
    %77 = vector.load %arg6[%c0_120, %c36] : memref<800x144xbf16, #tpu.memory_space<vmem>>, vector<32x36xbf16>
    tpu.vector_store %arg6[%c0_120, %c36], %76 {strides = array<i32>} : memref<800x144xbf16, #tpu.memory_space<vmem>>, vector<32x36xbf16>,
    %c0_121 = arith.constant 0 : index
    %c0_122 = arith.constant 0 : index
    %c0_123 = arith.constant 0 : index
    %c1_124 = arith.constant 1 : index
    %78 = vector.load %arg1[%c0_121, %c0_122, %c0_123, %c1_124] : memref<1x4x32x50xbf16, #tpu.memory_space<vmem>>, vector<1x1x32x36xbf16>
    %79 = vector.shape_cast %78 : vector<1x1x32x36xbf16> to vector<32x36xbf16>
    %c32_125 = arith.constant 32 : index
    %c36_126 = arith.constant 36 : index
    %80 = vector.load %arg6[%c32_125, %c36_126] : memref<800x144xbf16, #tpu.memory_space<vmem>>, vector<32x36xbf16>
    tpu.vector_store %arg6[%c32_125, %c36_126], %79 {strides = array<i32>} : memref<800x144xbf16, #tpu.memory_space<vmem>>, vector<32x36xbf16>,
    %c0_127 = arith.constant 0 : index
    %c1_128 = arith.constant 1 : index
    %c0_129 = arith.constant 0 : index
    %c1_130 = arith.constant 1 : index
    %81 = vector.load %arg1[%c0_127, %c1_128, %c0_129, %c1_130] : memref<1x4x32x50xbf16, #tpu.memory_space<vmem>>, vector<1x1x32x36xbf16>
    %82 = vector.shape_cast %81 : vector<1x1x32x36xbf16> to vector<32x36xbf16>
    %c64_131 = arith.constant 64 : index
    %c36_132 = arith.constant 36 : index
    %83 = vector.load %arg6[%c64_131, %c36_132] : memref<800x144xbf16, #tpu.memory_space<vmem>>, vector<32x36xbf16>
    tpu.vector_store %arg6[%c64_131, %c36_132], %82 {strides = array<i32>} : memref<800x144xbf16, #tpu.memory_space<vmem>>, vector<32x36xbf16>,
    %c0_133 = arith.constant 0 : index
    %c0_134 = arith.constant 0 : index
    %c0_135 = arith.constant 0 : index
    %c2_136 = arith.constant 2 : index
    %84 = vector.load %arg1[%c0_133, %c0_134, %c0_135, %c2_136] : memref<1x4x32x50xbf16, #tpu.memory_space<vmem>>, vector<1x1x32x36xbf16>
    %85 = vector.shape_cast %84 : vector<1x1x32x36xbf16> to vector<32x36xbf16>
    %c96_137 = arith.constant 96 : index
    %c36_138 = arith.constant 36 : index
    %86 = vector.load %arg6[%c96_137, %c36_138] : memref<800x144xbf16, #tpu.memory_space<vmem>>, vector<32x36xbf16>
    tpu.vector_store %arg6[%c96_137, %c36_138], %85 {strides = array<i32>} : memref<800x144xbf16, #tpu.memory_space<vmem>>, vector<32x36xbf16>,
    %c0_139 = arith.constant 0 : index
    %c1_140 = arith.constant 1 : index
    %c0_141 = arith.constant 0 : index
    %c2_142 = arith.constant 2 : index
    %87 = vector.load %arg1[%c0_139, %c1_140, %c0_141, %c2_142] : memref<1x4x32x50xbf16, #tpu.memory_space<vmem>>, vector<1x1x32x36xbf16>
    %88 = vector.shape_cast %87 : vector<1x1x32x36xbf16> to vector<32x36xbf16>
    %c128_143 = arith.constant 128 : index
    %c36_144 = arith.constant 36 : index
    %89 = vector.load %arg6[%c128_143, %c36_144] : memref<800x144xbf16, #tpu.memory_space<vmem>>, vector<32x36xbf16>
    tpu.vector_store %arg6[%c128_143, %c36_144], %88 {strides = array<i32>} : memref<800x144xbf16, #tpu.memory_space<vmem>>, vector<32x36xbf16>,
    %c0_145 = arith.constant 0 : index
    %c3_146 = arith.constant 3 : index
    %c0_147 = arith.constant 0 : index
    %c0_148 = arith.constant 0 : index
    %90 = vector.load %arg1[%c0_145, %c3_146, %c0_147, %c0_148] : memref<1x4x32x50xbf16, #tpu.memory_space<vmem>>, vector<1x1x32x36xbf16>
    %91 = vector.shape_cast %90 : vector<1x1x32x36xbf16> to vector<32x36xbf16>
    %c160_149 = arith.constant 160 : index
    %c36_150 = arith.constant 36 : index
    %92 = vector.load %arg6[%c160_149, %c36_150] : memref<800x144xbf16, #tpu.memory_space<vmem>>, vector<32x36xbf16>
    tpu.vector_store %arg6[%c160_149, %c36_150], %91 {strides = array<i32>} : memref<800x144xbf16, #tpu.memory_space<vmem>>, vector<32x36xbf16>,
    %c0_151 = arith.constant 0 : index
    %c2_152 = arith.constant 2 : index
    %c0_153 = arith.constant 0 : index
    %c1_154 = arith.constant 1 : index
    %93 = vector.load %arg1[%c0_151, %c2_152, %c0_153, %c1_154] : memref<1x4x32x50xbf16, #tpu.memory_space<vmem>>, vector<1x1x32x36xbf16>
    %94 = vector.shape_cast %93 : vector<1x1x32x36xbf16> to vector<32x36xbf16>
    %c192_155 = arith.constant 192 : index
    %c36_156 = arith.constant 36 : index
    %95 = vector.load %arg6[%c192_155, %c36_156] : memref<800x144xbf16, #tpu.memory_space<vmem>>, vector<32x36xbf16>
    tpu.vector_store %arg6[%c192_155, %c36_156], %94 {strides = array<i32>} : memref<800x144xbf16, #tpu.memory_space<vmem>>, vector<32x36xbf16>,
    %c0_157 = arith.constant 0 : index
    %c3_158 = arith.constant 3 : index
    %c0_159 = arith.constant 0 : index
    %c1_160 = arith.constant 1 : index
    %96 = vector.load %arg1[%c0_157, %c3_158, %c0_159, %c1_160] : memref<1x4x32x50xbf16, #tpu.memory_space<vmem>>, vector<1x1x32x36xbf16>
    %97 = vector.shape_cast %96 : vector<1x1x32x36xbf16> to vector<32x36xbf16>
    %c224_161 = arith.constant 224 : index
    %c36_162 = arith.constant 36 : index
    %98 = vector.load %arg6[%c224_161, %c36_162] : memref<800x144xbf16, #tpu.memory_space<vmem>>, vector<32x36xbf16>
    tpu.vector_store %arg6[%c224_161, %c36_162], %97 {strides = array<i32>} : memref<800x144xbf16, #tpu.memory_space<vmem>>, vector<32x36xbf16>,
    %c0_163 = arith.constant 0 : index
    %c2_164 = arith.constant 2 : index
    %c0_165 = arith.constant 0 : index
    %c2_166 = arith.constant 2 : index
    %99 = vector.load %arg1[%c0_163, %c2_164, %c0_165, %c2_166] : memref<1x4x32x50xbf16, #tpu.memory_space<vmem>>, vector<1x1x32x36xbf16>
    %100 = vector.shape_cast %99 : vector<1x1x32x36xbf16> to vector<32x36xbf16>
    %c256_167 = arith.constant 256 : index
    %c36_168 = arith.constant 36 : index
    %101 = vector.load %arg6[%c256_167, %c36_168] : memref<800x144xbf16, #tpu.memory_space<vmem>>, vector<32x36xbf16>
    tpu.vector_store %arg6[%c256_167, %c36_168], %100 {strides = array<i32>} : memref<800x144xbf16, #tpu.memory_space<vmem>>, vector<32x36xbf16>,
    %c0_169 = arith.constant 0 : index
    %c3_170 = arith.constant 3 : index
    %c0_171 = arith.constant 0 : index
    %c2_172 = arith.constant 2 : index
    %102 = vector.load %arg1[%c0_169, %c3_170, %c0_171, %c2_172] : memref<1x4x32x50xbf16, #tpu.memory_space<vmem>>, vector<1x1x32x36xbf16>
    %103 = vector.shape_cast %102 : vector<1x1x32x36xbf16> to vector<32x36xbf16>
    %c288_173 = arith.constant 288 : index
    %c36_174 = arith.constant 36 : index
    %104 = vector.load %arg6[%c288_173, %c36_174] : memref<800x144xbf16, #tpu.memory_space<vmem>>, vector<32x36xbf16>
    tpu.vector_store %arg6[%c288_173, %c36_174], %103 {strides = array<i32>} : memref<800x144xbf16, #tpu.memory_space<vmem>>, vector<32x36xbf16>,
    %c0_175 = arith.constant 0 : index
    %c1_176 = arith.constant 1 : index
    %c0_177 = arith.constant 0 : index
    %c6_178 = arith.constant 6 : index
    %105 = vector.load %arg1[%c0_175, %c1_176, %c0_177, %c6_178] : memref<1x4x32x50xbf16, #tpu.memory_space<vmem>>, vector<1x1x32x36xbf16>
    %106 = vector.shape_cast %105 : vector<1x1x32x36xbf16> to vector<32x36xbf16>
    %c320_179 = arith.constant 320 : index
    %c36_180 = arith.constant 36 : index
    %107 = vector.load %arg6[%c320_179, %c36_180] : memref<800x144xbf16, #tpu.memory_space<vmem>>, vector<32x36xbf16>
    tpu.vector_store %arg6[%c320_179, %c36_180], %106 {strides = array<i32>} : memref<800x144xbf16, #tpu.memory_space<vmem>>, vector<32x36xbf16>,
    %c0_181 = arith.constant 0 : index
    %c0_182 = arith.constant 0 : index
    %c0_183 = arith.constant 0 : index
    %c7_184 = arith.constant 7 : index
    %108 = vector.load %arg1[%c0_181, %c0_182, %c0_183, %c7_184] : memref<1x4x32x50xbf16, #tpu.memory_space<vmem>>, vector<1x1x32x36xbf16>
    %109 = vector.shape_cast %108 : vector<1x1x32x36xbf16> to vector<32x36xbf16>
    %c352_185 = arith.constant 352 : index
    %c36_186 = arith.constant 36 : index
    %110 = vector.load %arg6[%c352_185, %c36_186] : memref<800x144xbf16, #tpu.memory_space<vmem>>, vector<32x36xbf16>
    tpu.vector_store %arg6[%c352_185, %c36_186], %109 {strides = array<i32>} : memref<800x144xbf16, #tpu.memory_space<vmem>>, vector<32x36xbf16>,
    %c0_187 = arith.constant 0 : index
    %c1_188 = arith.constant 1 : index
    %c0_189 = arith.constant 0 : index
    %c7_190 = arith.constant 7 : index
    %111 = vector.load %arg1[%c0_187, %c1_188, %c0_189, %c7_190] : memref<1x4x32x50xbf16, #tpu.memory_space<vmem>>, vector<1x1x32x36xbf16>
    %112 = vector.shape_cast %111 : vector<1x1x32x36xbf16> to vector<32x36xbf16>
    %c384_191 = arith.constant 384 : index
    %c36_192 = arith.constant 36 : index
    %113 = vector.load %arg6[%c384_191, %c36_192] : memref<800x144xbf16, #tpu.memory_space<vmem>>, vector<32x36xbf16>
    tpu.vector_store %arg6[%c384_191, %c36_192], %112 {strides = array<i32>} : memref<800x144xbf16, #tpu.memory_space<vmem>>, vector<32x36xbf16>,
    %c0_193 = arith.constant 0 : index
    %c0_194 = arith.constant 0 : index
    %c0_195 = arith.constant 0 : index
    %c8_196 = arith.constant 8 : index
    %114 = vector.load %arg1[%c0_193, %c0_194, %c0_195, %c8_196] : memref<1x4x32x50xbf16, #tpu.memory_space<vmem>>, vector<1x1x32x36xbf16>
    %115 = vector.shape_cast %114 : vector<1x1x32x36xbf16> to vector<32x36xbf16>
    %c416_197 = arith.constant 416 : index
    %c36_198 = arith.constant 36 : index
    %116 = vector.load %arg6[%c416_197, %c36_198] : memref<800x144xbf16, #tpu.memory_space<vmem>>, vector<32x36xbf16>
    tpu.vector_store %arg6[%c416_197, %c36_198], %115 {strides = array<i32>} : memref<800x144xbf16, #tpu.memory_space<vmem>>, vector<32x36xbf16>,
    %c0_199 = arith.constant 0 : index
    %c1_200 = arith.constant 1 : index
    %c0_201 = arith.constant 0 : index
    %c8_202 = arith.constant 8 : index
    %117 = vector.load %arg1[%c0_199, %c1_200, %c0_201, %c8_202] : memref<1x4x32x50xbf16, #tpu.memory_space<vmem>>, vector<1x1x32x36xbf16>
    %118 = vector.shape_cast %117 : vector<1x1x32x36xbf16> to vector<32x36xbf16>
    %c448_203 = arith.constant 448 : index
    %c36_204 = arith.constant 36 : index
    %119 = vector.load %arg6[%c448_203, %c36_204] : memref<800x144xbf16, #tpu.memory_space<vmem>>, vector<32x36xbf16>
    tpu.vector_store %arg6[%c448_203, %c36_204], %118 {strides = array<i32>} : memref<800x144xbf16, #tpu.memory_space<vmem>>, vector<32x36xbf16>,
    %c0_205 = arith.constant 0 : index
    %c3_206 = arith.constant 3 : index
    %c0_207 = arith.constant 0 : index
    %c6_208 = arith.constant 6 : index
    %120 = vector.load %arg1[%c0_205, %c3_206, %c0_207, %c6_208] : memref<1x4x32x50xbf16, #tpu.memory_space<vmem>>, vector<1x1x32x36xbf16>
    %121 = vector.shape_cast %120 : vector<1x1x32x36xbf16> to vector<32x36xbf16>
    %c480_209 = arith.constant 480 : index
    %c36_210 = arith.constant 36 : index
    %122 = vector.load %arg6[%c480_209, %c36_210] : memref<800x144xbf16, #tpu.memory_space<vmem>>, vector<32x36xbf16>
    tpu.vector_store %arg6[%c480_209, %c36_210], %121 {strides = array<i32>} : memref<800x144xbf16, #tpu.memory_space<vmem>>, vector<32x36xbf16>,
    %c0_211 = arith.constant 0 : index
    %c2_212 = arith.constant 2 : index
    %c0_213 = arith.constant 0 : index
    %c7_214 = arith.constant 7 : index
    %123 = vector.load %arg1[%c0_211, %c2_212, %c0_213, %c7_214] : memref<1x4x32x50xbf16, #tpu.memory_space<vmem>>, vector<1x1x32x36xbf16>
    %124 = vector.shape_cast %123 : vector<1x1x32x36xbf16> to vector<32x36xbf16>
    %c512_215 = arith.constant 512 : index
    %c36_216 = arith.constant 36 : index
    %125 = vector.load %arg6[%c512_215, %c36_216] : memref<800x144xbf16, #tpu.memory_space<vmem>>, vector<32x36xbf16>
    tpu.vector_store %arg6[%c512_215, %c36_216], %124 {strides = array<i32>} : memref<800x144xbf16, #tpu.memory_space<vmem>>, vector<32x36xbf16>,
    %c0_217 = arith.constant 0 : index
    %c3_218 = arith.constant 3 : index
    %c0_219 = arith.constant 0 : index
    %c7_220 = arith.constant 7 : index
    %126 = vector.load %arg1[%c0_217, %c3_218, %c0_219, %c7_220] : memref<1x4x32x50xbf16, #tpu.memory_space<vmem>>, vector<1x1x32x36xbf16>
    %127 = vector.shape_cast %126 : vector<1x1x32x36xbf16> to vector<32x36xbf16>
    %c544_221 = arith.constant 544 : index
    %c36_222 = arith.constant 36 : index
    %128 = vector.load %arg6[%c544_221, %c36_222] : memref<800x144xbf16, #tpu.memory_space<vmem>>, vector<32x36xbf16>
    tpu.vector_store %arg6[%c544_221, %c36_222], %127 {strides = array<i32>} : memref<800x144xbf16, #tpu.memory_space<vmem>>, vector<32x36xbf16>,
    %c0_223 = arith.constant 0 : index
    %c2_224 = arith.constant 2 : index
    %c0_225 = arith.constant 0 : index
    %c8_226 = arith.constant 8 : index
    %129 = vector.load %arg1[%c0_223, %c2_224, %c0_225, %c8_226] : memref<1x4x32x50xbf16, #tpu.memory_space<vmem>>, vector<1x1x32x36xbf16>
    %130 = vector.shape_cast %129 : vector<1x1x32x36xbf16> to vector<32x36xbf16>
    %c576_227 = arith.constant 576 : index
    %c36_228 = arith.constant 36 : index
    %131 = vector.load %arg6[%c576_227, %c36_228] : memref<800x144xbf16, #tpu.memory_space<vmem>>, vector<32x36xbf16>
    tpu.vector_store %arg6[%c576_227, %c36_228], %130 {strides = array<i32>} : memref<800x144xbf16, #tpu.memory_space<vmem>>, vector<32x36xbf16>,
    %c0_229 = arith.constant 0 : index
    %c3_230 = arith.constant 3 : index
    %c0_231 = arith.constant 0 : index
    %c8_232 = arith.constant 8 : index
    %132 = vector.load %arg1[%c0_229, %c3_230, %c0_231, %c8_232] : memref<1x4x32x50xbf16, #tpu.memory_space<vmem>>, vector<1x1x32x36xbf16>
    %133 = vector.shape_cast %132 : vector<1x1x32x36xbf16> to vector<32x36xbf16>
    %c608_233 = arith.constant 608 : index
    %c36_234 = arith.constant 36 : index
    %134 = vector.load %arg6[%c608_233, %c36_234] : memref<800x144xbf16, #tpu.memory_space<vmem>>, vector<32x36xbf16>
    tpu.vector_store %arg6[%c608_233, %c36_234], %133 {strides = array<i32>} : memref<800x144xbf16, #tpu.memory_space<vmem>>, vector<32x36xbf16>,
    %c0_235 = arith.constant 0 : index
    %c1_236 = arith.constant 1 : index
    %c0_237 = arith.constant 0 : index
    %c12_238 = arith.constant 12 : index
    %135 = vector.load %arg1[%c0_235, %c1_236, %c0_237, %c12_238] : memref<1x4x32x50xbf16, #tpu.memory_space<vmem>>, vector<1x1x32x36xbf16>
    %136 = vector.shape_cast %135 : vector<1x1x32x36xbf16> to vector<32x36xbf16>
    %c640_239 = arith.constant 640 : index
    %c36_240 = arith.constant 36 : index
    %137 = vector.load %arg6[%c640_239, %c36_240] : memref<800x144xbf16, #tpu.memory_space<vmem>>, vector<32x36xbf16>
    tpu.vector_store %arg6[%c640_239, %c36_240], %136 {strides = array<i32>} : memref<800x144xbf16, #tpu.memory_space<vmem>>, vector<32x36xbf16>,
    %c0_241 = arith.constant 0 : index
    %c0_242 = arith.constant 0 : index
    %c0_243 = arith.constant 0 : index
    %c13_244 = arith.constant 13 : index
    %138 = vector.load %arg1[%c0_241, %c0_242, %c0_243, %c13_244] : memref<1x4x32x50xbf16, #tpu.memory_space<vmem>>, vector<1x1x32x36xbf16>
    %139 = vector.shape_cast %138 : vector<1x1x32x36xbf16> to vector<32x36xbf16>
    %c672_245 = arith.constant 672 : index
    %c36_246 = arith.constant 36 : index
    %140 = vector.load %arg6[%c672_245, %c36_246] : memref<800x144xbf16, #tpu.memory_space<vmem>>, vector<32x36xbf16>
    tpu.vector_store %arg6[%c672_245, %c36_246], %139 {strides = array<i32>} : memref<800x144xbf16, #tpu.memory_space<vmem>>, vector<32x36xbf16>,
    %c0_247 = arith.constant 0 : index
    %c1_248 = arith.constant 1 : index
    %c0_249 = arith.constant 0 : index
    %c13_250 = arith.constant 13 : index
    %141 = vector.load %arg1[%c0_247, %c1_248, %c0_249, %c13_250] : memref<1x4x32x50xbf16, #tpu.memory_space<vmem>>, vector<1x1x32x36xbf16>
    %142 = vector.shape_cast %141 : vector<1x1x32x36xbf16> to vector<32x36xbf16>
    %c704_251 = arith.constant 704 : index
    %c36_252 = arith.constant 36 : index
    %143 = vector.load %arg6[%c704_251, %c36_252] : memref<800x144xbf16, #tpu.memory_space<vmem>>, vector<32x36xbf16>
    tpu.vector_store %arg6[%c704_251, %c36_252], %142 {strides = array<i32>} : memref<800x144xbf16, #tpu.memory_space<vmem>>, vector<32x36xbf16>,
    %c0_253 = arith.constant 0 : index
    %c0_254 = arith.constant 0 : index
    %c0_255 = arith.constant 0 : index
    %c14_256 = arith.constant 14 : index
    %144 = vector.load %arg1[%c0_253, %c0_254, %c0_255, %c14_256] : memref<1x4x32x50xbf16, #tpu.memory_space<vmem>>, vector<1x1x32x36xbf16>
    %145 = vector.shape_cast %144 : vector<1x1x32x36xbf16> to vector<32x36xbf16>
    %c736_257 = arith.constant 736 : index
    %c36_258 = arith.constant 36 : index
    %146 = vector.load %arg6[%c736_257, %c36_258] : memref<800x144xbf16, #tpu.memory_space<vmem>>, vector<32x36xbf16>
    tpu.vector_store %arg6[%c736_257, %c36_258], %145 {strides = array<i32>} : memref<800x144xbf16, #tpu.memory_space<vmem>>, vector<32x36xbf16>,
    %c0_259 = arith.constant 0 : index
    %c1_260 = arith.constant 1 : index
    %c0_261 = arith.constant 0 : index
    %c14_262 = arith.constant 14 : index
    %147 = vector.load %arg1[%c0_259, %c1_260, %c0_261, %c14_262] : memref<1x4x32x50xbf16, #tpu.memory_space<vmem>>, vector<1x1x32x36xbf16>
    %148 = vector.shape_cast %147 : vector<1x1x32x36xbf16> to vector<32x36xbf16>
    %c768_263 = arith.constant 768 : index
    %c36_264 = arith.constant 36 : index
    %149 = vector.load %arg6[%c768_263, %c36_264] : memref<800x144xbf16, #tpu.memory_space<vmem>>, vector<32x36xbf16>
    tpu.vector_store %arg6[%c768_263, %c36_264], %148 {strides = array<i32>} : memref<800x144xbf16, #tpu.memory_space<vmem>>, vector<32x36xbf16>,
    %c0_265 = arith.constant 0 : index
    %c2_266 = arith.constant 2 : index
    %c0_267 = arith.constant 0 : index
    %c0_268 = arith.constant 0 : index
    %150 = vector.load %arg1[%c0_265, %c2_266, %c0_267, %c0_268] : memref<1x4x32x50xbf16, #tpu.memory_space<vmem>>, vector<1x1x32x36xbf16>
    %151 = vector.shape_cast %150 : vector<1x1x32x36xbf16> to vector<32x36xbf16>
    %c0_269 = arith.constant 0 : index
    %c72 = arith.constant 72 : index
    %152 = vector.load %arg6[%c0_269, %c72] : memref<800x144xbf16, #tpu.memory_space<vmem>>, vector<32x36xbf16>
    tpu.vector_store %arg6[%c0_269, %c72], %151 {strides = array<i32>} : memref<800x144xbf16, #tpu.memory_space<vmem>>, vector<32x36xbf16>,
    %c0_270 = arith.constant 0 : index
    %c3_271 = arith.constant 3 : index
    %c0_272 = arith.constant 0 : index
    %c0_273 = arith.constant 0 : index
    %153 = vector.load %arg1[%c0_270, %c3_271, %c0_272, %c0_273] : memref<1x4x32x50xbf16, #tpu.memory_space<vmem>>, vector<1x1x32x36xbf16>
    %154 = vector.shape_cast %153 : vector<1x1x32x36xbf16> to vector<32x36xbf16>
    %c32_274 = arith.constant 32 : index
    %c72_275 = arith.constant 72 : index
    %155 = vector.load %arg6[%c32_274, %c72_275] : memref<800x144xbf16, #tpu.memory_space<vmem>>, vector<32x36xbf16>
    tpu.vector_store %arg6[%c32_274, %c72_275], %154 {strides = array<i32>} : memref<800x144xbf16, #tpu.memory_space<vmem>>, vector<32x36xbf16>,
    %c0_276 = arith.constant 0 : index
    %c2_277 = arith.constant 2 : index
    %c0_278 = arith.constant 0 : index
    %c1_279 = arith.constant 1 : index
    %156 = vector.load %arg1[%c0_276, %c2_277, %c0_278, %c1_279] : memref<1x4x32x50xbf16, #tpu.memory_space<vmem>>, vector<1x1x32x36xbf16>
    %157 = vector.shape_cast %156 : vector<1x1x32x36xbf16> to vector<32x36xbf16>
    %c64_280 = arith.constant 64 : index
    %c72_281 = arith.constant 72 : index
    %158 = vector.load %arg6[%c64_280, %c72_281] : memref<800x144xbf16, #tpu.memory_space<vmem>>, vector<32x36xbf16>
    tpu.vector_store %arg6[%c64_280, %c72_281], %157 {strides = array<i32>} : memref<800x144xbf16, #tpu.memory_space<vmem>>, vector<32x36xbf16>,
    %c0_282 = arith.constant 0 : index
    %c3_283 = arith.constant 3 : index
    %c0_284 = arith.constant 0 : index
    %c1_285 = arith.constant 1 : index
    %159 = vector.load %arg1[%c0_282, %c3_283, %c0_284, %c1_285] : memref<1x4x32x50xbf16, #tpu.memory_space<vmem>>, vector<1x1x32x36xbf16>
    %160 = vector.shape_cast %159 : vector<1x1x32x36xbf16> to vector<32x36xbf16>
    %c96_286 = arith.constant 96 : index
    %c72_287 = arith.constant 72 : index
    %161 = vector.load %arg6[%c96_286, %c72_287] : memref<800x144xbf16, #tpu.memory_space<vmem>>, vector<32x36xbf16>
    tpu.vector_store %arg6[%c96_286, %c72_287], %160 {strides = array<i32>} : memref<800x144xbf16, #tpu.memory_space<vmem>>, vector<32x36xbf16>,
    %c0_288 = arith.constant 0 : index
    %c2_289 = arith.constant 2 : index
    %c0_290 = arith.constant 0 : index
    %c2_291 = arith.constant 2 : index
    %162 = vector.load %arg1[%c0_288, %c2_289, %c0_290, %c2_291] : memref<1x4x32x50xbf16, #tpu.memory_space<vmem>>, vector<1x1x32x36xbf16>
    %163 = vector.shape_cast %162 : vector<1x1x32x36xbf16> to vector<32x36xbf16>
    %c128_292 = arith.constant 128 : index
    %c72_293 = arith.constant 72 : index
    %164 = vector.load %arg6[%c128_292, %c72_293] : memref<800x144xbf16, #tpu.memory_space<vmem>>, vector<32x36xbf16>
    tpu.vector_store %arg6[%c128_292, %c72_293], %163 {strides = array<i32>} : memref<800x144xbf16, #tpu.memory_space<vmem>>, vector<32x36xbf16>,
    %c0_294 = arith.constant 0 : index
    %c0_295 = arith.constant 0 : index
    %c0_296 = arith.constant 0 : index
    %c6_297 = arith.constant 6 : index
    %165 = vector.load %arg1[%c0_294, %c0_295, %c0_296, %c6_297] : memref<1x4x32x50xbf16, #tpu.memory_space<vmem>>, vector<1x1x32x36xbf16>
    %166 = vector.shape_cast %165 : vector<1x1x32x36xbf16> to vector<32x36xbf16>
    %c160_298 = arith.constant 160 : index
    %c72_299 = arith.constant 72 : index
    %167 = vector.load %arg6[%c160_298, %c72_299] : memref<800x144xbf16, #tpu.memory_space<vmem>>, vector<32x36xbf16>
    tpu.vector_store %arg6[%c160_298, %c72_299], %166 {strides = array<i32>} : memref<800x144xbf16, #tpu.memory_space<vmem>>, vector<32x36xbf16>,
    %c0_300 = arith.constant 0 : index
    %c1_301 = arith.constant 1 : index
    %c0_302 = arith.constant 0 : index
    %c6_303 = arith.constant 6 : index
    %168 = vector.load %arg1[%c0_300, %c1_301, %c0_302, %c6_303] : memref<1x4x32x50xbf16, #tpu.memory_space<vmem>>, vector<1x1x32x36xbf16>
    %169 = vector.shape_cast %168 : vector<1x1x32x36xbf16> to vector<32x36xbf16>
    %c192_304 = arith.constant 192 : index
    %c72_305 = arith.constant 72 : index
    %170 = vector.load %arg6[%c192_304, %c72_305] : memref<800x144xbf16, #tpu.memory_space<vmem>>, vector<32x36xbf16>
    tpu.vector_store %arg6[%c192_304, %c72_305], %169 {strides = array<i32>} : memref<800x144xbf16, #tpu.memory_space<vmem>>, vector<32x36xbf16>,
    %c0_306 = arith.constant 0 : index
    %c0_307 = arith.constant 0 : index
    %c0_308 = arith.constant 0 : index
    %c7_309 = arith.constant 7 : index
    %171 = vector.load %arg1[%c0_306, %c0_307, %c0_308, %c7_309] : memref<1x4x32x50xbf16, #tpu.memory_space<vmem>>, vector<1x1x32x36xbf16>
    %172 = vector.shape_cast %171 : vector<1x1x32x36xbf16> to vector<32x36xbf16>
    %c224_310 = arith.constant 224 : index
    %c72_311 = arith.constant 72 : index
    %173 = vector.load %arg6[%c224_310, %c72_311] : memref<800x144xbf16, #tpu.memory_space<vmem>>, vector<32x36xbf16>
    tpu.vector_store %arg6[%c224_310, %c72_311], %172 {strides = array<i32>} : memref<800x144xbf16, #tpu.memory_space<vmem>>, vector<32x36xbf16>,
    %c0_312 = arith.constant 0 : index
    %c1_313 = arith.constant 1 : index
    %c0_314 = arith.constant 0 : index
    %c7_315 = arith.constant 7 : index
    %174 = vector.load %arg1[%c0_312, %c1_313, %c0_314, %c7_315] : memref<1x4x32x50xbf16, #tpu.memory_space<vmem>>, vector<1x1x32x36xbf16>
    %175 = vector.shape_cast %174 : vector<1x1x32x36xbf16> to vector<32x36xbf16>
    %c256_316 = arith.constant 256 : index
    %c72_317 = arith.constant 72 : index
    %176 = vector.load %arg6[%c256_316, %c72_317] : memref<800x144xbf16, #tpu.memory_space<vmem>>, vector<32x36xbf16>
    tpu.vector_store %arg6[%c256_316, %c72_317], %175 {strides = array<i32>} : memref<800x144xbf16, #tpu.memory_space<vmem>>, vector<32x36xbf16>,
    %c0_318 = arith.constant 0 : index
    %c0_319 = arith.constant 0 : index
    %c0_320 = arith.constant 0 : index
    %c8_321 = arith.constant 8 : index
    %177 = vector.load %arg1[%c0_318, %c0_319, %c0_320, %c8_321] : memref<1x4x32x50xbf16, #tpu.memory_space<vmem>>, vector<1x1x32x36xbf16>
    %178 = vector.shape_cast %177 : vector<1x1x32x36xbf16> to vector<32x36xbf16>
    %c288_322 = arith.constant 288 : index
    %c72_323 = arith.constant 72 : index
    %179 = vector.load %arg6[%c288_322, %c72_323] : memref<800x144xbf16, #tpu.memory_space<vmem>>, vector<32x36xbf16>
    tpu.vector_store %arg6[%c288_322, %c72_323], %178 {strides = array<i32>} : memref<800x144xbf16, #tpu.memory_space<vmem>>, vector<32x36xbf16>,
    %c0_324 = arith.constant 0 : index
    %c2_325 = arith.constant 2 : index
    %c0_326 = arith.constant 0 : index
    %c6_327 = arith.constant 6 : index
    %180 = vector.load %arg1[%c0_324, %c2_325, %c0_326, %c6_327] : memref<1x4x32x50xbf16, #tpu.memory_space<vmem>>, vector<1x1x32x36xbf16>
    %181 = vector.shape_cast %180 : vector<1x1x32x36xbf16> to vector<32x36xbf16>
    %c320_328 = arith.constant 320 : index
    %c72_329 = arith.constant 72 : index
    %182 = vector.load %arg6[%c320_328, %c72_329] : memref<800x144xbf16, #tpu.memory_space<vmem>>, vector<32x36xbf16>
    tpu.vector_store %arg6[%c320_328, %c72_329], %181 {strides = array<i32>} : memref<800x144xbf16, #tpu.memory_space<vmem>>, vector<32x36xbf16>,
    %c0_330 = arith.constant 0 : index
    %c3_331 = arith.constant 3 : index
    %c0_332 = arith.constant 0 : index
    %c6_333 = arith.constant 6 : index
    %183 = vector.load %arg1[%c0_330, %c3_331, %c0_332, %c6_333] : memref<1x4x32x50xbf16, #tpu.memory_space<vmem>>, vector<1x1x32x36xbf16>
    %184 = vector.shape_cast %183 : vector<1x1x32x36xbf16> to vector<32x36xbf16>
    %c352_334 = arith.constant 352 : index
    %c72_335 = arith.constant 72 : index
    %185 = vector.load %arg6[%c352_334, %c72_335] : memref<800x144xbf16, #tpu.memory_space<vmem>>, vector<32x36xbf16>
    tpu.vector_store %arg6[%c352_334, %c72_335], %184 {strides = array<i32>} : memref<800x144xbf16, #tpu.memory_space<vmem>>, vector<32x36xbf16>,
    %c0_336 = arith.constant 0 : index
    %c2_337 = arith.constant 2 : index
    %c0_338 = arith.constant 0 : index
    %c7_339 = arith.constant 7 : index
    %186 = vector.load %arg1[%c0_336, %c2_337, %c0_338, %c7_339] : memref<1x4x32x50xbf16, #tpu.memory_space<vmem>>, vector<1x1x32x36xbf16>
    %187 = vector.shape_cast %186 : vector<1x1x32x36xbf16> to vector<32x36xbf16>
    %c384_340 = arith.constant 384 : index
    %c72_341 = arith.constant 72 : index
    %188 = vector.load %arg6[%c384_340, %c72_341] : memref<800x144xbf16, #tpu.memory_space<vmem>>, vector<32x36xbf16>
    tpu.vector_store %arg6[%c384_340, %c72_341], %187 {strides = array<i32>} : memref<800x144xbf16, #tpu.memory_space<vmem>>, vector<32x36xbf16>,
    %c0_342 = arith.constant 0 : index
    %c3_343 = arith.constant 3 : index
    %c0_344 = arith.constant 0 : index
    %c7_345 = arith.constant 7 : index
    %189 = vector.load %arg1[%c0_342, %c3_343, %c0_344, %c7_345] : memref<1x4x32x50xbf16, #tpu.memory_space<vmem>>, vector<1x1x32x36xbf16>
    %190 = vector.shape_cast %189 : vector<1x1x32x36xbf16> to vector<32x36xbf16>
    %c416_346 = arith.constant 416 : index
    %c72_347 = arith.constant 72 : index
    %191 = vector.load %arg6[%c416_346, %c72_347] : memref<800x144xbf16, #tpu.memory_space<vmem>>, vector<32x36xbf16>
    tpu.vector_store %arg6[%c416_346, %c72_347], %190 {strides = array<i32>} : memref<800x144xbf16, #tpu.memory_space<vmem>>, vector<32x36xbf16>,
    %c0_348 = arith.constant 0 : index
    %c2_349 = arith.constant 2 : index
    %c0_350 = arith.constant 0 : index
    %c8_351 = arith.constant 8 : index
    %192 = vector.load %arg1[%c0_348, %c2_349, %c0_350, %c8_351] : memref<1x4x32x50xbf16, #tpu.memory_space<vmem>>, vector<1x1x32x36xbf16>
    %193 = vector.shape_cast %192 : vector<1x1x32x36xbf16> to vector<32x36xbf16>
    %c448_352 = arith.constant 448 : index
    %c72_353 = arith.constant 72 : index
    %194 = vector.load %arg6[%c448_352, %c72_353] : memref<800x144xbf16, #tpu.memory_space<vmem>>, vector<32x36xbf16>
    tpu.vector_store %arg6[%c448_352, %c72_353], %193 {strides = array<i32>} : memref<800x144xbf16, #tpu.memory_space<vmem>>, vector<32x36xbf16>,
    %c0_354 = arith.constant 0 : index
    %c0_355 = arith.constant 0 : index
    %c0_356 = arith.constant 0 : index
    %c12_357 = arith.constant 12 : index
    %195 = vector.load %arg1[%c0_354, %c0_355, %c0_356, %c12_357] : memref<1x4x32x50xbf16, #tpu.memory_space<vmem>>, vector<1x1x32x36xbf16>
    %196 = vector.shape_cast %195 : vector<1x1x32x36xbf16> to vector<32x36xbf16>
    %c480_358 = arith.constant 480 : index
    %c72_359 = arith.constant 72 : index
    %197 = vector.load %arg6[%c480_358, %c72_359] : memref<800x144xbf16, #tpu.memory_space<vmem>>, vector<32x36xbf16>
    tpu.vector_store %arg6[%c480_358, %c72_359], %196 {strides = array<i32>} : memref<800x144xbf16, #tpu.memory_space<vmem>>, vector<32x36xbf16>,
    %c0_360 = arith.constant 0 : index
    %c1_361 = arith.constant 1 : index
    %c0_362 = arith.constant 0 : index
    %c12_363 = arith.constant 12 : index
    %198 = vector.load %arg1[%c0_360, %c1_361, %c0_362, %c12_363] : memref<1x4x32x50xbf16, #tpu.memory_space<vmem>>, vector<1x1x32x36xbf16>
    %199 = vector.shape_cast %198 : vector<1x1x32x36xbf16> to vector<32x36xbf16>
    %c512_364 = arith.constant 512 : index
    %c72_365 = arith.constant 72 : index
    %200 = vector.load %arg6[%c512_364, %c72_365] : memref<800x144xbf16, #tpu.memory_space<vmem>>, vector<32x36xbf16>
    tpu.vector_store %arg6[%c512_364, %c72_365], %199 {strides = array<i32>} : memref<800x144xbf16, #tpu.memory_space<vmem>>, vector<32x36xbf16>,
    %c0_366 = arith.constant 0 : index
    %c0_367 = arith.constant 0 : index
    %c0_368 = arith.constant 0 : index
    %c13_369 = arith.constant 13 : index
    %201 = vector.load %arg1[%c0_366, %c0_367, %c0_368, %c13_369] : memref<1x4x32x50xbf16, #tpu.memory_space<vmem>>, vector<1x1x32x36xbf16>
    %202 = vector.shape_cast %201 : vector<1x1x32x36xbf16> to vector<32x36xbf16>
    %c544_370 = arith.constant 544 : index
    %c72_371 = arith.constant 72 : index
    %203 = vector.load %arg6[%c544_370, %c72_371] : memref<800x144xbf16, #tpu.memory_space<vmem>>, vector<32x36xbf16>
    tpu.vector_store %arg6[%c544_370, %c72_371], %202 {strides = array<i32>} : memref<800x144xbf16, #tpu.memory_space<vmem>>, vector<32x36xbf16>,
    %c0_372 = arith.constant 0 : index
    %c1_373 = arith.constant 1 : index
    %c0_374 = arith.constant 0 : index
    %c13_375 = arith.constant 13 : index
    %204 = vector.load %arg1[%c0_372, %c1_373, %c0_374, %c13_375] : memref<1x4x32x50xbf16, #tpu.memory_space<vmem>>, vector<1x1x32x36xbf16>
    %205 = vector.shape_cast %204 : vector<1x1x32x36xbf16> to vector<32x36xbf16>
    %c576_376 = arith.constant 576 : index
    %c72_377 = arith.constant 72 : index
    %206 = vector.load %arg6[%c576_376, %c72_377] : memref<800x144xbf16, #tpu.memory_space<vmem>>, vector<32x36xbf16>
    tpu.vector_store %arg6[%c576_376, %c72_377], %205 {strides = array<i32>} : memref<800x144xbf16, #tpu.memory_space<vmem>>, vector<32x36xbf16>,
    %c0_378 = arith.constant 0 : index
    %c0_379 = arith.constant 0 : index
    %c0_380 = arith.constant 0 : index
    %c14_381 = arith.constant 14 : index
    %207 = vector.load %arg1[%c0_378, %c0_379, %c0_380, %c14_381] : memref<1x4x32x50xbf16, #tpu.memory_space<vmem>>, vector<1x1x32x36xbf16>
    %208 = vector.shape_cast %207 : vector<1x1x32x36xbf16> to vector<32x36xbf16>
    %c608_382 = arith.constant 608 : index
    %c72_383 = arith.constant 72 : index
    %209 = vector.load %arg6[%c608_382, %c72_383] : memref<800x144xbf16, #tpu.memory_space<vmem>>, vector<32x36xbf16>
    tpu.vector_store %arg6[%c608_382, %c72_383], %208 {strides = array<i32>} : memref<800x144xbf16, #tpu.memory_space<vmem>>, vector<32x36xbf16>,
    %c0_384 = arith.constant 0 : index
    %c2_385 = arith.constant 2 : index
    %c0_386 = arith.constant 0 : index
    %c12_387 = arith.constant 12 : index
    %210 = vector.load %arg1[%c0_384, %c2_385, %c0_386, %c12_387] : memref<1x4x32x50xbf16, #tpu.memory_space<vmem>>, vector<1x1x32x36xbf16>
    %211 = vector.shape_cast %210 : vector<1x1x32x36xbf16> to vector<32x36xbf16>
    %c640_388 = arith.constant 640 : index
    %c72_389 = arith.constant 72 : index
    %212 = vector.load %arg6[%c640_388, %c72_389] : memref<800x144xbf16, #tpu.memory_space<vmem>>, vector<32x36xbf16>
    tpu.vector_store %arg6[%c640_388, %c72_389], %211 {strides = array<i32>} : memref<800x144xbf16, #tpu.memory_space<vmem>>, vector<32x36xbf16>,
    %c0_390 = arith.constant 0 : index
    %c3_391 = arith.constant 3 : index
    %c0_392 = arith.constant 0 : index
    %c12_393 = arith.constant 12 : index
    %213 = vector.load %arg1[%c0_390, %c3_391, %c0_392, %c12_393] : memref<1x4x32x50xbf16, #tpu.memory_space<vmem>>, vector<1x1x32x36xbf16>
    %214 = vector.shape_cast %213 : vector<1x1x32x36xbf16> to vector<32x36xbf16>
    %c672_394 = arith.constant 672 : index
    %c72_395 = arith.constant 72 : index
    %215 = vector.load %arg6[%c672_394, %c72_395] : memref<800x144xbf16, #tpu.memory_space<vmem>>, vector<32x36xbf16>
    tpu.vector_store %arg6[%c672_394, %c72_395], %214 {strides = array<i32>} : memref<800x144xbf16, #tpu.memory_space<vmem>>, vector<32x36xbf16>,
    %c0_396 = arith.constant 0 : index
    %c2_397 = arith.constant 2 : index
    %c0_398 = arith.constant 0 : index
    %c13_399 = arith.constant 13 : index
    %216 = vector.load %arg1[%c0_396, %c2_397, %c0_398, %c13_399] : memref<1x4x32x50xbf16, #tpu.memory_space<vmem>>, vector<1x1x32x36xbf16>
    %217 = vector.shape_cast %216 : vector<1x1x32x36xbf16> to vector<32x36xbf16>
    %c704_400 = arith.constant 704 : index
    %c72_401 = arith.constant 72 : index
    %218 = vector.load %arg6[%c704_400, %c72_401] : memref<800x144xbf16, #tpu.memory_space<vmem>>, vector<32x36xbf16>
    tpu.vector_store %arg6[%c704_400, %c72_401], %217 {strides = array<i32>} : memref<800x144xbf16, #tpu.memory_space<vmem>>, vector<32x36xbf16>,
    %c0_402 = arith.constant 0 : index
    %c3_403 = arith.constant 3 : index
    %c0_404 = arith.constant 0 : index
    %c13_405 = arith.constant 13 : index
    %219 = vector.load %arg1[%c0_402, %c3_403, %c0_404, %c13_405] : memref<1x4x32x50xbf16, #tpu.memory_space<vmem>>, vector<1x1x32x36xbf16>
    %220 = vector.shape_cast %219 : vector<1x1x32x36xbf16> to vector<32x36xbf16>
    %c736_406 = arith.constant 736 : index
    %c72_407 = arith.constant 72 : index
    %221 = vector.load %arg6[%c736_406, %c72_407] : memref<800x144xbf16, #tpu.memory_space<vmem>>, vector<32x36xbf16>
    tpu.vector_store %arg6[%c736_406, %c72_407], %220 {strides = array<i32>} : memref<800x144xbf16, #tpu.memory_space<vmem>>, vector<32x36xbf16>,
    %c0_408 = arith.constant 0 : index
    %c2_409 = arith.constant 2 : index
    %c0_410 = arith.constant 0 : index
    %c14_411 = arith.constant 14 : index
    %222 = vector.load %arg1[%c0_408, %c2_409, %c0_410, %c14_411] : memref<1x4x32x50xbf16, #tpu.memory_space<vmem>>, vector<1x1x32x36xbf16>
    %223 = vector.shape_cast %222 : vector<1x1x32x36xbf16> to vector<32x36xbf16>
    %c768_412 = arith.constant 768 : index
    %c72_413 = arith.constant 72 : index
    %224 = vector.load %arg6[%c768_412, %c72_413] : memref<800x144xbf16, #tpu.memory_space<vmem>>, vector<32x36xbf16>
    tpu.vector_store %arg6[%c768_412, %c72_413], %223 {strides = array<i32>} : memref<800x144xbf16, #tpu.memory_space<vmem>>, vector<32x36xbf16>,
    %c0_414 = arith.constant 0 : index
    %c3_415 = arith.constant 3 : index
    %c0_416 = arith.constant 0 : index
    %c0_417 = arith.constant 0 : index
    %225 = vector.load %arg1[%c0_414, %c3_415, %c0_416, %c0_417] : memref<1x4x32x50xbf16, #tpu.memory_space<vmem>>, vector<1x1x32x36xbf16>
    %226 = vector.shape_cast %225 : vector<1x1x32x36xbf16> to vector<32x36xbf16>
    %c0_418 = arith.constant 0 : index
    %c108 = arith.constant 108 : index
    %227 = vector.load %arg6[%c0_418, %c108] : memref<800x144xbf16, #tpu.memory_space<vmem>>, vector<32x36xbf16>
    tpu.vector_store %arg6[%c0_418, %c108], %226 {strides = array<i32>} : memref<800x144xbf16, #tpu.memory_space<vmem>>, vector<32x36xbf16>,
    %c0_419 = arith.constant 0 : index
    %c2_420 = arith.constant 2 : index
    %c0_421 = arith.constant 0 : index
    %c1_422 = arith.constant 1 : index
    %228 = vector.load %arg1[%c0_419, %c2_420, %c0_421, %c1_422] : memref<1x4x32x50xbf16, #tpu.memory_space<vmem>>, vector<1x1x32x36xbf16>
    %229 = vector.shape_cast %228 : vector<1x1x32x36xbf16> to vector<32x36xbf16>
    %c32_423 = arith.constant 32 : index
    %c108_424 = arith.constant 108 : index
    %230 = vector.load %arg6[%c32_423, %c108_424] : memref<800x144xbf16, #tpu.memory_space<vmem>>, vector<32x36xbf16>
    tpu.vector_store %arg6[%c32_423, %c108_424], %229 {strides = array<i32>} : memref<800x144xbf16, #tpu.memory_space<vmem>>, vector<32x36xbf16>,
    %c0_425 = arith.constant 0 : index
    %c3_426 = arith.constant 3 : index
    %c0_427 = arith.constant 0 : index
    %c1_428 = arith.constant 1 : index
    %231 = vector.load %arg1[%c0_425, %c3_426, %c0_427, %c1_428] : memref<1x4x32x50xbf16, #tpu.memory_space<vmem>>, vector<1x1x32x36xbf16>
    %232 = vector.shape_cast %231 : vector<1x1x32x36xbf16> to vector<32x36xbf16>
    %c64_429 = arith.constant 64 : index
    %c108_430 = arith.constant 108 : index
    %233 = vector.load %arg6[%c64_429, %c108_430] : memref<800x144xbf16, #tpu.memory_space<vmem>>, vector<32x36xbf16>
    tpu.vector_store %arg6[%c64_429, %c108_430], %232 {strides = array<i32>} : memref<800x144xbf16, #tpu.memory_space<vmem>>, vector<32x36xbf16>,
    %c0_431 = arith.constant 0 : index
    %c2_432 = arith.constant 2 : index
    %c0_433 = arith.constant 0 : index
    %c2_434 = arith.constant 2 : index
    %234 = vector.load %arg1[%c0_431, %c2_432, %c0_433, %c2_434] : memref<1x4x32x50xbf16, #tpu.memory_space<vmem>>, vector<1x1x32x36xbf16>
    %235 = vector.shape_cast %234 : vector<1x1x32x36xbf16> to vector<32x36xbf16>
    %c96_435 = arith.constant 96 : index
    %c108_436 = arith.constant 108 : index
    %236 = vector.load %arg6[%c96_435, %c108_436] : memref<800x144xbf16, #tpu.memory_space<vmem>>, vector<32x36xbf16>
    tpu.vector_store %arg6[%c96_435, %c108_436], %235 {strides = array<i32>} : memref<800x144xbf16, #tpu.memory_space<vmem>>, vector<32x36xbf16>,
    %c0_437 = arith.constant 0 : index
    %c3_438 = arith.constant 3 : index
    %c0_439 = arith.constant 0 : index
    %c2_440 = arith.constant 2 : index
    %237 = vector.load %arg1[%c0_437, %c3_438, %c0_439, %c2_440] : memref<1x4x32x50xbf16, #tpu.memory_space<vmem>>, vector<1x1x32x36xbf16>
    %238 = vector.shape_cast %237 : vector<1x1x32x36xbf16> to vector<32x36xbf16>
    %c128_441 = arith.constant 128 : index
    %c108_442 = arith.constant 108 : index
    %239 = vector.load %arg6[%c128_441, %c108_442] : memref<800x144xbf16, #tpu.memory_space<vmem>>, vector<32x36xbf16>
    tpu.vector_store %arg6[%c128_441, %c108_442], %238 {strides = array<i32>} : memref<800x144xbf16, #tpu.memory_space<vmem>>, vector<32x36xbf16>,
    %c0_443 = arith.constant 0 : index
    %c1_444 = arith.constant 1 : index
    %c0_445 = arith.constant 0 : index
    %c6_446 = arith.constant 6 : index
    %240 = vector.load %arg1[%c0_443, %c1_444, %c0_445, %c6_446] : memref<1x4x32x50xbf16, #tpu.memory_space<vmem>>, vector<1x1x32x36xbf16>
    %241 = vector.shape_cast %240 : vector<1x1x32x36xbf16> to vector<32x36xbf16>
    %c160_447 = arith.constant 160 : index
    %c108_448 = arith.constant 108 : index
    %242 = vector.load %arg6[%c160_447, %c108_448] : memref<800x144xbf16, #tpu.memory_space<vmem>>, vector<32x36xbf16>
    tpu.vector_store %arg6[%c160_447, %c108_448], %241 {strides = array<i32>} : memref<800x144xbf16, #tpu.memory_space<vmem>>, vector<32x36xbf16>,
    %c0_449 = arith.constant 0 : index
    %c0_450 = arith.constant 0 : index
    %c0_451 = arith.constant 0 : index
    %c7_452 = arith.constant 7 : index
    %243 = vector.load %arg1[%c0_449, %c0_450, %c0_451, %c7_452] : memref<1x4x32x50xbf16, #tpu.memory_space<vmem>>, vector<1x1x32x36xbf16>
    %244 = vector.shape_cast %243 : vector<1x1x32x36xbf16> to vector<32x36xbf16>
    %c192_453 = arith.constant 192 : index
    %c108_454 = arith.constant 108 : index
    %245 = vector.load %arg6[%c192_453, %c108_454] : memref<800x144xbf16, #tpu.memory_space<vmem>>, vector<32x36xbf16>
    tpu.vector_store %arg6[%c192_453, %c108_454], %244 {strides = array<i32>} : memref<800x144xbf16, #tpu.memory_space<vmem>>, vector<32x36xbf16>,
    %c0_455 = arith.constant 0 : index
    %c1_456 = arith.constant 1 : index
    %c0_457 = arith.constant 0 : index
    %c7_458 = arith.constant 7 : index
    %246 = vector.load %arg1[%c0_455, %c1_456, %c0_457, %c7_458] : memref<1x4x32x50xbf16, #tpu.memory_space<vmem>>, vector<1x1x32x36xbf16>
    %247 = vector.shape_cast %246 : vector<1x1x32x36xbf16> to vector<32x36xbf16>
    %c224_459 = arith.constant 224 : index
    %c108_460 = arith.constant 108 : index
    %248 = vector.load %arg6[%c224_459, %c108_460] : memref<800x144xbf16, #tpu.memory_space<vmem>>, vector<32x36xbf16>
    tpu.vector_store %arg6[%c224_459, %c108_460], %247 {strides = array<i32>} : memref<800x144xbf16, #tpu.memory_space<vmem>>, vector<32x36xbf16>,
    %c0_461 = arith.constant 0 : index
    %c0_462 = arith.constant 0 : index
    %c0_463 = arith.constant 0 : index
    %c8_464 = arith.constant 8 : index
    %249 = vector.load %arg1[%c0_461, %c0_462, %c0_463, %c8_464] : memref<1x4x32x50xbf16, #tpu.memory_space<vmem>>, vector<1x1x32x36xbf16>
    %250 = vector.shape_cast %249 : vector<1x1x32x36xbf16> to vector<32x36xbf16>
    %c256_465 = arith.constant 256 : index
    %c108_466 = arith.constant 108 : index
    %251 = vector.load %arg6[%c256_465, %c108_466] : memref<800x144xbf16, #tpu.memory_space<vmem>>, vector<32x36xbf16>
    tpu.vector_store %arg6[%c256_465, %c108_466], %250 {strides = array<i32>} : memref<800x144xbf16, #tpu.memory_space<vmem>>, vector<32x36xbf16>,
    %c0_467 = arith.constant 0 : index
    %c1_468 = arith.constant 1 : index
    %c0_469 = arith.constant 0 : index
    %c8_470 = arith.constant 8 : index
    %252 = vector.load %arg1[%c0_467, %c1_468, %c0_469, %c8_470] : memref<1x4x32x50xbf16, #tpu.memory_space<vmem>>, vector<1x1x32x36xbf16>
    %253 = vector.shape_cast %252 : vector<1x1x32x36xbf16> to vector<32x36xbf16>
    %c288_471 = arith.constant 288 : index
    %c108_472 = arith.constant 108 : index
    %254 = vector.load %arg6[%c288_471, %c108_472] : memref<800x144xbf16, #tpu.memory_space<vmem>>, vector<32x36xbf16>
    tpu.vector_store %arg6[%c288_471, %c108_472], %253 {strides = array<i32>} : memref<800x144xbf16, #tpu.memory_space<vmem>>, vector<32x36xbf16>,
    %c0_473 = arith.constant 0 : index
    %c3_474 = arith.constant 3 : index
    %c0_475 = arith.constant 0 : index
    %c6_476 = arith.constant 6 : index
    %255 = vector.load %arg1[%c0_473, %c3_474, %c0_475, %c6_476] : memref<1x4x32x50xbf16, #tpu.memory_space<vmem>>, vector<1x1x32x36xbf16>
    %256 = vector.shape_cast %255 : vector<1x1x32x36xbf16> to vector<32x36xbf16>
    %c320_477 = arith.constant 320 : index
    %c108_478 = arith.constant 108 : index
    %257 = vector.load %arg6[%c320_477, %c108_478] : memref<800x144xbf16, #tpu.memory_space<vmem>>, vector<32x36xbf16>
    tpu.vector_store %arg6[%c320_477, %c108_478], %256 {strides = array<i32>} : memref<800x144xbf16, #tpu.memory_space<vmem>>, vector<32x36xbf16>,
    %c0_479 = arith.constant 0 : index
    %c2_480 = arith.constant 2 : index
    %c0_481 = arith.constant 0 : index
    %c7_482 = arith.constant 7 : index
    %258 = vector.load %arg1[%c0_479, %c2_480, %c0_481, %c7_482] : memref<1x4x32x50xbf16, #tpu.memory_space<vmem>>, vector<1x1x32x36xbf16>
    %259 = vector.shape_cast %258 : vector<1x1x32x36xbf16> to vector<32x36xbf16>
    %c352_483 = arith.constant 352 : index
    %c108_484 = arith.constant 108 : index
    %260 = vector.load %arg6[%c352_483, %c108_484] : memref<800x144xbf16, #tpu.memory_space<vmem>>, vector<32x36xbf16>
    tpu.vector_store %arg6[%c352_483, %c108_484], %259 {strides = array<i32>} : memref<800x144xbf16, #tpu.memory_space<vmem>>, vector<32x36xbf16>,
    %c0_485 = arith.constant 0 : index
    %c3_486 = arith.constant 3 : index
    %c0_487 = arith.constant 0 : index
    %c7_488 = arith.constant 7 : index
    %261 = vector.load %arg1[%c0_485, %c3_486, %c0_487, %c7_488] : memref<1x4x32x50xbf16, #tpu.memory_space<vmem>>, vector<1x1x32x36xbf16>
    %262 = vector.shape_cast %261 : vector<1x1x32x36xbf16> to vector<32x36xbf16>
    %c384_489 = arith.constant 384 : index
    %c108_490 = arith.constant 108 : index
    %263 = vector.load %arg6[%c384_489, %c108_490] : memref<800x144xbf16, #tpu.memory_space<vmem>>, vector<32x36xbf16>
    tpu.vector_store %arg6[%c384_489, %c108_490], %262 {strides = array<i32>} : memref<800x144xbf16, #tpu.memory_space<vmem>>, vector<32x36xbf16>,
    %c0_491 = arith.constant 0 : index
    %c2_492 = arith.constant 2 : index
    %c0_493 = arith.constant 0 : index
    %c8_494 = arith.constant 8 : index
    %264 = vector.load %arg1[%c0_491, %c2_492, %c0_493, %c8_494] : memref<1x4x32x50xbf16, #tpu.memory_space<vmem>>, vector<1x1x32x36xbf16>
    %265 = vector.shape_cast %264 : vector<1x1x32x36xbf16> to vector<32x36xbf16>
    %c416_495 = arith.constant 416 : index
    %c108_496 = arith.constant 108 : index
    %266 = vector.load %arg6[%c416_495, %c108_496] : memref<800x144xbf16, #tpu.memory_space<vmem>>, vector<32x36xbf16>
    tpu.vector_store %arg6[%c416_495, %c108_496], %265 {strides = array<i32>} : memref<800x144xbf16, #tpu.memory_space<vmem>>, vector<32x36xbf16>,
    %c0_497 = arith.constant 0 : index
    %c3_498 = arith.constant 3 : index
    %c0_499 = arith.constant 0 : index
    %c8_500 = arith.constant 8 : index
    %267 = vector.load %arg1[%c0_497, %c3_498, %c0_499, %c8_500] : memref<1x4x32x50xbf16, #tpu.memory_space<vmem>>, vector<1x1x32x36xbf16>
    %268 = vector.shape_cast %267 : vector<1x1x32x36xbf16> to vector<32x36xbf16>
    %c448_501 = arith.constant 448 : index
    %c108_502 = arith.constant 108 : index
    %269 = vector.load %arg6[%c448_501, %c108_502] : memref<800x144xbf16, #tpu.memory_space<vmem>>, vector<32x36xbf16>
    tpu.vector_store %arg6[%c448_501, %c108_502], %268 {strides = array<i32>} : memref<800x144xbf16, #tpu.memory_space<vmem>>, vector<32x36xbf16>,
    %c0_503 = arith.constant 0 : index
    %c1_504 = arith.constant 1 : index
    %c0_505 = arith.constant 0 : index
    %c12_506 = arith.constant 12 : index
    %270 = vector.load %arg1[%c0_503, %c1_504, %c0_505, %c12_506] : memref<1x4x32x50xbf16, #tpu.memory_space<vmem>>, vector<1x1x32x36xbf16>
    %271 = vector.shape_cast %270 : vector<1x1x32x36xbf16> to vector<32x36xbf16>
    %c480_507 = arith.constant 480 : index
    %c108_508 = arith.constant 108 : index
    %272 = vector.load %arg6[%c480_507, %c108_508] : memref<800x144xbf16, #tpu.memory_space<vmem>>, vector<32x36xbf16>
    tpu.vector_store %arg6[%c480_507, %c108_508], %271 {strides = array<i32>} : memref<800x144xbf16, #tpu.memory_space<vmem>>, vector<32x36xbf16>,
    %c0_509 = arith.constant 0 : index
    %c0_510 = arith.constant 0 : index
    %c0_511 = arith.constant 0 : index
    %c13_512 = arith.constant 13 : index
    %273 = vector.load %arg1[%c0_509, %c0_510, %c0_511, %c13_512] : memref<1x4x32x50xbf16, #tpu.memory_space<vmem>>, vector<1x1x32x36xbf16>
    %274 = vector.shape_cast %273 : vector<1x1x32x36xbf16> to vector<32x36xbf16>
    %c512_513 = arith.constant 512 : index
    %c108_514 = arith.constant 108 : index
    %275 = vector.load %arg6[%c512_513, %c108_514] : memref<800x144xbf16, #tpu.memory_space<vmem>>, vector<32x36xbf16>
    tpu.vector_store %arg6[%c512_513, %c108_514], %274 {strides = array<i32>} : memref<800x144xbf16, #tpu.memory_space<vmem>>, vector<32x36xbf16>,
    %c0_515 = arith.constant 0 : index
    %c1_516 = arith.constant 1 : index
    %c0_517 = arith.constant 0 : index
    %c13_518 = arith.constant 13 : index
    %276 = vector.load %arg1[%c0_515, %c1_516, %c0_517, %c13_518] : memref<1x4x32x50xbf16, #tpu.memory_space<vmem>>, vector<1x1x32x36xbf16>
    %277 = vector.shape_cast %276 : vector<1x1x32x36xbf16> to vector<32x36xbf16>
    %c544_519 = arith.constant 544 : index
    %c108_520 = arith.constant 108 : index
    %278 = vector.load %arg6[%c544_519, %c108_520] : memref<800x144xbf16, #tpu.memory_space<vmem>>, vector<32x36xbf16>
    tpu.vector_store %arg6[%c544_519, %c108_520], %277 {strides = array<i32>} : memref<800x144xbf16, #tpu.memory_space<vmem>>, vector<32x36xbf16>,
    %c0_521 = arith.constant 0 : index
    %c0_522 = arith.constant 0 : index
    %c0_523 = arith.constant 0 : index
    %c14_524 = arith.constant 14 : index
    %279 = vector.load %arg1[%c0_521, %c0_522, %c0_523, %c14_524] : memref<1x4x32x50xbf16, #tpu.memory_space<vmem>>, vector<1x1x32x36xbf16>
    %280 = vector.shape_cast %279 : vector<1x1x32x36xbf16> to vector<32x36xbf16>
    %c576_525 = arith.constant 576 : index
    %c108_526 = arith.constant 108 : index
    %281 = vector.load %arg6[%c576_525, %c108_526] : memref<800x144xbf16, #tpu.memory_space<vmem>>, vector<32x36xbf16>
    tpu.vector_store %arg6[%c576_525, %c108_526], %280 {strides = array<i32>} : memref<800x144xbf16, #tpu.memory_space<vmem>>, vector<32x36xbf16>,
    %c0_527 = arith.constant 0 : index
    %c1_528 = arith.constant 1 : index
    %c0_529 = arith.constant 0 : index
    %c14_530 = arith.constant 14 : index
    %282 = vector.load %arg1[%c0_527, %c1_528, %c0_529, %c14_530] : memref<1x4x32x50xbf16, #tpu.memory_space<vmem>>, vector<1x1x32x36xbf16>
    %283 = vector.shape_cast %282 : vector<1x1x32x36xbf16> to vector<32x36xbf16>
    %c608_531 = arith.constant 608 : index
    %c108_532 = arith.constant 108 : index
    %284 = vector.load %arg6[%c608_531, %c108_532] : memref<800x144xbf16, #tpu.memory_space<vmem>>, vector<32x36xbf16>
    tpu.vector_store %arg6[%c608_531, %c108_532], %283 {strides = array<i32>} : memref<800x144xbf16, #tpu.memory_space<vmem>>, vector<32x36xbf16>,
    %c0_533 = arith.constant 0 : index
    %c3_534 = arith.constant 3 : index
    %c0_535 = arith.constant 0 : index
    %c12_536 = arith.constant 12 : index
    %285 = vector.load %arg1[%c0_533, %c3_534, %c0_535, %c12_536] : memref<1x4x32x50xbf16, #tpu.memory_space<vmem>>, vector<1x1x32x36xbf16>
    %286 = vector.shape_cast %285 : vector<1x1x32x36xbf16> to vector<32x36xbf16>
    %c640_537 = arith.constant 640 : index
    %c108_538 = arith.constant 108 : index
    %287 = vector.load %arg6[%c640_537, %c108_538] : memref<800x144xbf16, #tpu.memory_space<vmem>>, vector<32x36xbf16>
    tpu.vector_store %arg6[%c640_537, %c108_538], %286 {strides = array<i32>} : memref<800x144xbf16, #tpu.memory_space<vmem>>, vector<32x36xbf16>,
    %c0_539 = arith.constant 0 : index
    %c2_540 = arith.constant 2 : index
    %c0_541 = arith.constant 0 : index
    %c13_542 = arith.constant 13 : index
    %288 = vector.load %arg1[%c0_539, %c2_540, %c0_541, %c13_542] : memref<1x4x32x50xbf16, #tpu.memory_space<vmem>>, vector<1x1x32x36xbf16>
    %289 = vector.shape_cast %288 : vector<1x1x32x36xbf16> to vector<32x36xbf16>
    %c672_543 = arith.constant 672 : index
    %c108_544 = arith.constant 108 : index
    %290 = vector.load %arg6[%c672_543, %c108_544] : memref<800x144xbf16, #tpu.memory_space<vmem>>, vector<32x36xbf16>
    tpu.vector_store %arg6[%c672_543, %c108_544], %289 {strides = array<i32>} : memref<800x144xbf16, #tpu.memory_space<vmem>>, vector<32x36xbf16>,
    %c0_545 = arith.constant 0 : index
    %c3_546 = arith.constant 3 : index
    %c0_547 = arith.constant 0 : index
    %c13_548 = arith.constant 13 : index
    %291 = vector.load %arg1[%c0_545, %c3_546, %c0_547, %c13_548] : memref<1x4x32x50xbf16, #tpu.memory_space<vmem>>, vector<1x1x32x36xbf16>
    %292 = vector.shape_cast %291 : vector<1x1x32x36xbf16> to vector<32x36xbf16>
    %c704_549 = arith.constant 704 : index
    %c108_550 = arith.constant 108 : index
    %293 = vector.load %arg6[%c704_549, %c108_550] : memref<800x144xbf16, #tpu.memory_space<vmem>>, vector<32x36xbf16>
    tpu.vector_store %arg6[%c704_549, %c108_550], %292 {strides = array<i32>} : memref<800x144xbf16, #tpu.memory_space<vmem>>, vector<32x36xbf16>,
    %c0_551 = arith.constant 0 : index
    %c2_552 = arith.constant 2 : index
    %c0_553 = arith.constant 0 : index
    %c14_554 = arith.constant 14 : index
    %294 = vector.load %arg1[%c0_551, %c2_552, %c0_553, %c14_554] : memref<1x4x32x50xbf16, #tpu.memory_space<vmem>>, vector<1x1x32x36xbf16>
    %295 = vector.shape_cast %294 : vector<1x1x32x36xbf16> to vector<32x36xbf16>
    %c736_555 = arith.constant 736 : index
    %c108_556 = arith.constant 108 : index
    %296 = vector.load %arg6[%c736_555, %c108_556] : memref<800x144xbf16, #tpu.memory_space<vmem>>, vector<32x36xbf16>
    tpu.vector_store %arg6[%c736_555, %c108_556], %295 {strides = array<i32>} : memref<800x144xbf16, #tpu.memory_space<vmem>>, vector<32x36xbf16>,
    %c0_557 = arith.constant 0 : index
    %c3_558 = arith.constant 3 : index
    %c0_559 = arith.constant 0 : index
    %c14_560 = arith.constant 14 : index
    %297 = vector.load %arg1[%c0_557, %c3_558, %c0_559, %c14_560] : memref<1x4x32x50xbf16, #tpu.memory_space<vmem>>, vector<1x1x32x36xbf16>
    %298 = vector.shape_cast %297 : vector<1x1x32x36xbf16> to vector<32x36xbf16>
    %c768_561 = arith.constant 768 : index
    %c108_562 = arith.constant 108 : index
    %299 = vector.load %arg6[%c768_561, %c108_562] : memref<800x144xbf16, #tpu.memory_space<vmem>>, vector<32x36xbf16>
    tpu.vector_store %arg6[%c768_561, %c108_562], %298 {strides = array<i32>} : memref<800x144xbf16, #tpu.memory_space<vmem>>, vector<32x36xbf16>,
    %c0_563 = arith.constant 0 : index
    %c0_564 = arith.constant 0 : index
    %300 = vector.load %arg2[%c0_563, %c0_564] : memref<64x800xbf16, #tpu.memory_space<vmem>>, vector<64x800xbf16>
    %c0_565 = arith.constant 0 : index
    %c0_566 = arith.constant 0 : index
    %301 = vector.load %arg6[%c0_565, %c0_566] : memref<800x144xbf16, #tpu.memory_space<vmem>>, vector<800x144xbf16>
    %cst = arith.constant dense<0.000000e+00> : vector<64x144xf32>
    %302 = tpu.matmul %300, %301, %cst {dimension_numbers = #tpu.dot_dimension_numbers<[1], [0], [0], [1], [0, 0, 1, 1], [], []>} : vector<64x800xbf16>, vector<800x144xbf16>, vector<64x144xf32> -> vector<64x144xf32>
    %c0_567 = arith.constant 0 : index
    %c0_568 = arith.constant 0 : index
    %303 = vector.load %arg3[%c0_567, %c0_568] : memref<64x1xf32, #tpu.memory_space<vmem>>, vector<64x1xf32>
    %c0_569 = arith.constant 0 : index
    %c0_570 = arith.constant 0 : index
    %304 = memref.load %arg4[%c0_569, %c0_570] : memref<1x1xf32, #tpu.memory_space<smem>>
    %305 = vector.extract_strided_slice %302 {offsets = [0, 0], sizes = [64, 36], strides = [1, 1]} : vector<64x144xf32> to vector<64x36xf32>
    %306 = vector.broadcast %303 : vector<64x1xf32> to vector<64x36xf32>
    %307 = arith.addf %305, %306 : vector<64x36xf32>
    %cst_571 = arith.constant 0.000000e+00 : f32
    %308 = vector.broadcast %cst_571 : f32 to vector<64x36xf32>
    %309 = arith.cmpf oge, %307, %308 : vector<64x36xf32>
    %310 = vector.broadcast %304 : f32 to vector<64x36xf32>
    %311 = arith.mulf %310, %307 : vector<64x36xf32>
    %312 = arith.select %309, %307, %311 : vector<64x36xi1>, vector<64x36xf32>
    %313 = vector.extract_strided_slice %302 {offsets = [0, 36], sizes = [64, 36], strides = [1, 1]} : vector<64x144xf32> to vector<64x36xf32>
    %314 = vector.broadcast %303 : vector<64x1xf32> to vector<64x36xf32>
    %315 = arith.addf %313, %314 : vector<64x36xf32>
    %cst_572 = arith.constant 0.000000e+00 : f32
    %316 = vector.broadcast %cst_572 : f32 to vector<64x36xf32>
    %317 = arith.cmpf oge, %315, %316 : vector<64x36xf32>
    %318 = vector.broadcast %304 : f32 to vector<64x36xf32>
    %319 = arith.mulf %318, %315 : vector<64x36xf32>
    %320 = arith.select %317, %315, %319 : vector<64x36xi1>, vector<64x36xf32>
    %321 = arith.maximumf %312, %320 : vector<64x36xf32>
    %322 = vector.extract_strided_slice %302 {offsets = [0, 72], sizes = [64, 36], strides = [1, 1]} : vector<64x144xf32> to vector<64x36xf32>
    %323 = vector.broadcast %303 : vector<64x1xf32> to vector<64x36xf32>
    %324 = arith.addf %322, %323 : vector<64x36xf32>
    %cst_573 = arith.constant 0.000000e+00 : f32
    %325 = vector.broadcast %cst_573 : f32 to vector<64x36xf32>
    %326 = arith.cmpf oge, %324, %325 : vector<64x36xf32>
    %327 = vector.broadcast %304 : f32 to vector<64x36xf32>
    %328 = arith.mulf %327, %324 : vector<64x36xf32>
    %329 = arith.select %326, %324, %328 : vector<64x36xi1>, vector<64x36xf32>
    %330 = arith.maximumf %321, %329 : vector<64x36xf32>
    %331 = vector.extract_strided_slice %302 {offsets = [0, 108], sizes = [64, 36], strides = [1, 1]} : vector<64x144xf32> to vector<64x36xf32>
    %332 = vector.broadcast %303 : vector<64x1xf32> to vector<64x36xf32>
    %333 = arith.addf %331, %332 : vector<64x36xf32>
    %cst_574 = arith.constant 0.000000e+00 : f32
    %334 = vector.broadcast %cst_574 : f32 to vector<64x36xf32>
    %335 = arith.cmpf oge, %333, %334 : vector<64x36xf32>
    %336 = vector.broadcast %304 : f32 to vector<64x36xf32>
    %337 = arith.mulf %336, %333 : vector<64x36xf32>
    %338 = arith.select %335, %333, %337 : vector<64x36xi1>, vector<64x36xf32>
    %339 = arith.maximumf %330, %338 : vector<64x36xf32>
    %340 = arith.truncf %339 : vector<64x36xf32> to vector<64x36xbf16>
    %c0_575 = arith.constant 0 : index
    %c0_576 = arith.constant 0 : index
    %c0_577 = arith.constant 0 : index
    %341 = vector.load %arg5[%c0_575, %c0_576, %c0_577] : memref<1x64x36xbf16, #tpu.memory_space<vmem>>, vector<1x64x36xbf16>
    %342 = vector.shape_cast %341 : vector<1x64x36xbf16> to vector<64x36xbf16>
    %343 = vector.shape_cast %340 : vector<64x36xbf16> to vector<1x64x36xbf16>
    tpu.vector_store %arg5[%c0_575, %c0_576, %c0_577], %343 {strides = array<i32>} : memref<1x64x36xbf16, #tpu.memory_space<vmem>>, vector<1x64x36xbf16>,
    return
  }
  func.func @transform_0(%arg0: i32) -> (i32, i32, i32, i32) {
    %c0_i32 = arith.constant 0 : i32
    %c0_i32_0 = arith.constant 0 : i32
    %c0_i32_1 = arith.constant 0 : i32
    %c0_i32_2 = arith.constant 0 : i32
    return %arg0, %c0_i32, %c0_i32_0, %c0_i32_1 : i32, i32, i32, i32
  }
  func.func @transform_1(%arg0: i32) -> (i32, i32) {
    %c0_i32 = arith.constant 0 : i32
    %c0_i32_0 = arith.constant 0 : i32
    %c0_i32_1 = arith.constant 0 : i32
    return %c0_i32, %c0_i32_0 : i32, i32
  }
  func.func @transform_2(%arg0: i32) -> (i32, i32) {
    %c0_i32 = arith.constant 0 : i32
    %c0_i32_0 = arith.constant 0 : i32
    %c0_i32_1 = arith.constant 0 : i32
    return %c0_i32, %c0_i32_0 : i32, i32
  }
  func.func @transform_3(%arg0: i32) -> (i32, i32) {
    %c0_i32 = arith.constant 0 : i32
    %c0_i32_0 = arith.constant 0 : i32
    %c0_i32_1 = arith.constant 0 : i32
    return %c0_i32, %c0_i32_0 : i32, i32
  }
  func.func @transform_4(%arg0: i32) -> (i32, i32, i32) {
    %c0_i32 = arith.constant 0 : i32
    %c0_i32_0 = arith.constant 0 : i32
    %c0_i32_1 = arith.constant 0 : i32
    return %arg0, %c0_i32, %c0_i32_0 : i32, i32, i32
  }
}

module attributes {stable_mosaic.version = 11 : i64} {
  func.func @_fc_stack_kernel(%arg0: i32, %arg1: memref<16x1024xbf16, #tpu.memory_space<vmem>>, %arg2: memref<1024x256xbf16, #tpu.memory_space<vmem>>, %arg3: memref<1x256xf32, #tpu.memory_space<vmem>>, %arg4: memref<256x256xbf16, #tpu.memory_space<vmem>>, %arg5: memref<1x256xf32, #tpu.memory_space<vmem>>, %arg6: memref<256x128xbf16, #tpu.memory_space<vmem>>, %arg7: memref<1x128xf32, #tpu.memory_space<vmem>>, %arg8: memref<1x2xf32, #tpu.memory_space<smem>>, %arg9: memref<16x128xf32, #tpu.memory_space<vmem>>) attributes {dimension_semantics = [#tpu.dimension_semantics<parallel>], iteration_bounds = array<i64: 1>, scalar_prefetch = 0 : i64, scratch_operands = 0 : i64, tpu.core_type = #tpu.core_type<tc>, window_params = [{transform_indices = @transform_0, window_bounds = array<i64: 16, 1024>}, {pipeline_mode = #tpu.pipeline_mode<synchronous>, transform_indices = @transform_1, window_bounds = array<i64: 1024, 256>}, {pipeline_mode = #tpu.pipeline_mode<synchronous>, transform_indices = @transform_2, window_bounds = array<i64: 1, 256>}, {pipeline_mode = #tpu.pipeline_mode<synchronous>, transform_indices = @transform_3, window_bounds = array<i64: 256, 256>}, {pipeline_mode = #tpu.pipeline_mode<synchronous>, transform_indices = @transform_4, window_bounds = array<i64: 1, 256>}, {pipeline_mode = #tpu.pipeline_mode<synchronous>, transform_indices = @transform_5, window_bounds = array<i64: 256, 128>}, {pipeline_mode = #tpu.pipeline_mode<synchronous>, transform_indices = @transform_6, window_bounds = array<i64: 1, 128>}, {transform_indices = @transform_7, window_bounds = array<i64: 1, 2>}, {transform_indices = @transform_8, window_bounds = array<i64: 16, 128>}]} {
    %c0 = arith.constant 0 : index
    %c0_0 = arith.constant 0 : index
    %0 = memref.load %arg8[%c0, %c0_0] : memref<1x2xf32, #tpu.memory_space<smem>>
    %c0_1 = arith.constant 0 : index
    %c1 = arith.constant 1 : index
    %1 = memref.load %arg8[%c0_1, %c1] : memref<1x2xf32, #tpu.memory_space<smem>>
    %c0_2 = arith.constant 0 : index
    %c0_3 = arith.constant 0 : index
    %2 = vector.load %arg1[%c0_2, %c0_3] : memref<16x1024xbf16, #tpu.memory_space<vmem>>, vector<16x1024xbf16>
    %c0_4 = arith.constant 0 : index
    %c0_5 = arith.constant 0 : index
    %3 = vector.load %arg2[%c0_4, %c0_5] : memref<1024x256xbf16, #tpu.memory_space<vmem>>, vector<1024x256xbf16>
    %cst = arith.constant dense<0.000000e+00> : vector<16x256xf32>
    %4 = tpu.matmul %2, %3, %cst {dimension_numbers = #tpu.dot_dimension_numbers<[1], [0], [0], [1], [0, 0, 1, 1], [], []>} : vector<16x1024xbf16>, vector<1024x256xbf16>, vector<16x256xf32> -> vector<16x256xf32>
    %c0_6 = arith.constant 0 : index
    %c0_7 = arith.constant 0 : index
    %5 = vector.load %arg3[%c0_6, %c0_7] : memref<1x256xf32, #tpu.memory_space<vmem>>, vector<1x256xf32>
    %6 = vector.broadcast %5 : vector<1x256xf32> to vector<16x256xf32>
    %7 = arith.addf %4, %6 : vector<16x256xf32>
    %cst_8 = arith.constant 0.000000e+00 : f32
    %8 = vector.broadcast %cst_8 : f32 to vector<16x256xf32>
    %9 = arith.cmpf oge, %7, %8 : vector<16x256xf32>
    %10 = vector.broadcast %0 : f32 to vector<16x256xf32>
    %11 = arith.mulf %10, %7 : vector<16x256xf32>
    %12 = arith.select %9, %7, %11 : vector<16x256xi1>, vector<16x256xf32>
    %13 = arith.truncf %12 : vector<16x256xf32> to vector<16x256xbf16>
    %c0_9 = arith.constant 0 : index
    %c0_10 = arith.constant 0 : index
    %14 = vector.load %arg4[%c0_9, %c0_10] : memref<256x256xbf16, #tpu.memory_space<vmem>>, vector<256x256xbf16>
    %cst_11 = arith.constant dense<0.000000e+00> : vector<16x256xf32>
    %15 = tpu.matmul %13, %14, %cst_11 {dimension_numbers = #tpu.dot_dimension_numbers<[1], [0], [0], [1], [0, 0, 1, 1], [], []>} : vector<16x256xbf16>, vector<256x256xbf16>, vector<16x256xf32> -> vector<16x256xf32>
    %c0_12 = arith.constant 0 : index
    %c0_13 = arith.constant 0 : index
    %16 = vector.load %arg5[%c0_12, %c0_13] : memref<1x256xf32, #tpu.memory_space<vmem>>, vector<1x256xf32>
    %17 = vector.broadcast %16 : vector<1x256xf32> to vector<16x256xf32>
    %18 = arith.addf %15, %17 : vector<16x256xf32>
    %cst_14 = arith.constant 0.000000e+00 : f32
    %19 = vector.broadcast %cst_14 : f32 to vector<16x256xf32>
    %20 = arith.cmpf oge, %18, %19 : vector<16x256xf32>
    %21 = vector.broadcast %1 : f32 to vector<16x256xf32>
    %22 = arith.mulf %21, %18 : vector<16x256xf32>
    %23 = arith.select %20, %18, %22 : vector<16x256xi1>, vector<16x256xf32>
    %24 = arith.truncf %23 : vector<16x256xf32> to vector<16x256xbf16>
    %c0_15 = arith.constant 0 : index
    %c0_16 = arith.constant 0 : index
    %25 = vector.load %arg6[%c0_15, %c0_16] : memref<256x128xbf16, #tpu.memory_space<vmem>>, vector<256x128xbf16>
    %cst_17 = arith.constant dense<0.000000e+00> : vector<16x128xf32>
    %26 = tpu.matmul %24, %25, %cst_17 {dimension_numbers = #tpu.dot_dimension_numbers<[1], [0], [0], [1], [0, 0, 1, 1], [], []>} : vector<16x256xbf16>, vector<256x128xbf16>, vector<16x128xf32> -> vector<16x128xf32>
    %c0_18 = arith.constant 0 : index
    %c0_19 = arith.constant 0 : index
    %27 = vector.load %arg7[%c0_18, %c0_19] : memref<1x128xf32, #tpu.memory_space<vmem>>, vector<1x128xf32>
    %28 = vector.broadcast %27 : vector<1x128xf32> to vector<16x128xf32>
    %29 = arith.addf %26, %28 : vector<16x128xf32>
    %c0_20 = arith.constant 0 : index
    %c0_21 = arith.constant 0 : index
    %30 = vector.load %arg9[%c0_20, %c0_21] : memref<16x128xf32, #tpu.memory_space<vmem>>, vector<16x128xf32>
    tpu.vector_store %arg9[%c0_20, %c0_21], %29 {strides = array<i32>} : memref<16x128xf32, #tpu.memory_space<vmem>>, vector<16x128xf32>,
    return
  }
  func.func @transform_0(%arg0: i32) -> (i32, i32) {
    %c0_i32 = arith.constant 0 : i32
    %c0_i32_0 = arith.constant 0 : i32
    return %arg0, %c0_i32 : i32, i32
  }
  func.func @transform_1(%arg0: i32) -> (i32, i32) {
    %c0_i32 = arith.constant 0 : i32
    %c0_i32_0 = arith.constant 0 : i32
    %c0_i32_1 = arith.constant 0 : i32
    return %c0_i32, %c0_i32_0 : i32, i32
  }
  func.func @transform_2(%arg0: i32) -> (i32, i32) {
    %c0_i32 = arith.constant 0 : i32
    %c0_i32_0 = arith.constant 0 : i32
    %c0_i32_1 = arith.constant 0 : i32
    return %c0_i32, %c0_i32_0 : i32, i32
  }
  func.func @transform_3(%arg0: i32) -> (i32, i32) {
    %c0_i32 = arith.constant 0 : i32
    %c0_i32_0 = arith.constant 0 : i32
    %c0_i32_1 = arith.constant 0 : i32
    return %c0_i32, %c0_i32_0 : i32, i32
  }
  func.func @transform_4(%arg0: i32) -> (i32, i32) {
    %c0_i32 = arith.constant 0 : i32
    %c0_i32_0 = arith.constant 0 : i32
    %c0_i32_1 = arith.constant 0 : i32
    return %c0_i32, %c0_i32_0 : i32, i32
  }
  func.func @transform_5(%arg0: i32) -> (i32, i32) {
    %c0_i32 = arith.constant 0 : i32
    %c0_i32_0 = arith.constant 0 : i32
    %c0_i32_1 = arith.constant 0 : i32
    return %c0_i32, %c0_i32_0 : i32, i32
  }
  func.func @transform_6(%arg0: i32) -> (i32, i32) {
    %c0_i32 = arith.constant 0 : i32
    %c0_i32_0 = arith.constant 0 : i32
    %c0_i32_1 = arith.constant 0 : i32
    return %c0_i32, %c0_i32_0 : i32, i32
  }
  func.func @transform_7(%arg0: i32) -> (i32, i32) {
    %c0_i32 = arith.constant 0 : i32
    %c0_i32_0 = arith.constant 0 : i32
    %c0_i32_1 = arith.constant 0 : i32
    return %c0_i32, %c0_i32_0 : i32, i32
  }
  func.func @transform_8(%arg0: i32) -> (i32, i32) {
    %c0_i32 = arith.constant 0 : i32
    %c0_i32_0 = arith.constant 0 : i32
    return %arg0, %c0_i32 : i32, i32
  }
}

</mosaic_0001>

<bundles_post_ra>
// kernel: embedding_net_forward.5
= control target key start
LH: loop header
LB: loop body
LE: loop exit
PB: predicated region body
PF: predicated region fallthrough
CT: control target
= control target key end

     0   :  { %13 = vsyncpa [#allocation3], 0  ;;  %s2652_s0 = inlined_call_operand.vmem [shape: bf16[16,1024], index: 0, kind: input, shape index: {}]   ;;  %s2653_s1 = inlined_call_operand.vmem [shape: bf16[1024,256], index: 1, kind: input, shape index: {}]   ;;  %s2654_s2 = inlined_call_operand.vmem [shape: f32[1,256], index: 2, kind: input, shape index: {}]   ;;  %s2655_s3 = inlined_call_operand.vmem [shape: bf16[256,256], index: 3, kind: input, shape index: {}]   ;;  %s2656_s4 = inlined_call_operand.vmem [shape: f32[1,256], index: 4, kind: input, shape index: {}]   ;;  %s2657_s5 = inlined_call_operand.vmem [shape: bf16[256,128], index: 5, kind: input, shape index: {}]   ;;  %s2658_s6 = inlined_call_operand.vmem [shape: f32[1,128], index: 6, kind: input, shape index: {}]   ;;  %s2659_s7 = inlined_call_operand.vmem [shape: f32[1,2], index: 7, kind: input, shape index: {}]   ;;  %s2660_s8 = inlined_call_operand.vmem [shape: f32[16,128], index: 8, kind: output, shape index: {}]  }
   0x1   :  { %s34_s29 = sshll.u32 %s2659_s7, 4  ;;  %s35_s29 = int_to_ptr.vmem [resolvable:$true] %s34_s29 }
   0x2   :  { %s1986_s30 = scalar_lea.vmem %s35_s29, 16  ;;  %p1991_p1 = scmp.lt.s32.totalorder %s35_s29, %s35_s29 }
   0x3   :  { %p1987_p0 = scmp.ne.s32.totalorder %s35_s29, %s1986_s30  ;;  %p1992_p2 = scmp.lt.s32.totalorder %s1986_s30, %s1986_s30 }
   0x5   :  { %p1993_p3 = por %p1992_p2, %p1991_p1 }
   0x7   :  { %p1994_p4 = pnand %p1993_p3, %p1987_p0 }
   0x9   :  { %1997 = shalt.err (!%p1994_p4)
}
   0xa   :  { %s2000_s9 = smov [#allocation2]  }
   0xb   :  { %37 = dma.vmem_to_smem %s35_s29, 16, %s2000_s9, [#allocation3]  }
   0xc   :  { %1998 = dma.done.wait [#allocation3], 16  }
   0xd   :  { %1999 = vsyncadd [#allocation3], 4294967280 }
   0xe   :  { %41 = sfence }
   0xf   :  { %v1730_v0 = vld [vmem:[%s2653_s1 + $0x104] ss:$8 sps:$4 sm:$0xff]   ;;  %v1732_v1 = vld [vmem:[%s2653_s1 + $0x100] ss:$8 sps:$4 sm:$0xff]   ;;  %v1733_v2 = vld [vmem:[%s2653_s1 + $0x114] ss:$8 sps:$4 sm:$0xff]  }
  0x10   :  { %916 = vmatprep.subr.bf16.mxu0 %v1730_v0  ;;  %v1735_v3 = vld [vmem:[%s2653_s1 + $0x110] ss:$8 sps:$4 sm:$0xff]   ;;  %v1736_v4 = vld [vmem:[%s2653_s1 + $0x124] ss:$8 sps:$4 sm:$0xff]   ;;  %v1738_v5 = vld [vmem:[%s2653_s1 + $0x120] ss:$8 sps:$4 sm:$0xff]  }
  0x11   :  { %917 = vmatpush1.bf16.msra.mxu0 %v1732_v1  ;;  %v1739_v6 = vld [vmem:[%s2653_s1 + $0x134] ss:$8 sps:$4 sm:$0xff]   ;;  %v1741_v7 = vld [vmem:[%s2653_s1 + $0x130] ss:$8 sps:$4 sm:$0xff]   ;;  %v1742_v8 = vld [vmem:[%s2653_s1 + $0x144] ss:$8 sps:$4 sm:$0xff]  }
  0x12   :  { %918 = vmatprep.subr.bf16.mxu0 %v1733_v2  ;;  %v1744_v9 = vld [vmem:[%s2653_s1 + $0x140] ss:$8 sps:$4 sm:$0xff]   ;;  %v1745_v10 = vld [vmem:[%s2653_s1 + $0x154] ss:$8 sps:$4 sm:$0xff]   ;;  %v1747_v11 = vld [vmem:[%s2653_s1 + $0x150] ss:$8 sps:$4 sm:$0xff]  }
  0x13   :  { %v1748_v12 = vld [vmem:[%s2653_s1 + $0x164] ss:$8 sps:$4 sm:$0xff]   ;;  %v1750_v16 = vld [vmem:[%s2653_s1 + $0x160] ss:$8 sps:$4 sm:$0xff]   ;;  %v1751_v17 = vld [vmem:[%s2653_s1 + $0x174] ss:$8 sps:$4 sm:$0xff]  }
  0x14   :  { %v2091_v13 = vld [vmem:[%s2652_s0 + $0x8] sm:$0xff]  ;;  %v1753_v18 = vld [vmem:[%s2653_s1 + $0x170] ss:$8 sps:$4 sm:$0xff]   ;;  %v1757_v21 = vld [vmem:[%s2653_s1 + $0x194] ss:$8 sps:$4 sm:$0xff]   ;;  %s1505_s23 = sld [smem:[#allocation2 + $0x1]] }
  0x15   :  { %919 = vmatpush1.bf16.msra.mxu0 %v1735_v3  ;;  %v2096_v14 = vld [vmem:[%s2652_s0 + $0x28] sm:$0xff]  ;;  %v1759_v22 = vld [vmem:[%s2653_s1 + $0x190] ss:$8 sps:$4 sm:$0xff]   ;;  %v1763_v25 = vld [vmem:[%s2653_s1 + $0x1b4] ss:$8 sps:$4 sm:$0xff]  }
  0x16   :  { %920 = vmatprep.subr.bf16.mxu0 %v1736_v4  ;;  %v1509_v15 = vcombine.high %v2091_v13, %v2096_v14  ;;  %v1754_v19 = vld [vmem:[%s2653_s1 + $0x184] ss:$8 sps:$4 sm:$0xff]   ;;  %v1756_v20 = vld [vmem:[%s2653_s1 + $0x180] ss:$8 sps:$4 sm:$0xff]   ;;  %v1765_v26 = vld [vmem:[%s2653_s1 + $0x1b0] ss:$8 sps:$4 sm:$0xff]   ;;  %v1508_v50 = vcombine.low %v2091_v13, %v2096_v14 }
  0x17   :  { %v1760_v23 = vld [vmem:[%s2653_s1 + $0x1a4] ss:$8 sps:$4 sm:$0xff]   ;;  %v1762_v24 = vld [vmem:[%s2653_s1 + $0x1a0] ss:$8 sps:$4 sm:$0xff]   ;;  %v1829_v30 = vld [vmem:[%s2653_s1 + $0x14] ss:$8 sps:$4 sm:$0xff]  }
  0x18   :  { %948 = vmatprep.mubr.bf16.mxu0 %v1509_v15  ;;  %v1823_v27 = vld [vmem:[%s2653_s1 + $0x4] ss:$8 sps:$4 sm:$0xff]   ;;  %v1825_v28 = vld [vmem:[%s2653_s1] ss:$8 sps:$4 sm:$0xff]   ;;  %v1831_v31 = vld [vmem:[%s2653_s1 + $0x10] ss:$8 sps:$4 sm:$0xff]  }
  0x19   :  { %921 = vmatpush1.bf16.msra.mxu0 %v1738_v5  ;;  %v1766_v29 = vld [vmem:[%s2653_s1 + $0x1c4] ss:$8 sps:$4 sm:$0xff]   ;;  %873 = vmatprep.subr.bf16.mxu1 %v1823_v27  ;;  %v1768_v32 = vld [vmem:[%s2653_s1 + $0x1c0] ss:$8 sps:$4 sm:$0xff]   ;;  %v1769_v33 = vld [vmem:[%s2653_s1 + $0x1d4] ss:$8 sps:$4 sm:$0xff]  }
  0x1a   :  { %922 = vmatprep.subr.bf16.mxu0 %v1739_v6  ;;  %874 = vmatpush1.bf16.msra.mxu1 %v1825_v28  ;;  %v1835_v34 = vld [vmem:[%s2653_s1 + $0x24] ss:$8 sps:$4 sm:$0xff]   ;;  %v1837_v35 = vld [vmem:[%s2653_s1 + $0x20] ss:$8 sps:$4 sm:$0xff]   ;;  %v1771_v36 = vld [vmem:[%s2653_s1 + $0x1d0] ss:$8 sps:$4 sm:$0xff]  }
  0x1b   :  { %875 = vmatprep.subr.bf16.mxu1 %v1829_v30  ;;  %v1841_v37 = vld [vmem:[%s2653_s1 + $0x34] ss:$8 sps:$4 sm:$0xff]   ;;  %v1772_v38 = vld [vmem:[%s2653_s1 + $0x1e4] ss:$8 sps:$4 sm:$0xff]   ;;  %v1843_v39 = vld [vmem:[%s2653_s1 + $0x30] ss:$8 sps:$4 sm:$0xff]  }
  0x1c   :  { %v1847_v40 = vld [vmem:[%s2653_s1 + $0x44] ss:$8 sps:$4 sm:$0xff]   ;;  %v1774_v41 = vld [vmem:[%s2653_s1 + $0x1e0] ss:$8 sps:$4 sm:$0xff]   ;;  %v1775_v42 = vld [vmem:[%s2653_s1 + $0x1f4] ss:$8 sps:$4 sm:$0xff]  }
  0x1d   :  { %923 = vmatpush1.bf16.msra.mxu0 %v1741_v7  ;;  %v1849_v43 = vld [vmem:[%s2653_s1 + $0x40] ss:$8 sps:$4 sm:$0xff]   ;;  %v1777_v44 = vld [vmem:[%s2653_s1 + $0x1f0] ss:$8 sps:$4 sm:$0xff]   ;;  %v1853_v45 = vld [vmem:[%s2653_s1 + $0x54] ss:$8 sps:$4 sm:$0xff]  }
  0x1e   :  { %924 = vmatprep.subr.bf16.mxu0 %v1742_v8  ;;  %876 = vmatpush1.bf16.msra.mxu1 %v1831_v31  ;;  %v1780_v46 = vld [vmem:[%s2653_s1 + $0x204] ss:$8 sps:$4 sm:$0xff]   ;;  %v2196_v47 = vld [vmem:[%s2652_s0 + $0x10] sm:$0xff]  ;;  %v1778_v52 = vld [vmem:[%s2653_s1 + $0x200] ss:$8 sps:$4 sm:$0xff]  }
  0x1f   :  { %877 = vmatprep.subr.bf16.mxu1 %v1835_v34  ;;  %v2201_v48 = vld [vmem:[%s2652_s0 + $0x30] sm:$0xff]  ;;  %v1859_v51 = vld [vmem:[%s2653_s1 + $0x64] ss:$8 sps:$4 sm:$0xff]   ;;  %v1861_v55 = vld [vmem:[%s2653_s1 + $0x60] ss:$8 sps:$4 sm:$0xff]  }
  0x20   :  { %v1855_v49 = vld [vmem:[%s2653_s1 + $0x50] ss:$8 sps:$4 sm:$0xff]   ;;  %v1511_v53 = vcombine.high %v2196_v47, %v2201_v48  ;;  %v1783_v54 = vld [vmem:[%s2653_s1 + $0x214] ss:$8 sps:$4 sm:$0xff]   ;;  %v1786_v58 = vld [vmem:[%s2653_s1 + $0x224] ss:$8 sps:$4 sm:$0xff]  }
  0x21   :  { %925 = vmatpush1.bf16.msra.mxu0 %v1744_v9  ;;  %v1865_v56 = vld [vmem:[%s2653_s1 + $0x74] ss:$8 sps:$4 sm:$0xff]   ;;  %v1781_v57 = vld [vmem:[%s2653_s1 + $0x210] ss:$8 sps:$4 sm:$0xff]   ;;  %v1871_v60 = vld [vmem:[%s2653_s1 + $0x84] ss:$8 sps:$4 sm:$0xff]  }
  0x22   :  { %926 = vmatprep.subr.bf16.mxu0 %v1745_v10  ;;  %878 = vmatpush1.bf16.msra.mxu1 %v1837_v35  ;;  %v1867_v59 = vld [vmem:[%s2653_s1 + $0x70] ss:$8 sps:$4 sm:$0xff]   ;;  %v1784_v61 = vld [vmem:[%s2653_s1 + $0x220] ss:$8 sps:$4 sm:$0xff]   ;;  %v1789_v62 = vld [vmem:[%s2653_s1 + $0x234] ss:$8 sps:$4 sm:$0xff]  }
  0x23   :  { %879 = vmatprep.subr.bf16.mxu1 %v1841_v37  ;;  %v1873_v63 = vld [vmem:[%s2653_s1 + $0x80] ss:$8 sps:$4 sm:$0xff]   ;;  %v1877_v0 = vld [vmem:[%s2653_s1 + $0x94] ss:$8 sps:$4 sm:$0xff]   ;;  %v1787_v1 = vld [vmem:[%s2653_s1 + $0x230] ss:$8 sps:$4 sm:$0xff]  }
  0x24   :  { %v1792_v2 = vld [vmem:[%s2653_s1 + $0x244] ss:$8 sps:$4 sm:$0xff]   ;;  %v1879_v3 = vld [vmem:[%s2653_s1 + $0x90] ss:$8 sps:$4 sm:$0xff]   ;;  %v1790_v5 = vld [vmem:[%s2653_s1 + $0x240] ss:$8 sps:$4 sm:$0xff]  }
  0x25   :  { %927 = vmatpush1.bf16.msra.mxu0 %v1747_v11  ;;  %v1883_v4 = vld [vmem:[%s2653_s1 + $0xa4] ss:$8 sps:$4 sm:$0xff]   ;;  %v1795_v6 = vld [vmem:[%s2653_s1 + $0x254] ss:$8 sps:$4 sm:$0xff]   ;;  %v1885_v7 = vld [vmem:[%s2653_s1 + $0xa0] ss:$8 sps:$4 sm:$0xff]  }
  0x26   :  { %928 = vmatprep.subr.bf16.mxu0 %v1748_v12  ;;  %880 = vmatpush1.bf16.msra.mxu1 %v1843_v39  ;;  %v1889_v8 = vld [vmem:[%s2653_s1 + $0xb4] ss:$8 sps:$4 sm:$0xff]   ;;  %v1793_v9 = vld [vmem:[%s2653_s1 + $0x250] ss:$8 sps:$4 sm:$0xff]   ;;  %v1798_v10 = vld [vmem:[%s2653_s1 + $0x264] ss:$8 sps:$4 sm:$0xff]  }
  0x27   :  { %881 = vmatprep.subr.bf16.mxu1 %v1847_v40  ;;  %v1891_v11 = vld [vmem:[%s2653_s1 + $0xb0] ss:$8 sps:$4 sm:$0xff]   ;;  %v45_v12 = vld [vmem:[%s2652_s0] sm:$0xff]  ;;  %v1913_v27 = vld [vmem:[%s2653_s1 + $0xf4] ss:$8 sps:$4 sm:$0xff]  }
  0x28   :  { %v49_v13 = vld [vmem:[%s2652_s0 + $0x20] sm:$0xff]  ;;  %v1805_v28 = vld [vmem:[%s2653_s1 + $0x290] ss:$8 sps:$4 sm:$0xff]  }
  0x29   :  { %929 = vmatpush1.bf16.msra.mxu0 %v1750_v16  ;;  %v1895_v14 = vld [vmem:[%s2653_s1 + $0xc4] ss:$8 sps:$4 sm:$0xff]   ;;  %v1507_v15 = vcombine.high %v45_v12, %v49_v13  ;;  %v1796_v16 = vld [vmem:[%s2653_s1 + $0x260] ss:$8 sps:$4 sm:$0xff]   ;;  %v1915_v30 = vld [vmem:[%s2653_s1 + $0xf0] ss:$8 sps:$4 sm:$0xff]   ;;  %v1506_v35 = vcombine.low %v45_v12, %v49_v13 }
  0x2a   :  { %930 = vmatprep.subr.bf16.mxu0 %v1751_v17  ;;  %882 = vmatpush1.bf16.msra.mxu1 %v1849_v43  ;;  %v1801_v17 = vld [vmem:[%s2653_s1 + $0x274] ss:$8 sps:$4 sm:$0xff]   ;;  %v1808_v31 = vld [vmem:[%s2653_s1 + $0x2a0] ss:$8 sps:$4 sm:$0xff]   ;;  %v1811_v37 = vld [vmem:[%s2653_s1 + $0x2b0] ss:$8 sps:$4 sm:$0xff]  }
  0x2b   :  { %883 = vmatprep.subr.bf16.mxu1 %v1853_v45  ;;  %905 = vmatprep.mubr.bf16.mxu1 %v1507_v15  ;;  %v1922_v34 = vld [vmem:[%s2655_s3] ss:$8 sps:$4 sm:$0xff]   ;;  %v1925_v39 = vld [vmem:[%s2655_s3 + $0x10] ss:$8 sps:$4 sm:$0xff]   ;;  %v1930_v40 = vld [vmem:[%s2655_s3 + $0x24] ss:$8 sps:$4 sm:$0xff]  }
  0x2c   :  { %v1928_v43 = vld [vmem:[%s2655_s3 + $0x20] ss:$8 sps:$4 sm:$0xff]   ;;  %v1817_v45 = vld [vmem:[%s2653_s1 + $0x2d0] ss:$8 sps:$4 sm:$0xff]   ;;  %v1954_v12 = vld [vmem:[%s2655_s3 + $0xa4] ss:$8 sps:$4 sm:$0xff]  }
  0x2d   :  { %931 = vmatpush1.bf16.msra.mxu0 %v1753_v18  ;;  %v1897_v18 = vld [vmem:[%s2653_s1 + $0xc0] ss:$8 sps:$4 sm:$0xff]  }
  0x2e   :  { %932 = vmatprep.subr.bf16.mxu0 %v1754_v19  ;;  %884 = vmatpush1.bf16.msra.mxu1 %v1855_v49  ;;  %v1901_v19 = vld [vmem:[%s2653_s1 + $0xd4] ss:$8 sps:$4 sm:$0xff]   ;;  %v1931_v49 = vld [vmem:[%s2655_s3 + $0x30] ss:$8 sps:$4 sm:$0xff]   ;;  %v1856_v13 = vld [vmem:[%s2653_s1 + $0x340] ss:$8 sps:$4 sm:$0xff]  }
  0x2f   :  { %885 = vmatprep.subr.bf16.mxu1 %v1859_v51  ;;  %v1820_v51 = vld [vmem:[%s2653_s1 + $0x2e0] ss:$8 sps:$4 sm:$0xff]  }
  0x30   :  { %v1952_v15 = vld [vmem:[%s2655_s3 + $0xa0] ss:$8 sps:$4 sm:$0xff]  }
  0x31   :  { %933 = vmatpush1.bf16.msra.mxu0 %v1756_v20  ;;  %v1799_v20 = vld [vmem:[%s2653_s1 + $0x270] ss:$8 sps:$4 sm:$0xff]  }
  0x32   :  { %934 = vmatprep.subr.bf16.mxu0 %v1757_v21  ;;  %886 = vmatpush1.bf16.msra.mxu1 %v1861_v55  ;;  %v1804_v21 = vld [vmem:[%s2653_s1 + $0x284] ss:$8 sps:$4 sm:$0xff]   ;;  %v1826_v55 = vld [vmem:[%s2653_s1 + $0x2f0] ss:$8 sps:$4 sm:$0xff]  }
  0x33   :  { %887 = vmatprep.subr.bf16.mxu1 %v1865_v56  ;;  %v1834_v56 = vld [vmem:[%s2653_s1 + $0x304] ss:$8 sps:$4 sm:$0xff]  }
  0x35   :  { %935 = vmatpush1.bf16.msra.mxu0 %v1759_v22  ;;  %v1903_v22 = vld [vmem:[%s2653_s1 + $0xd0] ss:$8 sps:$4 sm:$0xff]  }
  0x36   :  { %936 = vmatprep.subr.bf16.mxu0 %v1760_v23  ;;  %888 = vmatpush1.bf16.msra.mxu1 %v1867_v59  ;;  %v1907_v23 = vld [vmem:[%s2653_s1 + $0xe4] ss:$8 sps:$4 sm:$0xff]   ;;  %v1937_v59 = vld [vmem:[%s2655_s3 + $0x50] ss:$8 sps:$4 sm:$0xff]  }
  0x37   :  { %889 = vmatprep.subr.bf16.mxu1 %v1871_v60  ;;  %v1510_v60 = vcombine.low %v2196_v47, %v2201_v48  ;;  %v1940_v47 = vld [vmem:[%s2655_s3 + $0x60] ss:$8 sps:$4 sm:$0xff]   ;;  %v1945_v48 = vld [vmem:[%s2655_s3 + $0x74] ss:$8 sps:$4 sm:$0xff]  }
  0x39   :  { %937 = vmatpush1.bf16.msra.mxu0 %v1762_v24  ;;  %v1802_v24 = vld [vmem:[%s2653_s1 + $0x280] ss:$8 sps:$4 sm:$0xff]  }
  0x3a   :  { %938 = vmatprep.subr.bf16.mxu0 %v1763_v25  ;;  %890 = vmatpush1.bf16.msra.mxu1 %v1873_v63  ;;  %v1807_v25 = vld [vmem:[%s2653_s1 + $0x294] ss:$8 sps:$4 sm:$0xff]  }
  0x3b   :  { %891 = vmatprep.subr.bf16.mxu1 %v1877_v0  ;;  %v1840_v0 = vld [vmem:[%s2653_s1 + $0x314] ss:$8 sps:$4 sm:$0xff]  }
  0x3d   :  { %939 = vmatpush1.bf16.msra.mxu0 %v1765_v26  ;;  %v1909_v26 = vld [vmem:[%s2653_s1 + $0xe0] ss:$8 sps:$4 sm:$0xff]  }
  0x3e   :  { %940 = vmatprep.subr.bf16.mxu0 %v1766_v29  ;;  %892 = vmatpush1.bf16.msra.mxu1 %v1879_v3  ;;  %v1810_v29 = vld [vmem:[%s2653_s1 + $0x2a4] ss:$8 sps:$4 sm:$0xff]   ;;  %v1943_v3 = vld [vmem:[%s2655_s3 + $0x70] ss:$8 sps:$4 sm:$0xff]  }
  0x3f   :  { %893 = vmatprep.subr.bf16.mxu1 %v1883_v4  ;;  %v1948_v4 = vld [vmem:[%s2655_s3 + $0x84] ss:$8 sps:$4 sm:$0xff]  }
  0x41   :  { %941 = vmatpush1.bf16.msra.mxu0 %v1768_v32  ;;  %v1924_v32 = vld [vmem:[%s2655_s3 + $0x4] ss:$8 sps:$4 sm:$0xff]  }
  0x42   :  { %942 = vmatprep.subr.bf16.mxu0 %v1769_v33  ;;  %894 = vmatpush1.bf16.msra.mxu1 %v1885_v7  ;;  %v1813_v33 = vld [vmem:[%s2653_s1 + $0x2b4] ss:$8 sps:$4 sm:$0xff]   ;;  %v1946_v7 = vld [vmem:[%s2655_s3 + $0x80] ss:$8 sps:$4 sm:$0xff]  }
  0x43   :  { %895 = vmatprep.subr.bf16.mxu1 %v1889_v8  ;;  %v1951_v8 = vld [vmem:[%s2655_s3 + $0x94] ss:$8 sps:$4 sm:$0xff]  }
  0x45   :  { %943 = vmatpush1.bf16.msra.mxu0 %v1771_v36  ;;  %v1927_v36 = vld [vmem:[%s2655_s3 + $0x14] ss:$8 sps:$4 sm:$0xff]  }
  0x46   :  { %944 = vmatprep.subr.bf16.mxu0 %v1772_v38  ;;  %896 = vmatpush1.bf16.msra.mxu1 %v1891_v11  ;;  %v1816_v38 = vld [vmem:[%s2653_s1 + $0x2c4] ss:$8 sps:$4 sm:$0xff]   ;;  %v1949_v11 = vld [vmem:[%s2655_s3 + $0x90] ss:$8 sps:$4 sm:$0xff]  }
  0x47   :  { %897 = vmatprep.subr.bf16.mxu1 %v1895_v14  ;;  %v1864_v14 = vld [vmem:[%s2653_s1 + $0x354] ss:$8 sps:$4 sm:$0xff]  }
  0x49   :  { %945 = vmatpush1.bf16.msra.mxu0 %v1774_v41  ;;  %v1814_v41 = vld [vmem:[%s2653_s1 + $0x2c0] ss:$8 sps:$4 sm:$0xff]  }
  0x4a   :  { %946 = vmatprep.subr.bf16.mxu0 %v1775_v42  ;;  %898 = vmatpush1.bf16.msra.mxu1 %v1897_v18  ;;  %v1819_v42 = vld [vmem:[%s2653_s1 + $0x2d4] ss:$8 sps:$4 sm:$0xff]   ;;  %v1870_v18 = vld [vmem:[%s2653_s1 + $0x364] ss:$8 sps:$4 sm:$0xff]  }
  0x4b   :  { %899 = vmatprep.subr.bf16.mxu1 %v1901_v19  ;;  %v1955_v19 = vld [vmem:[%s2655_s3 + $0xb0] ss:$8 sps:$4 sm:$0xff]  }
  0x4d   :  { %947 = vmatpush1.bf16.msra.mxu0 %v1777_v44  ;;  %v1933_v44 = vld [vmem:[%s2655_s3 + $0x34] ss:$8 sps:$4 sm:$0xff]  }
  0x4e   :  { %959 = vmatprep.subr.bf16.mxu0 %v1780_v46  ;;  %900 = vmatpush1.bf16.msra.mxu1 %v1903_v22  ;;  %v1822_v46 = vld [vmem:[%s2653_s1 + $0x2e4] ss:$8 sps:$4 sm:$0xff]   ;;  %v1874_v22 = vld [vmem:[%s2653_s1 + $0x370] ss:$8 sps:$4 sm:$0xff]  }
  0x4f   :  { %901 = vmatprep.subr.bf16.mxu1 %v1907_v23  ;;  %v1882_v23 = vld [vmem:[%s2653_s1 + $0x384] ss:$8 sps:$4 sm:$0xff]  }
  0x50   :  { %949 = vmatmul.mubr.bf16.vlgmr.msra.gmra.mrb[0].mxu0 %v1508_v50  ;;  %v1936_v50 = vld [vmem:[%s2655_s3 + $0x44] ss:$8 sps:$4 sm:$0xff]  }
  0x51   :  { %960 = vmatpush1.bf16.msra.mxu0 %v1778_v52  ;;  %991 = vmatprep.mubr.bf16.mxu0 %v1511_v53  ;;  %v1828_v52 = vld [vmem:[%s2653_s1 + $0x2f4] ss:$8 sps:$4 sm:$0xff]   ;;  %v1934_v53 = vld [vmem:[%s2655_s3 + $0x40] ss:$8 sps:$4 sm:$0xff]  }
  0x52   :  { %961 = vmatprep.subr.bf16.mxu0 %v1783_v54  ;;  %902 = vmatpush1.bf16.msra.mxu1 %v1909_v26  ;;  %v1939_v54 = vld [vmem:[%s2655_s3 + $0x54] ss:$8 sps:$4 sm:$0xff]   ;;  %v1886_v26 = vld [vmem:[%s2653_s1 + $0x390] ss:$8 sps:$4 sm:$0xff]  }
  0x53   :  { %903 = vmatprep.subr.bf16.mxu1 %v1913_v27  ;;  %v1894_v27 = vld [vmem:[%s2653_s1 + $0x3a4] ss:$8 sps:$4 sm:$0xff]  }
  0x55   :  { %962 = vmatpush1.bf16.msra.mxu0 %v1781_v57  ;;  %v2408_v57 = vld [vmem:[%s2652_s0 + $0x18] sm:$0xff] }
  0x56   :  { %963 = vmatprep.subr.bf16.mxu0 %v1786_v58  ;;  %904 = vmatpush1.bf16.msra.mxu1 %v1915_v30  ;;  %v2413_v58 = vld [vmem:[%s2652_s0 + $0x38] sm:$0xff] }
  0x57   :  { %1264 = vmatprep.subr.bf16.mxu1 %v1924_v32  ;;  %v1513_v63 = vcombine.high %v2408_v57, %v2413_v58  ;;  %v1898_v30 = vld [vmem:[%s2653_s1 + $0x3b0] ss:$8 sps:$4 sm:$0xff]   ;;  %v1904_v32 = vld [vmem:[%s2653_s1 + $0x3c0] ss:$8 sps:$4 sm:$0xff]  }
  0x59   :  { %964 = vmatpush1.bf16.msra.mxu0 %v1784_v61  ;;  %906 = vmatmul.mubr.bf16.vlgmr.msra.gmra.mrb[0].mxu1 %v1506_v35  ;;  %v1942_v61 = vld [vmem:[%s2655_s3 + $0x64] ss:$8 sps:$4 sm:$0xff]  }
  0x5a   :  { %965 = vmatprep.subr.bf16.mxu0 %v1789_v62  ;;  %1265 = vmatpush1.bf16.msra.mxu1 %v1922_v34  ;;  %v1832_v62 = vld [vmem:[%s2653_s1 + $0x300] ss:$8 sps:$4 sm:$0xff]   ;;  %v1910_v34 = vld [vmem:[%s2653_s1 + $0x3d0] ss:$8 sps:$4 sm:$0xff]   ;;  %v1918_v35 = vld [vmem:[%s2653_s1 + $0x3e4] ss:$8 sps:$4 sm:$0xff]  }
  0x5b   :  { %1266 = vmatprep.subr.bf16.mxu1 %v1927_v36  ;;  %v1916_v36 = vld [vmem:[%s2653_s1 + $0x3e0] ss:$8 sps:$4 sm:$0xff]  }
  0x5d   :  { %966 = vmatpush1.bf16.msra.mxu0 %v1787_v1  ;;  %v1838_v1 = vld [vmem:[%s2653_s1 + $0x310] ss:$8 sps:$4 sm:$0xff]  }
  0x5e   :  { %967 = vmatprep.subr.bf16.mxu0 %v1792_v2  ;;  %1267 = vmatpush1.bf16.msra.mxu1 %v1925_v39  ;;  %v1846_v2 = vld [vmem:[%s2653_s1 + $0x324] ss:$8 sps:$4 sm:$0xff]   ;;  %v1512_v39 = vcombine.low %v2408_v57, %v2413_v58  ;;  %v181_v58 = vld [vmem:[%s2654_s2] sm:$0x3] }
  0x5f   :  { %1268 = vmatprep.subr.bf16.mxu1 %v1930_v40  ;;  %v1958_v40 = vld [vmem:[%s2655_s3 + $0xc0] ss:$8 sps:$4 sm:$0xff]  }
  0x61   :  { %968 = vmatpush1.bf16.msra.mxu0 %v1790_v5  ;;  %v1844_v5 = vld [vmem:[%s2653_s1 + $0x320] ss:$8 sps:$4 sm:$0xff]  }
  0x62   :  { %969 = vmatprep.subr.bf16.mxu0 %v1795_v6  ;;  %1269 = vmatpush1.bf16.msra.mxu1 %v1928_v43  ;;  %v1852_v6 = vld [vmem:[%s2653_s1 + $0x334] ss:$8 sps:$4 sm:$0xff]   ;;  %v1961_v43 = vld [vmem:[%s2655_s3 + $0xd0] ss:$8 sps:$4 sm:$0xff]  }
  0x63   :  { %1270 = vmatprep.subr.bf16.mxu1 %v1933_v44  ;;  %v1966_v44 = vld [vmem:[%s2655_s3 + $0xe4] ss:$8 sps:$4 sm:$0xff]  }
  0x65   :  { %970 = vmatpush1.bf16.msra.mxu0 %v1793_v9  ;;  %v1850_v9 = vld [vmem:[%s2653_s1 + $0x330] ss:$8 sps:$4 sm:$0xff]  }
  0x66   :  { %971 = vmatprep.subr.bf16.mxu0 %v1798_v10  ;;  %1271 = vmatpush1.bf16.msra.mxu1 %v1931_v49  ;;  %v1858_v10 = vld [vmem:[%s2653_s1 + $0x344] ss:$8 sps:$4 sm:$0xff]   ;;  %v1967_v49 = vld [vmem:[%s2655_s3 + $0xf0] ss:$8 sps:$4 sm:$0xff]  }
  0x67   :  { %1272 = vmatprep.subr.bf16.mxu1 %v1936_v50  ;;  %v1970_v50 = vld [vmem:[%s2657_s5 + $0x40] sm:$0xff]  }
  0x69   :  { %972 = vmatpush1.bf16.msra.mxu0 %v1796_v16  ;;  %v1957_v16 = vld [vmem:[%s2655_s3 + $0xb4] ss:$8 sps:$4 sm:$0xff]  }
  0x6a   :  { %973 = vmatprep.subr.bf16.mxu0 %v1801_v17  ;;  %1273 = vmatpush1.bf16.msra.mxu1 %v1934_v53  ;;  %v1862_v17 = vld [vmem:[%s2653_s1 + $0x350] ss:$8 sps:$4 sm:$0xff]  }
  0x6b   :  { %1274 = vmatprep.subr.bf16.mxu1 %v1939_v54 }
  0x6d   :  { %974 = vmatpush1.bf16.msra.mxu0 %v1799_v20  ;;  %v1868_v20 = vld [vmem:[%s2653_s1 + $0x360] ss:$8 sps:$4 sm:$0xff]  }
  0x6e   :  { %975 = vmatprep.subr.bf16.mxu0 %v1804_v21  ;;  %1275 = vmatpush1.bf16.msra.mxu1 %v1937_v59  ;;  %v1876_v21 = vld [vmem:[%s2653_s1 + $0x374] ss:$8 sps:$4 sm:$0xff]  }
  0x6f   :  { %1276 = vmatprep.subr.bf16.mxu1 %v1942_v61 }
  0x71   :  { %976 = vmatpush1.bf16.msra.mxu0 %v1802_v24  ;;  %v1880_v24 = vld [vmem:[%s2653_s1 + $0x380] ss:$8 sps:$4 sm:$0xff]  }
  0x72   :  { %977 = vmatprep.subr.bf16.mxu0 %v1807_v25  ;;  %1277 = vmatpush1.bf16.msra.mxu1 %v1940_v47  ;;  %v1888_v25 = vld [vmem:[%s2653_s1 + $0x394] ss:$8 sps:$4 sm:$0xff]  }
  0x73   :  { %1278 = vmatprep.subr.bf16.mxu1 %v1945_v48 }
  0x75   :  { %978 = vmatpush1.bf16.msra.mxu0 %v1805_v28  ;;  %v1892_v28 = vld [vmem:[%s2653_s1 + $0x3a0] ss:$8 sps:$4 sm:$0xff]  }
  0x76   :  { %979 = vmatprep.subr.bf16.mxu0 %v1810_v29  ;;  %1279 = vmatpush1.bf16.msra.mxu1 %v1943_v3  ;;  %v1900_v29 = vld [vmem:[%s2653_s1 + $0x3b4] ss:$8 sps:$4 sm:$0xff]  }
  0x77   :  { %1280 = vmatprep.subr.bf16.mxu1 %v1948_v4 }
  0x79   :  { %980 = vmatpush1.bf16.msra.mxu0 %v1808_v31  ;;  %v1906_v31 = vld [vmem:[%s2653_s1 + $0x3c4] ss:$8 sps:$4 sm:$0xff]  }
  0x7a   :  { %981 = vmatprep.subr.bf16.mxu0 %v1813_v33  ;;  %1281 = vmatpush1.bf16.msra.mxu1 %v1946_v7  ;;  %v1912_v33 = vld [vmem:[%s2653_s1 + $0x3d4] ss:$8 sps:$4 sm:$0xff]  }
  0x7b   :  { %1282 = vmatprep.subr.bf16.mxu1 %v1951_v8 }
  0x7d   :  { %982 = vmatpush1.bf16.msra.mxu0 %v1811_v37  ;;  %v1921_v37 = vld [vmem:[%s2653_s1 + $0x3f4] ss:$8 sps:$4 sm:$0xff]  }
  0x7e   :  { %983 = vmatprep.subr.bf16.mxu0 %v1816_v38  ;;  %1283 = vmatpush1.bf16.msra.mxu1 %v1949_v11  ;;  %v1919_v38 = vld [vmem:[%s2653_s1 + $0x3f0] ss:$8 sps:$4 sm:$0xff]  }
  0x7f   :  { %1284 = vmatprep.subr.bf16.mxu1 %v1954_v12 }
  0x81   :  { %984 = vmatpush1.bf16.msra.mxu0 %v1814_v41  ;;  %v1960_v41 = vld [vmem:[%s2655_s3 + $0xc4] ss:$8 sps:$4 sm:$0xff]  }
  0x82   :  { %985 = vmatprep.subr.bf16.mxu0 %v1819_v42  ;;  %1285 = vmatpush1.bf16.msra.mxu1 %v1952_v15  ;;  %v1963_v42 = vld [vmem:[%s2655_s3 + $0xd4] ss:$8 sps:$4 sm:$0xff]  }
  0x83   :  { %1286 = vmatprep.subr.bf16.mxu1 %v1957_v16 }
  0x85   :  { %986 = vmatpush1.bf16.msra.mxu0 %v1817_v45  ;;  %v1964_v45 = vld [vmem:[%s2655_s3 + $0xe0] ss:$8 sps:$4 sm:$0xff]  }
  0x86   :  { %987 = vmatprep.subr.bf16.mxu0 %v1822_v46  ;;  %1287 = vmatpush1.bf16.msra.mxu1 %v1955_v19  ;;  %v1969_v46 = vld [vmem:[%s2655_s3 + $0xf4] ss:$8 sps:$4 sm:$0xff]   ;;  %s43_s3 = sld [smem:[#allocation2]]  ;;  %v1971_v19 = vld [vmem:[%s2657_s5] sm:$0xff]  }
  0x87   :  { %1288 = vmatprep.subr.bf16.mxu1 %v1960_v41 }
  0x89   :  { %988 = vmatpush1.bf16.msra.mxu0 %v1820_v51 }
  0x8a   :  { %989 = vmatprep.subr.bf16.mxu0 %v1828_v52  ;;  %1289 = vmatpush1.bf16.msra.mxu1 %v1958_v40 }
  0x8b   :  { %1290 = vmatprep.subr.bf16.mxu1 %v1963_v42 }
  0x8c   :  { %v1049_v47 = vstv %s43_s3 }
  0x8d   :  { %990 = vmatpush1.bf16.msra.mxu0 %v1826_v55  ;;  %v183_v55 = vlaneseq }
  0x8e   :  { %1002 = vmatprep.subr.bf16.mxu0 %v1834_v56  ;;  %1291 = vmatpush1.bf16.msra.mxu1 %v1961_v43 }
  0x8f   :  { %1292 = vmatprep.subr.bf16.mxu1 %v1966_v44  ;;  %v2580_v56 = vshrl.u32 %v183_v55, 7 }
  0x90   :  { %992 = vmatmul.mubr.bf16.vlgmr.msra.gmra.mrb[0].mxu0 %v1510_v60 }
  0x91   :  { %1003 = vmatpush1.bf16.msra.mxu0 %v1832_v62  ;;  %1034 = vmatprep.mubr.bf16.mxu0 %v1513_v63  ;;  %v185_v57 = vsub.s32 0, %v2580_v56  ;;  %v189_v59 = vsub.s32 1, %v2580_v56 }
  0x92   :  { %1004 = vmatprep.subr.bf16.mxu0 %v1840_v0  ;;  %1293 = vmatpush1.bf16.msra.mxu1 %v1964_v45 }
  0x93   :  { %1294 = vmatprep.subr.bf16.mxu1 %v1969_v46  ;;  %v186_v60 = vrot.slane %v181_v58, %v185_v57  ;;  %v190_v61 = vrot.slane %v181_v58, %v189_v59 }
  0x95   :  { %1005 = vmatpush1.bf16.msra.mxu0 %v1838_v1 }
  0x96   :  { %1006 = vmatprep.subr.bf16.mxu0 %v1846_v2  ;;  %1295 = vmatpush1.bf16.msra.mxu1 %v1967_v49 }
  0x97   :  { %1691 = vmatprep.subr.bf16.mxu1 %v1970_v50 }
  0x99   :  { %1007 = vmatpush1.bf16.msra.mxu0 %v1844_v5 }
  0x9a   :  { %1008 = vmatprep.subr.bf16.mxu0 %v1852_v6 }
  0x9d   :  { %1009 = vmatpush1.bf16.msra.mxu0 %v1850_v9 }
  0x9e   :  { %1010 = vmatprep.subr.bf16.mxu0 %v1858_v10 }
  0xa1   :  { %1011 = vmatpush1.bf16.msra.mxu0 %v1856_v13 }
  0xa2   :  { %1012 = vmatprep.subr.bf16.mxu0 %v1864_v14 }
  0xa5   :  { %1013 = vmatpush1.bf16.msra.mxu0 %v1862_v17 }
  0xa6   :  { %1014 = vmatprep.subr.bf16.mxu0 %v1870_v18 }
  0xa9   :  { %1015 = vmatpush1.bf16.msra.mxu0 %v1868_v20  ;;  %v1972_v20 = vld [vmem:[%s2657_s5 + $0x48] sm:$0xff]  }
  0xaa   :  { %1016 = vmatprep.subr.bf16.mxu0 %v1876_v21  ;;  %v1973_v21 = vld [vmem:[%s2657_s5 + $0x8] sm:$0xff]  }
  0xad   :  { %1017 = vmatpush1.bf16.msra.mxu0 %v1874_v22  ;;  %v1974_v22 = vld [vmem:[%s2657_s5 + $0x50] sm:$0xff]  }
  0xae   :  { %1018 = vmatprep.subr.bf16.mxu0 %v1882_v23  ;;  %v1975_v23 = vld [vmem:[%s2657_s5 + $0x10] sm:$0xff]  }
  0xb1   :  { %1019 = vmatpush1.bf16.msra.mxu0 %v1880_v24  ;;  %v1976_v24 = vld [vmem:[%s2657_s5 + $0x58] sm:$0xff]  }
  0xb2   :  { %1020 = vmatprep.subr.bf16.mxu0 %v1888_v25  ;;  %v1977_v25 = vld [vmem:[%s2657_s5 + $0x18] sm:$0xff]  }
  0xb5   :  { %1021 = vmatpush1.bf16.msra.mxu0 %v1886_v26  ;;  %v1978_v26 = vld [vmem:[%s2657_s5 + $0x60] sm:$0xff]  }
  0xb6   :  { %1022 = vmatprep.subr.bf16.mxu0 %v1894_v27  ;;  %v1979_v27 = vld [vmem:[%s2657_s5 + $0x20] sm:$0xff]  }
  0xb9   :  { %1023 = vmatpush1.bf16.msra.mxu0 %v1892_v28  ;;  %v1980_v28 = vld [vmem:[%s2657_s5 + $0x68] sm:$0xff]  }
  0xba   :  { %1024 = vmatprep.subr.bf16.mxu0 %v1900_v29  ;;  %v1981_v29 = vld [vmem:[%s2657_s5 + $0x28] sm:$0xff]  }
  0xbd   :  { %1025 = vmatpush1.bf16.msra.mxu0 %v1898_v30  ;;  %v1982_v30 = vld [vmem:[%s2657_s5 + $0x70] sm:$0xff]  }
  0xbe   :  { %1026 = vmatprep.subr.bf16.mxu0 %v1906_v31  ;;  %v1983_v31 = vld [vmem:[%s2657_s5 + $0x30] sm:$0xff]  }
  0xc1   :  { %1027 = vmatpush1.bf16.msra.mxu0 %v1904_v32  ;;  %v1984_v32 = vld [vmem:[%s2657_s5 + $0x78] sm:$0xff]  }
  0xc2   :  { %1028 = vmatprep.subr.bf16.mxu0 %v1912_v33  ;;  %v1985_v33 = vld [vmem:[%s2657_s5 + $0x38] sm:$0xff]  }
  0xc5   :  { %1029 = vmatpush1.bf16.msra.mxu0 %v1910_v34  ;;  %v1092_v34 = vld [vmem:[%s2656_s4] sm:$0x3] }
  0xc6   :  { %1030 = vmatprep.subr.bf16.mxu0 %v1918_v35  ;;  %v1097_v35 = vrot.slane %v1092_v34, %v185_v57 }
  0xc9   :  { %1031 = vmatpush1.bf16.msra.mxu0 %v1916_v36  ;;  %v1101_v36 = vrot.slane %v1092_v34, %v189_v59  ;;  %v1674_v59 = vld [vmem:[%s2658_s6] ss:$0 sm:$0xff] }
  0xca   :  { %1032 = vmatprep.subr.bf16.mxu0 %v1921_v37 }
  0xcd   :  { %1033 = vmatpush1.bf16.msra.mxu0 %v1919_v38  ;;  %v1311_v38 = vstv %s1505_s23 }
  0xd0   :  { %1035 = vmatmul.mubr.bf16.vlgmr.msra.gmra.mrb[0].mxu0 %v1512_v39 }
 0x12c   :  { %v907_v51 = vpop.f32.mrb[0].mxu1 }
 0x12d   :  { %v909_v52 = vpop.f32.mrb[1].mxu1  ;;  %v908_v62 = vadd.f32 %v907_v51, %v186_v60 }
 0x12e   :  { %v911_v53 = vpop.f32.mrb[2].mxu1  ;;  %v910_v63 = vadd.f32 %v909_v52, %v190_v61 }
 0x12f   :  { %v913_v54 = vpop.f32.mrb[3].mxu1  ;;  %v912_v48 = vadd.f32 %v911_v53, %v186_v60 }
 0x130   :  { %v914_v3 = vadd.f32 %v913_v54, %v190_v61 }
 0x1a3   :  { %v1036_v0 = vpop.f32.mrb[0].mxu0 }
 0x1a4   :  { %v1714_v1 = vadd.f32 %v1036_v0, %v908_v62  ;;  %v1038_v2 = vpop.f32.mrb[1].mxu0 }
 0x1a5   :  { %v1716_v4 = vadd.f32 %v1038_v2, %v910_v63  ;;  %v1040_v5 = vpop.f32.mrb[2].mxu0 }
 0x1a6   :  { %v1050_v6 = vmul.f32 %v1714_v1, %v1049_v47  ;;  %v1718_v7 = vadd.f32 %v1040_v5, %v912_v48  ;;  %v1042_v8 = vpop.f32.mrb[3].mxu0  ;;  %vm1045_vm0 = vcmp.ge.f32.partialorder %v1714_v1, 0.0 }
 0x1a7   :  { %v1051_v9 = vmul.f32 %v1716_v4, %v1049_v47  ;;  %v1720_v10 = vadd.f32 %v1042_v8, %v914_v3  ;;  %vm1046_vm1 = vcmp.ge.f32.partialorder %v1716_v4, 0.0 }
 0x1a8   :  { %vm1047_vm2 = vcmp.ge.f32.partialorder %v1718_v7, 0.0  ;;  %v1052_v11 = vmul.f32 %v1718_v7, %v1049_v47  ;;  %v1054_v13 = vsel %vm1045_vm0, %v1714_v1, %v1050_v6 }
 0x1a9   :  { %vm1048_vm3 = vcmp.ge.f32.partialorder %v1720_v10, 0.0  ;;  %v1053_v12 = vmul.f32 %v1720_v10, %v1049_v47  ;;  %v1055_v16 = vsel %vm1046_vm1, %v1716_v4, %v1051_v9 }
 0x1aa   :  { %v1056_v14 = vsel %vm1047_vm2, %v1718_v7, %v1052_v11 }
 0x1ab   :  { %v1058_v15 = vpack.c.bf16 %v1056_v14, %v1054_v13  ;;  %v1057_v17 = vsel %vm1048_vm3, %v1720_v10, %v1053_v12 }
 0x1ac   :  { %v1059_v18 = vpack.c.bf16 %v1057_v17, %v1055_v16 }
 0x1ae   :  { %1296 = vmatprep.mubr.bf16.mxu1 %v1059_v18 }
 0x1af   :  { %1297 = vmatmul.mubr.bf16.vlgmr.msra.gmra.mrb[4].mxu1 %v1058_v15 }
 0x1b0   :  { %1692 = vmatpush3.bf16.msra.mxu1 %v1971_v19 }
 0x1b1   :  { %1693 = vmatprep.subr.bf16.mxu1 %v1972_v20 }
 0x1b4   :  { %1694 = vmatpush3.bf16.msra.mxu1 %v1973_v21 }
 0x1b5   :  { %1695 = vmatprep.subr.bf16.mxu1 %v1974_v22 }
 0x1b8   :  { %1696 = vmatpush3.bf16.msra.mxu1 %v1975_v23 }
 0x1b9   :  { %1697 = vmatprep.subr.bf16.mxu1 %v1976_v24 }
 0x1bc   :  { %1698 = vmatpush3.bf16.msra.mxu1 %v1977_v25 }
 0x1bd   :  { %1699 = vmatprep.subr.bf16.mxu1 %v1978_v26 }
 0x1c0   :  { %1700 = vmatpush3.bf16.msra.mxu1 %v1979_v27 }
 0x1c1   :  { %1701 = vmatprep.subr.bf16.mxu1 %v1980_v28 }
 0x1c4   :  { %1702 = vmatpush3.bf16.msra.mxu1 %v1981_v29 }
 0x1c5   :  { %1703 = vmatprep.subr.bf16.mxu1 %v1982_v30 }
 0x1c8   :  { %1704 = vmatpush3.bf16.msra.mxu1 %v1983_v31 }
 0x1c9   :  { %1705 = vmatprep.subr.bf16.mxu1 %v1984_v32 }
 0x1cc   :  { %1706 = vmatpush3.bf16.msra.mxu1 %v1985_v33 }
 0x282   :  { %v1298_v37 = vpop.f32.mrb[4].mxu1 }
 0x283   :  { %v1299_v39 = vadd.f32 %v1298_v37, %v1097_v35  ;;  %v1300_v40 = vpop.f32.mrb[5].mxu1 }
 0x284   :  { %v1301_v41 = vadd.f32 %v1300_v40, %v1101_v36  ;;  %v1302_v42 = vpop.f32.mrb[6].mxu1 }
 0x285   :  { %v1312_v43 = vmul.f32 %v1311_v38, %v1299_v39  ;;  %v1303_v44 = vadd.f32 %v1302_v42, %v1097_v35  ;;  %v1304_v45 = vpop.f32.mrb[7].mxu1  ;;  %vm1307_vm4 = vcmp.ge.f32.partialorder %v1299_v39, 0.0 }
 0x286   :  { %v1313_v46 = vmul.f32 %v1311_v38, %v1301_v41  ;;  %v1305_v49 = vadd.f32 %v1304_v45, %v1101_v36  ;;  %vm1308_vm5 = vcmp.ge.f32.partialorder %v1301_v41, 0.0 }
 0x287   :  { %vm1309_vm6 = vcmp.ge.f32.partialorder %v1303_v44, 0.0  ;;  %v1314_v50 = vmul.f32 %v1311_v38, %v1303_v44  ;;  %v1316_v52 = vsel %vm1307_vm4, %v1299_v39, %v1312_v43 }
 0x288   :  { %vm1310_vm7 = vcmp.ge.f32.partialorder %v1305_v49, 0.0  ;;  %v1315_v51 = vmul.f32 %v1311_v38, %v1305_v49  ;;  %v1317_v55 = vsel %vm1308_vm5, %v1301_v41, %v1313_v46 }
 0x289   :  { %v1318_v53 = vsel %vm1309_vm6, %v1303_v44, %v1314_v50 }
 0x28a   :  { %v1320_v54 = vpack.c.bf16 %v1318_v53, %v1316_v52  ;;  %v1319_v56 = vsel %vm1310_vm7, %v1305_v49, %v1315_v51 }
 0x28b   :  { %v1321_v57 = vpack.c.bf16 %v1319_v56, %v1317_v55 }
 0x28d   :  { %1489 = vmatprep.mubr.bf16.mxu1 %v1321_v57 }
 0x28e   :  { %1490 = vmatmul.mubr.bf16.vlgmr.msra.gmra.mrb[8].mxu1 %v1320_v54 }
 0x361   :  { %v1707_v58 = vpop.f32.mrb[8].mxu1 }
 0x362   :  { %v1708_v60 = vpop.f32.mrb[9].mxu1 }
 0x363   :  { %v1709_v61 = vadd.f32 %v1708_v60, %v1707_v58  ;;  %v1710_v62 = vpop.f32.mrb[10].mxu1 }
 0x364   :  { %v1711_v63 = vpop.f32.mrb[11].mxu1 }
 0x365   :  { %v1492_v0 = vadd.f32 %v1709_v61, %v1674_v59  ;;  %v1712_v47 = vadd.f32 %v1711_v63, %v1710_v62 }
 0x367   :  { %1498 = vst [vmem:[%s2660_s8] sm:$0xff] %v1492_v0  ;;  %v1495_v48 = vadd.f32 %v1712_v47, %v1674_v59 }
 0x369   :  { %1499 = vst [vmem:[%s2660_s8 + $0x8] sm:$0xff] %v1495_v48 }
 0x36a   :  { %1504 = vsyncpa [#allocation3], 1 }

// kernel: embedding_net_forward.3
= control target key start
LH: loop header
LB: loop body
LE: loop exit
PB: predicated region body
PF: predicated region fallthrough
CT: control target
= control target key end

     0   :  { %s4448_s17 = smov 0   ;;  %s6210_s0 = inlined_call_operand.vmem [shape: bf16[2,4,1,226], index: 0, kind: input, shape index: {}]   ;;  %s6211_s1 = inlined_call_operand.vmem [shape: bf16[32,25], index: 1, kind: input, shape index: {}]   ;;  %s6212_s2 = inlined_call_operand.vmem [shape: f32[32,1], index: 2, kind: input, shape index: {}]   ;;  %s6213_s3 = inlined_call_operand.<no memory space> [shape: f32[1,1], index: 3, kind: input, shape index: {}]   ;;  %s6214_s4 = inlined_call_operand.vmem [shape: bf16[2,32,196], index: 4, kind: output, shape index: {}]  }
   0x1   :  { %9 = sst [smem:[#allocation3]] %s6213_s3 }
   0x2 LB: > { %s3920_s18 = sadd.s32 4294967295, %s4380_s17   ;;  %p3924_p0 = scmp.ge.s32.totalorder %s4380_s17, 1  ;;  %s4380_s17 = sphi %s4448_s17, %s15_s17  }
   0x3   : > { %p162_p1 = scmp.lt.s32.totalorder %s4380_s17, 3 }
   0x5   : > { %p163_p2 = pnand %p3924_p0, %p162_p1 }
   0x6   : > { %p187_p3 = scmp.lt.s32.totalorder (!%p163_p2), %s3920_s18, 1  ;;  %v209_v0 = vlaneseq (!%p163_p2)  ;;  %v4382_v1 = vmov (!%p163_p2), 1935823168   ;;  %vm214_vm0 = vcmask (!%p163_p2), 1040384   ;;  %vm6221_vm1 = vsmask.f32 (!%p163_p2), 256 }
   0x7   : > { %166 = sbr.rel (%p163_p2) target bundleno = 695 (0x2b7), region = 36  ;;  %v207_v2 = vunpack.c.l.s4 (!%p163_p2), %v4382_v1  ;;  %vm217_vm2 = vcmask (!%p163_p2), 552964   ;;  %vm6220_vm3 = vsmask.f32 (!%p163_p2), 4352  ;;  %vm4477_vm4 = vmand (!%p163_p2), %vm214_vm0, %vm6221_vm1  ;;  %s4383_s22 = smov (!%p163_p2), 68   ;;  %v6315_v24 = vmov (!%p163_p2), 0 }
   0x8   : > { %v210_v3 = vshrl.u32 (!%p163_p2), %v209_v0, 7  ;;  %vm219_vm5 = vmand (!%p163_p2), %vm217_vm2, %vm6220_vm3  ;;  %s4384_s23 = smov (!%p163_p2), 54   ;;  %v221_v19 = vld [vmem:[#allocation2] sm:$0x11] (!%p163_p2)  ;;  %s4385_s24 = smov (!%p163_p2), 66   ;;  %vm402_vm13 = vcmask (!%p163_p2), 1043459  }
   0x9   : > { %v208_v4 = vunpack.c.0.s8 (!%p163_p2), %v207_v2  ;;  %vm4503_vm6 = vmor (!%p163_p2), %vm219_vm5, %vm4477_vm4  ;;  %s4386_s25 = smov (!%p163_p2), 67   ;;  %s4387_s26 = smov (!%p163_p2), 53   ;;  %vm6219_vm7 = vsmask.f32 (!%p163_p2), 7938  ;;  %vm6218_vm8 = vsmask.f32 (!%p163_p2), 7954 }
   0xa   : > { %v6316_v24 = vsel (!%p163_p2), %vm4503_vm6, 4294967295, %v6315_v24  ;;  %s4388_s27 = smov (!%p163_p2), 52   ;;  %s4389_s28 = smov (!%p163_p2), 127   ;;  %vm4578_vm9 = vmand (!%p163_p2), %vm214_vm0, %vm6219_vm7  ;;  %vm6216_vm12 = vsmask.f32 (!%p163_p2), 7424  ;;  %vm405_vm14 = vcmask (!%p163_p2), 556039  }
   0xb   : > { %v4464_v5 = vsub.s32 (!%p163_p2), %v208_v4, %v210_v3  ;;  %s4390_s29 = smov (!%p163_p2), 126   ;;  %s4391_s30 = smov (!%p163_p2), 114   ;;  %vm248_vm10 = vmand (!%p163_p2), %vm217_vm2, %vm6218_vm8  ;;  %vm6229_vm15 = vsmask.f32 (!%p163_p2), 3328  ;;  %vm6215_vm5 = vsmask.f32 (!%p163_p2), 7966 }
   0xc   : > { %s4392_s5 = smov (!%p163_p2), 113   ;;  %s4393_s6 = smov (!%p163_p2), 112   ;;  %vm4607_vm11 = vmor (!%p163_p2), %vm248_vm10, %vm4578_vm9  ;;  %vm6217_vm9 = vsmask.f32 (!%p163_p2), 7950  ;;  %vm6224_vm8 = vcmask (!%p163_p2), 556032  }
   0xd   : > { %s4394_s7 = smov (!%p163_p2), 40   ;;  %s4395_s8 = smov (!%p163_p2), 39   ;;  %vm404_vm0 = vmand (!%p163_p2), %vm402_vm13, %vm6229_vm15 }
   0xe   : > { %s6716_s18 = smov (!%p187_p3, %s3920_s18), 1  ;;  %s4396_s9 = smov 100   ;;  %vm407_vm2 = vmand %vm405_vm14, %vm6216_vm12  ;;  %vm6236_vm12 = vsmask.f32 1280 }
   0xf   : > { %s3925_s3 = sshll.u32 %s6716_s18, 3  ;;  %s4397_s10 = smov 99   ;;  %vm4710_vm4 = vmor %vm407_vm2, %vm404_vm0 }
  0x10   : > { %s4462_s21 = scalar_lea.vmem %s6210_s0, %s3925_s3  ;;  %s4398_s11 = smov 38   ;;  %vm438_vm10 = vmand %vm402_vm13, %vm6217_vm9  ;;  %vm6227_vm13 = vcmask 1040928   ;;  %vm6223_vm9 = vcmask 58369  }
  0x11   : > { %v3964_v6 = vld.sshfl [vmem:[%s4462_s21 + $0x2] sm:$0x5 pattern:$0x73625140]  ;;  %vm440_vm0 = vmand %vm405_vm14, %vm6215_vm5  ;;  %s4399_s12 = smov 8   ;;  %s4400_s13 = smov 7  }
  0x12   : > { %v4468_v7 = vrot.slane %v3964_v6, %v4464_v5  ;;  %v1255_v8 = vcombine.low %v3964_v6, %v3964_v6  ;;  %v4471_v9 = vld.sshfl [vmem:[%s4462_s21 + $0x4] sm:$0x5 pattern:$0x73625140]  ;;  %vm4766_vm2 = vmor %vm440_vm0, %vm438_vm10  ;;  %s4401_s14 = smov 6   ;;  %s4402_s15 = smov 122  }
  0x13   : > { %v4329_v10 = vld [vmem:[%s4462_s21 + $0x2] ss:$0 sps:$4 sm:$0x33]   ;;  %v4330_v11 = vld [vmem:[%s4462_s21 + $0x4] ss:$0 sps:$4 sm:$0x33]   ;;  %v4488_v14 = vrot.slane %v4471_v9, %v4464_v5  ;;  %v1501_v52 = vcombine.low %v4471_v9, %v4471_v9  ;;  %vm921_vm10 = vmand %vm6227_vm13, %vm6221_vm1 }
  0x14   : > { %913 = vrot.lane.b32.xlu0 %v4468_v7, %s4383_s22  ;;  %v4484_v13 = vrot.slane %v1255_v8, %v4464_v5  ;;  %v4331_v15 = vld [vmem:[%s4462_s21 + $0x2] ss:$0 sps:$4 sm:$0x33]   ;;  %v1051_v16 = vrot.slane %v4329_v10, %v4464_v5  ;;  %v1123_v17 = vrot.slane %v4330_v11, %v4464_v5  ;;  %v4333_v29 = vld [vmem:[%s4462_s21] ss:$0 sps:$4 sm:$0x33]  }
  0x15   : > { %v4332_v18 = vld [vmem:[%s4462_s21 + $0x2] ss:$0 sps:$4 sm:$0x33]   ;;  %v1318_v25 = vrot.slane %v4331_v15, %v4464_v5  ;;  %v328_v34 = vrot.slane %v4333_v29, %v4464_v5  ;;  %v4335_v35 = vld [vmem:[%s4462_s21] ss:$0 sps:$4 sm:$0x33]   ;;  %v4589_v6 = vrot.slane %v1501_v52, %v4464_v5 }
  0x16   : > { %1263 = vrot.lane.b32.xlu1 %v4484_v13, %s4384_s23  ;;  %v1058_v20 = vrot.slane %v1051_v16, %v4464_v5  ;;  %v1124_v21 = vcombine.low %v1123_v17, %v1123_v17  ;;  %v1380_v22 = vrot.slane %v4332_v18, %v4464_v5  ;;  %v3931_v23 = vld.sshfl [vmem:[%s4462_s21] sm:$0x5 pattern:$0x73625140]  ;;  %v613_v40 = vrot.slane %v4335_v35, %v4464_v5  ;;  %s4403_s16 = smov 121   ;;  %s4404_s3 = smov 120  }
  0x17   : > { %v4511_v26 = vrot.slane %v3931_v23, %v4464_v5  ;;  %v1325_v31 = vrot.slane %v1318_v25, %v4464_v5  ;;  %v262_v32 = vcombine.low %v3931_v23, %v3931_v23  ;;  %v4334_v37 = vld [vmem:[%s4462_s21] ss:$0 sps:$4 sm:$0x33]   ;;  %v335_v39 = vrot.slane %v328_v34, %v4464_v5  ;;  %v4337_v43 = vld [vmem:[%s4462_s21 + $0x2] ss:$0 sps:$4 sm:$0x33]  }
  0x18   : > { %1203 = vrot.lane.b32.xlu0 %v4488_v14, %s4385_s24  ;;  %v1131_v27 = vrot.slane %v1124_v21, %v4464_v5  ;;  %v1381_v28 = vcombine.low %v1380_v22, %v1380_v22  ;;  %v4532_v38 = vld.sshfl [vmem:[%s4462_s21 + $0x6] sm:$0x5 pattern:$0x73625140]  ;;  %v559_v42 = vrot.slane %v4334_v37, %v4464_v5  ;;  %v614_v46 = vcombine.low %v613_v40, %v613_v40  ;;  %s4405_s19 = smov 108   ;;  %s4406_s20 = smov 107  }
  0x19   : > { %v222_v30 = vsel %vm4503_vm6, %v4511_v26, %v221_v19  ;;  %v4528_v36 = vrot.slane %v262_v32, %v4464_v5  ;;  %v4541_v41 = vrot.slane %v4532_v38, %v4464_v5  ;;  %v4340_v44 = vld [vmem:[%s4462_s21 + $0x4] ss:$0 sps:$4 sm:$0x33]   ;;  %v4341_v45 = vld [vmem:[%s4462_s21 + $0x2] ss:$0 sps:$4 sm:$0x33]   ;;  %v1625_v53 = vrot.slane %v4337_v43, %v4464_v5 }
  0x1a   : > { %1059 = vrot.lane.b32.xlu1 %v1058_v20, %s4385_s24  ;;  %223 = vst [vmem:[#allocation2] sm:$0x11] %v222_v30  ;;  %v1388_v33 = vrot.slane %v1381_v28, %v4464_v5  ;;  %v4342_v47 = vld [vmem:[%s4462_s21 + $0x4] ss:$0 sps:$4 sm:$0x33]   ;;  %v566_v50 = vrot.slane %v559_v42, %v4464_v5  ;;  %v621_v54 = vrot.slane %v614_v46, %v4464_v5  ;;  %v6319_v19 = vmov 0 }
  0x1b   : > { %v4336_v48 = vld [vmem:[%s4462_s21 + $0x2] ss:$0 sps:$4 sm:$0x33]   ;;  %v4343_v49 = vld [vmem:[%s4462_s21 + $0x4] ss:$0 sps:$4 sm:$0x33]   ;;  %v1838_v55 = vrot.slane %v4340_v44, %v4464_v5  ;;  %v1901_v56 = vrot.slane %v4341_v45, %v4464_v5  ;;  %v2069_v57 = vrot.slane %v4342_v47, %v4464_v5  ;;  %v1626_v8 = vcombine.low %v1625_v53, %v1625_v53 }
  0x1c   : > { %986 = vrot.lane.b32.xlu0 %v4484_v13, %s4386_s25  ;;  %v4344_v51 = vld [vmem:[%s4462_s21 + $0x4] ss:$0 sps:$4 sm:$0x33]   ;;  %v1562_v59 = vrot.slane %v4336_v48, %v4464_v5  ;;  %v2122_v60 = vrot.slane %v4343_v49, %v4464_v5  ;;  %v4339_v9 = vld [vmem:[%s4462_s21] ss:$0 sps:$4 sm:$0x33]   ;;  %v719_v23 = vcombine.low %v4532_v38, %v4532_v38 }
  0x1d   : > { %v4345_v58 = vld [vmem:[%s4462_s21 + $0x4] ss:$0 sps:$4 sm:$0x33]   ;;  %v2283_v61 = vrot.slane %v4344_v51, %v4464_v5  ;;  %v4570_v62 = vrot.slane %v1838_v55, %v4464_v5  ;;  %v1902_v63 = vcombine.low %v1901_v56, %v1901_v56  ;;  %v4573_v0 = vrot.slane %v2069_v57, %v4464_v5  ;;  %v4338_v12 = vld [vmem:[%s4462_s21] ss:$0 sps:$4 sm:$0x33]  }
  0x1e   : > { %1132 = vrot.lane.b32.xlu1 %v1131_v27, %s4386_s25  ;;  %v2336_v1 = vrot.slane %v4345_v58, %v4464_v5  ;;  %v2123_v3 = vcombine.low %v2122_v60, %v2122_v60  ;;  %v1569_v17 = vrot.slane %v1562_v59, %v4464_v5  ;;  %v6320_v19 = vsel %vm4607_vm11, 4294967295, %v6319_v19  ;;  %v4346_v20 = vld [vmem:[%s4462_s21 + $0x6] ss:$0 sps:$4 sm:$0x33]  }
  0x1f   : > { %v4583_v4 = vrot.slane %v2283_v61, %v4464_v5  ;;  %v4593_v10 = vrot.slane %v1902_v63, %v4464_v5  ;;  %v4613_v21 = vshll.u32 %v4468_v7, 16  ;;  %v1633_v22 = vrot.slane %v1626_v8, %v4464_v5  ;;  %v4347_v28 = vld [vmem:[%s4462_s21] ss:$0 sps:$4 sm:$0x33]  }
  0x20   : > { %1326 = vrot.lane.b32.xlu0 %v1325_v31, %s4387_s26  ;;  %v2337_v11 = vcombine.low %v2336_v1, %v2336_v1  ;;  %v4597_v15 = vrot.slane %v2123_v3, %v4464_v5  ;;  %v826_v25 = vrot.slane %v4339_v9, %v4464_v5  ;;  %v772_v29 = vrot.slane %v4338_v12, %v4464_v5  ;;  %v4349_v46 = vld [vmem:[%s4462_s21 + $0x6] ss:$0 sps:$4 sm:$0x33]   ;;  %v409_v9 = vld [vmem:[#allocation2] sm:$0x88] }
  0x21   : > { %v250_v16 = vld [vmem:[#allocation2] sm:$0x11]  ;;  %v4627_v30 = vshll.u32 %v4541_v41, 16  ;;  %v2553_v31 = vrot.slane %v4346_v20, %v4464_v5  ;;  %v2623_v32 = vrot.slane %v4347_v28, %v4464_v5  ;;  %v4634_v34 = vrot.slane %v719_v23, %v4464_v5  ;;  %v4350_v58 = vld [vmem:[%s4462_s21 + $0x6] ss:$0 sps:$4 sm:$0x33]  }
  0x22   : > { %1389 = vrot.lane.b32.xlu1 %v1388_v33, %s4388_s27  ;;  %v4603_v18 = vrot.slane %v2337_v11, %v4464_v5  ;;  %v251_v27 = vsel %vm4607_vm11, %v4613_v21, %v250_v16  ;;  %v4348_v33 = vld [vmem:[%s4462_s21 + $0x6] ss:$0 sps:$4 sm:$0x33]   ;;  %v827_v35 = vcombine.low %v826_v25, %v826_v25  ;;  %v4637_v37 = vshll.u32 %v4511_v26, 16 }
  0x23   : > { %252 = vst [vmem:[#allocation2] sm:$0x11] %v251_v27  ;;  %v4640_v38 = vrot.slane %v2553_v31, %v4464_v5  ;;  %v2815_v40 = vrot.slane %v4348_v33, %v4464_v5  ;;  %v779_v42 = vrot.slane %v772_v29, %v4464_v5  ;;  %v1170_v43 = vrot.slane %v4627_v30, 5  ;;  %v4351_v63 = vld [vmem:[%s4462_s21 + $0x6] ss:$0 sps:$4 sm:$0x33]  }
  0x24   : > { %270 = vrot.lane.b32.xlu0 %v4528_v36, %s4389_s28  ;;  %v834_v47 = vrot.slane %v827_v35, %v4464_v5  ;;  %v1024_v48 = vrot.slane %v4637_v37, 7  ;;  %v2876_v49 = vrot.slane %v4349_v46, %v4464_v5  ;;  %v1097_v53 = vrot.slane %v4627_v30, 6  ;;  %v4352_v1 = vld [vmem:[%s4462_s21 + $0x6] ss:$0 sps:$4 sm:$0x33]  }
  0x25   : > { %v4651_v45 = vrot.slane %v2815_v40, %v4464_v5  ;;  %v4662_v51 = vpack.i.bf16 %v1170_v43, %v4637_v37  ;;  %v4674_v57 = vshll.u32 %v4488_v14, 16  ;;  %v1540_v59 = vrot.slane %v4627_v30, 7  ;;  %v4049_v23 = vld.sshfl [vmem:[%s4462_s21 + $0x2] sm:$0x5 pattern:$0x73625140] }
  0x26   : > { %336 = vrot.lane.b32.xlu1 %v335_v39, %s4390_s29  ;;  %v2624_v39 = vcombine.low %v2623_v32, %v2623_v32  ;;  %v2877_v55 = vcombine.low %v2876_v49, %v2876_v49  ;;  %v4177_v56 = vpack.i.bf16 %v4627_v30, %v1024_v48  ;;  %v392_v61 = vrot.slane %v4350_v58, %v4464_v5 }
  0x27   : > { %v3061_v3 = vrot.slane %v4351_v63, %v4464_v5  ;;  %v305_v8 = vrot.slane %v4613_v21, 7  ;;  %v3122_v11 = vrot.slane %v4352_v1, %v4464_v5  ;;  %v2593_v28 = vrot.slane %v4049_v23, %v4464_v5 }
  0x28   : > { %461 = vrot.lane.b32.xlu0 %v4541_v41, %s4389_s28  ;;  %v4648_v44 = vrot.slane %v2624_v39, %v4464_v5  ;;  %v4679_v60 = vrot.slane %v2877_v55, %v4464_v5  ;;  %v393_v2 = vcombine.low %v392_v61, %v392_v61  ;;  %v595_v40 = vrot.slane %v4613_v21, 6 }
  0x29   : > { %v3123_v27 = vcombine.low %v3122_v11, %v3122_v11  ;;  %v4722_v33 = vshll.u32 %v2593_v28, 16  ;;  %v1665_v61 = vrot.slane %v4637_v37, 5  ;;  %v754_v63 = vrot.slane %v4674_v57, 7 }
  0x2a   : > { %513 = vrot.lane.b32.xlu1 %v4528_v36, %s4391_s30  ;;  %v400_v20 = vrot.slane %v393_v2, %v4464_v5  ;;  %v863_v1 = vrot.slane %v4613_v21, 5  ;;  %vm6225_vm14 = vcmask 1044484   ;;  %vm6222_vm0 = vcmask 57344   ;;  %v1273_v21 = vld [vmem:[#allocation2 + $0x28] sm:$0x2] }
  0x2b   : > { %v4720_v32 = vrot.slane %v3123_v27, %v4464_v5  ;;  %vm4797_vm5 = vmand %vm6225_vm14, %vm6220_vm3  ;;  %vm6230_vm14 = vcmask 60419   ;;  %vm6235_vm13 = vcmask 1041409  }
  0x2c   : > { %567 = vrot.lane.b32.xlu0 %v566_v50, %s4392_s5  ;;  %v4038_v50 = vld.sshfl [vmem:[%s4462_s21 + $0x4] sm:$0x5 pattern:$0x73625140]  ;;  %v410_v29 = vsel %vm4710_vm4, %v400_v20, %v409_v9  ;;  %vm4803_vm7 = vmand %vm6222_vm0, %vm6221_vm1  ;;  %vm6231_vm0 = vsmask.f32 2304 }
  0x2d   : > { %v4665_v52 = vrot.slane %v4038_v50, %v4464_v5  ;;  %411 = vst [vmem:[#allocation2] sm:$0x88] %v410_v29  ;;  %v4736_v50 = vld.sshfl [vmem:[%s4462_s21 + $0x6] sm:$0x5 pattern:$0x73625140]  ;;  %vm4812_vm3 = vmor %vm4797_vm5, %vm921_vm10 }
  0x2e   : > { %622 = vrot.lane.b32.xlu1 %v621_v54, %s4393_s6  ;;  %v1357_v54 = vrot.slane %v4637_v37, 6  ;;  %s4407_s21 = smov 98   ;;  %vm4818_vm1 = vmand %vm6223_vm9, %vm6236_vm12  ;;  %vm6226_vm10 = vcmask 59394   ;;  %vm6228_vm9 = vcmask 539648   ;;  %v1075_v9 = vld [vmem:[#allocation2 + $0xc] sm:$0x4] }
  0x2f   : > { %v4693_v12 = vshll.u32 %v4665_v52, 16  ;;  %v1002_v20 = vld [vmem:[#allocation2 + $0xc] sm:$0x2] }
  0x30   : > { %1449 = vrot.lane.b32.xlu0 %v4488_v14, %s4387_s26  ;;  %v4700_v16 = vpack.i.bf16 %v1540_v59, %v1357_v54 }
  0x31   : > { %v2793_v31 = vrot.slane %v4693_v12, 7  ;;  %v2854_v35 = vrot.slane %v4693_v12, 6  ;;  %v3162_v49 = vrot.slane %v4693_v12, 5 }
  0x32   : > { %1509 = vrot.lane.b32.xlu1 %v4589_v6, %s4388_s27 }
  0x33   : > { %v4730_v46 = vpack.i.bf16 %v2854_v35, %v4722_v33  ;;  %v1148_v35 = vld [vmem:[#allocation2 + $0xc] sm:$0x8] }
  0x34   : > { %1570 = vrot.lane.b32.xlu0 %v1569_v17, %s4394_s7  ;;  %v431_v17 = vrot.slane %v4674_v57, 5 }
  0x36   : > { %1634 = vrot.lane.b32.xlu1 %v1633_v22, %s4395_s8  ;;  %v4707_v22 = vrot.slane %v3061_v3, %v4464_v5  ;;  %v4192_v39 = vpack.i.bf16 %v431_v17, %v305_v8 }
  0x38   : > { %675 = vrot.lane.b32.xlu0 %v4541_v41, %s4391_s30 }
  0x3a   : > { %727 = vrot.lane.b32.xlu1 %v4634_v34, %s4392_s5 }
  0x3c   : > { %780 = vrot.lane.b32.xlu0 %v779_v42, %s4396_s9  ;;  %v2669_v42 = vrot.slane %v4722_v33, 5 }
  0x3e   : > { %835 = vrot.lane.b32.xlu1 %v834_v47, %s4397_s10  ;;  %v3039_v47 = vrot.slane %v4722_v33, 7  ;;  %v4742_v55 = vpack.i.bf16 %v2793_v31, %v2669_v42 }
  0x40   : > { %4173 = vrot.lane.b32.xlu0 %v4662_v51, %s4386_s25  ;;  %v4747_v58 = vpack.i.bf16 %v3162_v49, %v3039_v47  ;;  %s4411_s25 = smov 74   ;;  %v1335_v47 = vld [vmem:[#allocation2 + $0x28] sm:$0x4] }
  0x42   : > { %4178 = vrot.lane.b32.xlu1 %v4177_v56, %s4385_s24  ;;  %s4410_s24 = smov 75  }
  0x44   : > { %1098 = vrot.lane.b32.xlu0 %v1097_v53, %s4383_s22  ;;  %s4408_s22 = smov 106  }
  0x46   : > { %4183 = vrot.lane.b32.xlu1 %v4177_v56, %s4387_s26  ;;  %v3190_v56 = vrot.slane %v4736_v50, %v4464_v5  ;;  %s4412_s26 = smov 61   ;;  %v6393_v50 = vmov 0 }
  0x48   : > { %4188 = vrot.lane.b32.xlu0 %v4700_v16, %s4388_s27 }
  0x4a   : > { %1421 = vrot.lane.b32.xlu1 %v1170_v43, %s4384_s23  ;;  %v4202_v43 = vpack.i.bf16 %v4674_v57, %v595_v40  ;;  %s4409_s23 = smov 76  }
  0x4c   : > { %4193 = vrot.lane.b32.xlu0 %v4192_v39, %s4389_s28  ;;  %s4413_s28 = smov 60  }
  0x4e   : > { %488 = vrot.lane.b32.xlu1 %v4674_v57, %s4390_s29  ;;  %s4414_s29 = smov 62  }
  0x50   : > { %4198 = vrot.lane.b32.xlu0 %v4192_v39, %s4391_s30  ;;  %s4415_s30 = smov 47  }
  0x52   : > { %4203 = vrot.lane.b32.xlu1 %v4202_v43, %s4392_s5  ;;  %s4416_s5 = smov 46  }
  0x54   : > { %1603 = vrot.lane.b32.xlu0 %v1357_v54, %s4395_s8  ;;  %v6323_v54 = vmov 0 }
  0x55   : > { %v6324_v54 = vsel %vm4766_vm2, 4294967295, %v6323_v54 }
  0x56   : > { %1666 = vrot.lane.b32.xlu1 %v1665_v61, %s4398_s11 }
  0x58   : > { %755 = vrot.lane.b32.xlu0 %v754_v63, %s4393_s6  ;;  %v1398_v63 = vld [vmem:[#allocation2 + $0x28] sm:$0x8]  ;;  %s4418_s6 = smov 48  }
  0x5a   : > { %809 = vrot.lane.b32.xlu1 %v595_v40, %s4396_s9 }
  0x5c   : > { %864 = vrot.lane.b32.xlu0 %v863_v1, %s4397_s10 }
  0x5e   : > { %1723 = vrot.lane.b32.xlu1 %v4488_v14, %s4399_s12  ;;  %v4212_v14 = vpack.i.bf16 %v1097_v53, %v1665_v61  ;;  %v1643_v61 = vld [vmem:[#allocation2 + $0x44] sm:$0x8] }
  0x60   : > { %1784 = vrot.lane.b32.xlu0 %v4589_v6, %s4400_s13 }
  0x62   : > { %1846 = vrot.lane.b32.xlu1 %v4570_v62, %s4401_s14  ;;  %v6327_v62 = vmov 0 }
  0x63   : > { %v6328_v62 = vsel %vm4803_vm7, 4294967295, %v6327_v62 }
  0x64   : > { %1910 = vrot.lane.b32.xlu0 %v4593_v10, %s4402_s15 }
  0x66   : > { %1971 = vrot.lane.b32.xlu1 %v4468_v7, %s4403_s16 }
  0x68   : > { %2024 = vrot.lane.b32.xlu0 %v4589_v6, %s4402_s15  ;;  %v6329_v6 = vmov 0 }
  0x69   : > { %v6330_v6 = vsel %vm4812_vm3, 4294967295, %v6329_v6 }
  0x6a   : > { %2077 = vrot.lane.b32.xlu1 %v4573_v0, %s4403_s16  ;;  %v930_v0 = vld [vmem:[#allocation2 + $0xc] sm:$0x1] }
  0x6c   : > { %2131 = vrot.lane.b32.xlu0 %v4597_v15, %s4404_s3  ;;  %v925_v15 = vld [vmem:[#allocation2 + $0x4] sm:$0x11] }
  0x6e   : > { %2184 = vrot.lane.b32.xlu1 %v4468_v7, %s4405_s19 }
  0x70   : > { %2237 = vrot.lane.b32.xlu0 %v4484_v13, %s4406_s20  ;;  %v6325_v13 = vmov 0 }
  0x71   : > { %v6326_v13 = vsel %vm4797_vm5, 4294967295, %v6325_v13  ;;  %vm6340_vm5 = vcmask 553989  }
  0x72   : > { %2291 = vrot.lane.b32.xlu1 %v4583_v4, %s4405_s19 }
  0x74   : > { %2345 = vrot.lane.b32.xlu0 %v4603_v18, %s4406_s20 }
  0x76   : > { %888 = vrot.lane.b32.xlu1 %v4511_v26, %s4407_s21  ;;  %s3542_s21 = sld [smem:[#allocation3]] }
  0x78   : > { %1756 = vrot.lane.b32.xlu0 %v4627_v30, %s4399_s12 }
  0x7a   : > { %1818 = vrot.lane.b32.xlu1 %v1540_v59, %s4400_s13  ;;  %v1212_v59 = vld [vmem:[#allocation2 + $0x28] sm:$0x1] }
  0x7c   : > { %4208 = vrot.lane.b32.xlu0 %v4700_v16, %s4402_s15 }
  0x7e   : > { %4213 = vrot.lane.b32.xlu1 %v4212_v14, %s4403_s16 }
  0x80   : > { %1998 = vrot.lane.b32.xlu0 %v4637_v37, %s4404_s3 }
  0x82   : > { %4218 = vrot.lane.b32.xlu1 %v4212_v14, %s4405_s19 }
  0x84   : > { %4223 = vrot.lane.b32.xlu0 %v4662_v51, %s4406_s20 }
  0x86   : > { %v914_v4 = vpop.permute.xlu0 %913  ;;  %2265 = vrot.lane.b32.xlu1 %v1024_v48, %s4408_s22 }
  0x87   : > { %v915_v10 = vrot.slane %v914_v4, 4 }
  0x88   : > { %v4822_v30 = vpop.permute.xlu1 %1263  ;;  %1695 = vrot.lane.b32.xlu0 %v4468_v7, %s4398_s11 }
  0x89   : > { %v917_v37 = vsel %vm6224_vm8, %v915_v10, %v914_v4  ;;  %v931_v48 = vsel %vm4803_vm7, %v915_v10, %v930_v0  ;;  %v6281_v51 = vrot.slane %v4822_v30, 4  ;;  %vm4839_vm8 = vmand %vm6226_vm10, %vm6231_vm0 }
  0x8a   : > { %v926_v53 = vsel %vm4812_vm3, %v917_v37, %v925_v15  ;;  %932 = vst [vmem:[#allocation2 + $0xc] sm:$0x1] %v931_v48  ;;  %v1204_v2 = vpop.permute.xlu0 %1203  ;;  %2421 = vrot.lane.b32.xlu1 %v4541_v41, %s4409_s23  ;;  %vm4864_vm10 = vmand %vm6230_vm14, %vm6229_vm15  ;;  %vm6339_vm14 = vsmask.f32 5376  ;;  %vm6240_vm15 = vcmask 1039360   ;;  %v6377_v15 = vmov 0 }
  0x8b   : > { %927 = vst [vmem:[#allocation2 + $0x4] sm:$0x11] %v926_v53  ;;  %v1274_v7 = vsel %vm4818_vm1, %v6281_v51, %v1273_v21  ;;  %v1205_v3 = vrot.slane %v1204_v2, 4  ;;  %vm4888_vm0 = vmand %vm6235_vm13, %vm6236_vm12  ;;  %vm6341_vm13 = vsmask.f32 2304  ;;  %vm6342_vm12 = vcmask 1042434  }
  0x8c   : > { %1275 = vst [vmem:[#allocation2 + $0x28] sm:$0x2] %v1274_v7  ;;  %v4843_v11 = vpop.permute.xlu1 %1059  ;;  %2491 = vrot.lane.b32.xlu0 %v4634_v34, %s4410_s24  ;;  %vm281_vm3 = vmand %vm6340_vm5, %vm6339_vm14  ;;  %vm6345_vm5 = vsmask.f32 6400  ;;  %vm6346_vm14 = vcmask 555014  }
  0x8d   : > { %v4848_v41 = vsel %vm6228_vm9, %v1205_v3, %v1204_v2  ;;  %v1213_v16 = vsel %vm4803_vm7, %v1205_v3, %v1212_v59  ;;  %v1061_v17 = vrot.slane %v4843_v11, 4  ;;  %vm4905_vm9 = vmand %vm6342_vm12, %vm6341_vm13  ;;  %v283_v21 = vld [vmem:[#allocation2] sm:$0x22]  ;;  %vm6239_vm13 = vcmask 1031168   ;;  %v349_v59 = vld [vmem:[#allocation2] sm:$0x44] }
  0x8e   : > { %1214 = vst [vmem:[#allocation2 + $0x28] sm:$0x1] %v1213_v16  ;;  %v4853_v23 = vpop.permute.xlu0 %986  ;;  %2561 = vrot.lane.b32.xlu1 %v4640_v38, %s4411_s25  ;;  %vm347_vm11 = vmand %vm6346_vm14, %vm6345_vm5 }
  0x8f   : > { %v1076_v27 = vsel %vm4839_vm8, %v1061_v17, %v1075_v9  ;;  %v988_v28 = vrot.slane %v4853_v23, 4  ;;  %vm4919_vm12 = vmor %vm281_vm3, %vm4888_vm0  ;;  %vm6241_vm3 = vsmask.f32 7946  ;;  %v466_v9 = vld [vmem:[#allocation2 + $0x1c] sm:$0x11] }
  0x90   : > { %1077 = vst [vmem:[#allocation2 + $0xc] sm:$0x4] %v1076_v27  ;;  %v4868_v39 = vpop.permute.xlu1 %1132  ;;  %2632 = vrot.lane.b32.xlu0 %v4648_v44, %s4412_s26  ;;  %vm4928_vm5 = vmor %vm347_vm11, %vm4905_vm9  ;;  %vm6243_vm0 = vsmask.f32 7962  ;;  %vm6351_vm9 = vcmask 1042434   ;;  %vm6354_vm11 = vcmask 555014  }
  0x91   : > { %v1003_v38 = vsel %vm4818_vm1, %v988_v28, %v1002_v20  ;;  %v6282_v40 = vrot.slane %v4868_v39, 4  ;;  %vm4944_vm14 = vmand %vm6351_vm9, %vm6241_vm3  ;;  %vm6357_vm9 = vcmask 932864   ;;  %vm6242_vm3 = vcmask 916480  }
  0x92   : > { %1004 = vst [vmem:[#allocation2 + $0xc] sm:$0x2] %v1003_v38  ;;  %v4877_v49 = vpop.permute.xlu0 %1326  ;;  %2701 = vrot.lane.b32.xlu1 %v4511_v26, %s4413_s28 }
  0x93   : > { %v1149_v44 = vsel %vm4864_vm10, %v6282_v40, %v1148_v35  ;;  %v6277_v43 = vrot.slane %v4877_v49, 4  ;;  %v519_v35 = vld [vmem:[#allocation2 + $0x1c] sm:$0x22] }
  0x94   : > { %1150 = vst [vmem:[#allocation2 + $0xc] sm:$0x8] %v1149_v44  ;;  %v4892_v1 = vpop.permute.xlu1 %1389  ;;  %2762 = vrot.lane.b32.xlu0 %v4634_v34, %s4414_s29 }
  0x95   : > { %v1336_v14 = vsel %vm4839_vm8, %v6277_v43, %v1335_v47  ;;  %v6280_v0 = vrot.slane %v4892_v1, 4 }
  0x96   : > { %1337 = vst [vmem:[#allocation2 + $0x28] sm:$0x4] %v1336_v14  ;;  %2823 = vrot.lane.b32.xlu1 %v4651_v45, %s4412_s26  ;;  %v271_v34 = vpop.permute.xlu0 %270  ;;  %v573_v14 = vld [vmem:[#allocation2 + $0x1c] sm:$0x44] }
  0x97   : > { %v1399_v10 = vsel %vm4864_vm10, %v6280_v0, %v1398_v63  ;;  %v272_v37 = vrot.slane %v271_v34, 4 }
  0x98   : > { %1400 = vst [vmem:[#allocation2 + $0x28] sm:$0x8] %v1399_v10  ;;  %v337_v45 = vpop.permute.xlu1 %336  ;;  %2885 = vrot.lane.b32.xlu0 %v4679_v60, %s4413_s28 }
  0x99   : > { %v274_v48 = vsel %vm6240_vm15, %v271_v34, %v272_v37  ;;  %v338_v2 = vrot.slane %v337_v45, 4  ;;  %v6258_v34 = vmov 0  }
  0x9a   : > { %v284_v7 = vsel %vm4919_vm12, %v274_v48, %v283_v21  ;;  %2397 = vrot.lane.b32.xlu1 %v4665_v52, %s4408_s22  ;;  %v462_v3 = vpop.permute.xlu0 %461  ;;  %3362 = vmatprep.mubr.bf16.mxu0 %v6258_v34  ;;  %v372_v21 = vrot.slane %v4674_v57, 6  ;;  %v1458_v57 = vld [vmem:[#allocation2 + $0x44] sm:$0x1] }
  0x9b   : > { %285 = vst [vmem:[#allocation2] sm:$0x22] %v284_v7  ;;  %v340_v60 = vsel %vm6239_vm13, %v337_v45, %v338_v2  ;;  %v463_v16 = vrot.slane %v462_v3, 4  ;;  %vm6244_vm13 = vcmask 924672   ;;  %3415 = vmatprep.mubr.bf16.mxu1 %v6258_v34  ;;  %4247 = vset.pattern.permute.xlu1 %v6258_v34  ;;  %v628_v45 = vld [vmem:[#allocation2 + $0x1c] sm:$0x88] }
  0x9c   : > { %v350_v20 = vsel %vm4928_vm5, %v340_v60, %v349_v59  ;;  %v514_v27 = vpop.permute.xlu1 %513  ;;  %2946 = vrot.lane.b32.xlu0 %v4511_v26, %s4415_s30  ;;  %v6358_v59 = vmov 0  ;;  %v1184_v5 = vld [vmem:[#allocation2 + $0xc] sm:$0x8] }
  0x9d   : > { %351 = vst [vmem:[#allocation2] sm:$0x44] %v350_v20  ;;  %v464_v52 = vsel %vm6240_vm15, %v462_v3, %v463_v16  ;;  %v515_v38 = vrot.slane %v514_v27, 4  ;;  %vm4954_vm15 = vmand %vm6354_vm11, %vm6243_vm0  ;;  %4248 = vset.pattern.permute.xlu0 %v6258_v34  ;;  %v1518_v16 = vld [vmem:[#allocation2 + $0x44] sm:$0x2] }
  0x9e   : > { %v467_v44 = vsel %vm4503_vm6, %v464_v52, %v466_v9  ;;  %3007 = vrot.lane.b32.xlu1 %v4528_v36, %s4416_s5  ;;  %v568_v26 = vpop.permute.xlu0 %567  ;;  %vm4973_vm11 = vmor %vm4954_vm15, %vm4944_vm14  ;;  %vm6246_vm15 = vcmask 1042978   ;;  %vm6245_vm14 = vcmask 1046534   ;;  %vm6361_vm0 = vsmask.f32 6400 }
  0x9f   : > { %468 = vst [vmem:[#allocation2 + $0x1c] sm:$0x11] %v467_v44  ;;  %v517_v63 = vsel %vm6357_vm9, %v514_v27, %v515_v38  ;;  %v569_v4 = vrot.slane %v568_v26, 4  ;;  %v6359_v59 = vsel %vm4973_vm11, 4294967295, %v6358_v59  ;;  %v1580_v38 = vld [vmem:[#allocation2 + $0x44] sm:$0x4] }
  0xa0   : > { %v520_v36 = vsel %vm4919_vm12, %v517_v63, %v519_v35  ;;  %v623_v10 = vpop.permute.xlu1 %622  ;;  %3069 = vrot.lane.b32.xlu0 %v4707_v22, %s4418_s6  ;;  %vm6360_vm9 = vsmask.f32 2304 }
  0xa1   : > { %521 = vst [vmem:[#allocation2 + $0x1c] sm:$0x22] %v520_v36  ;;  %v571_v37 = vsel %vm6244_vm13, %v568_v26, %v569_v4  ;;  %v624_v48 = vrot.slane %v623_v10, 4  ;;  %vm5016_vm13 = vmand %vm6245_vm14, %vm6361_vm0  ;;  %v680_v36 = vld [vmem:[#allocation2 + $0x38] sm:$0x11]  ;;  %vm6367_vm0 = vcmask 932864  }
  0xa2   : > { %v574_v22 = vsel %vm4928_vm5, %v571_v37, %v573_v14  ;;  %3131 = vrot.lane.b32.xlu1 %v4720_v32, %s4415_s30  ;;  %v4981_v2 = vpop.permute.xlu0 %1449  ;;  %v2597_v32 = vrot.slane %v4722_v33, 6  ;;  %v732_v37 = vld [vmem:[#allocation2 + $0x38] sm:$0x22]  ;;  %v6375_v33 = vmov 0 }
  0xa3   : > { %575 = vst [vmem:[#allocation2 + $0x1c] sm:$0x44] %v574_v22  ;;  %v626_v7 = vsel %vm6242_vm3, %v623_v10, %v624_v48  ;;  %v6278_v3 = vrot.slane %v4981_v2, 4  ;;  %vm1066_vm3 = vmand %vm6246_vm15, %vm6360_vm9  ;;  %vm6369_vm9 = vcmask 1040928   ;;  %vm6374_vm15 = vcmask 1044484  }
  0xa4   : > { %v379_v60 = vld [vmem:[#allocation2] sm:$0x44]  ;;  %v629_v9 = vsel %vm4710_vm4, %v626_v7, %v628_v45  ;;  %v4987_v20 = vpop.permute.xlu1 %1509  ;;  %2458 = vrot.lane.b32.xlu0 %v4693_v12, %s4410_s24  ;;  %v6362_v12 = vmov 0 }
  0xa5   : > { %v380_v27 = vsel %vm4973_vm11, %v372_v21, %v379_v60  ;;  %630 = vst [vmem:[#allocation2 + $0x1c] sm:$0x88] %v629_v9  ;;  %v1459_v52 = vsel %vm4803_vm7, %v6278_v3, %v1458_v57  ;;  %v6276_v35 = vrot.slane %v4987_v20, 4  ;;  %v6363_v12 = vsel %vm5016_vm13, 4294967295, %v6362_v12  ;;  %v786_v60 = vld [vmem:[#allocation2 + $0x38] sm:$0x44] }
  0xa6   : > { %381 = vst [vmem:[#allocation2] sm:$0x44] %v380_v27  ;;  %1460 = vst [vmem:[#allocation2 + $0x44] sm:$0x1] %v1459_v52  ;;  %2528 = vrot.lane.b32.xlu1 %v2793_v31, %s4411_s25  ;;  %v5002_v47 = vpop.permute.xlu0 %1570  ;;  %v6364_v21 = vmov 0  ;;  %v6475_v3 = vrot.slane %v4868_v39, 4 }
  0xa7   : > { %v1519_v44 = vsel %vm4818_vm1, %v6276_v35, %v1518_v16  ;;  %v6271_v26 = vrot.slane %v5002_v47, 4  ;;  %vm5033_vm1 = vmor %vm5016_vm13, %vm1066_vm3  ;;  %vm6368_vm3 = vsmask.f32 7938  ;;  %v841_v27 = vld [vmem:[#allocation2 + $0x38] sm:$0x88] }
  0xa8   : > { %1520 = vst [vmem:[#allocation2 + $0x44] sm:$0x2] %v1519_v44  ;;  %v5011_v63 = vpop.permute.xlu1 %1634  ;;  %2598 = vrot.lane.b32.xlu0 %v2597_v32, %s4414_s29  ;;  %v6365_v21 = vsel %vm5033_vm1, 4294967295, %v6364_v21  ;;  %vm5051_vm14 = vmand %vm6369_vm9, %vm6368_vm3  ;;  %vm6248_vm3 = vcmask 809984   ;;  %vm6380_vm9 = vcmask 57344  }
  0xa9   : > { %v1581_v31 = vsel %vm4839_vm8, %v6271_v26, %v1580_v38  ;;  %v6269_v18 = vrot.slane %v5011_v63, 4  ;;  %vm6366_vm8 = vcmask 539648   ;;  %v493_v35 = vld [vmem:[#allocation2 + $0x1c] sm:$0x11] }
  0xaa   : > { %1582 = vst [vmem:[#allocation2 + $0x44] sm:$0x4] %v1581_v31  ;;  %4228 = vrot.lane.b32.xlu1 %v4742_v55, %s4412_s26  ;;  %v676_v14 = vpop.permute.xlu0 %675  ;;  %v1062_v55 = vsel %vm6366_vm8, %v1061_v17, %v4843_v11  ;;  %vm6372_vm8 = vcmask 924672  }
  0xab   : > { %v1644_v4 = vsel %vm4864_vm10, %v6269_v18, %v1643_v61  ;;  %v677_v10 = vrot.slane %v676_v14, 4  ;;  %vm6249_vm10 = vcmask 818176  }
  0xac   : > { %1645 = vst [vmem:[#allocation2 + $0x44] sm:$0x8] %v1644_v4  ;;  %v728_v8 = vpop.permute.xlu1 %727  ;;  %4233 = vrot.lane.b32.xlu0 %v4730_v46, %s4413_s28 }
  0xad   : > { %v678_v29 = vsel %vm6367_vm0, %v676_v14, %v677_v10  ;;  %v729_v45 = vrot.slane %v728_v8, 4  ;;  %v1070_v48 = vld [vmem:[#allocation2 + $0x4] sm:$0x44]  ;;  %vm6373_vm0 = vsmask.f32 7954 }
  0xae   : > { %v681_v22 = vsel %vm4503_vm6, %v678_v29, %v680_v36  ;;  %2917 = vrot.lane.b32.xlu1 %v2669_v42, %s4418_s6  ;;  %v781_v57 = vpop.permute.xlu0 %780  ;;  %v1071_v11 = vsel %vm5033_vm1, %v1062_v55, %v1070_v48  ;;  %vm5060_vm13 = vmand %vm6374_vm15, %vm6373_vm0  ;;  %vm6379_vm15 = vsmask.f32 7938  ;;  %v966_v29 = vld [vmem:[#allocation2 + $0xc] sm:$0x1]  ;;  %v962_v48 = vld [vmem:[#allocation2 + $0x4] sm:$0x11] }
  0xaf   : > { %682 = vst [vmem:[#allocation2 + $0x38] sm:$0x11] %v681_v22  ;;  %v730_v17 = vsel %vm6372_vm8, %v728_v8, %v729_v45  ;;  %v782_v9 = vrot.slane %v781_v57, 4  ;;  %v6376_v33 = vsel %vm5060_vm13, 4294967295, %v6375_v33  ;;  %1072 = vst [vmem:[#allocation2 + $0x4] sm:$0x44] %v1071_v11 }
  0xb0   : > { %v733_v42 = vsel %vm4919_vm12, %v730_v17, %v732_v37  ;;  %v836_v16 = vpop.permute.xlu1 %835  ;;  %4238 = vrot.lane.b32.xlu0 %v4730_v46, %s4415_s30  ;;  %vm5077_vm12 = vmor %vm5060_vm13, %vm5051_vm14  ;;  %vm6384_vm14 = vcmask 60419   ;;  %vm6253_vm13 = vcmask 1041953   ;;  %vm6426_vm1 = vcmask 1047559  }
  0xb1   : > { %734 = vst [vmem:[#allocation2 + $0x38] sm:$0x22] %v733_v42  ;;  %v784_v32 = vsel %vm6249_vm10, %v781_v57, %v782_v9  ;;  %v837_v52 = vrot.slane %v836_v16, 4  ;;  %v6378_v15 = vsel %vm5077_vm12, 4294967295, %v6377_v15  ;;  %vm5086_vm8 = vmand %vm6380_vm9, %vm6379_vm15  ;;  %vm6388_vm15 = vcmask 1042978  }
  0xb2   : > { %v787_v38 = vsel %vm4928_vm5, %v784_v32, %v786_v60  ;;  %4243 = vrot.lane.b32.xlu1 %v4747_v58, %s4416_s5  ;;  %v5081_v46 = vpop.permute.xlu0 %4173  ;;  %vm6383_vm5 = vsmask.f32 7950  ;;  %vm6392_vm10 = vcmask 1046534   ;;  %v1243_v32 = vld [vmem:[#allocation2 + $0x28] sm:$0x1] }
  0xb3   : > { %788 = vst [vmem:[#allocation2 + $0x38] sm:$0x44] %v787_v38  ;;  %v839_v44 = vsel %vm6248_vm3, %v836_v16, %v837_v52  ;;  %v6275_v58 = vunpack.i.h.bf16 %v5081_v46  ;;  %v4175_v61 = vunpack.i.l.bf16 %v5081_v46  ;;  %vm5096_vm0 = vmand %vm6384_vm14, %vm6383_vm5  ;;  %vm6252_vm5 = vcmask 547840   ;;  %v1039_v16 = vld [vmem:[#allocation2 + $0xc] sm:$0x2] }
  0xb4   : > { %v842_v31 = vsel %vm4710_vm4, %v839_v44, %v841_v27  ;;  %v5100_v4 = vpop.permute.xlu1 %4178  ;;  %3191 = vrot.lane.b32.xlu0 %v3190_v56, %s4416_s5  ;;  %vm6387_vm4 = vsmask.f32 7946  ;;  %vm6391_vm14 = vsmask.f32 7962  ;;  %v6403_v27 = vmov 0 }
  0xb5   : > { %843 = vst [vmem:[#allocation2 + $0x38] sm:$0x88] %v842_v31  ;;  %v5108_v36 = vrot.slane %v6275_v58, 4  ;;  %v954_v25 = vrot.slane %v4175_v61, 4  ;;  %v6272_v10 = vunpack.i.h.bf16 %v5100_v4  ;;  %v6273_v8 = vunpack.i.l.bf16 %v5100_v4  ;;  %vm5114_vm9 = vmand %vm6388_vm15, %vm6387_vm4  ;;  %v1111_v31 = vld [vmem:[#allocation2 + $0xc] sm:$0x4] }
  0xb6   : > { %vm5120_vm3 = vmand %vm6392_vm10, %vm6391_vm14  ;;  %v1099_v56 = vpop.permute.xlu0 %1098  ;;  %vm6395_vm4 = vsmask.f32 7942  ;;  %vm6396_vm15 = vcmask 58369   ;;  %vm6399_vm10 = vsmask.f32 7946  ;;  %vm6400_vm14 = vcmask 59394  }
  0xb7   : > { %v6394_v50 = vsel %vm5120_vm3, 4294967295, %v6393_v50  ;;  %v1185_v37 = vsel %vm5096_vm0, %v5108_v36, %v1184_v5  ;;  %v956_v45 = vsel %vm6252_vm5, %v954_v25, %v4175_v61  ;;  %v967_v22 = vsel %vm5086_vm8, %v954_v25, %v966_v29  ;;  %vm5132_vm7 = vmand %vm6396_vm15, %vm6395_vm4  ;;  %v1107_v29 = vld [vmem:[#allocation2 + $0x4] sm:$0x44]  ;;  %v316_v58 = vld [vmem:[#allocation2] sm:$0x22] }
  0xb8   : > { %1186 = vst [vmem:[#allocation2 + $0xc] sm:$0x8] %v1185_v37  ;;  %v963_v7 = vsel %vm5077_vm12, %v956_v45, %v962_v48  ;;  %968 = vst [vmem:[#allocation2 + $0xc] sm:$0x1] %v967_v22  ;;  %v5140_v11 = vrot.slane %v6272_v10, 4  ;;  %v5144_v17 = vrot.slane %v6273_v8, 4  ;;  %v5152_v42 = vpop.permute.xlu1 %4183 }
  0xb9   : > { %vm5148_vm5 = vmand %vm6400_vm14, %vm6399_vm10  ;;  %v1100_v9 = vrot.slane %v1099_v56, 4  ;;  %964 = vst [vmem:[#allocation2 + $0x4] sm:$0x11] %v963_v7  ;;  %v6268_v52 = vunpack.i.h.bf16 %v5152_v42  ;;  %v6270_v38 = vunpack.i.l.bf16 %v5152_v42  ;;  %vm6408_vm4 = vcmask 556032   ;;  %v1306_v7 = vld [vmem:[#allocation2 + $0x28] sm:$0x2] }
  0xba   : > { %vm5158_vm15 = vmor %vm5120_vm3, %vm5114_vm9  ;;  %v1244_v44 = vsel %vm5086_vm8, %v5140_v11, %v1243_v32  ;;  %v1040_v61 = vsel %vm5132_vm7, %v5144_v17, %v1039_v16  ;;  %v5170_v25 = vpop.permute.xlu0 %4188  ;;  %vm6405_vm9 = vsmask.f32 1280  ;;  %v6411_v22 = vmov 0  ;;  %v1613_v51 = vld [vmem:[#allocation2 + $0x44] sm:$0x4] }
  0xbb   : > { %v6404_v27 = vsel %vm5158_vm15, 4294967295, %v6403_v27  ;;  %vm5174_vm14 = vmand %vm6253_vm13, %vm6405_vm9  ;;  %1245 = vst [vmem:[#allocation2 + $0x28] sm:$0x1] %v1244_v44  ;;  %v1101_v5 = vsel %vm6408_vm4, %v1100_v9, %v1099_v56  ;;  %v1112_v37 = vsel %vm5148_vm5, %v1100_v9, %v1111_v31  ;;  %v5183_v45 = vrot.slane %v6268_v52, 4  ;;  %v1489_v9 = vld [vmem:[#allocation2 + $0x44] sm:$0x1] }
  0xbc   : > { %1041 = vst [vmem:[#allocation2 + $0xc] sm:$0x2] %v1040_v61  ;;  %v5187_v48 = vrot.slane %v6270_v38, 4  ;;  %vm6409_vm9 = vsmask.f32 5376  ;;  %vm6410_vm13 = vcmask 1045509   ;;  %v1108_v56 = vsel %vm5158_vm15, %v1101_v5, %v1107_v29  ;;  %v5199_v44 = vpop.permute.xlu1 %1421 }
  0xbd   : > { %vm5191_vm10 = vmand %vm6410_vm13, %vm6409_vm9  ;;  %1113 = vst [vmem:[#allocation2 + $0xc] sm:$0x4] %v1112_v37  ;;  %v6260_v16 = vunpack.i.h.bf16 %v5170_v25  ;;  %v6267_v32 = vunpack.i.l.bf16 %v5170_v25  ;;  %v1490_v31 = vsel %vm5086_vm8, %v5183_v45, %v1489_v9  ;;  %vm6413_vm13 = vsmask.f32 7942  ;;  %v1430_v38 = vld [vmem:[#allocation2 + $0x28] sm:$0x8] }
  0xbe   : > { %v6412_v22 = vsel %vm5191_vm10, 4294967295, %v6411_v22  ;;  %1109 = vst [vmem:[#allocation2 + $0x4] sm:$0x44] %v1108_v56  ;;  %v1307_v61 = vsel %vm5132_vm7, %v5187_v48, %v1306_v7  ;;  %vm6414_vm9 = vcmask 1041409   ;;  %1491 = vst [vmem:[#allocation2 + $0x44] sm:$0x1] %v1490_v31  ;;  %v4194_v53 = vpop.permute.xlu0 %4193 }
  0xbf   : > { %vm5209_vm3 = vmand %vm6414_vm9, %vm6413_vm13  ;;  %1308 = vst [vmem:[#allocation2 + $0x28] sm:$0x2] %v1307_v61  ;;  %v5215_v5 = vrot.slane %v6260_v16, 4  ;;  %v5219_v37 = vrot.slane %v6267_v32, 4  ;;  %v6274_v56 = vrot.slane %v5199_v44, 4  ;;  %vm6418_vm4 = vcmask 553989  }
  0xc0   : > { %vm6417_vm8 = vsmask.f32 7958  ;;  %vm6421_vm13 = vsmask.f32 3328  ;;  %vm6422_vm9 = vcmask 1044003   ;;  %v4196_v34 = vunpack.i.h.bf16 %v4194_v53  ;;  %v489_v26 = vpop.permute.xlu1 %488 }
  0xc1   : > { %vm5224_vm6 = vmand %vm6418_vm4, %vm6417_vm8  ;;  %v1368_v61 = vld [vmem:[#allocation2 + $0x28] sm:$0x4]  ;;  %v1550_v31 = vld [vmem:[#allocation2 + $0x44] sm:$0x2]  ;;  %v4195_v16 = vunpack.i.l.bf16 %v4194_v53  ;;  %vm6425_vm12 = vsmask.f32 7424  ;;  %v1431_v53 = vsel %vm5096_vm0, %v6274_v56, %v1430_v38 }
  0xc2   : > { %vm5230_vm15 = vmand %vm6422_vm9, %vm6421_vm13  ;;  %v6427_v32 = vmov 0  ;;  %v1551_v52 = vsel %vm5132_vm7, %v5215_v5, %v1550_v31  ;;  %v1369_v18 = vsel %vm5148_vm5, %v5219_v37, %v1368_v61  ;;  %v434_v10 = vrot.slane %v4196_v34, 4  ;;  %v442_v61 = vld [vmem:[#allocation2] sm:$0x88]  ;;  %1432 = vst [vmem:[#allocation2 + $0x28] sm:$0x8] %v1431_v53 }
  0xc3   : > { %vm5236_vm11 = vmand %vm6426_vm1, %vm6425_vm12  ;;  %1552 = vst [vmem:[#allocation2 + $0x44] sm:$0x2] %v1551_v52  ;;  %v308_v8 = vrot.slane %v4195_v16, 4  ;;  %v490_v31 = vrot.slane %v489_v26, 4  ;;  %v4199_v52 = vpop.permute.xlu0 %4198  ;;  %vm6433_vm12 = vcmask 1039360   ;;  %vm6440_vm8 = vcmask 1041953  }
  0xc4   : > { %v6428_v32 = vsel %vm5236_vm11, 4294967295, %v6427_v32  ;;  %1370 = vst [vmem:[#allocation2 + $0x28] sm:$0x4] %v1369_v18  ;;  %vm5254_vm7 = vmor %vm5224_vm6, %vm5209_vm3  ;;  %v435_v38 = vsel %vm6433_vm12, %v4196_v34, %v434_v10  ;;  %v4201_v7 = vunpack.i.h.bf16 %v4199_v52  ;;  %v4200_v56 = vunpack.i.l.bf16 %v4199_v52  ;;  %v4204_v43 = vpop.permute.xlu1 %4203  ;;  %v1676_v60 = vld [vmem:[#allocation2 + $0x44] sm:$0x8] }
  0xc5   : > { %vm5262_vm1 = vmor %vm5191_vm10, %vm5174_vm14  ;;  %vm6437_vm3 = vcmask 1031168   ;;  %v443_v10 = vsel %vm4766_vm2, %v435_v38, %v442_v61  ;;  %vm6438_vm14 = vnez %v6320_v19  ;;  %v4206_v52 = vunpack.i.h.bf16 %v4204_v43  ;;  %v814_v57 = vld [vmem:[#allocation2 + $0x38] sm:$0x44] }
  0xc6   : > { %vm6434_vm4 = vmmov %vm6433_vm12  ;;  %v491_v55 = vsel %vm6437_vm3, %v489_v26, %v490_v31  ;;  %v544_v9 = vrot.slane %v4200_v56, 4  ;;  %444 = vst [vmem:[#allocation2] sm:$0x88] %v443_v10  ;;  %v4205_v26 = vunpack.i.l.bf16 %v4204_v43  ;;  %vm6443_vm9 = vsmask.f32 7958  ;;  %v3539_v31 = vld [vmem:[%s6212_s2 + $0x8] sm:$0xff] }
  0xc7   : > { %v309_v29 = vsel %vm6434_vm4, %v4195_v16, %v308_v8  ;;  %vm5272_vm6 = vmor %vm5236_vm11, %vm5230_vm15  ;;  %v494_v8 = vsel %vm6438_vm14, %v491_v55, %v493_v35  ;;  %v653_v16 = vrot.slane %v4201_v7, 4  ;;  %vm6439_vm15 = vsmask.f32 7942  ;;  %v3538_v35 = vld [vmem:[%s6212_s2] sm:$0xff]  ;;  %3550 = vperm.xlu0 %4248, %v3539_v31   ;;  %v707_v31 = vld [vmem:[#allocation2 + $0x38] sm:$0x11] }
  0xc8   : > { %v317_v34 = vsel %vm5254_vm7, %v309_v29, %v316_v58  ;;  %vm5285_vm13 = vmand %vm6440_vm8, %vm6439_vm15  ;;  %495 = vst [vmem:[#allocation2 + $0x1c] sm:$0x11] %v494_v8  ;;  %v5289_v58 = vpop.permute.xlu0 %1603  ;;  %vm6444_vm12 = vcmask 1045509   ;;  %v6445_v61 = vmov 0  ;;  %vm6447_vm15 = vcmask 932864   ;;  %3545 = vperm.xlu1 %4247, %v3538_v35   ;;  %v5312_v40 = vpop.permute.xlu1 %1666 }
  0xc9   : > { %318 = vst [vmem:[#allocation2] sm:$0x22] %v317_v34  ;;  %vm5293_vm4 = vmand %vm6444_vm12, %vm6443_vm9  ;;  %v654_v43 = vsel %vm6447_vm15, %v4201_v7, %v653_v16  ;;  %v704_v29 = vrot.slane %v4206_v52, 4  ;;  %v1605_v55 = vrot.slane %v5289_v58, 4  ;;  %v547_v34 = vld [vmem:[#allocation2 + $0x1c] sm:$0x22] }
  0xca   : > { %v6446_v61 = vsel %vm5293_vm4, 4294967295, %v6445_v61  ;;  %vm6448_vm8 = vmmov %vm6447_vm15  ;;  %v656_v10 = vld [vmem:[#allocation2 + $0x1c] sm:$0x88]  ;;  %vm6449_vm9 = vsmask.f32 7950  ;;  %vm6450_vm12 = vcmask 1044003  }
  0xcb   : > { %v545_v38 = vsel %vm6448_vm8, %v4200_v56, %v544_v9  ;;  %vm5308_vm11 = vmand %vm6450_vm12, %vm6449_vm9  ;;  %v598_v0 = vrot.slane %v4205_v26, 4  ;;  %vm6453_vm15 = vsmask.f32 7966  ;;  %vm6454_vm8 = vcmask 1047559   ;;  %v3540_v9 = vld [vmem:[%s6212_s2 + $0x10] sm:$0xff] }
  0xcc   : > { %v548_v56 = vsel %vm5254_vm7, %v545_v38, %v547_v34  ;;  %vm5318_vm3 = vmand %vm6454_vm8, %vm6453_vm15  ;;  %v6455_v7 = vmov 0  ;;  %v657_v16 = vsel %vm4766_vm2, %v654_v43, %v656_v10  ;;  %vm6457_vm12 = vcmask 924672   ;;  %3555 = vperm.xlu1 %4247, %v3540_v9   ;;  %v3541_v9 = vld [vmem:[%s6212_s2 + $0x18] sm:$0xff] }
  0xcd   : > { %v6456_v7 = vsel %vm5318_vm3, 4294967295, %v6455_v7  ;;  %v705_v35 = vsel %vm6457_vm12, %v4206_v52, %v704_v29  ;;  %v1614_v38 = vsel %vm5148_vm5, %v1605_v55, %v1613_v51  ;;  %v6286_v34 = vrot.slane %v5312_v40, 4  ;;  %549 = vst [vmem:[#allocation2 + $0x1c] sm:$0x22] %v548_v56  ;;  %658 = vst [vmem:[#allocation2 + $0x1c] sm:$0x88] %v657_v16  ;;  %v756_v51 = vpop.permute.xlu0 %755 }
  0xce   : > { %vm6458_vm15 = vsmask.f32 256  ;;  %vm6459_vm8 = vcmask 1040448   ;;  %v6460_v43 = vmov 0  ;;  %vm6462_vm2 = vmmov %vm6457_vm12  ;;  %v601_v52 = vld [vmem:[#allocation2 + $0x1c] sm:$0x44]  ;;  %v708_v29 = vsel %vm6438_vm14, %v705_v35, %v707_v31 }
  0xcf   : > { %vm5335_vm10 = vmand %vm6459_vm8, %vm6458_vm15  ;;  %v599_v10 = vsel %vm6462_vm2, %v4205_v26, %v598_v0  ;;  %1615 = vst [vmem:[#allocation2 + $0x44] sm:$0x4] %v1614_v38  ;;  %vm6463_vm5 = vsmask.f32 4352  ;;  %vm6464_vm12 = vcmask 618500   ;;  %vm6287_vm15 = vcmask 619525  }
  0xd0   : > { %v6461_v43 = vsel %vm5335_vm10, 4294967295, %v6460_v43  ;;  %vm5344_vm3 = vmand %vm6464_vm12, %vm6463_vm5  ;;  %vm6467_vm10 = vnez %v6359_v59  ;;  %709 = vst [vmem:[#allocation2 + $0x38] sm:$0x11] %v708_v29  ;;  %v1677_v19 = vsel %vm5096_vm0, %v6286_v34, %v1676_v60  ;;  %v6468_v0 = vmov 0  ;;  %v997_v38 = vld [vmem:[#allocation2 + $0x4] sm:$0x22]  ;;  %3560 = vperm.xlu1 %4247, %v3541_v9  }
  0xd1   : > { %v602_v16 = vsel %vm6467_vm10, %v599_v10, %v601_v52  ;;  %vm5358_vm2 = vmor %vm5293_vm4, %vm5285_vm13  ;;  %v757_v26 = vrot.slane %v756_v51, 4  ;;  %vm6470_vm14 = vsmask.f32 1280  ;;  %vm6471_vm5 = vcmask 1041473   ;;  %1678 = vst [vmem:[#allocation2 + $0x44] sm:$0x8] %v1677_v19  ;;  %v810_v10 = vpop.permute.xlu1 %809 }
  0xd2   : > { %v6469_v0 = vsel %vm5358_vm2, 4294967295, %v6468_v0  ;;  %vm5364_vm12 = vmand %vm6471_vm5, %vm6470_vm14  ;;  %vm6474_vm0 = vcmask 547840   ;;  %603 = vst [vmem:[#allocation2 + $0x1c] sm:$0x44] %v602_v16  ;;  %v1143_v52 = vld [vmem:[#allocation2 + $0x4] sm:$0x88]  ;;  %vm6481_vm14 = vnez %v6330_v6 }
  0xd3   : > { %v989_v14 = vsel %vm6474_vm0, %v988_v28, %v4853_v23  ;;  %vm6476_vm13 = vmmov %vm6474_vm0  ;;  %v1209_v29 = vld [vmem:[#allocation2 + $0x20] sm:$0x11]  ;;  %v760_v60 = vld [vmem:[#allocation2 + $0x38] sm:$0x22]  ;;  %vm6477_vm5 = vcmask 916480   ;;  %v811_v34 = vrot.slane %v810_v10, 4 }
  0xd4   : > { %v1135_v31 = vsel %vm6476_vm13, %v6475_v3, %v4868_v39  ;;  %v758_v23 = vsel %vm6477_vm5, %v756_v51, %v757_v26  ;;  %v998_v28 = vsel %vm5262_vm1, %v989_v14, %v997_v38  ;;  %vm6478_vm0 = vsmask.f32 5376  ;;  %v865_v14 = vpop.permute.xlu0 %864 }
  0xd5   : > { %v1144_v39 = vsel %vm5272_vm6, %v1135_v31, %v1143_v52  ;;  %vm5386_vm13 = vmand %vm6287_vm15, %vm6478_vm0  ;;  %v1210_v19 = vsel %vm6481_vm14, %v4848_v41, %v1209_v29  ;;  %v761_v51 = vsel %vm5254_vm7, %v758_v23, %v760_v60  ;;  %999 = vst [vmem:[#allocation2 + $0x4] sm:$0x22] %v998_v28  ;;  %vm6482_vm5 = vnez %v6456_v7  ;;  %v1395_v52 = vld [vmem:[#allocation2 + $0x20] sm:$0x88]  ;;  %v1724_v29 = vpop.permute.xlu1 %1723 }
  0xd6   : > { %vm5399_vm8 = vmor %vm6482_vm5, %vm5308_vm11  ;;  %1145 = vst [vmem:[#allocation2 + $0x4] sm:$0x88] %v1144_v39  ;;  %vm6292_vm0 = vcmask 64512   ;;  %vm6290_vm15 = vcmask 1042498   ;;  %vm6485_vm4 = vcmask 818176   ;;  %v866_v3 = vrot.slane %v865_v14, 4 }
  0xd7   : > { %1211 = vst [vmem:[#allocation2 + $0x20] sm:$0x11] %v1210_v19  ;;  %762 = vst [vmem:[#allocation2 + $0x38] sm:$0x22] %v761_v51  ;;  %v812_v41 = vsel %vm6485_vm4, %v810_v10, %v811_v34  ;;  %vm6486_vm7 = vnez %v6461_v43  ;;  %vm6291_vm11 = vcmask 620550   ;;  %v6489_v31 = vrot.slane %v4822_v30, 4 }
  0xd8   : > { %vm5408_vm2 = vmor %vm5344_vm3, %vm6486_vm7  ;;  %vm6490_vm9 = vcmask 441344   ;;  %v6491_v34 = vrot.slane %v4892_v1, 4  ;;  %vm6492_vm4 = vcmask 424960   ;;  %v1270_v43 = vld [vmem:[#allocation2 + $0x20] sm:$0x22]  ;;  %v815_v56 = vsel %vm6467_vm10, %v812_v41, %v814_v57  ;;  %v1785_v51 = vpop.permute.xlu0 %1784 }
  0xd9   : > { %v1267_v38 = vsel %vm6490_vm9, %v6489_v31, %v4822_v30  ;;  %vm5426_vm3 = vmor %vm5386_vm13, %vm5364_vm12  ;;  %816 = vst [vmem:[#allocation2 + $0x38] sm:$0x44] %v815_v56  ;;  %vm6495_vm7 = vcmask 809984   ;;  %v1725_v23 = vrot.slane %v1724_v29, 4  ;;  %vm6496_vm10 = vsmask.f32 2304 }
  0xda   : > { %v1392_v10 = vsel %vm6492_vm4, %v6491_v34, %v4892_v1  ;;  %v1271_v30 = vsel %vm5262_vm1, %v1267_v38, %v1270_v43  ;;  %v869_v1 = vld [vmem:[#allocation2 + $0x38] sm:$0x88]  ;;  %v867_v60 = vsel %vm6495_vm7, %v865_v14, %v866_v3  ;;  %vm5437_vm4 = vmand %vm6290_vm15, %vm6496_vm10  ;;  %v6499_v28 = vrot.slane %v4981_v2, 4  ;;  %v1455_v16 = vld [vmem:[#allocation2 + $0x3c] sm:$0x11] }
  0xdb   : > { %v1396_v59 = vsel %vm5272_vm6, %v1392_v10, %v1395_v52  ;;  %vm6500_vm12 = vcmask 433152   ;;  %1272 = vst [vmem:[#allocation2 + $0x20] sm:$0x22] %v1271_v30  ;;  %vm6501_vm13 = vnez %v6324_v54  ;;  %vm6502_vm5 = vsmask.f32 6400 }
  0xdc   : > { %v1452_v39 = vsel %vm6500_vm12, %v6499_v28, %v4981_v2  ;;  %v870_v19 = vsel %vm6501_vm13, %v867_v60, %v869_v1  ;;  %1397 = vst [vmem:[#allocation2 + $0x20] sm:$0x88] %v1396_v59  ;;  %vm5449_vm10 = vmand %vm6291_vm11, %vm6502_vm5  ;;  %v6505_v41 = vrot.slane %v4877_v49, 4  ;;  %v1332_v57 = vld [vmem:[#allocation2 + $0x20] sm:$0x44]  ;;  %v1727_v3 = vsel %vm6292_vm0, %v1725_v23, %v1724_v29  ;;  %v1847_v29 = vpop.permute.xlu1 %1846  ;;  %v1911_v14 = vpop.permute.xlu0 %1910 }
  0xdd   : > { %vm6506_vm15 = vmmov %vm6500_vm12  ;;  %v1456_v54 = vsel %vm6481_vm14, %v1452_v39, %v1455_v16  ;;  %871 = vst [vmem:[#allocation2 + $0x38] sm:$0x88] %v870_v19  ;;  %v1734_v31 = vld [vmem:[#allocation2 + $0xc] sm:$0x11]  ;;  %v1786_v38 = vrot.slane %v1785_v51, 4  ;;  %vm6508_vm13 = vcmask 1043523   ;;  %v6518_v1 = vunpack.i.h.bf16 %v5081_v46 }
  0xde   : > { %v1329_v2 = vsel %vm6506_vm15, %v6505_v41, %v4877_v49  ;;  %vm6507_vm12 = vsmask.f32 3328  ;;  %v6511_v10 = vrot.slane %v4987_v20, 4  ;;  %vm6512_vm11 = vcmask 424960   ;;  %1457 = vst [vmem:[#allocation2 + $0x3c] sm:$0x11] %v1456_v54 }
  0xdf   : > { %vm5462_vm5 = vmand %vm6508_vm13, %vm6507_vm12  ;;  %vm6513_vm15 = vnez %v6365_v21  ;;  %v1735_v56 = vsel %vm5408_vm2, %v1727_v3, %v1734_v31  ;;  %v1795_v52 = vld [vmem:[#allocation2 + $0xc] sm:$0x22]  ;;  %vm6514_vm9 = vsmask.f32 7424  ;;  %vm6515_vm12 = vcmask 621575  }
  0xe0   : > { %v1512_v49 = vsel %vm6512_vm11, %v6511_v10, %v4987_v20  ;;  %v1333_v43 = vsel %vm6513_vm15, %v1329_v2, %v1332_v57  ;;  %vm5476_vm13 = vmand %vm6515_vm12, %vm6514_vm9  ;;  %vm6519_vm11 = vcmask 547840   ;;  %v6520_v60 = vunpack.i.l.bf16 %v5100_v4  ;;  %v1035_v23 = vld [vmem:[#allocation2 + $0x4] sm:$0x22]  ;;  %v1180_v28 = vld [vmem:[#allocation2 + $0x4] sm:$0x88] }
  0xe1   : > { %v1174_v20 = vsel %vm6519_vm11, %v5108_v36, %v6518_v1  ;;  %vm6521_vm7 = vcmask 539648   ;;  %1334 = vst [vmem:[#allocation2 + $0x20] sm:$0x44] %v1333_v43  ;;  %1736 = vst [vmem:[#allocation2 + $0xc] sm:$0x11] %v1735_v56  ;;  %vm6522_vm0 = vcmask 56320   ;;  %v6525_v16 = vunpack.i.h.bf16 %v5100_v4 }
  0xe2   : > { %v1029_v59 = vsel %vm6521_vm7, %v5144_v17, %v6520_v60  ;;  %v1788_v39 = vsel %vm6522_vm0, %v1786_v38, %v1785_v51  ;;  %vm5493_vm9 = vmor %vm5449_vm10, %vm5437_vm4  ;;  %v1848_v36 = vrot.slane %v1847_v29, 4  ;;  %v1240_v19 = vld [vmem:[#allocation2 + $0x20] sm:$0x11]  ;;  %v1515_v2 = vld [vmem:[#allocation2 + $0x3c] sm:$0x22]  ;;  %v1181_v35 = vsel %vm5399_vm8, %v1174_v20, %v1180_v28 }
  0xe3   : > { %vm6526_vm12 = vmmov %vm6521_vm7  ;;  %vm6527_vm7 = vnez %v6469_v0  ;;  %v1796_v51 = vsel %vm5426_vm3, %v1788_v39, %v1795_v52  ;;  %vm6528_vm0 = vnez %v6378_v15  ;;  %v1516_v4 = vsel %vm5262_vm1, %v1512_v49, %v1515_v2  ;;  %1182 = vst [vmem:[#allocation2 + $0x4] sm:$0x88] %v1181_v35  ;;  %v1857_v54 = vld [vmem:[#allocation2 + $0xc] sm:$0x44]  ;;  %v1577_v34 = vld [vmem:[#allocation2 + $0x3c] sm:$0x44]  ;;  %v1972_v52 = vpop.permute.xlu1 %1971 }
  0xe4   : > { %v1237_v17 = vsel %vm6526_vm12, %v5140_v11, %v6525_v16  ;;  %v1036_v41 = vsel %vm6527_vm7, %v1029_v59, %v1035_v23  ;;  %1797 = vst [vmem:[#allocation2 + $0xc] sm:$0x22] %v1796_v51  ;;  %vm6529_vm4 = vcmask 48128   ;;  %vm5516_vm10 = vmor %vm5476_vm13, %vm5462_vm5  ;;  %v1912_v31 = vrot.slane %v1911_v14, 4  ;;  %v1920_v56 = vld [vmem:[#allocation2 + $0xc] sm:$0x88] }
  0xe5   : > { %v1241_v57 = vsel %vm6528_vm0, %v1237_v17, %v1240_v19  ;;  %1037 = vst [vmem:[#allocation2 + $0x4] sm:$0x22] %v1036_v41  ;;  %v1850_v11 = vsel %vm6529_vm4, %v1848_v36, %v1847_v29  ;;  %v6532_v38 = vrot.slane %v5002_v47, 4  ;;  %vm6533_vm11 = vcmask 326656   ;;  %1517 = vst [vmem:[#allocation2 + $0x3c] sm:$0x22] %v1516_v4  ;;  %v2025_v36 = vpop.permute.xlu0 %2024 }
  0xe6   : > { %v6534_v10 = vunpack.i.l.bf16 %v5152_v42  ;;  %vm6535_vm1 = vcmask 433152   ;;  %1242 = vst [vmem:[#allocation2 + $0x20] sm:$0x11] %v1241_v57  ;;  %v1858_v43 = vsel %vm5493_vm9, %v1850_v11, %v1857_v54  ;;  %vm6297_vm5 = vcmask 990208   ;;  %v1427_v20 = vld [vmem:[#allocation2 + $0x20] sm:$0x88] }
  0xe7   : > { %v1574_v18 = vsel %vm6533_vm11, %v6532_v38, %v5002_v47  ;;  %v6536_v29 = vrot.slane %v5199_v44, 4  ;;  %vm6537_vm13 = vcmask 441344   ;;  %v1303_v47 = vld [vmem:[#allocation2 + $0x20] sm:$0x22]  ;;  %1859 = vst [vmem:[#allocation2 + $0xc] sm:$0x44] %v1858_v43  ;;  %v6541_v16 = vunpack.i.h.bf16 %v5152_v42  ;;  %v2078_v53 = vpop.permute.xlu1 %2077 }
  0xe8   : > { %v1300_v49 = vsel %vm6535_vm1, %v5187_v48, %v6534_v10  ;;  %v1578_v1 = vsel %vm6513_vm15, %v1574_v18, %v1577_v34  ;;  %vm6538_vm12 = vcmask 998400   ;;  %v1973_v60 = vrot.slane %v1972_v52, 4  ;;  %v1640_v39 = vld [vmem:[#allocation2 + $0x3c] sm:$0x88]  ;;  %vm6542_vm15 = vmmov %vm6535_vm1  ;;  %v1486_v19 = vld [vmem:[#allocation2 + $0x3c] sm:$0x11] }
  0xe9   : > { %v1424_v30 = vsel %vm6537_vm13, %v6536_v29, %v5199_v44  ;;  %v1913_v48 = vsel %vm6538_vm12, %v1911_v14, %v1912_v31  ;;  %v6539_v59 = vrot.slane %v5011_v63, 4  ;;  %vm6540_vm4 = vcmask 318464   ;;  %1579 = vst [vmem:[#allocation2 + $0x3c] sm:$0x44] %v1578_v1  ;;  %v1976_v2 = vld [vmem:[#allocation2 + $0x28] sm:$0x11]  ;;  %vm6546_vm1 = vmmov %vm6538_vm12  ;;  %v2132_v15 = vpop.permute.xlu0 %2131 }
  0xea   : > { %v1304_v28 = vsel %vm6527_vm7, %v1300_v49, %v1303_v47  ;;  %v1428_v44 = vsel %vm5399_vm8, %v1424_v30, %v1427_v20  ;;  %v1921_v21 = vsel %vm5516_vm10, %v1913_v48, %v1920_v56  ;;  %v1483_v17 = vsel %vm6542_vm15, %v5183_v45, %v6541_v16  ;;  %v1365_v42 = vld [vmem:[#allocation2 + $0x20] sm:$0x44]  ;;  %v2029_v11 = vld [vmem:[#allocation2 + $0x28] sm:$0x22]  ;;  %v2082_v34 = vld [vmem:[#allocation2 + $0x28] sm:$0x44] }
  0xeb   : > { %v1637_v23 = vsel %vm6540_vm4, %v6539_v59, %v5011_v63  ;;  %1305 = vst [vmem:[#allocation2 + $0x20] sm:$0x22] %v1304_v28  ;;  %1429 = vst [vmem:[#allocation2 + $0x20] sm:$0x88] %v1428_v44  ;;  %v1974_v41 = vsel %vm6297_vm5, %v1972_v52, %v1973_v60  ;;  %v2026_v35 = vrot.slane %v2025_v36, 4  ;;  %v6543_v51 = vunpack.i.l.bf16 %v5170_v25  ;;  %v2185_v29 = vpop.permute.xlu1 %2184 }
  0xec   : > { %v1641_v63 = vsel %vm5272_vm6, %v1637_v23, %v1640_v39  ;;  %1922 = vst [vmem:[#allocation2 + $0xc] sm:$0x88] %v1921_v21  ;;  %vm6544_vm11 = vcmask 424960   ;;  %v1487_v45 = vsel %vm6528_vm0, %v1483_v17, %v1486_v19  ;;  %v1977_v57 = vsel %vm5408_vm2, %v1974_v41, %v1976_v2  ;;  %v1547_v10 = vld [vmem:[#allocation2 + $0x3c] sm:$0x22] }
  0xed   : > { %v1362_v14 = vsel %vm6544_vm11, %v5219_v37, %v6543_v51  ;;  %1642 = vst [vmem:[#allocation2 + $0x3c] sm:$0x88] %v1641_v63  ;;  %vm6545_vm6 = vnez %v6404_v27  ;;  %1488 = vst [vmem:[#allocation2 + $0x3c] sm:$0x11] %v1487_v45  ;;  %v2027_v54 = vsel %vm6546_vm1, %v2025_v36, %v2026_v35  ;;  %v2079_v31 = vrot.slane %v2078_v53, 4  ;;  %v2238_v48 = vpop.permute.xlu0 %2237 }
  0xee   : > { %v1366_v4 = vsel %vm6545_vm6, %v1362_v14, %v1365_v42  ;;  %1978 = vst [vmem:[#allocation2 + $0x28] sm:$0x11] %v1977_v57  ;;  %v2030_v37 = vsel %vm5426_vm3, %v2027_v54, %v2029_v11  ;;  %vm6295_vm13 = vcmask 982016   ;;  %v6547_v38 = vunpack.i.h.bf16 %v5170_v25  ;;  %vm6548_vm0 = vmmov %vm6544_vm11  ;;  %v2136_v30 = vld [vmem:[#allocation2 + $0x28] sm:$0x88] }
  0xef   : > { %1367 = vst [vmem:[#allocation2 + $0x20] sm:$0x44] %v1366_v4  ;;  %2031 = vst [vmem:[#allocation2 + $0x28] sm:$0x22] %v2030_v37  ;;  %v2080_v49 = vsel %vm6297_vm5, %v2078_v53, %v2079_v31  ;;  %v2133_v43 = vrot.slane %v2132_v15, 4  ;;  %vm6293_vm12 = vcmask 310272   ;;  %v2292_v21 = vpop.permute.xlu1 %2291 }
  0xf0   : > { %v1544_v18 = vsel %vm6548_vm0, %v5215_v5, %v6547_v38  ;;  %v2083_v52 = vsel %vm5493_vm9, %v2080_v49, %v2082_v34  ;;  %vm6294_vm4 = vcmask 883712   ;;  %vm6549_vm15 = vcmask 318464   ;;  %v1610_v5 = vld [vmem:[#allocation2 + $0x3c] sm:$0x44]  ;;  %v2189_v23 = vld [vmem:[#allocation2 + $0x44] sm:$0x11] }
  0xf1   : > { %v1548_v56 = vsel %vm6527_vm7, %v1544_v18, %v1547_v10  ;;  %v1607_v25 = vsel %vm6549_vm15, %v1605_v55, %v5289_v58  ;;  %2084 = vst [vmem:[#allocation2 + $0x28] sm:$0x44] %v2083_v52  ;;  %v2134_v47 = vsel %vm6295_vm13, %v2132_v15, %v2133_v43  ;;  %v2186_v1 = vrot.slane %v2185_v29, 4  ;;  %v2242_v39 = vld [vmem:[#allocation2 + $0x44] sm:$0x22]  ;;  %v2346_v63 = vpop.permute.xlu0 %2345 }
  0xf2   : > { %1549 = vst [vmem:[#allocation2 + $0x3c] sm:$0x22] %v1548_v56  ;;  %v1611_v0 = vsel %vm6545_vm6, %v1607_v25, %v1610_v5  ;;  %v2137_v20 = vsel %vm5516_vm10, %v2134_v47, %v2136_v30  ;;  %vm6296_vm7 = vcmask 875520   ;;  %v6550_v60 = vrot.slane %v5312_v40, 4  ;;  %v4355_v17 = vld [vmem:[#allocation2] ss:$28 sps:$4 sm:$0xff]  }
  0xf3   : > { %1612 = vst [vmem:[#allocation2 + $0x3c] sm:$0x44] %v1611_v0  ;;  %2138 = vst [vmem:[#allocation2 + $0x28] sm:$0x88] %v2137_v20  ;;  %v2187_v59 = vsel %vm6294_vm4, %v2185_v29, %v2186_v1  ;;  %v2239_v28 = vrot.slane %v2238_v48, 4  ;;  %v2347_v2 = vrot.slane %v2346_v63, 4  ;;  %v889_v14 = vpop.permute.xlu1 %888 }
  0xf4   : > { %v1670_v58 = vsel %vm6293_vm12, %v6550_v60, %v5312_v40  ;;  %v1673_v55 = vld [vmem:[#allocation2 + $0x3c] sm:$0x88]  ;;  %v2190_v44 = vsel %vm5408_vm2, %v2187_v59, %v2189_v23  ;;  %v2293_v40 = vrot.slane %v2292_v21, 4  ;;  %v2296_v41 = vld [vmem:[#allocation2 + $0x44] sm:$0x44]  ;;  %vm6552_vm11 = vcmask 1040448  }
  0xf5   : > { %v1674_v27 = vsel %vm5399_vm8, %v1670_v58, %v1673_v55  ;;  %2191 = vst [vmem:[#allocation2 + $0x44] sm:$0x11] %v2190_v44  ;;  %v2240_v36 = vsel %vm6296_vm7, %v2238_v48, %v2239_v28  ;;  %vm6551_vm8 = vsmask.f32 7938  ;;  %vm891_vm1 = vcmask 801792   ;;  %v1757_v46 = vpop.permute.xlu0 %1756 }
  0xf6   : > { %1675 = vst [vmem:[#allocation2 + $0x3c] sm:$0x88] %v1674_v27  ;;  %v4353_v16 = vld [vmem:[#allocation2 + $0x4] ss:$28 sps:$4 sm:$0xff]   ;;  %v2243_v19 = vsel %vm5426_vm3, %v2240_v36, %v2242_v39  ;;  %v2294_v26 = vsel %vm6294_vm4, %v2292_v21, %v2293_v40  ;;  %vm5600_vm6 = vmand %vm6552_vm11, %vm6551_vm8  ;;  %vm6555_vm3 = vsmask.f32 7954  ;;  %v2348_v42 = vsel %vm6296_vm7, %v2346_v63, %v2347_v2 }
  0xf7   : > { %2244 = vst [vmem:[#allocation2 + $0x44] sm:$0x22] %v2243_v19  ;;  %3330 = vmatprep.subr.bf16.mxu0 %v4353_v16  ;;  %v2297_v51 = vsel %vm5493_vm9, %v2294_v26, %v2296_v41  ;;  %vm6556_vm0 = vcmask 618500   ;;  %v2350_v9 = vld [vmem:[#allocation2 + $0x44] sm:$0x88]  ;;  %v890_v57 = vrot.slane %v889_v14, 4  ;;  %v1819_v37 = vpop.permute.xlu1 %1818 }
  0xf8   : > { %3331 = vmatpush1.bf16.msra.mxu0 %v4355_v17  ;;  %vm1762_vm15 = vmand %vm6556_vm0, %vm6555_vm3  ;;  %2298 = vst [vmem:[#allocation2 + $0x44] sm:$0x44] %v2297_v51  ;;  %v894_v45 = vld [vmem:[#allocation2 + $0x54] sm:$0x11]  ;;  %vm6557_vm12 = vsmask.f32 7942  ;;  %v2351_v53 = vsel %vm5516_vm10, %v2348_v42, %v2350_v9  ;;  %vm6567_vm10 = vnez %v6316_v24 }
  0xf9   : > { %vm6558_vm8 = vcmask 1041473   ;;  %vm6559_vm9 = vsmask.f32 7958  ;;  %vm6560_vm4 = vcmask 619525   ;;  %2352 = vst [vmem:[#allocation2 + $0x44] sm:$0x88] %v2351_v53  ;;  %v892_v4 = vsel %vm891_vm1, %v889_v14, %v890_v57  ;;  %vm5617_vm3 = vmor %vm1762_vm15, %vm5600_vm6  ;;  %v4209_v34 = vpop.permute.xlu0 %4208 }
  0xfa   : > { %vm1823_vm11 = vmand %vm6558_vm8, %vm6557_vm12  ;;  %v1758_v54 = vrot.slane %v1757_v46, 4  ;;  %vm6563_vm0 = vsmask.f32 7946  ;;  %vm6564_vm7 = vcmask 1042498   ;;  %v895_v3 = vsel %vm6567_vm10, %v892_v4, %v894_v45  ;;  %v1764_v38 = vld [vmem:[#allocation2 + $0xc] sm:$0x11] }
  0xfb   : > { %vm1824_vm13 = vmand %vm6560_vm4, %vm6559_vm9  ;;  %896 = vst [vmem:[#allocation2 + $0x54] sm:$0x11] %v895_v3  ;;  %vm6568_vm12 = vcmask 64512   ;;  %v1820_v10 = vrot.slane %v1819_v37, 4  ;;  %vm6571_vm6 = vsmask.f32 7962  ;;  %v4211_v52 = vunpack.i.h.bf16 %v4209_v34  ;;  %v4214_v5 = vpop.permute.xlu1 %4213 }
  0xfc   : > { %vm5623_vm5 = vmand %vm6564_vm7, %vm6563_vm0  ;;  %v1759_v15 = vsel %vm6568_vm12, %v1758_v54, %v1757_v46  ;;  %vm6572_vm1 = vcmask 620550   ;;  %vm6573_vm7 = vsmask.f32 7950  ;;  %vm6574_vm8 = vcmask 1043523   ;;  %v1826_v56 = vld [vmem:[#allocation2 + $0xc] sm:$0x22] }
  0xfd   : > { %vm5630_vm4 = vmor %vm1824_vm13, %vm1823_vm11  ;;  %v1765_v49 = vsel %vm5617_vm3, %v1759_v15, %v1764_v38  ;;  %vm6577_vm0 = vcmask 56320   ;;  %v4210_v29 = vunpack.i.l.bf16 %v4209_v34  ;;  %vm6578_vm13 = vsmask.f32 7966  ;;  %v1999_v48 = vpop.permute.xlu0 %1998  ;;  %v1889_v58 = vld [vmem:[#allocation2 + $0xc] sm:$0x44] }
  0xfe   : > { %vm1887_vm15 = vmand %vm6572_vm1, %vm6571_vm6  ;;  %1766 = vst [vmem:[#allocation2 + $0xc] sm:$0x11] %v1765_v49  ;;  %v1821_v43 = vsel %vm6577_vm0, %v1820_v10, %v1819_v37  ;;  %vm6579_vm11 = vcmask 621575   ;;  %v2054_v47 = vrot.slane %v4211_v52, 4  ;;  %v4216_v0 = vunpack.i.h.bf16 %v4214_v5  ;;  %v2057_v55 = vld [vmem:[#allocation2 + $0x28] sm:$0x22] }
  0xff   : > { %vm5640_vm9 = vmand %vm6574_vm8, %vm6573_vm7  ;;  %v1827_v25 = vsel %vm5630_vm4, %v1821_v43, %v1826_v56  ;;  %v1882_v1 = vrot.slane %v4210_v29, 4  ;;  %v4215_v20 = vunpack.i.l.bf16 %v4214_v5  ;;  %vm6298_vm6 = vcmask 1040992   ;;  %v4219_v36 = vpop.permute.xlu1 %4218  ;;  %v1952_v17 = vld [vmem:[#allocation2 + $0xc] sm:$0x88]  ;;  %v2110_v19 = vld [vmem:[#allocation2 + $0x28] sm:$0x44] }
 0x100   : > { %vm1950_vm10 = vmand %vm6579_vm11, %vm6578_vm13  ;;  %1828 = vst [vmem:[#allocation2 + $0xc] sm:$0x22] %v1827_v25  ;;  %vm6584_vm7 = vcmask 998400   ;;  %v2107_v28 = vrot.slane %v4216_v0, 4  ;;  %v2000_v21 = vrot.slane %v1999_v48, 4  ;;  %vm6586_vm8 = vcmask 990208  }
 0x101   : > { %vm5651_vm12 = vmor %vm1887_vm15, %vm5623_vm5  ;;  %v2055_v59 = vsel %vm6584_vm7, %v4211_v52, %v2054_v47  ;;  %v1945_v27 = vrot.slane %v4215_v20, 4  ;;  %vm6300_vm15 = vcmask 122880   ;;  %v4221_v63 = vunpack.i.h.bf16 %v4219_v36  ;;  %v2004_v51 = vld [vmem:[#allocation2 + $0x28] sm:$0x11]  ;;  %v4224_v9 = vpop.permute.xlu0 %4223  ;;  %v2165_v37 = vld [vmem:[#allocation2 + $0x28] sm:$0x88] }
 0x102   : > { %vm5657_vm1 = vmor %vm1950_vm10, %vm5640_vm9  ;;  %v2058_v44 = vsel %vm5630_vm4, %v2055_v59, %v2057_v55  ;;  %v2108_v40 = vsel %vm6586_vm8, %v4216_v0, %v2107_v28  ;;  %v4220_v26 = vunpack.i.l.bf16 %v4219_v36  ;;  %vm6588_vm0 = vsmask.f32 256  ;;  %v2324_v15 = vld [vmem:[#allocation2 + $0x44] sm:$0x44]  ;;  %v1704_v43 = vld [vmem:[#allocation2 + $0x60] sm:$0x1] }
 0x103   : > { %vm6585_vm5 = vmmov %vm6584_vm7  ;;  %2059 = vst [vmem:[#allocation2 + $0x28] sm:$0x22] %v2058_v44  ;;  %v2111_v35 = vsel %vm5651_vm12, %v2108_v40, %v2110_v19  ;;  %vm6591_vm11 = vcmask 982016   ;;  %vm6299_vm10 = vcmask 1042017   ;;  %v2321_v45 = vrot.slane %v4221_v63, 4  ;;  %v2266_v4 = vpop.permute.xlu1 %2265 }
 0x104   : > { %v1884_v23 = vsel %vm6585_vm5, %v4210_v29, %v1882_v1  ;;  %vm6587_vm9 = vmmov %vm6586_vm8  ;;  %v2002_v14 = vsel %vm6591_vm11, %v1999_v48, %v2000_v21  ;;  %2112 = vst [vmem:[#allocation2 + $0x28] sm:$0x44] %v2111_v35  ;;  %v2161_v57 = vrot.slane %v4220_v26, 4  ;;  %v4226_v53 = vunpack.i.h.bf16 %v4224_v9  ;;  %v2378_v29 = vld [vmem:[#allocation2 + $0x44] sm:$0x88] }
 0x105   : > { %v1890_v39 = vsel %vm5651_vm12, %v1884_v23, %v1889_v58  ;;  %v1947_v16 = vsel %vm6587_vm9, %v4215_v20, %v1945_v27  ;;  %vm5671_vm13 = vmand %vm6298_vm6, %vm6588_vm0  ;;  %v2005_v42 = vsel %vm5617_vm3, %v2002_v14, %v2004_v51  ;;  %v4225_v46 = vunpack.i.l.bf16 %v4224_v9  ;;  %v1696_v56 = vpop.permute.xlu0 %1695  ;;  %v2271_v47 = vld [vmem:[#allocation2 + $0x44] sm:$0x22]  ;;  %v2217_v0 = vld [vmem:[#allocation2 + $0x44] sm:$0x11] }
 0x106   : > { %1891 = vst [vmem:[#allocation2 + $0xc] sm:$0x44] %v1890_v39  ;;  %v1953_v2 = vsel %vm5657_vm1, %v1947_v16, %v1952_v17  ;;  %2006 = vst [vmem:[#allocation2 + $0x28] sm:$0x11] %v2005_v42  ;;  %vm6592_vm8 = vnez %v6326_v13  ;;  %vm6301_vm0 = vcmask 1043042   ;;  %vm6595_vm11 = vcmask 883712  }
 0x107   : > { %1954 = vst [vmem:[#allocation2 + $0xc] sm:$0x88] %v1953_v2  ;;  %vm5686_vm9 = vmor %vm6592_vm8, %vm5671_vm13  ;;  %v2322_v31 = vsel %vm6595_vm11, %v4221_v63, %v2321_v45  ;;  %v2375_v38 = vrot.slane %v4226_v53, 4  ;;  %v2267_v10 = vrot.slane %v2266_v4, 4  ;;  %vm6597_vm7 = vsmask.f32 1280  ;;  %v2422_v59 = vpop.permute.xlu1 %2421 }
 0x108   : > { %vm6596_vm6 = vmmov %vm6595_vm11  ;;  %v2325_v34 = vsel %vm5651_vm12, %v2322_v31, %v2324_v15  ;;  %v2213_v24 = vrot.slane %v4225_v46, 4  ;;  %vm6302_vm8 = vcmask 123905   ;;  %vm6604_vm11 = vcmask 867328   ;;  %v2436_v55 = vld [vmem:[#allocation2 + $0x18] sm:$0x1] }
 0x109   : > { %v2163_v3 = vsel %vm6596_vm6, %v4220_v26, %v2161_v57  ;;  %vm5694_vm5 = vmand %vm6299_vm10, %vm6597_vm7  ;;  %vm6600_vm6 = vsmask.f32 256  ;;  %2326 = vst [vmem:[#allocation2 + $0x44] sm:$0x44] %v2325_v34  ;;  %vm6603_vm7 = vcmask 875520   ;;  %v2269_v5 = vsel %vm6604_vm11, %v2266_v4, %v2267_v10  ;;  %v2492_v21 = vpop.permute.xlu0 %2491 }
 0x10a   : > { %v2166_v13 = vsel %vm5657_vm1, %v2163_v3, %v2165_v37  ;;  %vm5704_vm13 = vmand %vm6300_vm15, %vm6600_vm6  ;;  %v2376_v25 = vsel %vm6603_vm7, %v4226_v53, %v2375_v38  ;;  %v1697_v30 = vrot.slane %v1696_v56, 4  ;;  %vm6605_vm12 = vsmask.f32 2304  ;;  %v1701_v28 = vld [vmem:[#allocation2 + $0x58] sm:$0x11] }
 0x10b   : > { %2167 = vst [vmem:[#allocation2 + $0x28] sm:$0x88] %v2166_v13  ;;  %vm5712_vm10 = vmand %vm6301_vm0, %vm6605_vm12  ;;  %vm6303_vm6 = vcmask 124930   ;;  %v2379_v20 = vsel %vm5657_vm1, %v2376_v25, %v2378_v29  ;;  %v2272_v58 = vsel %vm5630_vm4, %v2269_v5, %v2271_v47  ;;  %vm6304_vm12 = vcmask 1044067   ;;  %v2505_v39 = vld [vmem:[#allocation2 + $0x18] sm:$0x2]  ;;  %v2562_v63 = vpop.permute.xlu1 %2561 }
 0x10c   : > { %vm6608_vm15 = vmmov %vm6603_vm7  ;;  %vm6609_vm7 = vnez %v6412_v22  ;;  %2380 = vst [vmem:[#allocation2 + $0x44] sm:$0x88] %v2379_v20  ;;  %vm6612_vm1 = vcmask 310272   ;;  %vm6613_vm4 = vnez %v6328_v62  ;;  %v2423_v44 = vrot.slane %v2422_v59, 4  ;;  %v2431_v40 = vld [vmem:[#allocation2 + $0x10] sm:$0x11] }
 0x10d   : > { %v2215_v48 = vsel %vm6608_vm15, %v4225_v46, %v2213_v24  ;;  %vm5725_vm11 = vmor %vm6609_vm7, %vm5694_vm5  ;;  %2273 = vst [vmem:[#allocation2 + $0x44] sm:$0x22] %v2272_v58  ;;  %v1698_v18 = vsel %vm6612_vm1, %v1697_v30, %v1696_v56  ;;  %v1705_v27 = vsel %vm6613_vm4, %v1697_v30, %v1704_v43  ;;  %vm6614_vm15 = vsmask.f32 1280  ;;  %v2575_v19 = vld [vmem:[#allocation2 + $0x18] sm:$0x4]  ;;  %v2633_v45 = vpop.permute.xlu0 %2632 }
 0x10e   : > { %v2218_v60 = vsel %vm5617_vm3, %v2215_v48, %v2217_v0  ;;  %vm5736_vm0 = vmand %vm6302_vm8, %vm6614_vm15  ;;  %v1702_v11 = vsel %vm6481_vm14, %v1698_v18, %v1701_v28  ;;  %1706 = vst [vmem:[#allocation2 + $0x60] sm:$0x1] %v1705_v27  ;;  %vm6311_vm3 = vcmask 613376   ;;  %vm6617_vm5 = vnez %v6363_v12  ;;  %v2500_v41 = vld [vmem:[#allocation2 + $0x10] sm:$0x22]  ;;  %v3208_v57 = vld [vmem:[#allocation2 + $0x8] sm:$0xff] }
 0x10f   : > { %2219 = vst [vmem:[#allocation2 + $0x44] sm:$0x11] %v2218_v60  ;;  %vm5746_vm7 = vmor %vm6617_vm5, %vm5712_vm10  ;;  %vm6305_vm1 = vcmask 125955   ;;  %vm6306_vm4 = vcmask 1043456   ;;  %vm6620_vm15 = vcmask 621568   ;;  %v2437_v6 = vsel %vm5704_vm13, %v2423_v44, %v2436_v55  ;;  %v2702_v24 = vpop.permute.xlu1 %2701 }
 0x110   : > { %1703 = vst [vmem:[#allocation2 + $0x58] sm:$0x11] %v1702_v11  ;;  %v2425_v36 = vsel %vm6620_vm15, %v2423_v44, %v2422_v59  ;;  %v2493_v16 = vrot.slane %v2492_v21, 4  ;;  %vm6621_vm14 = vsmask.f32 2304  ;;  %v2563_v51 = vrot.slane %v2562_v63, 4 }
 0x111   : > { %vm5755_vm8 = vmand %vm6303_vm6, %vm6621_vm14  ;;  %v2432_v12 = vsel %vm5686_vm9, %v2425_v36, %v2431_v40  ;;  %2438 = vst [vmem:[#allocation2 + $0x18] sm:$0x1] %v2437_v6  ;;  %vm6624_vm5 = vsmask.f32 3328  ;;  %vm6308_vm14 = vcmask 498688   ;;  %v4419_v4 = vmov 65535   ;;  %v2763_v30 = vpop.permute.xlu0 %2762 }
 0x112   : > { %vm5763_vm15 = vmand %vm6304_vm12, %vm6624_vm5  ;;  %2433 = vst [vmem:[#allocation2 + $0x10] sm:$0x11] %v2432_v12  ;;  %v2494_v2 = vsel %vm6311_vm3, %v2493_v16, %v2492_v21  ;;  %v2506_v35 = vsel %vm5736_vm0, %v2493_v16, %v2505_v39  ;;  %v2647_v9 = vld [vmem:[#allocation2 + $0x18] sm:$0x8]  ;;  %v3212_v53 = vld [vmem:[#allocation2 + $0x24] sm:$0xff]  ;;  %v3307_v31 = vsel %vm6306_vm4, 4294967295, %v4419_v4  ;;  %v2576_v15 = vsel %vm5755_vm8, %v2563_v51, %v2575_v19 }
 0x113   : > { %vm6627_vm6 = vmmov %vm6624_vm5  ;;  %v2501_v42 = vsel %vm5725_vm11, %v2494_v2, %v2500_v41  ;;  %2507 = vst [vmem:[#allocation2 + $0x18] sm:$0x2] %v2506_v35  ;;  %v4356_v46 = vld [vmem:[#allocation2 + $0xc] ss:$28 sps:$4 sm:$0xff]   ;;  %vm3306_vm5 = vcmask 1044480   ;;  %vm6630_vm12 = vcmask 605184   ;;  %v4083_v49 = vcombine.low %v3208_v57, %v3212_v53  ;;  %v2824_v28 = vpop.permute.xlu1 %2823 }
 0x114   : > { %vm5772_vm10 = vmand %vm6305_vm1, %vm6627_vm6  ;;  %2502 = vst [vmem:[#allocation2 + $0x10] sm:$0x22] %v2501_v42  ;;  %v2564_v3 = vsel %vm6630_vm12, %v2563_v51, %v2562_v63  ;;  %v2570_v37 = vld [vmem:[#allocation2 + $0x10] sm:$0x44]  ;;  %vm6631_vm6 = vnez %v6428_v32  ;;  %v2634_v10 = vrot.slane %v2633_v45, 4  ;;  %vm6307_vm4 = vcmask 490496   ;;  %3383 = vmatprep.subr.bf16.mxu1 %v4356_v46 }
 0x115   : > { %vm5786_vm1 = vmor %vm6631_vm6, %vm5763_vm15  ;;  %v2571_v13 = vsel %vm5746_vm7, %v2564_v3, %v2570_v37  ;;  %2577 = vst [vmem:[#allocation2 + $0x18] sm:$0x4] %v2576_v15  ;;  %v2711_v34 = vld [vmem:[#allocation2 + $0x34] sm:$0x1]  ;;  %v2771_v43 = vld [vmem:[#allocation2 + $0x34] sm:$0x2]  ;;  %3384 = vmatpush1.bf16.msra.mxu1 %v4083_v49  ;;  %v2886_v6 = vpop.permute.xlu0 %2885 }
 0x116   : > { %2572 = vst [vmem:[#allocation2 + $0x10] sm:$0x44] %v2571_v13  ;;  %v2636_v56 = vsel %vm6308_vm14, %v2634_v10, %v2633_v45  ;;  %v2642_v29 = vld [vmem:[#allocation2 + $0x10] sm:$0x88]  ;;  %v2648_v32 = vsel %vm5772_vm10, %v2634_v10, %v2647_v9  ;;  %v2703_v25 = vrot.slane %v2702_v24, 4  ;;  %v5796_v5 = vsel %vm3306_vm5, %v3307_v31, 0 }
 0x117   : > { %v2643_v47 = vsel %vm5786_vm1, %v2636_v56, %v2642_v29  ;;  %2649 = vst [vmem:[#allocation2 + $0x18] sm:$0x8] %v2648_v32  ;;  %vm6309_vm12 = vcmask 506880   ;;  %v4358_v1 = vld [vmem:[#allocation2 + $0x3c] ss:$28 sps:$4 sm:$0x1f]   ;;  %v2398_v2 = vpop.permute.xlu1 %2397 }
 0x118   : > { %2644 = vst [vmem:[#allocation2 + $0x10] sm:$0x88] %v2643_v47  ;;  %v2705_v0 = vsel %vm6307_vm4, %v2703_v25, %v2702_v24  ;;  %v2708_v20 = vld [vmem:[#allocation2 + $0x2c] sm:$0x11]  ;;  %v2712_v48 = vsel %vm5704_vm13, %v2703_v25, %v2711_v34  ;;  %v2764_v58 = vrot.slane %v2763_v30, 4  ;;  %v3313_v18 = vand.u32 %v4358_v1, %v5796_v5  ;;  %v5815_v16 = vld [vmem:[%s6211_s1] sm:$0xff]  }
 0x119   : > { %v4360_v55 = vld [vmem:[#allocation2 + $0x38] ss:$28 sps:$4 sm:$0x1f]   ;;  %v2709_v59 = vsel %vm5686_vm9, %v2705_v0, %v2708_v20  ;;  %2713 = vst [vmem:[#allocation2 + $0x34] sm:$0x1] %v2712_v48  ;;  %v2825_v39 = vrot.slane %v2824_v28, 4  ;;  %v2947_v53 = vpop.permute.xlu0 %2946 }
 0x11a   : > { %v2832_v60 = vld [vmem:[#allocation2 + $0x34] sm:$0x4]  ;;  %2710 = vst [vmem:[#allocation2 + $0x2c] sm:$0x11] %v2709_v59  ;;  %v2765_v27 = vsel %vm6309_vm12, %v2764_v58, %v2763_v30  ;;  %v2768_v44 = vld [vmem:[#allocation2 + $0x2c] sm:$0x22]  ;;  %v2772_v11 = vsel %vm5736_vm0, %v2764_v58, %v2771_v43  ;;  %v3310_v21 = vand.u32 %v4360_v55, %v5796_v5  ;;  %3332 = vmatprep.subr.bf16.mxu0 %v3313_v18 }
 0x11b   : > { %v2769_v36 = vsel %vm5725_vm11, %v2765_v27, %v2768_v44  ;;  %2773 = vst [vmem:[#allocation2 + $0x34] sm:$0x2] %v2772_v11  ;;  %v2894_v40 = vld [vmem:[#allocation2 + $0x34] sm:$0x8]  ;;  %v2826_v12 = vsel %vm6308_vm14, %v2825_v39, %v2824_v28  ;;  %v2829_v19 = vld [vmem:[#allocation2 + $0x2c] sm:$0x44]  ;;  %v2833_v63 = vsel %vm5755_vm8, %v2825_v39, %v2832_v60  ;;  %v3008_v10 = vpop.permute.xlu1 %3007 }
 0x11c   : > { %2770 = vst [vmem:[#allocation2 + $0x2c] sm:$0x22] %v2769_v36  ;;  %v2887_v26 = vrot.slane %v2886_v6, 4  ;;  %3333 = vmatpush1.bf16.msra.mxu0 %v3310_v21  ;;  %vm3298_vm15 = vcmask 203776   ;;  %v2830_v41 = vsel %vm5746_vm7, %v2826_v12, %v2829_v19  ;;  %2834 = vst [vmem:[#allocation2 + $0x34] sm:$0x4] %v2833_v63 }
 0x11d   : > { %2831 = vst [vmem:[#allocation2 + $0x2c] sm:$0x44] %v2830_v41  ;;  %v2891_v35 = vld [vmem:[#allocation2 + $0x2c] sm:$0x88]  ;;  %v2399_v42 = vrot.slane %v2398_v2, 4  ;;  %vm6312_vm5 = vcmask 384000   ;;  %v3070_v29 = vpop.permute.xlu0 %3069 }
 0x11e   : > { %v2888_v51 = vsel %vm6307_vm4, %v2887_v26, %v2886_v6  ;;  %v2895_v9 = vsel %vm5772_vm10, %v2887_v26, %v2894_v40  ;;  %v2956_v57 = vld [vmem:[#allocation2 + $0x50] sm:$0x1]  ;;  %vm6634_vm6 = vcmask 867328   ;;  %v2402_v4 = vld [vmem:[#allocation2 + $0x60] sm:$0x11]  ;;  %v2948_v31 = vrot.slane %v2947_v53, 4 }
 0x11f   : > { %v2892_v45 = vsel %vm5786_vm1, %v2888_v51, %v2891_v35  ;;  %2896 = vst [vmem:[#allocation2 + $0x34] sm:$0x8] %v2895_v9  ;;  %4095 = vmatmul.mubr.msk.bf16.vlgmr.msra.gmra.mrb[0].mxu0 %vm3298_vm15, %v5815_v16  ;;  %v2400_v46 = vsel %vm6634_vm6, %v2398_v2, %v2399_v42  ;;  %v6635_v3 = vmov 0   ;;  %vm6310_vm4 = vcmask 375808   ;;  %v3017_v15 = vld [vmem:[#allocation2 + $0x50] sm:$0x2]  ;;  %v3132_v48 = vpop.permute.xlu1 %3131 }
 0x120   : > { %2893 = vst [vmem:[#allocation2 + $0x2c] sm:$0x88] %v2892_v45  ;;  %3372 = vmatprep.mubr.bf16.mxu0 %v6635_v3  ;;  %v2403_v37 = vsel %vm5408_vm2, %v2400_v46, %v2402_v4  ;;  %v2950_v49 = vsel %vm6312_vm5, %v2948_v31, %v2947_v53  ;;  %v2953_v13 = vld [vmem:[#allocation2 + $0x48] sm:$0x11]  ;;  %v2957_v34 = vsel %vm5704_vm13, %v2948_v31, %v2956_v57  ;;  %v3009_v24 = vrot.slane %v3008_v10, 4 }
 0x121   : > { %2404 = vst [vmem:[#allocation2 + $0x60] sm:$0x11] %v2403_v37  ;;  %vm6636_vm14 = vsmask.f32 7938  ;;  %vm6637_vm6 = vcmask 1040992   ;;  %v2954_v8 = vsel %vm5686_vm9, %v2950_v49, %v2953_v13  ;;  %vm2920_vm2 = vcmask 392192   ;;  %v2459_v28 = vpop.permute.xlu0 %2458 }
 0x122   : > { %vm5838_vm12 = vmand %vm6637_vm6, %vm6636_vm14  ;;  %2958 = vst [vmem:[#allocation2 + $0x50] sm:$0x1] %v2957_v34  ;;  %v3078_v56 = vld [vmem:[#allocation2 + $0x50] sm:$0x4]  ;;  %v5847_v32 = vld [vmem:[%s6211_s1 + $0x8] sm:$0xff]   ;;  %v3011_v25 = vsel %vm6310_vm4, %v3009_v24, %v3008_v10  ;;  %v3018_v30 = vsel %vm5736_vm0, %v3009_v24, %v3017_v15  ;;  %v3071_v1 = vrot.slane %v3070_v29, 4  ;;  %vm6640_vm14 = vnez %v6376_v33 }
 0x123   : > { %2955 = vst [vmem:[#allocation2 + $0x48] sm:$0x11] %v2954_v8  ;;  %v3014_v47 = vld [vmem:[#allocation2 + $0x48] sm:$0x22]  ;;  %3019 = vst [vmem:[#allocation2 + $0x50] sm:$0x2] %v3018_v30  ;;  %v2529_v36 = vpop.permute.xlu1 %2528 }
 0x124   : > { %v3015_v0 = vsel %vm5725_vm11, %v3011_v25, %v3014_v47  ;;  %v3140_v20 = vld [vmem:[#allocation2 + $0x50] sm:$0x8]  ;;  %vm5858_vm6 = vmor %vm6640_vm14, %vm5838_vm12  ;;  %v3075_v55 = vld [vmem:[#allocation2 + $0x48] sm:$0x44]  ;;  %v3072_v22 = vsel %vm2920_vm2, %v3071_v1, %v3070_v29  ;;  %v3079_v59 = vsel %vm5755_vm8, %v3071_v1, %v3078_v56  ;;  %v3133_v23 = vrot.slane %v3132_v48, 4 }
 0x125   : > { %3016 = vst [vmem:[#allocation2 + $0x48] sm:$0x22] %v3015_v0  ;;  %vm6643_vm0 = vsmask.f32 7938  ;;  %vm6644_vm11 = vcmask 122880   ;;  %v3076_v33 = vsel %vm5746_vm7, %v3072_v22, %v3075_v55  ;;  %vm6648_vm14 = vcmask 1042017   ;;  %v2599_v51 = vpop.permute.xlu0 %2598 }
 0x126   : > { %vm5867_vm4 = vmand %vm6644_vm11, %vm6643_vm0  ;;  %3080 = vst [vmem:[#allocation2 + $0x50] sm:$0x4] %v3079_v59  ;;  %vm6647_vm12 = vsmask.f32 7942  ;;  %v3134_v17 = vsel %vm6312_vm5, %v3133_v23, %v3132_v48  ;;  %v3137_v27 = vld [vmem:[#allocation2 + $0x48] sm:$0x88]  ;;  %v3141_v44 = vsel %vm5772_vm10, %v3133_v23, %v3140_v20 }
 0x127   : > { %vm5875_vm3 = vmand %vm6648_vm14, %vm6647_vm12  ;;  %4096 = vmatmul.mubr.msk.bf16.gmra.mrb[4].mxu0 %vm3298_vm15, %v5847_v32  ;;  %3077 = vst [vmem:[#allocation2 + $0x48] sm:$0x44] %v3076_v33  ;;  %v2471_v62 = vld [vmem:[#allocation2 + $0x18] sm:$0x1]  ;;  %v2460_v11 = vrot.slane %v2459_v28, 4  ;;  %vm6652_vm7 = vcmask 123905   ;;  %v3138_v21 = vsel %vm5786_vm1, %v3134_v17, %v3137_v27  ;;  %vm6660_vm1 = vnez %v6446_v61  ;;  %v4229_v37 = vpop.permute.xlu1 %4228 }
 0x128   : > { %vm6651_vm8 = vmmov %vm6647_vm12  ;;  %3468 = vmatprep.mubr.bf16.mxu0 %v6635_v3  ;;  %3142 = vst [vmem:[#allocation2 + $0x50] sm:$0x8] %v3141_v44  ;;  %vm6655_vm11 = vsmask.f32 7946  ;;  %vm6656_vm12 = vcmask 1043042   ;;  %vm6659_vm10 = vcmask 613376   ;;  %v4231_v13 = vunpack.i.h.bf16 %v4229_v37 }
 0x129   : > { %vm5886_vm0 = vmand %vm6652_vm7, %vm6651_vm8  ;;  %v4361_v40 = vld [vmem:[#allocation2 + $0x44] ss:$28 sps:$4 sm:$0x1f]   ;;  %3139 = vst [vmem:[#allocation2 + $0x48] sm:$0x88] %v3138_v21  ;;  %v2462_v6 = vsel %vm6659_vm10, %v2460_v11, %v2459_v28  ;;  %v2472_v19 = vsel %vm5867_vm4, %v2460_v11, %v2471_v62  ;;  %v2530_v63 = vrot.slane %v2529_v36, 4  ;;  %vm6668_vm10 = vnez %v6394_v50  ;;  %v4234_v8 = vpop.permute.xlu0 %4233 }
 0x12a   : > { %vm5895_vm14 = vmand %vm6656_vm12, %vm6655_vm11  ;;  %v2467_v12 = vld [vmem:[#allocation2 + $0x10] sm:$0x11]  ;;  %v4363_v26 = vld [vmem:[#allocation2 + $0x40] ss:$28 sps:$4 sm:$0x1f]   ;;  %v3319_v61 = vand.u32 %v4361_v40, %v5796_v5  ;;  %v2600_v53 = vrot.slane %v2599_v51, 4  ;;  %v4230_v34 = vunpack.i.l.bf16 %v4229_v37  ;;  %v4236_v25 = vunpack.i.h.bf16 %v4234_v8 }
 0x12b   : > { %vm5906_vm8 = vmor %vm6660_vm1, %vm5875_vm3  ;;  %v2468_v41 = vsel %vm5858_vm6, %v2462_v6, %v2467_v12  ;;  %2473 = vst [vmem:[#allocation2 + $0x18] sm:$0x1] %v2472_v19  ;;  %v2541_v2 = vld [vmem:[#allocation2 + $0x18] sm:$0x2]  ;;  %vm6667_vm3 = vcmask 605184   ;;  %v3316_v46 = vand.u32 %v4363_v26, %v5796_v5  ;;  %vm6677_vm5 = vcmask 125955   ;;  %v2918_v20 = vpop.permute.xlu1 %2917 }
 0x12c   : > { %vm6663_vm7 = vmmov %vm6655_vm11  ;;  %vm6664_vm11 = vcmask 124930   ;;  %2469 = vst [vmem:[#allocation2 + $0x10] sm:$0x11] %v2468_v41  ;;  %v2532_v9 = vsel %vm6667_vm3, %v2530_v63, %v2529_v36  ;;  %v2537_v42 = vld [vmem:[#allocation2 + $0x10] sm:$0x22]  ;;  %v2542_v45 = vsel %vm5886_vm0, %v2530_v63, %v2541_v2  ;;  %3385 = vmatprep.subr.bf16.mxu1 %v3319_v61  ;;  %v2796_v56 = vrot.slane %v4231_v13, 4 }
 0x12d   : > { %vm5914_vm12 = vmand %vm6664_vm11, %vm6663_vm7  ;;  %v2538_v4 = vsel %vm5906_vm8, %v2532_v9, %v2537_v42  ;;  %2543 = vst [vmem:[#allocation2 + $0x18] sm:$0x2] %v2542_v45  ;;  %v2611_v31 = vld [vmem:[#allocation2 + $0x18] sm:$0x4]  ;;  %vm6671_vm7 = vsmask.f32 7950  ;;  %3386 = vmatpush1.bf16.msra.mxu1 %v3316_v46  ;;  %v4235_v47 = vunpack.i.l.bf16 %v4234_v8  ;;  %v4239_v27 = vpop.permute.xlu0 %4238 }
 0x12e   : > { %vm5926_vm1 = vmor %vm6668_vm10, %vm5895_vm14  ;;  %vm6672_vm11 = vcmask 1044067   ;;  %2539 = vst [vmem:[#allocation2 + $0x10] sm:$0x22] %v2538_v4  ;;  %vm6675_vm14 = vcmask 506880   ;;  %v2607_v10 = vld [vmem:[#allocation2 + $0x10] sm:$0x44]  ;;  %v2612_v49 = vsel %vm5914_vm12, %v2600_v53, %v2611_v31  ;;  %v4241_v21 = vunpack.i.h.bf16 %v4239_v27 }
 0x12f   : > { %vm5935_vm3 = vmand %vm6672_vm11, %vm6671_vm7  ;;  %v2602_v50 = vsel %vm6675_vm14, %v2600_v53, %v2599_v51  ;;  %2613 = vst [vmem:[#allocation2 + $0x18] sm:$0x4] %v2612_v49  ;;  %v2672_v29 = vrot.slane %v4230_v34, 4  ;;  %vm6680_vm11 = vnez %v6456_v7  ;;  %v2682_v1 = vld [vmem:[#allocation2 + $0x18] sm:$0x8]  ;;  %v2857_v28 = vrot.slane %v4236_v25, 4  ;;  %v4244_v41 = vpop.permute.xlu1 %4243 }
 0x130   : > { %v2608_v24 = vsel %vm5926_vm1, %v2602_v50, %v2607_v10  ;;  %vm6676_vm10 = vmmov %vm6671_vm7  ;;  %v2803_v0 = vld [vmem:[#allocation2 + $0x34] sm:$0x2]  ;;  %4097 = vmatmul.mubr.msk.bf16.vlgmr.msra.gmra.mrb[0].mxu1 %vm3298_vm15, %v5815_v16  ;;  %v2800_v59 = vld [vmem:[#allocation2 + $0x2c] sm:$0x22]  ;;  %v2735_v18 = vrot.slane %v4235_v47, 4  ;;  %v2919_v11 = vrot.slane %v2918_v20, 4  ;;  %v4240_v36 = vunpack.i.l.bf16 %v4239_v27 }
 0x131   : > { %vm5946_vm7 = vmand %vm6677_vm5, %vm6676_vm10  ;;  %2609 = vst [vmem:[#allocation2 + $0x10] sm:$0x44] %v2608_v24  ;;  %vm6683_vm5 = vcmask 498688   ;;  %v2804_v7 = vsel %vm5886_vm0, %v2796_v56, %v2803_v0  ;;  %v2678_v23 = vld [vmem:[#allocation2 + $0x10] sm:$0x88]  ;;  %3425 = vmatprep.mubr.bf16.mxu1 %v6635_v3  ;;  %v3103_v53 = vrot.slane %v4241_v21, 4  ;;  %v4246_v4 = vunpack.i.h.bf16 %v4244_v41  ;;  %v3192_v37 = vpop.permute.xlu0 %3191 }
 0x132   : > { %vm5954_vm14 = vmor %vm6680_vm11, %vm5935_vm3  ;;  %v2797_v48 = vsel %vm6683_vm5, %v2796_v56, %v4231_v13  ;;  %v2683_v22 = vsel %vm5946_vm7, %v2672_v29, %v2682_v1  ;;  %2805 = vst [vmem:[#allocation2 + $0x34] sm:$0x2] %v2804_v7  ;;  %v2742_v44 = vld [vmem:[#allocation2 + $0x34] sm:$0x1]  ;;  %v2864_v62 = vld [vmem:[#allocation2 + $0x34] sm:$0x4]  ;;  %v2921_v61 = vsel %vm2920_vm2, %v2919_v11, %v2918_v20  ;;  %v4245_v10 = vunpack.i.l.bf16 %v4244_v41 }
 0x133   : > { %vm6684_vm10 = vmmov %vm6683_vm5  ;;  %2684 = vst [vmem:[#allocation2 + $0x18] sm:$0x8] %v2683_v22  ;;  %v2801_v33 = vsel %vm5906_vm8, %v2797_v48, %v2800_v59  ;;  %v2739_v14 = vld [vmem:[#allocation2 + $0x2c] sm:$0x11]  ;;  %vm6685_vm3 = vcmask 490496   ;;  %v2865_v6 = vsel %vm5914_vm12, %v2857_v28, %v2864_v62  ;;  %v2743_v19 = vsel %vm5867_vm4, %v2735_v18, %v2742_v44 }
 0x134   : > { %v2673_v55 = vsel %vm6684_vm10, %v2672_v29, %v4230_v34  ;;  %2802 = vst [vmem:[#allocation2 + $0x2c] sm:$0x22] %v2801_v33  ;;  %v2858_v40 = vsel %vm6685_vm3, %v2857_v28, %v4236_v25  ;;  %vm6686_vm11 = vmmov %vm6685_vm3  ;;  %v2861_v63 = vld [vmem:[#allocation2 + $0x2c] sm:$0x44]  ;;  %v2927_v26 = vld [vmem:[#allocation2 + $0x34] sm:$0x8] }
 0x135   : > { %v2679_v17 = vsel %vm5954_vm14, %v2673_v55, %v2678_v23  ;;  %v2736_v12 = vsel %vm6686_vm11, %v2735_v18, %v4235_v47  ;;  %2866 = vst [vmem:[#allocation2 + $0x34] sm:$0x4] %v2865_v6  ;;  %2744 = vst [vmem:[#allocation2 + $0x34] sm:$0x1] %v2743_v19  ;;  %v2862_v51 = vsel %vm5926_vm1, %v2858_v40, %v2861_v63  ;;  %v2924_v9 = vld [vmem:[#allocation2 + $0x2c] sm:$0x88] }
 0x136   : > { %2680 = vst [vmem:[#allocation2 + $0x10] sm:$0x88] %v2679_v17  ;;  %v2740_v2 = vsel %vm5858_vm6, %v2736_v12, %v2739_v14  ;;  %v2928_v42 = vsel %vm5946_vm7, %v2919_v11, %v2927_v26  ;;  %2863 = vst [vmem:[#allocation2 + $0x2c] sm:$0x44] %v2862_v51  ;;  %v2925_v45 = vsel %vm5954_vm14, %v2921_v61, %v2924_v9  ;;  %v2980_v46 = vrot.slane %v4240_v36, 4 }
 0x137   : > { %2741 = vst [vmem:[#allocation2 + $0x2c] sm:$0x11] %v2740_v2  ;;  %2929 = vst [vmem:[#allocation2 + $0x34] sm:$0x8] %v2928_v42  ;;  %v3200_v31 = vld [vmem:[#allocation2 + $0x6c] sm:$0x1]  ;;  %v6028_v14 = vstv %s3542_s21 }
 0x138   : > { %2926 = vst [vmem:[#allocation2 + $0x2c] sm:$0x88] %v2925_v45  ;;  %v2987_v15 = vld [vmem:[#allocation2 + $0x50] sm:$0x1]  ;;  %v3110_v50 = vld [vmem:[#allocation2 + $0x50] sm:$0x4]  ;;  %4098 = vmatmul.mubr.msk.bf16.gmra.mrb[4].mxu1 %vm3298_vm15, %v5847_v32 }
 0x139   : > { %v3193_v49 = vrot.slane %v3192_v37, 4  ;;  %v3107_v13 = vld [vmem:[#allocation2 + $0x48] sm:$0x44]  ;;  %vm6687_vm2 = vcmask 384000   ;;  %v3111_v24 = vsel %vm5914_vm12, %v3103_v53, %v3110_v50  ;;  %v2984_v56 = vld [vmem:[#allocation2 + $0x48] sm:$0x11]  ;;  %v2988_v29 = vsel %vm5867_vm4, %v2980_v46, %v2987_v15  ;;  %4122 = vmatprep.mubr.msk.bf16.mxu1 %vm3298_vm15, %v5815_v16 }
 0x13a   : > { %v3104_v34 = vsel %vm6687_vm2, %v3103_v53, %v4241_v21  ;;  %vm6688_vm5 = vmmov %vm6687_vm2  ;;  %3112 = vst [vmem:[#allocation2 + $0x50] sm:$0x4] %v3111_v24  ;;  %v3165_v1 = vrot.slane %v4246_v4, 4  ;;  %v3042_v35 = vrot.slane %v4245_v10, 4  ;;  %v3049_v60 = vld [vmem:[#allocation2 + $0x50] sm:$0x2] }
 0x13b   : > { %v2981_v8 = vsel %vm6688_vm5, %v2980_v46, %v4240_v36  ;;  %v3108_v25 = vsel %vm5926_vm1, %v3104_v34, %v3107_v13  ;;  %2989 = vst [vmem:[#allocation2 + $0x50] sm:$0x1] %v2988_v29  ;;  %v3172_v0 = vld [vmem:[#allocation2 + $0x50] sm:$0x8]  ;;  %vm6689_vm4 = vcmask 375808   ;;  %v3201_v57 = vsel %vm5704_vm13, %v3193_v49, %v3200_v31 }
 0x13c   : > { %v2985_v47 = vsel %vm5858_vm6, %v2981_v8, %v2984_v56  ;;  %3109 = vst [vmem:[#allocation2 + $0x48] sm:$0x44] %v3108_v25  ;;  %v3194_v20 = vsel %vm6689_vm4, %v3193_v49, %v3192_v37  ;;  %vm6690_vm12 = vmmov %vm6689_vm4  ;;  %v3173_v58 = vsel %vm5946_vm7, %v3165_v1, %v3172_v0  ;;  %v3046_v22 = vld [vmem:[#allocation2 + $0x48] sm:$0x22]  ;;  %v3050_v59 = vsel %vm5886_vm0, %v3042_v35, %v3049_v60  ;;  %v3169_v7 = vld [vmem:[#allocation2 + $0x48] sm:$0x88] }
 0x13d   : > { %2986 = vst [vmem:[#allocation2 + $0x48] sm:$0x11] %v2985_v47  ;;  %v3166_v48 = vsel %vm6690_vm12, %v3165_v1, %v4246_v4  ;;  %vm6691_vm6 = vmmov %vm6689_vm4  ;;  %v3197_v23 = vld [vmem:[#allocation2 + $0x64] sm:$0x11] }
 0x13e   : > { %v3043_v55 = vsel %vm6691_vm6, %v3042_v35, %v4245_v10  ;;  %3202 = vst [vmem:[#allocation2 + $0x6c] sm:$0x1] %v3201_v57  ;;  %3174 = vst [vmem:[#allocation2 + $0x50] sm:$0x8] %v3173_v58  ;;  %v3170_v52 = vsel %vm5954_vm14, %v3166_v48, %v3169_v7  ;;  %v3198_v43 = vsel %vm5686_vm9, %v3194_v20, %v3197_v23  ;;  %v4366_v28 = vld [vmem:[#allocation2 + $0x18] ss:$28 sps:$4 sm:$0xff]  }
 0x13f   : > { %v3047_v33 = vsel %vm5906_vm8, %v3043_v55, %v3046_v22  ;;  %3051 = vst [vmem:[#allocation2 + $0x50] sm:$0x2] %v3050_v59  ;;  %3171 = vst [vmem:[#allocation2 + $0x48] sm:$0x88] %v3170_v52  ;;  %v4367_v39 = vld [vmem:[#allocation2 + $0x10] ss:$28 sps:$4 sm:$0xff]   ;;  %4118 = vmatprep.subr.bf16.mxu1 %v4366_v28 }
 0x140   : > { %3048 = vst [vmem:[#allocation2 + $0x48] sm:$0x22] %v3047_v33  ;;  %3199 = vst [vmem:[#allocation2 + $0x64] sm:$0x11] %v3198_v43  ;;  %v4369_v18 = vld [vmem:[#allocation2 + $0x14] ss:$28 sps:$4 sm:$0xff]   ;;  %4119 = vmatpush3.bf16.msra.mxu1 %v4366_v28 }
 0x141   : > { %3436 = vmatprep.subr.bf16.mxu0 %v4369_v18 }
 0x142   : > { %3437 = vmatpush1.bf16.msra.mxu0 %v4367_v39 }
 0x146   : > { %v4370_v17 = vld [vmem:[#allocation2 + $0x50] ss:$28 sps:$4 sm:$0x1f]   ;;  %v6030_v40 = vpop.permute.xlu0 %3550 }
 0x147   : > { %v4371_v38 = vld [vmem:[#allocation2 + $0x48] ss:$28 sps:$4 sm:$0x1f]   ;;  %v3328_v27 = vand.u32 %v4370_v17, %v5796_v5  ;;  %v6025_v62 = vpop.permute.xlu1 %3545 }
 0x148   : > { %v4373_v44 = vld [vmem:[#allocation2 + $0x4c] ss:$28 sps:$4 sm:$0x1f]   ;;  %v3322_v30 = vand.u32 %v4371_v38, %v5796_v5 }
 0x149   : > { %4120 = vmatprep.subr.bf16.mxu1 %v3328_v27  ;;  %v3325_v54 = vand.u32 %v4373_v44, %v5796_v5 }
 0x14a   : > { %4121 = vmatpush3.bf16.msra.mxu1 %v3328_v27 }
 0x14b   : > { %3438 = vmatprep.subr.bf16.mxu0 %v3325_v54  ;;  %v6034_v12 = vpop.permute.xlu1 %3555 }
 0x14c   : > { %3439 = vmatpush1.bf16.msra.mxu0 %v3322_v30 }
 0x14d   : > { %4123 = vmatmul.mubr.msk.bf16.vlgmr.msra.gmra.mrb[8].mxu1 %vm3298_vm15, %v5847_v32 }
 0x14f   : > { %4099 = vmatmul.mubr.msk.bf16.vlgmr.msra.gmra.mrb[8].mxu0 %vm3298_vm15, %v5815_v16  ;;  %v6042_v61 = vpop.permute.xlu1 %3560 }
 0x150   : > { %3478 = vmatprep.mubr.bf16.mxu0 %v6635_v3 }
 0x157   : > { %4100 = vmatmul.mubr.msk.bf16.gmra.mrb[12].mxu0 %vm3298_vm15, %v5847_v32 }
 0x1f2   : > { %v3364_v11 = vpop.f32.mrb[0].mxu0 }
 0x1f3   : > { %v3366_v21 = vpop.f32.mrb[1].mxu0  ;;  %v3563_v5 = vadd.f32 %v6025_v62, %v3364_v11 }
 0x1f4   : > { %v3368_v36 = vpop.f32.mrb[2].mxu0  ;;  %v3564_v46 = vadd.f32 %v6025_v62, %v3366_v21 }
 0x1f5   : > { %v3370_v6 = vpop.f32.mrb[3].mxu0  ;;  %vm3571_vm9 = vcmp.ge.f32.partialorder %v3563_v5, 0.0  ;;  %v3580_v16 = vmul.f32 %v6028_v14, %v3563_v5  ;;  %v3565_v3 = vadd.f32 %v6030_v40, %v3368_v36 }
 0x1f6   : > { %v3566_v53 = vadd.f32 %v6030_v40, %v3370_v6  ;;  %v3581_v50 = vmul.f32 %v6028_v14, %v3564_v46  ;;  %vm3572_vm1 = vcmp.ge.f32.partialorder %v3564_v46, 0.0 }
 0x1f7   : > { %v6036_v32 = vsel %vm3571_vm9, %v3563_v5, %v3580_v16  ;;  %vm3573_vm13 = vcmp.ge.f32.partialorder %v3565_v3, 0.0  ;;  %v3582_v19 = vmul.f32 %v6028_v14, %v3565_v3 }
 0x1f8   : > { %v3583_v15 = vmul.f32 %v6028_v14, %v3566_v53  ;;  %vm3574_vm8 = vcmp.ge.f32.partialorder %v3566_v53, 0.0  ;;  %v6057_v8 = vsel %vm3572_vm1, %v3564_v46, %v3581_v50 }
 0x1f9   : > { %v6039_v63 = vsel %vm3573_vm13, %v3565_v3, %v3582_v19 }
 0x1fa   : > { %v3374_v26 = vpop.f32.mrb[4].mxu0  ;;  %v6059_v56 = vsel %vm3574_vm8, %v3566_v53, %v3583_v15 }
 0x1fb   : > { %v3567_v41 = vadd.f32 %v6034_v12, %v3374_v26  ;;  %v3376_v2 = vpop.f32.mrb[5].mxu0 }
 0x1fc   : > { %v3378_v51 = vpop.f32.mrb[6].mxu0  ;;  %v3568_v1 = vadd.f32 %v6034_v12, %v3376_v2 }
 0x1fd   : > { %vm3575_vm15 = vcmp.ge.f32.partialorder %v3567_v41, 0.0  ;;  %v3584_v9 = vmul.f32 %v6028_v14, %v3567_v41  ;;  %v3380_v42 = vpop.f32.mrb[7].mxu0  ;;  %v3569_v45 = vadd.f32 %v6042_v61, %v3378_v51 }
 0x1fe   : > { %v3570_v0 = vadd.f32 %v6042_v61, %v3380_v42  ;;  %v3585_v22 = vmul.f32 %v6028_v14, %v3568_v1  ;;  %vm3576_vm11 = vcmp.ge.f32.partialorder %v3568_v1, 0.0 }
 0x1ff   : > { %v6048_v4 = vsel %vm3575_vm15, %v3567_v41, %v3584_v9  ;;  %vm3577_vm0 = vcmp.ge.f32.partialorder %v3569_v45, 0.0  ;;  %v3586_v31 = vmul.f32 %v6028_v14, %v3569_v45 }
 0x200   : > { %v3587_v33 = vmul.f32 %v6028_v14, %v3570_v0  ;;  %vm3578_vm2 = vcmp.ge.f32.partialorder %v3570_v0, 0.0  ;;  %v6086_v30 = vsel %vm3576_vm11, %v3568_v1, %v3585_v22 }
 0x201   : > { %v6051_v37 = vsel %vm3577_vm0, %v3569_v45, %v3586_v31 }
 0x202   : > { %v6091_v21 = vsel %vm3578_vm2, %v3570_v0, %v3587_v33 }
 0x203   : > { %v3417_v10 = vpop.f32.mrb[0].mxu1 }
 0x204   : > { %v3596_v49 = vadd.f32 %v6025_v62, %v3417_v10  ;;  %v3419_v13 = vpop.f32.mrb[1].mxu1 }
 0x205   : > { %v3597_v34 = vadd.f32 %v6025_v62, %v3419_v13  ;;  %v3421_v24 = vpop.f32.mrb[2].mxu1 }
 0x206   : > { %vm3604_vm7 = vcmp.ge.f32.partialorder %v3596_v49, 0.0  ;;  %v3612_v29 = vmul.f32 %v3596_v49, %v6028_v14  ;;  %v3598_v25 = vadd.f32 %v6030_v40, %v3421_v24  ;;  %v3423_v47 = vpop.f32.mrb[3].mxu1 }
 0x207   : > { %vm3605_vm14 = vcmp.ge.f32.partialorder %v3597_v34, 0.0  ;;  %v3613_v35 = vmul.f32 %v3597_v34, %v6028_v14  ;;  %v3599_v60 = vadd.f32 %v6030_v40, %v3423_v47 }
 0x208   : > { %vm3606_vm10 = vcmp.ge.f32.partialorder %v3598_v25, 0.0  ;;  %v3614_v20 = vmul.f32 %v3598_v25, %v6028_v14  ;;  %v3620_v57 = vsel %vm3604_vm7, %v3596_v49, %v3612_v29 }
 0x209   : > { %vm3607_vm3 = vcmp.ge.f32.partialorder %v3599_v60, 0.0  ;;  %v3615_v48 = vmul.f32 %v3599_v60, %v6028_v14  ;;  %v4249_v58 = vpack.i.bf16 %v3620_v57, %v6057_v8  ;;  %v6070_v55 = vsel %vm3605_vm14, %v3597_v34, %v3613_v35 }
 0x20a   : > { %v4254_v59 = vpack.i.bf16 %v6059_v56, %v6070_v55  ;;  %v3622_v7 = vsel %vm3606_vm10, %v3598_v25, %v3614_v20 }
 0x20b   : > { %v3427_v23 = vpop.f32.mrb[4].mxu1  ;;  %4250 = vrot.lane.b32.xlu0 %v4249_v58, %s4413_s28  ;;  %v6077_v52 = vsel %vm3607_vm3, %v3599_v60, %v3615_v48 }
 0x20c   : > { %v3600_v43 = vadd.f32 %v6034_v12, %v3427_v23  ;;  %v3429_v28 = vpop.f32.mrb[5].mxu1  ;;  %4255 = vrot.lane.b32.xlu1 %v4254_v59, %s4413_s28  ;;  %v4259_v39 = vpack.i.bf16 %v6077_v52, %v3622_v7 }
 0x20d   : > { %v3601_v18 = vadd.f32 %v6034_v12, %v3429_v28  ;;  %v3431_v17 = vpop.f32.mrb[6].mxu1 }
 0x20e   : > { %vm3608_vm5 = vcmp.ge.f32.partialorder %v3600_v43, 0.0  ;;  %v3616_v38 = vmul.f32 %v3600_v43, %v6028_v14  ;;  %v3602_v27 = vadd.f32 %v6042_v61, %v3431_v17  ;;  %v3433_v44 = vpop.f32.mrb[7].mxu1 }
 0x20f   : > { %vm3609_vm4 = vcmp.ge.f32.partialorder %v3601_v18, 0.0  ;;  %v3617_v54 = vmul.f32 %v3601_v18, %v6028_v14  ;;  %v3603_v11 = vadd.f32 %v6042_v61, %v3433_v44  ;;  %4260 = vrot.lane.b32.xlu0 %v4259_v39, %s4413_s28 }
 0x210   : > { %vm3610_vm12 = vcmp.ge.f32.partialorder %v3602_v27, 0.0  ;;  %v3618_v5 = vmul.f32 %v3602_v27, %v6028_v14  ;;  %v3624_v36 = vsel %vm3608_vm5, %v3600_v43, %v3616_v38  ;;  %vm6692_vm5 = vcmask 490496  }
 0x211   : > { %vm3611_vm6 = vcmp.ge.f32.partialorder %v3603_v11, 0.0  ;;  %v3619_v6 = vmul.f32 %v3603_v11, %v6028_v14  ;;  %v4264_v16 = vpack.i.bf16 %v3624_v36, %v6086_v30  ;;  %v6096_v3 = vsel %vm3609_vm4, %v3601_v18, %v3617_v54  ;;  %vm6693_vm4 = vmmov %vm6692_vm5 }
 0x212   : > { %v4269_v19 = vpack.i.bf16 %v6091_v21, %v6096_v3  ;;  %v3626_v26 = vsel %vm3610_vm12, %v3602_v27, %v3618_v5  ;;  %vm6694_vm12 = vmmov %vm6693_vm4 }
 0x213   : > { %4265 = vrot.lane.b32.xlu1 %v4264_v16, %s4413_s28  ;;  %v6101_v41 = vsel %vm3611_vm6, %v3603_v11, %v3619_v6  ;;  %vm6695_vm6 = vmmov %vm6693_vm4 }
 0x214   : > { %4270 = vrot.lane.b32.xlu0 %v4269_v19, %s4413_s28  ;;  %v4274_v2 = vpack.i.bf16 %v6101_v41, %v3626_v26 }
 0x217   : > { %4275 = vrot.lane.b32.xlu1 %v4274_v2, %s4413_s28 }
 0x220   : > { %v4124_v51 = vpop.f32.mrb[8].mxu1 }
 0x221   : > { %v3523_v9 = vpop.f32.mrb[9].mxu1  ;;  %v3751_v35 = vadd.f32 %v4124_v51, %v6034_v12 }
 0x222   : > { %v3470_v42 = vpop.f32.mrb[8].mxu0  ;;  %v3747_v45 = vadd.f32 %v6025_v62, %v3523_v9  ;;  %v4125_v53 = vpop.f32.mrb[10].mxu1 }
 0x223   : > { %v3689_v46 = vadd.f32 %v6025_v62, %v3470_v42  ;;  %v3472_v31 = vpop.f32.mrb[9].mxu0  ;;  %v3526_v15 = vpop.f32.mrb[11].mxu1  ;;  %v3753_v20 = vadd.f32 %v4125_v53, %v6042_v61  ;;  %vm3759_vm7 = vcmp.ge.f32.partialorder %v3751_v35, 0.0  ;;  %v3767_v38 = vmul.f32 %v3751_v35, %v6028_v14 }
 0x224   : > { %v3746_v50 = vadd.f32 %v6025_v62, %v3472_v31  ;;  %v3474_v10 = vpop.f32.mrb[10].mxu0  ;;  %v3749_v49 = vadd.f32 %v6030_v40, %v3526_v15  ;;  %vm3755_vm13 = vcmp.ge.f32.partialorder %v3747_v45, 0.0  ;;  %v3763_v24 = vmul.f32 %v3747_v45, %v6028_v14 }
 0x225   : > { %vm3693_vm9 = vcmp.ge.f32.partialorder %v3689_v46, 0.0  ;;  %v3697_v13 = vmul.f32 %v3689_v46, %v6028_v14  ;;  %v3476_v34 = vpop.f32.mrb[11].mxu0  ;;  %v3690_v25 = vadd.f32 %v6030_v40, %v3474_v10  ;;  %v3769_v11 = vmul.f32 %v3753_v20, %v6028_v14 }
 0x226   : > { %vm3754_vm15 = vcmp.ge.f32.partialorder %v3746_v50, 0.0  ;;  %v3762_v29 = vmul.f32 %v3746_v50, %v6028_v14  ;;  %vm3757_vm0 = vcmp.ge.f32.partialorder %v3749_v49, 0.0  ;;  %v3765_v47 = vmul.f32 %v3749_v49, %v6028_v14 }
 0x227   : > { %v3748_v62 = vadd.f32 %v6030_v40, %v3476_v34  ;;  %v3701_v1 = vsel %vm3693_vm9, %v3689_v46, %v3697_v13  ;;  %vm3694_vm8 = vcmp.ge.f32.partialorder %v3690_v25, 0.0  ;;  %v3698_v60 = vmul.f32 %v3690_v25, %v6028_v14 }
 0x228   : > { %v4279_v0 = vpack.i.bf16 %v3701_v1, %v6070_v55  ;;  %v3770_v48 = vsel %vm3754_vm15, %v3746_v50, %v3762_v29  ;;  %v3771_v40 = vsel %vm3755_vm13, %v3747_v45, %v3763_v24  ;;  %v3773_v7 = vsel %vm3757_vm0, %v3749_v49, %v3765_v47  ;;  %vm6697_vm15 = vmmov %vm6693_vm4 }
 0x229   : > { %vm3756_vm1 = vcmp.ge.f32.partialorder %v3748_v62, 0.0  ;;  %v3764_v57 = vmul.f32 %v3748_v62, %v6028_v14  ;;  %v3702_v22 = vsel %vm3694_vm8, %v3690_v25, %v3698_v60  ;;  %v4284_v59 = vpack.i.bf16 %v3770_v48, %v3701_v1  ;;  %vm6699_vm8 = vmmov %vm6693_vm4 }
 0x22a   : > { %4280 = vrot.lane.b32.xlu0 %v4279_v0, %s4404_s3  ;;  %v3480_v58 = vpop.f32.mrb[12].mxu0  ;;  %v4289_v55 = vpack.i.bf16 %v3702_v22, %v6077_v52  ;;  %v4294_v43 = vpack.i.bf16 %v3702_v22, %v3771_v40  ;;  %vm3761_vm3 = vcmp.ge.f32.partialorder %v3753_v20, 0.0  ;;  %v3775_v26 = vsel %vm3759_vm7, %v3751_v35, %v3767_v38 }
 0x22b   : > { %v3691_v23 = vadd.f32 %v6034_v12, %v3480_v58  ;;  %v3482_v33 = vpop.f32.mrb[13].mxu0  ;;  %v3772_v28 = vsel %vm3756_vm1, %v3748_v62, %v3764_v57  ;;  %vm3859_vm9 = vcmask 556036   ;;  %vm6696_vm13 = vcmask 982016  }
 0x22c   : > { %v3750_v39 = vadd.f32 %v6034_v12, %v3482_v33  ;;  %v3484_v18 = vpop.f32.mrb[14].mxu0  ;;  %v4299_v17 = vpack.i.bf16 %v3773_v7, %v3772_v28  ;;  %4290 = vrot.lane.b32.xlu1 %v4289_v55, %s4404_s3  ;;  %vm6698_vm0 = vmmov %vm6696_vm13  ;;  %vm6700_vm1 = vcmask 424960  }
 0x22d   : > { %vm3695_vm14 = vcmp.ge.f32.partialorder %v3691_v23, 0.0  ;;  %v3699_v27 = vmul.f32 %v3691_v23, %v6028_v14  ;;  %v3692_v44 = vadd.f32 %v6042_v61, %v3484_v18  ;;  %v3486_v54 = vpop.f32.mrb[15].mxu0  ;;  %vm6701_vm7 = vmmov %vm6700_vm1 }
 0x22e   : > { %vm3758_vm10 = vcmp.ge.f32.partialorder %v3750_v39, 0.0  ;;  %v3766_v52 = vmul.f32 %v3750_v39, %v6028_v14  ;;  %v3752_v5 = vadd.f32 %v6042_v61, %v3486_v54  ;;  %4285 = vrot.lane.b32.xlu0 %v4284_v59, %s4388_s27  ;;  %v3777_v61 = vsel %vm3761_vm3, %v3753_v20, %v3769_v11 }
 0x22f   : > { %vm3696_vm11 = vcmp.ge.f32.partialorder %v3692_v44, 0.0  ;;  %v3700_v12 = vmul.f32 %v3692_v44, %v6028_v14  ;;  %v3703_v36 = vsel %vm3695_vm14, %v3691_v23, %v3699_v27  ;;  %vm6702_vm14 = vmmov %vm6700_vm1  ;;  %vm6704_vm3 = vcmask 1043456  }
 0x230   : > { %vm3760_vm2 = vcmp.ge.f32.partialorder %v3752_v5, 0.0  ;;  %v3768_v6 = vmul.f32 %v3752_v5, %v6028_v14  ;;  %v3774_v16 = vsel %vm3758_vm10, %v3750_v39, %v3766_v52  ;;  %v4304_v19 = vpack.i.bf16 %v3703_v36, %v6096_v3  ;;  %4295 = vrot.lane.b32.xlu1 %v4294_v43, %s4388_s27  ;;  %vm6703_vm10 = vmmov %vm6700_vm1 }
 0x231   : > { %v3704_v2 = vsel %vm3696_vm11, %v3692_v44, %v3700_v12  ;;  %v4309_v51 = vpack.i.bf16 %v3774_v16, %v3703_v36  ;;  %vm6179_vm11 = vmor %vm3859_vm9, %vm6704_vm3 }
 0x232   : > { %v4319_v9 = vpack.i.bf16 %v3704_v2, %v3775_v26  ;;  %v4314_v42 = vpack.i.bf16 %v3704_v2, %v6101_v41  ;;  %v3776_v45 = vsel %vm3760_vm2, %v3752_v5, %v3768_v6  ;;  %4300 = vrot.lane.b32.xlu0 %v4299_v17, %s4388_s27  ;;  %vm6707_vm2 = vmmov %vm6693_vm4 }
 0x233   : > { %v4324_v53 = vpack.i.bf16 %v3777_v61, %v3776_v45  ;;  %vm6712_vm9 = vmmov %vm6700_vm1 }
 0x234   : > { %4310 = vrot.lane.b32.xlu1 %v4309_v51, %s4388_s27 }
 0x236   : > { %4305 = vrot.lane.b32.xlu0 %v4304_v19, %s4404_s3 }
 0x238   : > { %4315 = vrot.lane.b32.xlu1 %v4314_v42, %s4404_s3 }
 0x23a   : > { %4320 = vrot.lane.b32.xlu0 %v4319_v9, %s4388_s27 }
 0x23c   : > { %4325 = vrot.lane.b32.xlu1 %v4324_v53, %s4388_s27  ;;  %s4109_s27 = sshll.u32 %s6716_s18, 5 }
 0x23d   : > { %s6175_s22 = scalar_lea.vmem %s6214_s4, %s4109_s27 }
 0x27d   : > { %v4251_v14 = vpop.permute.xlu0 %4250 }
 0x27e   : > { %v4256_v3 = vpop.permute.xlu1 %4255  ;;  %v4253_v41 = vunpack.i.h.bf16 %v4251_v14  ;;  %v4252_v50 = vunpack.i.l.bf16 %v4251_v14 }
 0x27f   : > { %v4258_v10 = vunpack.i.h.bf16 %v4256_v3  ;;  %v4257_v49 = vunpack.i.l.bf16 %v4256_v3 }
 0x280   : > { %v3665_v25 = vsel %vm6692_vm5, %v4252_v50, %v4253_v41  ;;  %vm6708_vm5 = vmmov %vm6698_vm0 }
 0x281   : > { %v4261_v46 = vpop.permute.xlu0 %4260  ;;  %v3666_v1 = vsel %vm6693_vm4, %v4253_v41, %v4257_v49  ;;  %v3681_v23 = vmax.f32 %v6036_v32, %v3665_v25  ;;  %vm6709_vm4 = vmmov %vm6707_vm2 }
 0x282   : > { %v4262_v13 = vunpack.i.l.bf16 %v4261_v46  ;;  %v4263_v24 = vunpack.i.h.bf16 %v4261_v46  ;;  %v3682_v55 = vmax.f32 %v6057_v8, %v3666_v1 }
 0x284   : > { %v3667_v35 = vsel %vm6694_vm12, %v4258_v10, %v4262_v13  ;;  %v3668_v57 = vsel %vm6695_vm6, %v4262_v13, %v4263_v24  ;;  %vm6710_vm12 = vmmov %vm6698_vm0 }
 0x285   : > { %v4266_v31 = vpop.permute.xlu1 %4265  ;;  %v3683_v33 = vmax.f32 %v6039_v63, %v3667_v35  ;;  %v3684_v18 = vmax.f32 %v6059_v56, %v3668_v57  ;;  %vm6711_vm6 = vmmov %vm6700_vm1 }
 0x286   : > { %v6147_v15 = vpop.permute.xlu0 %4270  ;;  %v4268_v60 = vunpack.i.h.bf16 %v4266_v31  ;;  %v4267_v0 = vunpack.i.l.bf16 %v4266_v31 }
 0x287   : > { %v4272_v48 = vunpack.i.l.bf16 %v6147_v15  ;;  %v4273_v39 = vunpack.i.h.bf16 %v6147_v15 }
 0x288   : > { %v3669_v28 = vsel %vm6697_vm15, %v4267_v0, %v4268_v60  ;;  %vm6714_vm15 = vmmov %vm6700_vm1 }
 0x289   : > { %v6149_v34 = vpop.permute.xlu1 %4275  ;;  %v3670_v27 = vsel %vm6699_vm8, %v4268_v60, %v4272_v48  ;;  %v3685_v31 = vmax.f32 %v6048_v4, %v3669_v28 }
 0x28a   : > { %v4277_v12 = vunpack.i.l.bf16 %v6149_v34  ;;  %v4278_v61 = vunpack.i.h.bf16 %v6149_v34  ;;  %v3686_v41 = vmax.f32 %v6086_v30, %v3670_v27 }
 0x28c   : > { %v3671_v50 = vsel %vm6707_vm2, %v4273_v39, %v4277_v12  ;;  %v3672_v24 = vsel %vm6709_vm4, %v4277_v12, %v4278_v61 }
 0x28d   : > { %v3688_v0 = vmax.f32 %v6091_v21, %v3672_v24 }
 0x29c   : > { %v4281_v29 = vpop.permute.xlu0 %4280 }
 0x29d   : > { %v4283_v47 = vunpack.i.h.bf16 %v4281_v29  ;;  %v4282_v62 = vunpack.i.l.bf16 %v4281_v29 }
 0x29e   : > { %v4291_v20 = vpop.permute.xlu1 %4290 }
 0x29f   : > { %v4293_v58 = vunpack.i.h.bf16 %v4291_v20  ;;  %v4292_v22 = vunpack.i.l.bf16 %v4291_v20  ;;  %v3726_v43 = vsel %vm6696_vm13, %v4282_v62, %v4283_v47  ;;  %v3739_v44 = vmax.f32 %v3682_v55, %v4283_v47  ;;  %vm6713_vm13 = vmmov %vm6700_vm1 }
 0x2a0   : > { %v4286_v59 = vpop.permute.xlu0 %4285  ;;  %v3738_v11 = vmax.f32 %v3681_v23, %v3726_v43  ;;  %v3687_v62 = vmax.f32 %v6051_v37, %v3671_v50 }
 0x2a1   : > { %v4288_v40 = vunpack.i.h.bf16 %v4286_v59  ;;  %v4287_v7 = vunpack.i.l.bf16 %v4286_v59  ;;  %v3727_v17 = vsel %vm6698_vm0, %v4292_v22, %v4293_v58  ;;  %v3741_v36 = vmax.f32 %v3684_v18, %v4293_v58 }
 0x2a2   : > { %v4296_v38 = vpop.permute.xlu1 %4295  ;;  %v3740_v6 = vmax.f32 %v3683_v33, %v3727_v17 }
 0x2a3   : > { %v3811_v32 = vsel %vm6700_vm1, %v4287_v7, %v4288_v40  ;;  %v4297_v54 = vunpack.i.l.bf16 %v4296_v38  ;;  %v4298_v8 = vunpack.i.h.bf16 %v4296_v38 }
 0x2a4   : > { %v4301_v63 = vpop.permute.xlu0 %4300  ;;  %v3827_v16 = vmax.f32 %v3738_v11, %v3811_v32 }
 0x2a5   : > { %v4303_v52 = vunpack.i.h.bf16 %v4301_v63  ;;  %v4302_v5 = vunpack.i.l.bf16 %v4301_v63  ;;  %v3812_v56 = vsel %vm6701_vm7, %v4288_v40, %v4297_v54 }
 0x2a6   : > { %v3828_v19 = vmax.f32 %v3739_v44, %v3812_v56  ;;  %v4311_v51 = vpop.permute.xlu1 %4310 }
 0x2a7   : > { %v3813_v26 = vsel %vm6702_vm14, %v4298_v8, %v4302_v5  ;;  %v3814_v2 = vsel %vm6703_vm10, %v4302_v5, %v4303_v52  ;;  %v4313_v10 = vunpack.i.h.bf16 %v4311_v51  ;;  %v4312_v49 = vunpack.i.l.bf16 %v4311_v51 }
 0x2a8   : > { %v3829_v42 = vmax.f32 %v3740_v6, %v3813_v26  ;;  %v3830_v45 = vmax.f32 %v3741_v36, %v3814_v2  ;;  %v4306_v53 = vpop.permute.xlu0 %4305  ;;  %v4110_v14 = vpack.c.bf16 %v3828_v19, %v3827_v16 }
 0x2a9   : > { %v4308_v3 = vunpack.i.h.bf16 %v4306_v53  ;;  %v4307_v46 = vunpack.i.l.bf16 %v4306_v53  ;;  %v3815_v60 = vsel %vm6711_vm6, %v4312_v49, %v4313_v10 }
 0x2aa   : > { %v4111_v15 = vpack.c.bf16 %v3830_v45, %v3829_v42  ;;  %3861 = vst.msk [vmem:[%s6175_s22] sm:$0xff] %vm6179_vm11, %v4110_v14  ;;  %v4316_v34 = vpop.permute.xlu1 %4315 }
 0x2ab   : > { %v3728_v13 = vsel %vm6708_vm5, %v4307_v46, %v4308_v3  ;;  %v4318_v4 = vunpack.i.h.bf16 %v4316_v34  ;;  %v4317_v25 = vunpack.i.l.bf16 %v4316_v34  ;;  %v3743_v1 = vmax.f32 %v3686_v41, %v4308_v3 }
 0x2ac   : > { %3862 = vst.msk [vmem:[%s6175_s22 + $0x8] sm:$0xff] %vm6179_vm11, %v4111_v15  ;;  %v3742_v29 = vmax.f32 %v3685_v31, %v3728_v13  ;;  %v4321_v47 = vpop.permute.xlu0 %4320 }
 0x2ad   : > { %v4322_v30 = vunpack.i.l.bf16 %v4321_v47  ;;  %v3729_v35 = vsel %vm6710_vm12, %v4317_v25, %v4318_v4  ;;  %v4323_v20 = vunpack.i.h.bf16 %v4321_v47  ;;  %v3745_v7 = vmax.f32 %v3688_v0, %v4318_v4 }
 0x2ae   : > { %v4326_v48 = vpop.permute.xlu1 %4325  ;;  %v3831_v58 = vmax.f32 %v3742_v29, %v3815_v60  ;;  %v3744_v23 = vmax.f32 %v3687_v62, %v3729_v35 }
 0x2af   : > { %v3816_v57 = vsel %vm6712_vm9, %v4313_v10, %v4322_v30  ;;  %v4328_v59 = vunpack.i.h.bf16 %v4326_v48  ;;  %v4327_v40 = vunpack.i.l.bf16 %v4326_v48 }
 0x2b0   : > { %v3832_v22 = vmax.f32 %v3743_v1, %v3816_v57 }
 0x2b1   : > { %v3817_v33 = vsel %vm6713_vm13, %v4323_v20, %v4327_v40  ;;  %v3818_v55 = vsel %vm6714_vm15, %v4327_v40, %v4328_v59 }
 0x2b2   : > { %v4112_v37 = vpack.c.bf16 %v3832_v22, %v3831_v58  ;;  %v3833_v43 = vmax.f32 %v3744_v23, %v3817_v33  ;;  %v3834_v28 = vmax.f32 %v3745_v7, %v3818_v55 }
 0x2b4   : > { %3863 = vst.msk [vmem:[%s6175_s22 + $0x10] sm:$0xff] %vm6179_vm11, %v4112_v37  ;;  %v4113_v21 = vpack.c.bf16 %v3834_v28, %v3833_v43 }
 0x2b6   : > { %3864 = vst.msk [vmem:[%s6175_s22 + $0x18] sm:$0xff] %vm6179_vm11, %v4113_v21 }
 0x2b7 PF: > { %s15_s17 = sadd.s32 1, %s4380_s17  }
 0x2b8   : > { %p12_p4 = scmp.ge.s32.totalorder %s15_s17, 4  }
 0x2ba   :  { %14 = sbr.rel (!%p12_p4) target bundleno = 2 (0x2), region = 69 }

// kernel: embedding_net_forward.4
= control target key start
LH: loop header
LB: loop body
LE: loop exit
PB: predicated region body
PF: predicated region fallthrough
CT: control target
= control target key end

     0   :  { %s4417_s17 = smov 0   ;;  %s5291_s0 = inlined_call_operand.vmem [shape: bf16[2,4,32,50], index: 0, kind: input, shape index: {}]   ;;  %s5292_s1 = inlined_call_operand.vmem [shape: bf16[64,800], index: 1, kind: input, shape index: {}]   ;;  %s5293_s2 = inlined_call_operand.vmem [shape: f32[64,1], index: 2, kind: input, shape index: {}]   ;;  %s5294_s3 = inlined_call_operand.<no memory space> [shape: f32[1,1], index: 3, kind: input, shape index: {}]   ;;  %s5295_s4 = inlined_call_operand.vmem [shape: bf16[2,64,36], index: 4, kind: output, shape index: {}]  }
   0x1   :  { %9 = sst [smem:[#allocation3]] %s5294_s3 }
   0x2 LB: > { %s3366_s18 = sadd.s32 4294967295, %s4348_s17   ;;  %p3370_p0 = scmp.ge.s32.totalorder %s4348_s17, 1  ;;  %s4348_s17 = sphi %s4417_s17, %s15_s17  }
   0x3   : > { %p163_p1 = scmp.lt.s32.totalorder %s4348_s17, 3 }
   0x5   : > { %p164_p2 = pnand %p3370_p0, %p163_p1 }
   0x6   : > { %p189_p3 = scmp.lt.s32.totalorder (!%p164_p2), %s3366_s18, 1  ;;  %s4350_s22 = smov (!%p164_p2), 108   ;;  %vm216_vm0 = vcmask (!%p164_p2), 293888   ;;  %vm1862_vm1 = vcmask (!%p164_p2), 130048   ;;  %vm758_vm2 = vcmask (!%p164_p2), 589088   ;;  %vm1309_vm3 = vcmask (!%p164_p2), 884288  }
   0x7   : > { %167 = sbr.rel (%p164_p2) target bundleno = 905 (0x389), region = 36  ;;  %s4351_s23 = smov (!%p164_p2), 36   ;;  %vm1860_vm4 = vcmask (!%p164_p2), 1048416   ;;  %vm2714_vm5 = vcmask (!%p164_p2), 261120  }
   0x8   : > { %s4352_s24 = smov (!%p164_p2), 72   ;;  %s4353_s25 = smov (!%p164_p2), 35  }
   0x9   : > { %s4354_s26 = smov (!%p164_p2), 107   ;;  %s4355_s27 = smov (!%p164_p2), 127  }
   0xa   : > { %s4356_s28 = smov (!%p164_p2), 71   ;;  %s4357_s29 = smov (!%p164_p2), 34  }
   0xb   : > { %s4358_s30 = smov (!%p164_p2), 106   ;;  %s4359_s5 = smov (!%p164_p2), 122  }
   0xc   : > { %s4360_s6 = smov (!%p164_p2), 126   ;;  %s4361_s7 = smov (!%p164_p2), 29  }
   0xd   : > { %s4362_s8 = smov (!%p164_p2), 60   ;;  %s4363_s9 = smov (!%p164_p2), 70  }
   0xe   : > { %s5297_s18 = smov (!%p189_p3, %s3366_s18), 1  ;;  %s4364_s10 = smov 95  }
   0xf   : > { %s3917_s3 = sshll.u32 %s5297_s18, 6  ;;  %s4365_s11 = smov 121  }
  0x10   : > { %s4431_s21 = scalar_lea.vmem %s5291_s0, %s3917_s3  ;;  %s4366_s12 = smov 66  }
  0x11   : > { %v4104_v0 = vld [vmem:[%s4431_s21 + $0x30] sm:$0xff]   ;;  %v4106_v2 = vld [vmem:[%s4431_s21 + $0x18] sm:$0xff]   ;;  %v4107_v3 = vld [vmem:[%s4431_s21 + $0x20] sm:$0xff]   ;;  %s4367_s13 = smov 102   ;;  %s4368_s14 = smov 59  }
  0x12   : > { %v4105_v1 = vld [vmem:[%s4431_s21 + $0x10] sm:$0xff]   ;;  %1854 = vrot.lane.b32.xlu1 %v4104_v0, %s4350_s22  ;;  %v4108_v4 = vld [vmem:[%s4431_s21 + $0x38] sm:$0xff]   ;;  %v4109_v5 = vld [vmem:[%s4431_s21 + $0x28] sm:$0xff]   ;;  %s4369_s15 = smov 28   ;;  %s4370_s16 = smov 101  }
  0x13   : > { %752 = vrot.lane.b32.xlu0 %v4105_v1, %s4351_s23  ;;  %v4110_v6 = vld [vmem:[%s4431_s21 + $0x30] sm:$0xff]   ;;  %v4111_v7 = vld [vmem:[%s4431_s21] sm:$0xff]   ;;  %v4112_v8 = vld [vmem:[%s4431_s21 + $0x8] sm:$0xff]   ;;  %s4371_s3 = smov 94   ;;  %s4372_s19 = smov 120  }
  0x14   : > { %v4113_v9 = vld [vmem:[%s4431_s21 + $0x20] sm:$0xff]   ;;  %v4114_v10 = vld [vmem:[%s4431_s21 + $0x28] sm:$0xff]   ;;  %v4115_v11 = vld [vmem:[%s4431_s21 + $0x38] sm:$0xff]   ;;  %s4373_s20 = smov 58  }
  0x15   : > { %v4116_v12 = vld [vmem:[%s4431_s21 + $0x10] sm:$0xff]   ;;  %v4117_v13 = vld [vmem:[%s4431_s21] sm:$0xff]   ;;  %v4120_v16 = vld [vmem:[%s4431_s21 + $0x18] sm:$0xff]  }
  0x16   : > { %754 = vrot.lane.b32.xlu1 %v4106_v2, %s4351_s23  ;;  %v4118_v14 = vld [vmem:[%s4431_s21 + $0x30] sm:$0xff]   ;;  %v4119_v15 = vld [vmem:[%s4431_s21 + $0x20] sm:$0xff]   ;;  %v4121_v17 = vld [vmem:[%s4431_s21 + $0x8] sm:$0xff]  }
  0x17   : > { %1303 = vrot.lane.b32.xlu0 %v4107_v3, %s4352_s24  ;;  %v4122_v18 = vld [vmem:[%s4431_s21 + $0x38] sm:$0xff]   ;;  %v4123_v19 = vld [vmem:[%s4431_s21 + $0x28] sm:$0xff]   ;;  %v4124_v20 = vld [vmem:[%s4431_s21] sm:$0xff]  }
  0x18   : > { %v4125_v21 = vld [vmem:[%s4431_s21 + $0x10] sm:$0xff]   ;;  %v4126_v22 = vld [vmem:[%s4431_s21 + $0x20] sm:$0xff]   ;;  %v4128_v24 = vld [vmem:[%s4431_s21 + $0x8] sm:$0xff]  }
  0x19   : > { %v4127_v23 = vld [vmem:[%s4431_s21 + $0x30] sm:$0xff]   ;;  %v4129_v25 = vld [vmem:[%s4431_s21 + $0x18] sm:$0xff]   ;;  %v4130_v26 = vld [vmem:[%s4431_s21 + $0x28] sm:$0xff]  }
  0x1a   : > { %1856 = vrot.lane.b32.xlu1 %v4108_v4, %s4350_s22  ;;  %v4131_v27 = vld [vmem:[%s4431_s21 + $0x38] sm:$0xff]   ;;  %v4132_v28 = vld [vmem:[%s4431_s21 + $0x30] sm:$0xff]   ;;  %v4133_v29 = vld [vmem:[%s4431_s21] sm:$0xff]   ;;  %s4374_s22 = smov 65  }
  0x1b   : > { %1305 = vrot.lane.b32.xlu0 %v4109_v5, %s4352_s24  ;;  %v4134_v30 = vld [vmem:[%s4431_s21 + $0x20] sm:$0xff]   ;;  %v4135_v32 = vld [vmem:[%s4431_s21 + $0x10] sm:$0xff]   ;;  %v4165_v33 = vld [vmem:[%s4431_s21 + $0x8] sm:$0xff]  }
  0x1c   : > { %v4162_v31 = vld [vmem:[%s4431_s21] sm:$0xff]   ;;  %v4136_v34 = vld [vmem:[%s4431_s21 + $0x10] sm:$0xff]   ;;  %218 = vst.msk [vmem:[#allocation2 + $0x10] sm:$0xff] %vm216_vm0, %v4165_v33  ;;  %v4173_v39 = vld [vmem:[%s4431_s21 + $0x18] sm:$0xff]  }
  0x1d   : > { %217 = vst.msk [vmem:[#allocation2] sm:$0xff] %vm216_vm0, %v4162_v31  ;;  %v4137_v35 = vld [vmem:[%s4431_s21 + $0x20] sm:$0xff]   ;;  %v4170_v37 = vld [vmem:[%s4431_s21 + $0x10] sm:$0xff]   ;;  %v4140_v40 = vld [vmem:[%s4431_s21 + $0x38] sm:$0xff]  }
  0x1e   : > { %1326 = vrot.lane.b32.xlu1 %v4110_v6, %s4352_s24  ;;  %v4138_v36 = vld [vmem:[%s4431_s21] sm:$0xff]   ;;  %v4139_v38 = vld [vmem:[%s4431_s21 + $0x30] sm:$0xff]   ;;  %236 = vst.msk [vmem:[#allocation2 + $0x20] sm:$0xff] %vm216_vm0, %v4170_v37  ;;  %v4141_v41 = vld [vmem:[%s4431_s21 + $0x8] sm:$0xff]  }
  0x1f   : > { %775 = vrot.lane.b32.xlu0 %v4111_v7, %s4353_s25  ;;  %237 = vst.msk [vmem:[#allocation2 + $0x30] sm:$0xff] %vm216_vm0, %v4173_v39  ;;  %v4142_v42 = vld [vmem:[%s4431_s21 + $0x28] sm:$0xff]   ;;  %v4143_v43 = vld [vmem:[%s4431_s21 + $0x18] sm:$0xff]   ;;  %v4148_v48 = vld [vmem:[%s4431_s21 + $0x30] sm:$0xff]  }
  0x20   : > { %v4144_v44 = vld [vmem:[%s4431_s21 + $0x18] sm:$0xff]   ;;  %v4145_v45 = vld [vmem:[%s4431_s21 + $0x28] sm:$0xff]   ;;  %v4149_v49 = vld [vmem:[%s4431_s21 + $0x20] sm:$0xff]  }
  0x21   : > { %v4146_v46 = vld [vmem:[%s4431_s21 + $0x8] sm:$0xff]   ;;  %v4147_v47 = vld [vmem:[%s4431_s21 + $0x38] sm:$0xff]   ;;  %v4150_v50 = vld [vmem:[%s4431_s21] sm:$0xff]  }
  0x22   : > { %777 = vrot.lane.b32.xlu1 %v4112_v8, %s4353_s25  ;;  %v4151_v51 = vld [vmem:[%s4431_s21 + $0x30] sm:$0xff]   ;;  %v4153_v53 = vld [vmem:[%s4431_s21] sm:$0xff]   ;;  %v4154_v54 = vld [vmem:[%s4431_s21 + $0x28] sm:$0xff]  }
  0x23   : > { %1880 = vrot.lane.b32.xlu0 %v4113_v9, %s4354_s26  ;;  %v4152_v52 = vld [vmem:[%s4431_s21 + $0x10] sm:$0xff]   ;;  %v4156_v56 = vld [vmem:[%s4431_s21 + $0x38] sm:$0xff]   ;;  %v4158_v58 = vld [vmem:[%s4431_s21 + $0x8] sm:$0xff]  }
  0x24   : > { %v4155_v55 = vld [vmem:[%s4431_s21 + $0x10] sm:$0xff]   ;;  %v4157_v57 = vld [vmem:[%s4431_s21 + $0x38] sm:$0xff]   ;;  %v4210_v59 = vld [vmem:[%s4431_s21 + $0x20] sm:$0xff]  }
  0x25   : > { %v4159_v60 = vld [vmem:[%s4431_s21 + $0x8] sm:$0xff]   ;;  %321 = vst.msk [vmem:[#allocation2 + $0xa0] sm:$0xff] %vm216_vm0, %v4210_v59  ;;  %v4160_v61 = vld [vmem:[%s4431_s21 + $0x18] sm:$0xff]   ;;  %v4163_v63 = vld [vmem:[%s4431_s21 + $0x20] sm:$0xff]  }
  0x26   : > { %1882 = vrot.lane.b32.xlu1 %v4114_v10, %s4354_s26  ;;  %v4161_v62 = vld [vmem:[%s4431_s21 + $0x18] sm:$0xff]   ;;  %v4164_v0 = vld [vmem:[%s4431_s21 + $0x30] sm:$0xff]   ;;  %v4219_v1 = vld [vmem:[%s4431_s21 + $0x28] sm:$0xff]  }
  0x27   : > { %1328 = vrot.lane.b32.xlu0 %v4115_v11, %s4352_s24  ;;  %322 = vst.msk [vmem:[#allocation2 + $0xb0] sm:$0xff] %vm216_vm0, %v4219_v1  ;;  %v4166_v4 = vld [vmem:[%s4431_s21 + $0x10] sm:$0xff]   ;;  %v4167_v5 = vld [vmem:[%s4431_s21 + $0x20] sm:$0xff]   ;;  %v4179_v31 = vld [vmem:[%s4431_s21 + $0x8] sm:$0xff]   ;;  %s4376_s24 = smov 24  }
  0x28   : > { %v4168_v8 = vld [vmem:[%s4431_s21] sm:$0xff]   ;;  %v4226_v9 = vld [vmem:[%s4431_s21 + $0x30] sm:$0xff]  }
  0x29   : > { %v4169_v10 = vld [vmem:[%s4431_s21 + $0x10] sm:$0xff]   ;;  %340 = vst.msk [vmem:[#allocation2 + $0xc0] sm:$0xff] %vm216_vm0, %v4226_v9  ;;  %v4181_v37 = vld [vmem:[%s4431_s21 + $0x20] sm:$0xff]   ;;  %v4195_v9 = vld [vmem:[%s4431_s21 + $0x18] sm:$0xff]  }
  0x2a   : > { %797 = vrot.lane.b32.xlu1 %v4116_v12, %s4353_s25 }
  0x2b   : > { %252 = vrot.lane.b32.xlu0 %v4117_v13, %s4355_s27 }
  0x2e   : > { %1904 = vrot.lane.b32.xlu1 %v4118_v14, %s4354_s26  ;;  %v4171_v14 = vld [vmem:[%s4431_s21 + $0x38] sm:$0xff]  }
  0x2f   : > { %1348 = vrot.lane.b32.xlu0 %v4119_v15, %s4356_s28  ;;  %v4172_v15 = vld [vmem:[%s4431_s21] sm:$0xff]  }
  0x32   : > { %799 = vrot.lane.b32.xlu1 %v4120_v16, %s4353_s25 }
  0x33   : > { %254 = vrot.lane.b32.xlu0 %v4121_v17, %s4355_s27 }
  0x36   : > { %1906 = vrot.lane.b32.xlu1 %v4122_v18, %s4354_s26 }
  0x37   : > { %1350 = vrot.lane.b32.xlu0 %v4123_v19, %s4356_s28  ;;  %v4174_v19 = vld [vmem:[%s4431_s21 + $0x28] sm:$0xff]  }
  0x3a   : > { %819 = vrot.lane.b32.xlu1 %v4124_v20, %s4357_s29  ;;  %v4175_v20 = vld [vmem:[%s4431_s21 + $0x28] sm:$0xff]  }
  0x3b   : > { %274 = vrot.lane.b32.xlu0 %v4125_v21, %s4355_s27 }
  0x3e   : > { %1928 = vrot.lane.b32.xlu1 %v4126_v22, %s4358_s30 }
  0x3f   : > { %1370 = vrot.lane.b32.xlu0 %v4127_v23, %s4356_s28  ;;  %v4235_v23 = vld [vmem:[%s4431_s21 + $0x38] sm:$0xff]  }
  0x40   : > { %341 = vst.msk [vmem:[#allocation2 + $0xd0] sm:$0xff] %vm216_vm0, %v4235_v23  ;;  %v4201_v23 = vld [vmem:[%s4431_s21 + $0x10] sm:$0xff]  }
  0x42   : > { %821 = vrot.lane.b32.xlu1 %v4128_v24, %s4357_s29 }
  0x43   : > { %276 = vrot.lane.b32.xlu0 %v4129_v25, %s4355_s27  ;;  %v4176_v25 = vld [vmem:[%s4431_s21 + $0x18] sm:$0xff]  }
  0x46   : > { %1930 = vrot.lane.b32.xlu1 %v4130_v26, %s4358_s30 }
  0x47   : > { %1372 = vrot.lane.b32.xlu0 %v4131_v27, %s4356_s28  ;;  %v4177_v27 = vld [vmem:[%s4431_s21 + $0x18] sm:$0xff]   ;;  %s4377_s28 = smov 96  }
  0x4a   : > { %554 = vrot.lane.b32.xlu1 %v4132_v28, %s4359_s5 }
  0x4b   : > { %296 = vrot.lane.b32.xlu0 %v4133_v29, %s4360_s6 }
  0x4e   : > { %1105 = vrot.lane.b32.xlu1 %v4134_v30, %s4361_s7  ;;  %v4178_v30 = vld [vmem:[%s4431_s21 + $0x8] sm:$0xff]  }
  0x4f   : > { %841 = vrot.lane.b32.xlu0 %v4135_v32, %s4357_s29 }
  0x52   : > { %1656 = vrot.lane.b32.xlu1 %v4136_v34, %s4362_s8 }
  0x53   : > { %1392 = vrot.lane.b32.xlu0 %v4137_v35, %s4363_s9 }
  0x56   : > { %2240 = vrot.lane.b32.xlu1 %v4138_v36, %s4364_s10  ;;  %v4180_v36 = vld [vmem:[%s4431_s21 + $0x20] sm:$0xff]  }
  0x57   : > { %1952 = vrot.lane.b32.xlu0 %v4139_v38, %s4358_s30 }
  0x5a   : > { %556 = vrot.lane.b32.xlu1 %v4140_v40, %s4359_s5 }
  0x5b   : > { %298 = vrot.lane.b32.xlu0 %v4141_v41, %s4360_s6 }
  0x5e   : > { %1107 = vrot.lane.b32.xlu1 %v4142_v42, %s4361_s7  ;;  %v4182_v42 = vld [vmem:[%s4431_s21 + $0x30] sm:$0xff]  }
  0x5f   : > { %843 = vrot.lane.b32.xlu0 %v4143_v43, %s4357_s29  ;;  %v4183_v43 = vld [vmem:[%s4431_s21 + $0x30] sm:$0xff]  }
  0x62   : > { %1658 = vrot.lane.b32.xlu1 %v4144_v44, %s4362_s8 }
  0x63   : > { %1394 = vrot.lane.b32.xlu0 %v4145_v45, %s4363_s9  ;;  %s4380_s9 = smov 64  }
  0x66   : > { %2242 = vrot.lane.b32.xlu1 %v4146_v46, %s4364_s10  ;;  %v4184_v46 = vld [vmem:[%s4431_s21] sm:$0xff]  }
  0x67   : > { %1954 = vrot.lane.b32.xlu0 %v4147_v47, %s4358_s30  ;;  %v4185_v47 = vld [vmem:[%s4431_s21] sm:$0xff]   ;;  %s4378_s30 = smov 100  }
  0x6a   : > { %863 = vrot.lane.b32.xlu1 %v4148_v48, %s4351_s23 }
  0x6b   : > { %576 = vrot.lane.b32.xlu0 %v4149_v49, %s4365_s11 }
  0x6e   : > { %1414 = vrot.lane.b32.xlu1 %v4150_v50, %s4366_s12 }
  0x6f   : > { %1127 = vrot.lane.b32.xlu0 %v4151_v51, %s4361_s7 }
  0x72   : > { %1976 = vrot.lane.b32.xlu1 %v4152_v52, %s4367_s13  ;;  %v4186_v52 = vld [vmem:[%s4431_s21 + $0x10] sm:$0xff]  }
  0x73   : > { %1678 = vrot.lane.b32.xlu0 %v4153_v53, %s4368_s14  ;;  %v4187_v53 = vld [vmem:[%s4431_s21 + $0x10] sm:$0xff]  }
  0x76   : > { %578 = vrot.lane.b32.xlu1 %v4154_v54, %s4365_s11 }
  0x77   : > { %2264 = vrot.lane.b32.xlu0 %v4155_v55, %s4364_s10 }
  0x7a   : > { %1129 = vrot.lane.b32.xlu1 %v4156_v56, %s4361_s7  ;;  %v4188_v56 = vld [vmem:[%s4431_s21 + $0x28] sm:$0xff]  }
  0x7b   : > { %865 = vrot.lane.b32.xlu0 %v4157_v57, %s4351_s23  ;;  %v4189_v57 = vld [vmem:[%s4431_s21 + $0x28] sm:$0xff]   ;;  %s4375_s23 = smov 116  }
  0x7e   : > { %1680 = vrot.lane.b32.xlu1 %v4158_v58, %s4368_s14 }
  0x7f   : > { %1416 = vrot.lane.b32.xlu0 %v4159_v60, %s4366_s12 }
  0x82   : > { %2266 = vrot.lane.b32.xlu1 %v4160_v61, %s4364_s10 }
  0x83   : > { %1978 = vrot.lane.b32.xlu0 %v4161_v62, %s4367_s13  ;;  %v4190_v62 = vld [vmem:[%s4431_s21 + $0x38] sm:$0xff]  }
  0x84   : > { %v1855_v2 = vpop.permute.xlu1 %1854 }
  0x85   : > { %1863 = vst.msk [vmem:[#allocation2 + $0x8] sm:$0xff] %vm1862_vm1, %v1855_v2  ;;  %v753_v3 = vpop.permute.xlu0 %752 }
  0x86   : > { %759 = vst.msk [vmem:[#allocation2] sm:$0xff] %vm758_vm2, %v753_v3  ;;  %885 = vrot.lane.b32.xlu1 %v4163_v63, %s4353_s25  ;;  %v4191_v63 = vld [vmem:[%s4431_s21 + $0x38] sm:$0xff]   ;;  %v4193_v3 = vld [vmem:[%s4431_s21 + $0x8] sm:$0xff]  }
  0x87   : > { %598 = vrot.lane.b32.xlu0 %v4164_v0, %s4365_s11 }
  0x88   : > { %v755_v6 = vpop.permute.xlu1 %754 }
  0x89   : > { %760 = vst.msk [vmem:[#allocation2 + $0x10] sm:$0xff] %vm758_vm2, %v755_v6  ;;  %v1304_v7 = vpop.permute.xlu0 %1303 }
  0x8a   : > { %1310 = vst.msk [vmem:[#allocation2] sm:$0xff] %vm1309_vm3, %v1304_v7  ;;  %1436 = vrot.lane.b32.xlu1 %v4166_v4, %s4366_s12 }
  0x8b   : > { %1861 = vst.msk [vmem:[#allocation2] sm:$0xff] %vm1860_vm4, %v1855_v2  ;;  %1149 = vrot.lane.b32.xlu0 %v4167_v5, %s4369_s15  ;;  %v4192_v2 = vld [vmem:[%s4431_s21 + $0x8] sm:$0xff]  }
  0x8c   : > { %v1857_v11 = vpop.permute.xlu1 %1856  ;;  %v2475_v12 = vld [vmem:[#allocation2 + $0x8] sm:$0xff] }
  0x8d   : > { %1865 = vst.msk [vmem:[#allocation2 + $0x18] sm:$0xff] %vm1862_vm1, %v1857_v11  ;;  %v1306_v13 = vpop.permute.xlu0 %1305  ;;  %2727 = vmatprep.subr.bf16.mxu1 %v2475_v12  ;;  %v4196_v12 = vld [vmem:[%s4431_s21] sm:$0xff]  }
  0x8e   : > { %1311 = vst.msk [vmem:[#allocation2 + $0x10] sm:$0xff] %vm1309_vm3, %v1306_v13  ;;  %2000 = vrot.lane.b32.xlu1 %v4168_v8, %s4370_s16  ;;  %v4194_v8 = vld [vmem:[%s4431_s21 + $0x18] sm:$0xff]   ;;  %v4197_v13 = vld [vmem:[%s4431_s21 + $0x30] sm:$0xff]  }
  0x8f   : > { %1864 = vst.msk [vmem:[#allocation2 + $0x10] sm:$0xff] %vm1860_vm4, %v1857_v11  ;;  %1700 = vrot.lane.b32.xlu0 %v4169_v10, %s4368_s14 }
  0x90   : > { %v1327_v16 = vpop.permute.xlu1 %1326 }
  0x91   : > { %v776_v17 = vpop.permute.xlu0 %775 }
  0x92   : > { %781 = vst.msk [vmem:[#allocation2 + $0x20] sm:$0xff] %vm758_vm2, %v776_v17  ;;  %600 = vrot.lane.b32.xlu1 %v4171_v14, %s4365_s11  ;;  %v2474_v18 = vld [vmem:[#allocation2] sm:$0xff] }
  0x93   : > { %1332 = vst.msk [vmem:[#allocation2 + $0x20] sm:$0xff] %vm1309_vm3, %v1327_v16  ;;  %2288 = vrot.lane.b32.xlu0 %v4172_v15, %s4371_s3  ;;  %2728 = vmatpush1.bf16.msra.mxu1 %v2474_v18  ;;  %v4198_v18 = vld [vmem:[%s4431_s21 + $0x10] sm:$0xff]  }
  0x94   : > { %v778_v21 = vpop.permute.xlu1 %777  ;;  %v2477_v22 = vld [vmem:[#allocation2 + $0x18] sm:$0xff] }
  0x95   : > { %782 = vst.msk [vmem:[#allocation2 + $0x30] sm:$0xff] %vm758_vm2, %v778_v21  ;;  %v1881_v24 = vpop.permute.xlu0 %1880  ;;  %2729 = vmatprep.subr.bf16.mxu1 %v2477_v22  ;;  %v4200_v22 = vld [vmem:[%s4431_s21 + $0x20] sm:$0xff]  }
  0x96   : > { %1886 = vst.msk [vmem:[#allocation2 + $0x20] sm:$0xff] %vm1860_vm4, %v1881_v24  ;;  %1151 = vrot.lane.b32.xlu1 %v4174_v19, %s4369_s15  ;;  %v2476_v26 = vld [vmem:[#allocation2 + $0x10] sm:$0xff]  ;;  %v4199_v19 = vld [vmem:[%s4431_s21 + $0x20] sm:$0xff]  }
  0x97   : > { %1887 = vst.msk [vmem:[#allocation2 + $0x28] sm:$0xff] %vm1862_vm1, %v1881_v24  ;;  %887 = vrot.lane.b32.xlu0 %v4175_v20, %s4353_s25  ;;  %2730 = vmatpush1.bf16.msra.mxu1 %v2476_v26  ;;  %v4276_v26 = vld [vmem:[%s5292_s1 + $0x4] ss:$28 sps:$4 sm:$0xff]  }
  0x98   : > { %v1883_v28 = vpop.permute.xlu1 %1882  ;;  %2759 = vmatprep.mubr.bf16.mxu1 %v4276_v26 }
  0x99   : > { %1889 = vst.msk [vmem:[#allocation2 + $0x38] sm:$0xff] %vm1862_vm1, %v1883_v28  ;;  %v1329_v29 = vpop.permute.xlu0 %1328 }
  0x9a   : > { %1333 = vst.msk [vmem:[#allocation2 + $0x30] sm:$0xff] %vm1309_vm3, %v1329_v29  ;;  %1702 = vrot.lane.b32.xlu1 %v4176_v25, %s4368_s14 }
  0x9b   : > { %1888 = vst.msk [vmem:[#allocation2 + $0x30] sm:$0xff] %vm1860_vm4, %v1883_v28  ;;  %1438 = vrot.lane.b32.xlu0 %v4177_v27, %s4366_s12  ;;  %v4202_v27 = vld [vmem:[%s4431_s21 + $0x30] sm:$0xff]   ;;  %v4203_v28 = vld [vmem:[%s4431_s21] sm:$0xff]  }
  0x9c   : > { %v798_v32 = vpop.permute.xlu1 %797 }
  0x9d   : > { %v253_v33 = vpop.permute.xlu0 %252  ;;  %v2478_v35 = vld [vmem:[#allocation2 + $0x20] sm:$0xff] }
  0x9e   : > { %v2479_v34 = vld [vmem:[#allocation2 + $0x28] sm:$0xff]  ;;  %258 = vst.msk [vmem:[#allocation2 + $0x40] sm:$0xff] %vm216_vm0, %v253_v33  ;;  %2290 = vrot.lane.b32.xlu1 %v4178_v30, %s4371_s3 }
  0x9f   : > { %2731 = vmatprep.subr.bf16.mxu1 %v2479_v34  ;;  %803 = vst.msk [vmem:[#allocation2 + $0x40] sm:$0xff] %vm758_vm2, %v798_v32  ;;  %2002 = vrot.lane.b32.xlu0 %v4179_v31, %s4370_s16  ;;  %v4204_v31 = vld [vmem:[%s4431_s21 + $0x8] sm:$0xff]   ;;  %v4205_v32 = vld [vmem:[%s4431_s21 + $0x38] sm:$0xff]  }
  0xa0   : > { %2732 = vmatpush1.bf16.msra.mxu1 %v2478_v35  ;;  %v1905_v38 = vpop.permute.xlu1 %1904  ;;  %v2481_v39 = vld [vmem:[#allocation2 + $0x38] sm:$0xff] }
  0xa1   : > { %1911 = vst.msk [vmem:[#allocation2 + $0x48] sm:$0xff] %vm1862_vm1, %v1905_v38  ;;  %v1349_v40 = vpop.permute.xlu0 %1348  ;;  %2733 = vmatprep.subr.bf16.mxu1 %v2481_v39  ;;  %v4206_v39 = vld [vmem:[%s4431_s21 + $0x18] sm:$0xff]  }
  0xa2   : > { %1354 = vst.msk [vmem:[#allocation2 + $0x40] sm:$0xff] %vm1309_vm3, %v1349_v40  ;;  %620 = vrot.lane.b32.xlu1 %v4180_v36, %s4372_s19  ;;  %v2480_v41 = vld [vmem:[#allocation2 + $0x30] sm:$0xff]  ;;  %v4207_v40 = vld [vmem:[%s4431_s21 + $0x28] sm:$0xff]  }
  0xa3   : > { %1910 = vst.msk [vmem:[#allocation2 + $0x40] sm:$0xff] %vm1860_vm4, %v1905_v38  ;;  %356 = vrot.lane.b32.xlu0 %v4181_v37, %s4355_s27 }
  0xa4   : > { %2734 = vmatpush1.bf16.msra.mxu1 %v2480_v41  ;;  %v800_v44 = vpop.permute.xlu1 %799 }
  0xa5   : > { %v255_v45 = vpop.permute.xlu0 %254 }
  0xa6   : > { %259 = vst.msk [vmem:[#allocation2 + $0x50] sm:$0xff] %vm216_vm0, %v255_v45  ;;  %1171 = vrot.lane.b32.xlu1 %v4182_v42, %s4369_s15 }
  0xa7   : > { %804 = vst.msk [vmem:[#allocation2 + $0x50] sm:$0xff] %vm758_vm2, %v800_v44  ;;  %907 = vrot.lane.b32.xlu0 %v4183_v43, %s4353_s25  ;;  %v4208_v43 = vld [vmem:[%s4431_s21 + $0x28] sm:$0xff]   ;;  %v4209_v44 = vld [vmem:[%s4431_s21 + $0x18] sm:$0xff]  }
  0xa8   : > { %v1907_v48 = vpop.permute.xlu1 %1906  ;;  %v2483_v49 = vld [vmem:[#allocation2 + $0x48] sm:$0xff] }
  0xa9   : > { %1913 = vst.msk [vmem:[#allocation2 + $0x58] sm:$0xff] %vm1862_vm1, %v1907_v48  ;;  %v1351_v50 = vpop.permute.xlu0 %1350  ;;  %2735 = vmatprep.subr.bf16.mxu1 %v2483_v49 }
  0xaa   : > { %1355 = vst.msk [vmem:[#allocation2 + $0x50] sm:$0xff] %vm1309_vm3, %v1351_v50  ;;  %1722 = vrot.lane.b32.xlu1 %v4184_v46, %s4373_s20  ;;  %v2482_v51 = vld [vmem:[#allocation2 + $0x40] sm:$0xff] }
  0xab   : > { %1912 = vst.msk [vmem:[#allocation2 + $0x50] sm:$0xff] %vm1860_vm4, %v1907_v48  ;;  %1458 = vrot.lane.b32.xlu0 %v4185_v47, %s4374_s22  ;;  %2736 = vmatpush1.bf16.msra.mxu1 %v2482_v51  ;;  %v4211_v47 = vld [vmem:[%s4431_s21 + $0x38] sm:$0xff]   ;;  %v4212_v48 = vld [vmem:[%s4431_s21 + $0x8] sm:$0xff]   ;;  %v4213_v51 = vld [vmem:[%s4431_s21 + $0x10] sm:$0xff]  }
  0xac   : > { %v820_v54 = vpop.permute.xlu1 %819 }
  0xad   : > { %v275_v55 = vpop.permute.xlu0 %274 }
  0xae   : > { %280 = vst.msk [vmem:[#allocation2 + $0x60] sm:$0xff] %vm216_vm0, %v275_v55  ;;  %2312 = vrot.lane.b32.xlu1 %v4186_v52, %s4371_s3  ;;  %v4214_v52 = vld [vmem:[%s4431_s21 + $0x20] sm:$0xff]  }
  0xaf   : > { %825 = vst.msk [vmem:[#allocation2 + $0x60] sm:$0xff] %vm758_vm2, %v820_v54  ;;  %2024 = vrot.lane.b32.xlu0 %v4187_v53, %s4370_s16 }
  0xb0   : > { %v1929_v58 = vpop.permute.xlu1 %1928  ;;  %v2485_v59 = vld [vmem:[#allocation2 + $0x58] sm:$0xff] }
  0xb1   : > { %1935 = vst.msk [vmem:[#allocation2 + $0x68] sm:$0xff] %vm1862_vm1, %v1929_v58  ;;  %v1371_v60 = vpop.permute.xlu0 %1370  ;;  %2737 = vmatprep.subr.bf16.mxu1 %v2485_v59  ;;  %v4215_v59 = vld [vmem:[%s4431_s21] sm:$0xff]  }
  0xb2   : > { %1376 = vst.msk [vmem:[#allocation2 + $0x60] sm:$0xff] %vm1309_vm3, %v1371_v60  ;;  %622 = vrot.lane.b32.xlu1 %v4188_v56, %s4372_s19  ;;  %v2484_v61 = vld [vmem:[#allocation2 + $0x50] sm:$0xff] }
  0xb3   : > { %1934 = vst.msk [vmem:[#allocation2 + $0x60] sm:$0xff] %vm1860_vm4, %v1929_v58  ;;  %358 = vrot.lane.b32.xlu0 %v4189_v57, %s4355_s27  ;;  %2738 = vmatpush1.bf16.msra.mxu1 %v2484_v61  ;;  %v4216_v60 = vld [vmem:[%s4431_s21 + $0x30] sm:$0xff]  }
  0xb4   : > { %v822_v0 = vpop.permute.xlu1 %821 }
  0xb5   : > { %v277_v1 = vpop.permute.xlu0 %276 }
  0xb6   : > { %281 = vst.msk [vmem:[#allocation2 + $0x70] sm:$0xff] %vm216_vm0, %v277_v1  ;;  %1173 = vrot.lane.b32.xlu1 %v4190_v62, %s4369_s15 }
  0xb7   : > { %826 = vst.msk [vmem:[#allocation2 + $0x70] sm:$0xff] %vm758_vm2, %v822_v0  ;;  %909 = vrot.lane.b32.xlu0 %v4191_v63, %s4353_s25  ;;  %v4217_v63 = vld [vmem:[%s4431_s21 + $0x30] sm:$0xff]   ;;  %v4218_v0 = vld [vmem:[%s4431_s21] sm:$0xff]  }
  0xb8   : > { %v1931_v4 = vpop.permute.xlu1 %1930  ;;  %v2487_v5 = vld [vmem:[#allocation2 + $0x68] sm:$0xff] }
  0xb9   : > { %1937 = vst.msk [vmem:[#allocation2 + $0x78] sm:$0xff] %vm1862_vm1, %v1931_v4  ;;  %v1373_v6 = vpop.permute.xlu0 %1372  ;;  %2739 = vmatprep.subr.bf16.mxu1 %v2487_v5 }
  0xba   : > { %1377 = vst.msk [vmem:[#allocation2 + $0x70] sm:$0xff] %vm1309_vm3, %v1373_v6  ;;  %1724 = vrot.lane.b32.xlu1 %v4192_v2, %s4373_s20  ;;  %v2486_v7 = vld [vmem:[#allocation2 + $0x60] sm:$0xff] }
  0xbb   : > { %1936 = vst.msk [vmem:[#allocation2 + $0x70] sm:$0xff] %vm1860_vm4, %v1931_v4  ;;  %1460 = vrot.lane.b32.xlu0 %v4193_v3, %s4374_s22  ;;  %2740 = vmatpush1.bf16.msra.mxu1 %v2486_v7  ;;  %v4220_v3 = vld [vmem:[%s4431_s21 + $0x20] sm:$0xff]   ;;  %v4221_v4 = vld [vmem:[%s4431_s21 + $0x10] sm:$0xff]  }
  0xbc   : > { %v555_v10 = vpop.permute.xlu1 %554 }
  0xbd   : > { %560 = vst.msk [vmem:[#allocation2 + $0x200] sm:$0xff] %vm216_vm0, %v555_v10  ;;  %v297_v11 = vpop.permute.xlu0 %296  ;;  %v4223_v10 = vld [vmem:[%s4431_s21 + $0x28] sm:$0xff]  }
  0xbe   : > { %302 = vst.msk [vmem:[#allocation2 + $0x80] sm:$0xff] %vm216_vm0, %v297_v11  ;;  %2314 = vrot.lane.b32.xlu1 %v4194_v8, %s4371_s3 }
  0xbf   : > { %2026 = vrot.lane.b32.xlu0 %v4195_v9, %s4370_s16  ;;  %v4222_v9 = vld [vmem:[%s4431_s21 + $0x18] sm:$0xff]  }
  0xc0   : > { %v1106_v14 = vpop.permute.xlu1 %1105  ;;  %v2489_v15 = vld [vmem:[#allocation2 + $0x78] sm:$0xff] }
  0xc1   : > { %1111 = vst.msk [vmem:[#allocation2 + $0x200] sm:$0xff] %vm758_vm2, %v1106_v14  ;;  %v842_v16 = vpop.permute.xlu0 %841  ;;  %2741 = vmatprep.subr.bf16.mxu1 %v2489_v15  ;;  %v4224_v15 = vld [vmem:[%s4431_s21 + $0x8] sm:$0xff]  }
  0xc2   : > { %847 = vst.msk [vmem:[#allocation2 + $0x80] sm:$0xff] %vm758_vm2, %v842_v16  ;;  %642 = vrot.lane.b32.xlu1 %v4196_v12, %s4375_s23  ;;  %v2488_v17 = vld [vmem:[#allocation2 + $0x70] sm:$0xff]  ;;  %v4225_v16 = vld [vmem:[%s4431_s21 + $0x38] sm:$0xff]  }
  0xc3   : > { %378 = vrot.lane.b32.xlu0 %v4197_v13, %s4355_s27  ;;  %2742 = vmatpush1.bf16.msra.mxu1 %v2488_v17 }
  0xc4   : > { %v1657_v20 = vpop.permute.xlu1 %1656 }
  0xc5   : > { %1662 = vst.msk [vmem:[#allocation2 + $0x200] sm:$0xff] %vm1309_vm3, %v1657_v20  ;;  %v1393_v21 = vpop.permute.xlu0 %1392  ;;  %v4228_v20 = vld [vmem:[%s4431_s21 + $0x8] sm:$0xff]  }
  0xc6   : > { %1398 = vst.msk [vmem:[#allocation2 + $0x80] sm:$0xff] %vm1309_vm3, %v1393_v21  ;;  %1193 = vrot.lane.b32.xlu1 %v4198_v18, %s4376_s24 }
  0xc7   : > { %929 = vrot.lane.b32.xlu0 %v4199_v19, %s4357_s29  ;;  %v4227_v19 = vld [vmem:[%s4431_s21 + $0x38] sm:$0xff]  }
  0xc8   : > { %v2241_v24 = vpop.permute.xlu1 %2240 }
  0xc9   : > { %2246 = vst.msk [vmem:[#allocation2 + $0x200] sm:$0xff] %vm1860_vm4, %v2241_v24  ;;  %v1953_v25 = vpop.permute.xlu0 %1952 }
  0xca   : > { %2247 = vst.msk [vmem:[#allocation2 + $0x208] sm:$0xff] %vm1862_vm1, %v2241_v24  ;;  %1959 = vst.msk [vmem:[#allocation2 + $0x88] sm:$0xff] %vm1862_vm1, %v1953_v25  ;;  %1744 = vrot.lane.b32.xlu1 %v4200_v22, %s4362_s8  ;;  %v4230_v24 = vld [vmem:[%s4431_s21 + $0x18] sm:$0xff]  }
  0xcb   : > { %1958 = vst.msk [vmem:[#allocation2 + $0x80] sm:$0xff] %vm1860_vm4, %v1953_v25  ;;  %1480 = vrot.lane.b32.xlu0 %v4201_v23, %s4374_s22  ;;  %v4229_v23 = vld [vmem:[%s4431_s21 + $0x28] sm:$0xff]  }
  0xcc   : > { %v557_v29 = vpop.permute.xlu1 %556 }
  0xcd   : > { %561 = vst.msk [vmem:[#allocation2 + $0x210] sm:$0xff] %vm216_vm0, %v557_v29  ;;  %v299_v30 = vpop.permute.xlu0 %298 }
  0xce   : > { %303 = vst.msk [vmem:[#allocation2 + $0x90] sm:$0xff] %vm216_vm0, %v299_v30  ;;  %2336 = vrot.lane.b32.xlu1 %v4202_v27, %s4377_s28 }
  0xcf   : > { %2048 = vrot.lane.b32.xlu0 %v4203_v28, %s4378_s30 }
  0xd0   : > { %v1108_v33 = vpop.permute.xlu1 %1107  ;;  %v2538_v35 = vld [vmem:[#allocation2 + $0x200] sm:$0xff] }
  0xd1   : > { %v2539_v34 = vld [vmem:[#allocation2 + $0x208] sm:$0xff]  ;;  %1112 = vst.msk [vmem:[#allocation2 + $0x210] sm:$0xff] %vm758_vm2, %v1108_v33  ;;  %v844_v36 = vpop.permute.xlu0 %843 }
  0xd2   : > { %2873 = vmatprep.subr.bf16.mxu0 %v2539_v34  ;;  %v2491_v37 = vld [vmem:[#allocation2 + $0x88] sm:$0xff]  ;;  %v2490_v38 = vld [vmem:[#allocation2 + $0x80] sm:$0xff]  ;;  %848 = vst.msk [vmem:[#allocation2 + $0x90] sm:$0xff] %vm758_vm2, %v844_v36  ;;  %644 = vrot.lane.b32.xlu1 %v4204_v31, %s4375_s23  ;;  %v4234_v36 = vld [vmem:[%s4431_s21 + $0x10] sm:$0xff]  }
  0xd3   : > { %2874 = vmatpush1.bf16.msra.mxu0 %v2538_v35  ;;  %380 = vrot.lane.b32.xlu0 %v4205_v32, %s4355_s27  ;;  %s4379_s27 = smov 23   ;;  %v4231_v31 = vld [vmem:[%s4431_s21] sm:$0xff]   ;;  %v4233_v35 = vld [vmem:[%s4431_s21 + $0x10] sm:$0xff]  }
  0xd4   : > { %2743 = vmatprep.subr.bf16.mxu1 %v2491_v37  ;;  %v1659_v41 = vpop.permute.xlu1 %1658  ;;  %v4232_v32 = vld [vmem:[%s4431_s21] sm:$0xff]  }
  0xd5   : > { %2744 = vmatpush1.bf16.msra.mxu1 %v2490_v38  ;;  %1663 = vst.msk [vmem:[#allocation2 + $0x210] sm:$0xff] %vm1309_vm3, %v1659_v41  ;;  %v1395_v42 = vpop.permute.xlu0 %1394 }
  0xd6   : > { %1399 = vst.msk [vmem:[#allocation2 + $0x90] sm:$0xff] %vm1309_vm3, %v1395_v42  ;;  %1195 = vrot.lane.b32.xlu1 %v4206_v39, %s4376_s24  ;;  %v4236_v39 = vld [vmem:[%s4431_s21 + $0x20] sm:$0xff]  }
  0xd7   : > { %931 = vrot.lane.b32.xlu0 %v4207_v40, %s4357_s29  ;;  %v4237_v40 = vld [vmem:[%s4431_s21 + $0x20] sm:$0xff]  }
  0xd8   : > { %v2243_v45 = vpop.permute.xlu1 %2242 }
  0xd9   : > { %2248 = vst.msk [vmem:[#allocation2 + $0x210] sm:$0xff] %vm1860_vm4, %v2243_v45  ;;  %v1955_v46 = vpop.permute.xlu0 %1954 }
  0xda   : > { %2249 = vst.msk [vmem:[#allocation2 + $0x218] sm:$0xff] %vm1862_vm1, %v2243_v45  ;;  %1961 = vst.msk [vmem:[#allocation2 + $0x98] sm:$0xff] %vm1862_vm1, %v1955_v46  ;;  %1746 = vrot.lane.b32.xlu1 %v4208_v43, %s4362_s8  ;;  %v4238_v45 = vld [vmem:[%s4431_s21 + $0x30] sm:$0xff]  }
  0xdb   : > { %1960 = vst.msk [vmem:[#allocation2 + $0x90] sm:$0xff] %vm1860_vm4, %v1955_v46  ;;  %1482 = vrot.lane.b32.xlu0 %v4209_v44, %s4374_s22  ;;  %v4239_v46 = vld [vmem:[%s4431_s21 + $0x30] sm:$0xff]  }
  0xdc   : > { %v864_v49 = vpop.permute.xlu1 %863 }
  0xdd   : > { %869 = vst.msk [vmem:[#allocation2 + $0xa0] sm:$0xff] %vm758_vm2, %v864_v49  ;;  %v577_v50 = vpop.permute.xlu0 %576 }
  0xde   : > { %582 = vst.msk [vmem:[#allocation2 + $0x220] sm:$0xff] %vm216_vm0, %v577_v50  ;;  %2338 = vrot.lane.b32.xlu1 %v4211_v47, %s4377_s28 }
  0xdf   : > { %2050 = vrot.lane.b32.xlu0 %v4212_v48, %s4378_s30 }
  0xe0   : > { %v1415_v53 = vpop.permute.xlu1 %1414  ;;  %v2540_v55 = vld [vmem:[#allocation2 + $0x210] sm:$0xff] }
  0xe1   : > { %v2541_v54 = vld [vmem:[#allocation2 + $0x218] sm:$0xff]  ;;  %1420 = vst.msk [vmem:[#allocation2 + $0xa0] sm:$0xff] %vm1309_vm3, %v1415_v53  ;;  %v1128_v56 = vpop.permute.xlu0 %1127 }
  0xe2   : > { %2875 = vmatprep.subr.bf16.mxu0 %v2541_v54  ;;  %v2493_v57 = vld [vmem:[#allocation2 + $0x98] sm:$0xff]  ;;  %v2492_v58 = vld [vmem:[#allocation2 + $0x90] sm:$0xff]  ;;  %1133 = vst.msk [vmem:[#allocation2 + $0x220] sm:$0xff] %vm758_vm2, %v1128_v56  ;;  %664 = vrot.lane.b32.xlu1 %v4213_v51, %s4375_s23  ;;  %v4240_v51 = vld [vmem:[%s4431_s21 + $0x8] sm:$0xff]  }
  0xe3   : > { %2876 = vmatpush1.bf16.msra.mxu0 %v2540_v55  ;;  %400 = vrot.lane.b32.xlu0 %v4214_v52, %s4360_s6  ;;  %v4241_v52 = vld [vmem:[%s4431_s21 + $0x8] sm:$0xff]   ;;  %v4242_v55 = vld [vmem:[%s4431_s21 + $0x18] sm:$0xff]  }
  0xe4   : > { %2745 = vmatprep.subr.bf16.mxu1 %v2493_v57  ;;  %v1977_v61 = vpop.permute.xlu1 %1976  ;;  %v4243_v56 = vld [vmem:[%s4431_s21 + $0x18] sm:$0xff]  }
  0xe5   : > { %2746 = vmatpush1.bf16.msra.mxu1 %v2492_v58  ;;  %1982 = vst.msk [vmem:[#allocation2 + $0xa0] sm:$0xff] %vm1860_vm4, %v1977_v61  ;;  %v1679_v62 = vpop.permute.xlu0 %1678 }
  0xe6   : > { %1983 = vst.msk [vmem:[#allocation2 + $0xa8] sm:$0xff] %vm1862_vm1, %v1977_v61  ;;  %1215 = vrot.lane.b32.xlu1 %v4215_v59, %s4379_s27  ;;  %v4244_v59 = vld [vmem:[%s4431_s21 + $0x28] sm:$0xff]  }
  0xe7   : > { %1684 = vst.msk [vmem:[#allocation2 + $0x220] sm:$0xff] %vm1309_vm3, %v1679_v62  ;;  %951 = vrot.lane.b32.xlu0 %v4216_v60, %s4357_s29  ;;  %v4245_v60 = vld [vmem:[%s4431_s21 + $0x28] sm:$0xff]  }
  0xe8   : > { %v579_v1 = vpop.permute.xlu1 %578 }
  0xe9   : > { %583 = vst.msk [vmem:[#allocation2 + $0x230] sm:$0xff] %vm216_vm0, %v579_v1  ;;  %v2265_v2 = vpop.permute.xlu0 %2264 }
  0xea   : > { %2270 = vst.msk [vmem:[#allocation2 + $0x220] sm:$0xff] %vm1860_vm4, %v2265_v2  ;;  %1766 = vrot.lane.b32.xlu1 %v4217_v63, %s4362_s8 }
  0xeb   : > { %2271 = vst.msk [vmem:[#allocation2 + $0x228] sm:$0xff] %vm1862_vm1, %v2265_v2  ;;  %1502 = vrot.lane.b32.xlu0 %v4218_v0, %s4380_s9 }
  0xec   : > { %v1130_v5 = vpop.permute.xlu1 %1129  ;;  %v2494_v7 = vld [vmem:[#allocation2 + $0xa0] sm:$0xff] }
  0xed   : > { %v2495_v6 = vld [vmem:[#allocation2 + $0xa8] sm:$0xff]  ;;  %1134 = vst.msk [vmem:[#allocation2 + $0x230] sm:$0xff] %vm758_vm2, %v1130_v5  ;;  %v866_v8 = vpop.permute.xlu0 %865 }
  0xee   : > { %2747 = vmatprep.subr.bf16.mxu1 %v2495_v6  ;;  %870 = vst.msk [vmem:[#allocation2 + $0xb0] sm:$0xff] %vm758_vm2, %v866_v8  ;;  %2360 = vrot.lane.b32.xlu1 %v4220_v3, %s4364_s10  ;;  %v4246_v3 = vld [vmem:[%s4431_s21 + $0x38] sm:$0xff]   ;;  %v4249_v8 = vld [vmem:[%s4431_s21 + $0x10] sm:$0xff]  }
  0xef   : > { %2748 = vmatpush1.bf16.msra.mxu1 %v2494_v7  ;;  %2072 = vrot.lane.b32.xlu0 %v4221_v4, %s4378_s30  ;;  %v4247_v4 = vld [vmem:[%s4431_s21 + $0x38] sm:$0xff]   ;;  %v4248_v7 = vld [vmem:[%s4431_s21 + $0x10] sm:$0xff]  }
  0xf0   : > { %v1681_v11 = vpop.permute.xlu1 %1680 }
  0xf1   : > { %1685 = vst.msk [vmem:[#allocation2 + $0x230] sm:$0xff] %vm1309_vm3, %v1681_v11  ;;  %v1417_v12 = vpop.permute.xlu0 %1416  ;;  %v2542_v14 = vld [vmem:[#allocation2 + $0x220] sm:$0xff] }
  0xf2   : > { %v2543_v13 = vld [vmem:[#allocation2 + $0x228] sm:$0xff]  ;;  %1421 = vst.msk [vmem:[#allocation2 + $0xb0] sm:$0xff] %vm1309_vm3, %v1417_v12  ;;  %666 = vrot.lane.b32.xlu1 %v4222_v9, %s4375_s23  ;;  %v4250_v11 = vld [vmem:[%s4431_s21] sm:$0xff]   ;;  %s4386_s23 = smov 20  }
  0xf3   : > { %2877 = vmatprep.subr.bf16.mxu0 %v2543_v13  ;;  %402 = vrot.lane.b32.xlu0 %v4223_v10, %s4360_s6  ;;  %s4382_s6 = smov 30   ;;  %v4251_v12 = vld [vmem:[%s4431_s21] sm:$0xff]  }
  0xf4   : > { %2878 = vmatpush1.bf16.msra.mxu0 %v2542_v14  ;;  %v2267_v17 = vpop.permute.xlu1 %2266 }
  0xf5   : > { %2272 = vst.msk [vmem:[#allocation2 + $0x230] sm:$0xff] %vm1860_vm4, %v2267_v17  ;;  %v1979_v18 = vpop.permute.xlu0 %1978 }
  0xf6   : > { %2273 = vst.msk [vmem:[#allocation2 + $0x238] sm:$0xff] %vm1862_vm1, %v2267_v17  ;;  %1985 = vst.msk [vmem:[#allocation2 + $0xb8] sm:$0xff] %vm1862_vm1, %v1979_v18  ;;  %1217 = vrot.lane.b32.xlu1 %v4224_v15, %s4379_s27  ;;  %v4252_v15 = vld [vmem:[%s4431_s21 + $0x30] sm:$0xff]  }
  0xf7   : > { %1984 = vst.msk [vmem:[#allocation2 + $0xb0] sm:$0xff] %vm1860_vm4, %v1979_v18  ;;  %953 = vrot.lane.b32.xlu0 %v4225_v16, %s4357_s29  ;;  %s4381_s29 = smov 115   ;;  %v4253_v16 = vld [vmem:[%s4431_s21 + $0x30] sm:$0xff]  }
  0xf8   : > { %v886_v21 = vpop.permute.xlu1 %885 }
  0xf9   : > { %891 = vst.msk [vmem:[#allocation2 + $0xc0] sm:$0xff] %vm758_vm2, %v886_v21  ;;  %v599_v22 = vpop.permute.xlu0 %598 }
  0xfa   : > { %604 = vst.msk [vmem:[#allocation2 + $0x240] sm:$0xff] %vm216_vm0, %v599_v22  ;;  %1768 = vrot.lane.b32.xlu1 %v4227_v19, %s4362_s8 }
  0xfb   : > { %1504 = vrot.lane.b32.xlu0 %v4228_v20, %s4380_s9 }
  0xfc   : > { %v1437_v25 = vpop.permute.xlu1 %1436  ;;  %v2544_v27 = vld [vmem:[#allocation2 + $0x230] sm:$0xff] }
  0xfd   : > { %v2545_v26 = vld [vmem:[#allocation2 + $0x238] sm:$0xff]  ;;  %1442 = vst.msk [vmem:[#allocation2 + $0xc0] sm:$0xff] %vm1309_vm3, %v1437_v25  ;;  %v1150_v28 = vpop.permute.xlu0 %1149 }
  0xfe   : > { %2879 = vmatprep.subr.bf16.mxu0 %v2545_v26  ;;  %v2497_v29 = vld [vmem:[#allocation2 + $0xb8] sm:$0xff]  ;;  %v2496_v30 = vld [vmem:[#allocation2 + $0xb0] sm:$0xff]  ;;  %1155 = vst.msk [vmem:[#allocation2 + $0x240] sm:$0xff] %vm758_vm2, %v1150_v28  ;;  %2362 = vrot.lane.b32.xlu1 %v4229_v23, %s4364_s10  ;;  %v4254_v23 = vld [vmem:[%s4431_s21 + $0x20] sm:$0xff]  }
  0xff   : > { %2880 = vmatpush1.bf16.msra.mxu0 %v2544_v27  ;;  %2074 = vrot.lane.b32.xlu0 %v4230_v24, %s4378_s30  ;;  %v4255_v24 = vld [vmem:[%s4431_s21 + $0x20] sm:$0xff]   ;;  %v4256_v27 = vld [vmem:[%s4431_s21 + $0x18] sm:$0xff]  }
 0x100   : > { %2749 = vmatprep.subr.bf16.mxu1 %v2497_v29  ;;  %v2001_v33 = vpop.permute.xlu1 %2000  ;;  %v4257_v28 = vld [vmem:[%s4431_s21 + $0x18] sm:$0xff]  }
 0x101   : > { %2750 = vmatpush1.bf16.msra.mxu1 %v2496_v30  ;;  %2006 = vst.msk [vmem:[#allocation2 + $0xc0] sm:$0xff] %vm1860_vm4, %v2001_v33  ;;  %v1701_v34 = vpop.permute.xlu0 %1700 }
 0x102   : > { %2007 = vst.msk [vmem:[#allocation2 + $0xc8] sm:$0xff] %vm1862_vm1, %v2001_v33  ;;  %686 = vrot.lane.b32.xlu1 %v4231_v31, %s4381_s29  ;;  %v4258_v31 = vld [vmem:[%s4431_s21 + $0x8] sm:$0xff]  }
 0x103   : > { %1706 = vst.msk [vmem:[#allocation2 + $0x240] sm:$0xff] %vm1309_vm3, %v1701_v34  ;;  %422 = vrot.lane.b32.xlu0 %v4232_v32, %s4359_s5  ;;  %v4259_v32 = vld [vmem:[%s4431_s21 + $0x8] sm:$0xff]  }
 0x104   : > { %v601_v37 = vpop.permute.xlu1 %600 }
 0x105   : > { %605 = vst.msk [vmem:[#allocation2 + $0x250] sm:$0xff] %vm216_vm0, %v601_v37  ;;  %v2289_v38 = vpop.permute.xlu0 %2288 }
 0x106   : > { %2294 = vst.msk [vmem:[#allocation2 + $0x240] sm:$0xff] %vm1860_vm4, %v2289_v38  ;;  %1237 = vrot.lane.b32.xlu1 %v4233_v35, %s4379_s27  ;;  %v4260_v35 = vld [vmem:[%s4431_s21 + $0x38] sm:$0xff]  }
 0x107   : > { %2295 = vst.msk [vmem:[#allocation2 + $0x248] sm:$0xff] %vm1862_vm1, %v2289_v38  ;;  %973 = vrot.lane.b32.xlu0 %v4234_v36, %s4382_s6  ;;  %v4261_v36 = vld [vmem:[%s4431_s21 + $0x38] sm:$0xff]  }
 0x108   : > { %v1152_v41 = vpop.permute.xlu1 %1151  ;;  %v2498_v43 = vld [vmem:[#allocation2 + $0xc0] sm:$0xff] }
 0x109   : > { %v2499_v42 = vld [vmem:[#allocation2 + $0xc8] sm:$0xff]  ;;  %1156 = vst.msk [vmem:[#allocation2 + $0x250] sm:$0xff] %vm758_vm2, %v1152_v41  ;;  %v888_v44 = vpop.permute.xlu0 %887 }
 0x10a   : > { %2751 = vmatprep.subr.bf16.mxu1 %v2499_v42  ;;  %892 = vst.msk [vmem:[#allocation2 + $0xd0] sm:$0xff] %vm758_vm2, %v888_v44  ;;  %1788 = vrot.lane.b32.xlu1 %v4236_v39, %s4368_s14  ;;  %v4263_v44 = vld [vmem:[%s4431_s21 + $0x28] sm:$0xff]  }
 0x10b   : > { %2752 = vmatpush1.bf16.msra.mxu1 %v2498_v43  ;;  %1524 = vrot.lane.b32.xlu0 %v4237_v40, %s4366_s12  ;;  %v4262_v43 = vld [vmem:[%s4431_s21 + $0x28] sm:$0xff]  }
 0x10c   : > { %v1703_v47 = vpop.permute.xlu1 %1702 }
 0x10d   : > { %1707 = vst.msk [vmem:[#allocation2 + $0x250] sm:$0xff] %vm1309_vm3, %v1703_v47  ;;  %v1439_v48 = vpop.permute.xlu0 %1438  ;;  %v2546_v50 = vld [vmem:[#allocation2 + $0x240] sm:$0xff] }
 0x10e   : > { %v2547_v49 = vld [vmem:[#allocation2 + $0x248] sm:$0xff]  ;;  %1443 = vst.msk [vmem:[#allocation2 + $0xd0] sm:$0xff] %vm1309_vm3, %v1439_v48  ;;  %2384 = vrot.lane.b32.xlu1 %v4238_v45, %s4364_s10  ;;  %v4274_v45 = vld [vmem:[%s5292_s1] ss:$28 sps:$4 sm:$0xff]   ;;  %v4264_v48 = vld [vmem:[%s4431_s21 + $0x10] sm:$0xff]  }
 0x10f   : > { %2881 = vmatprep.subr.bf16.mxu0 %v2547_v49  ;;  %2096 = vrot.lane.b32.xlu0 %v4239_v46, %s4367_s13  ;;  %v4265_v49 = vld [vmem:[%s4431_s21] sm:$0xff]  }
 0x110   : > { %2882 = vmatpush1.bf16.msra.mxu0 %v2546_v50  ;;  %v2291_v53 = vpop.permute.xlu1 %2290 }
 0x111   : > { %2296 = vst.msk [vmem:[#allocation2 + $0x250] sm:$0xff] %vm1860_vm4, %v2291_v53  ;;  %v2003_v54 = vpop.permute.xlu0 %2002 }
 0x112   : > { %2297 = vst.msk [vmem:[#allocation2 + $0x258] sm:$0xff] %vm1862_vm1, %v2291_v53  ;;  %2009 = vst.msk [vmem:[#allocation2 + $0xd8] sm:$0xff] %vm1862_vm1, %v2003_v54  ;;  %688 = vrot.lane.b32.xlu1 %v4240_v51, %s4381_s29  ;;  %v4267_v53 = vld [vmem:[%s4431_s21 + $0x20] sm:$0xff]  }
 0x113   : > { %2008 = vst.msk [vmem:[#allocation2 + $0xd0] sm:$0xff] %vm1860_vm4, %v2003_v54  ;;  %424 = vrot.lane.b32.xlu0 %v4241_v52, %s4359_s5  ;;  %v4266_v52 = vld [vmem:[%s4431_s21 + $0x30] sm:$0xff]  }
 0x114   : > { %v621_v57 = vpop.permute.xlu1 %620 }
 0x115   : > { %626 = vst.msk [vmem:[#allocation2 + $0x260] sm:$0xff] %vm216_vm0, %v621_v57  ;;  %v357_v58 = vpop.permute.xlu0 %356  ;;  %v4269_v57 = vld [vmem:[%s4431_s21 + $0x8] sm:$0xff]  }
 0x116   : > { %362 = vst.msk [vmem:[#allocation2 + $0xe0] sm:$0xff] %vm216_vm0, %v357_v58  ;;  %1239 = vrot.lane.b32.xlu1 %v4242_v55, %s4379_s27 }
 0x117   : > { %975 = vrot.lane.b32.xlu0 %v4243_v56, %s4382_s6  ;;  %v4268_v56 = vld [vmem:[%s4431_s21 + $0x18] sm:$0xff]  }
 0x118   : > { %v1172_v61 = vpop.permute.xlu1 %1171  ;;  %v2548_v63 = vld [vmem:[#allocation2 + $0x250] sm:$0xff] }
 0x119   : > { %v2549_v62 = vld [vmem:[#allocation2 + $0x258] sm:$0xff]  ;;  %1177 = vst.msk [vmem:[#allocation2 + $0x260] sm:$0xff] %vm758_vm2, %v1172_v61  ;;  %v908_v0 = vpop.permute.xlu0 %907 }
 0x11a   : > { %2883 = vmatprep.subr.bf16.mxu0 %v2549_v62  ;;  %v2501_v1 = vld [vmem:[#allocation2 + $0xd8] sm:$0xff]  ;;  %v2500_v2 = vld [vmem:[#allocation2 + $0xd0] sm:$0xff]  ;;  %913 = vst.msk [vmem:[#allocation2 + $0xe0] sm:$0xff] %vm758_vm2, %v908_v0  ;;  %1790 = vrot.lane.b32.xlu1 %v4244_v59, %s4368_s14 }
 0x11b   : > { %2884 = vmatpush1.bf16.msra.mxu0 %v2548_v63  ;;  %1526 = vrot.lane.b32.xlu0 %v4245_v60, %s4366_s12  ;;  %v4270_v0 = vld [vmem:[%s4431_s21 + $0x38] sm:$0xff]  }
 0x11c   : > { %2753 = vmatprep.subr.bf16.mxu1 %v2501_v1  ;;  %v1723_v5 = vpop.permute.xlu1 %1722  ;;  %v4271_v1 = vld [vmem:[%s4431_s21 + $0x28] sm:$0xff]  }
 0x11d   : > { %2754 = vmatpush1.bf16.msra.mxu1 %v2500_v2  ;;  %1728 = vst.msk [vmem:[#allocation2 + $0x260] sm:$0xff] %vm1309_vm3, %v1723_v5  ;;  %v1459_v6 = vpop.permute.xlu0 %1458  ;;  %v4273_v5 = vld [vmem:[%s4431_s21 + $0x10] sm:$0xff]  }
 0x11e   : > { %1464 = vst.msk [vmem:[#allocation2 + $0xe0] sm:$0xff] %vm1309_vm3, %v1459_v6  ;;  %2386 = vrot.lane.b32.xlu1 %v4246_v3, %s4364_s10  ;;  %s4383_s10 = smov 22  }
 0x11f   : > { %2098 = vrot.lane.b32.xlu0 %v4247_v4, %s4367_s13  ;;  %v4272_v4 = vld [vmem:[%s4431_s21] sm:$0xff]   ;;  %s3027_s13 = sld [smem:[#allocation3]] }
 0x120   : > { %v2313_v9 = vpop.permute.xlu1 %2312 }
 0x121   : > { %2318 = vst.msk [vmem:[#allocation2 + $0x260] sm:$0xff] %vm1860_vm4, %v2313_v9  ;;  %v2025_v10 = vpop.permute.xlu0 %2024 }
 0x122   : > { %2319 = vst.msk [vmem:[#allocation2 + $0x268] sm:$0xff] %vm1862_vm1, %v2313_v9  ;;  %2031 = vst.msk [vmem:[#allocation2 + $0xe8] sm:$0xff] %vm1862_vm1, %v2025_v10  ;;  %708 = vrot.lane.b32.xlu1 %v4248_v7, %s4381_s29  ;;  %v4278_v9 = vld [vmem:[%s4431_s21 + $0x30] sm:$0xff]  }
 0x123   : > { %2030 = vst.msk [vmem:[#allocation2 + $0xe0] sm:$0xff] %vm1860_vm4, %v2025_v10  ;;  %444 = vrot.lane.b32.xlu0 %v4249_v8, %s4359_s5  ;;  %v4277_v8 = vld [vmem:[%s4431_s21 + $0x20] sm:$0xff]  }
 0x124   : > { %v623_v13 = vpop.permute.xlu1 %622 }
 0x125   : > { %627 = vst.msk [vmem:[#allocation2 + $0x270] sm:$0xff] %vm216_vm0, %v623_v13  ;;  %v359_v14 = vpop.permute.xlu0 %358  ;;  %v4280_v13 = vld [vmem:[%s4431_s21 + $0x18] sm:$0xff]  }
 0x126   : > { %363 = vst.msk [vmem:[#allocation2 + $0xf0] sm:$0xff] %vm216_vm0, %v359_v14  ;;  %1259 = vrot.lane.b32.xlu1 %v4250_v11, %s4383_s10 }
 0x127   : > { %995 = vrot.lane.b32.xlu0 %v4251_v12, %s4361_s7  ;;  %v4279_v12 = vld [vmem:[%s4431_s21 + $0x8] sm:$0xff]  }
 0x128   : > { %v1174_v17 = vpop.permute.xlu1 %1173  ;;  %v2550_v19 = vld [vmem:[#allocation2 + $0x260] sm:$0xff] }
 0x129   : > { %v2551_v18 = vld [vmem:[#allocation2 + $0x268] sm:$0xff]  ;;  %1178 = vst.msk [vmem:[#allocation2 + $0x270] sm:$0xff] %vm758_vm2, %v1174_v17  ;;  %v910_v20 = vpop.permute.xlu0 %909 }
 0x12a   : > { %2885 = vmatprep.subr.bf16.mxu0 %v2551_v18  ;;  %v2503_v21 = vld [vmem:[#allocation2 + $0xe8] sm:$0xff]  ;;  %v2502_v22 = vld [vmem:[#allocation2 + $0xe0] sm:$0xff]  ;;  %914 = vst.msk [vmem:[#allocation2 + $0xf0] sm:$0xff] %vm758_vm2, %v910_v20  ;;  %1810 = vrot.lane.b32.xlu1 %v4252_v15, %s4368_s14 }
 0x12b   : > { %2886 = vmatpush1.bf16.msra.mxu0 %v2550_v19  ;;  %1546 = vrot.lane.b32.xlu0 %v4253_v16, %s4366_s12  ;;  %v4281_v20 = vld [vmem:[%s4431_s21 + $0x28] sm:$0xff]  }
 0x12c   : > { %2755 = vmatprep.subr.bf16.mxu1 %v2503_v21  ;;  %v1725_v25 = vpop.permute.xlu1 %1724  ;;  %v4282_v21 = vld [vmem:[%s4431_s21 + $0x38] sm:$0xff]  }
 0x12d   : > { %2756 = vmatpush1.bf16.msra.mxu1 %v2502_v22  ;;  %1729 = vst.msk [vmem:[#allocation2 + $0x270] sm:$0xff] %vm1309_vm3, %v1725_v25  ;;  %v1461_v26 = vpop.permute.xlu0 %1460  ;;  %v4284_v25 = vld [vmem:[%s4431_s21] sm:$0xff]  }
 0x12e   : > { %1465 = vst.msk [vmem:[#allocation2 + $0xf0] sm:$0xff] %vm1309_vm3, %v1461_v26  ;;  %2408 = vrot.lane.b32.xlu1 %v4254_v23, %s4371_s3 }
 0x12f   : > { %2120 = vrot.lane.b32.xlu0 %v4255_v24, %s4370_s16  ;;  %v4283_v24 = vld [vmem:[%s4431_s21 + $0x10] sm:$0xff]  }
 0x130   : > { %v2315_v29 = vpop.permute.xlu1 %2314 }
 0x131   : > { %2320 = vst.msk [vmem:[#allocation2 + $0x270] sm:$0xff] %vm1860_vm4, %v2315_v29  ;;  %v2027_v30 = vpop.permute.xlu0 %2026 }
 0x132   : > { %2321 = vst.msk [vmem:[#allocation2 + $0x278] sm:$0xff] %vm1862_vm1, %v2315_v29  ;;  %2033 = vst.msk [vmem:[#allocation2 + $0xf8] sm:$0xff] %vm1862_vm1, %v2027_v30  ;;  %710 = vrot.lane.b32.xlu1 %v4256_v27, %s4381_s29  ;;  %v4286_v29 = vld [vmem:[%s4431_s21 + $0x20] sm:$0xff]  }
 0x133   : > { %2032 = vst.msk [vmem:[#allocation2 + $0xf0] sm:$0xff] %vm1860_vm4, %v2027_v30  ;;  %446 = vrot.lane.b32.xlu0 %v4257_v28, %s4359_s5  ;;  %v4285_v28 = vld [vmem:[%s4431_s21 + $0x30] sm:$0xff]  }
 0x134   : > { %v643_v33 = vpop.permute.xlu1 %642 }
 0x135   : > { %648 = vst.msk [vmem:[#allocation2 + $0x280] sm:$0xff] %vm216_vm0, %v643_v33  ;;  %v379_v34 = vpop.permute.xlu0 %378  ;;  %v4288_v33 = vld [vmem:[%s4431_s21 + $0x8] sm:$0xff]  }
 0x136   : > { %384 = vst.msk [vmem:[#allocation2 + $0x100] sm:$0xff] %vm216_vm0, %v379_v34  ;;  %1261 = vrot.lane.b32.xlu1 %v4258_v31, %s4383_s10 }
 0x137   : > { %997 = vrot.lane.b32.xlu0 %v4259_v32, %s4361_s7  ;;  %v4287_v32 = vld [vmem:[%s4431_s21 + $0x18] sm:$0xff]  }
 0x138   : > { %v1194_v37 = vpop.permute.xlu1 %1193  ;;  %v2552_v39 = vld [vmem:[#allocation2 + $0x270] sm:$0xff] }
 0x139   : > { %v2553_v38 = vld [vmem:[#allocation2 + $0x278] sm:$0xff]  ;;  %1199 = vst.msk [vmem:[#allocation2 + $0x280] sm:$0xff] %vm758_vm2, %v1194_v37  ;;  %v930_v40 = vpop.permute.xlu0 %929 }
 0x13a   : > { %2887 = vmatprep.subr.bf16.mxu0 %v2553_v38  ;;  %v2505_v41 = vld [vmem:[#allocation2 + $0xf8] sm:$0xff]  ;;  %v2504_v42 = vld [vmem:[#allocation2 + $0xf0] sm:$0xff]  ;;  %935 = vst.msk [vmem:[#allocation2 + $0x100] sm:$0xff] %vm758_vm2, %v930_v40  ;;  %1812 = vrot.lane.b32.xlu1 %v4260_v35, %s4368_s14 }
 0x13b   : > { %2888 = vmatpush1.bf16.msra.mxu0 %v2552_v39  ;;  %1548 = vrot.lane.b32.xlu0 %v4261_v36, %s4366_s12  ;;  %v4289_v40 = vld [vmem:[%s4431_s21 + $0x38] sm:$0xff]   ;;  %s4384_s12 = smov 114  }
 0x13c   : > { %2757 = vmatprep.subr.bf16.mxu1 %v2505_v41  ;;  %v1745_v46 = vpop.permute.xlu1 %1744  ;;  %v4290_v41 = vld [vmem:[%s4431_s21 + $0x28] sm:$0xff]  }
 0x13d   : > { %2758 = vmatpush1.bf16.msra.mxu1 %v2504_v42  ;;  %1750 = vst.msk [vmem:[#allocation2 + $0x280] sm:$0xff] %vm1309_vm3, %v1745_v46  ;;  %v1481_v47 = vpop.permute.xlu0 %1480  ;;  %v4309_v42 = vld [vmem:[%s5292_s1 + $0x14] ss:$28 sps:$4 sm:$0xff]   ;;  %v4292_v46 = vld [vmem:[%s4431_s21 + $0x20] sm:$0xff]  }
 0x13e   : > { %1486 = vst.msk [vmem:[#allocation2 + $0x100] sm:$0xff] %vm1309_vm3, %v1481_v47  ;;  %2410 = vrot.lane.b32.xlu1 %v4262_v43, %s4371_s3  ;;  %2905 = vmatprep.mubr.bf16.mxu0 %v4309_v42 }
 0x13f   : > { %2122 = vrot.lane.b32.xlu0 %v4263_v44, %s4370_s16 }
 0x140   : > { %2760 = vmatmul.mubr.bf16.vlgmr.msra.gmra.mrb[0].mxu1 %v4274_v45  ;;  %v2337_v50 = vpop.permute.xlu1 %2336  ;;  %v4291_v45 = vld [vmem:[%s4431_s21] sm:$0xff]  }
 0x141   : > { %2342 = vst.msk [vmem:[#allocation2 + $0x280] sm:$0xff] %vm1860_vm4, %v2337_v50  ;;  %v2049_v51 = vpop.permute.xlu0 %2048 }
 0x142   : > { %2343 = vst.msk [vmem:[#allocation2 + $0x288] sm:$0xff] %vm1862_vm1, %v2337_v50  ;;  %2055 = vst.msk [vmem:[#allocation2 + $0x108] sm:$0xff] %vm1862_vm1, %v2049_v51  ;;  %1017 = vrot.lane.b32.xlu1 %v4264_v48, %s4361_s7  ;;  %v4294_v50 = vld [vmem:[%s4431_s21 + $0x30] sm:$0xff]  }
 0x143   : > { %2054 = vst.msk [vmem:[#allocation2 + $0x100] sm:$0xff] %vm1860_vm4, %v2049_v51  ;;  %466 = vrot.lane.b32.xlu0 %v4265_v49, %s4365_s11  ;;  %v4293_v49 = vld [vmem:[%s4431_s21 + $0x10] sm:$0xff]  }
 0x144   : > { %v645_v54 = vpop.permute.xlu1 %644 }
 0x145   : > { %649 = vst.msk [vmem:[#allocation2 + $0x290] sm:$0xff] %vm216_vm0, %v645_v54  ;;  %v381_v55 = vpop.permute.xlu0 %380  ;;  %v4314_v54 = vld [vmem:[%s5292_s1 + $0x38] ss:$28 sps:$4 sm:$0xff]  }
 0x146   : > { %385 = vst.msk [vmem:[#allocation2 + $0x110] sm:$0xff] %vm216_vm0, %v381_v55  ;;  %2144 = vrot.lane.b32.xlu1 %v4266_v52, %s4370_s16  ;;  %v4295_v55 = vld [vmem:[%s4431_s21 + $0x20] sm:$0xff]  }
 0x147   : > { %1568 = vrot.lane.b32.xlu0 %v4267_v53, %s4374_s22  ;;  %v4312_v53 = vld [vmem:[%s5292_s1 + $0x3c] ss:$28 sps:$4 sm:$0xff]  }
 0x148   : > { %v1196_v58 = vpop.permute.xlu1 %1195  ;;  %v2554_v60 = vld [vmem:[#allocation2 + $0x280] sm:$0xff]  ;;  %2769 = vmatprep.mubr.bf16.mxu1 %v4312_v53 }
 0x149   : > { %v2555_v59 = vld [vmem:[#allocation2 + $0x288] sm:$0xff]  ;;  %1200 = vst.msk [vmem:[#allocation2 + $0x290] sm:$0xff] %vm758_vm2, %v1196_v58  ;;  %v932_v61 = vpop.permute.xlu0 %931  ;;  %2770 = vmatmul.mubr.bf16.gmra.mrb[4].mxu1 %v4314_v54  ;;  %v3022_v54 = vld [vmem:[%s5293_s2 + $0x18] sm:$0xff] }
 0x14a   : > { %2889 = vmatprep.subr.bf16.mxu0 %v2555_v59  ;;  %v2507_v62 = vld [vmem:[#allocation2 + $0x108] sm:$0xff]  ;;  %v2506_v63 = vld [vmem:[#allocation2 + $0x100] sm:$0xff]  ;;  %936 = vst.msk [vmem:[#allocation2 + $0x110] sm:$0xff] %vm758_vm2, %v932_v61  ;;  %1019 = vrot.lane.b32.xlu1 %v4268_v56, %s4361_s7  ;;  %s4387_s7 = smov 92  }
 0x14b   : > { %2890 = vmatpush1.bf16.msra.mxu0 %v2554_v60  ;;  %468 = vrot.lane.b32.xlu0 %v4269_v57, %s4365_s11  ;;  %v4296_v56 = vld [vmem:[%s4431_s21] sm:$0xff]  }
 0x14c   : > { %2800 = vmatprep.subr.bf16.mxu1 %v2507_v62  ;;  %v1747_v2 = vpop.permute.xlu1 %1746 }
 0x14d   : > { %2801 = vmatpush1.bf16.msra.mxu1 %v2506_v63  ;;  %1751 = vst.msk [vmem:[#allocation2 + $0x290] sm:$0xff] %vm1309_vm3, %v1747_v2  ;;  %v1483_v3 = vpop.permute.xlu0 %1482  ;;  %v4297_v63 = vld [vmem:[%s4431_s21 + $0x30] sm:$0xff]  }
 0x14e   : > { %1487 = vst.msk [vmem:[#allocation2 + $0x110] sm:$0xff] %vm1309_vm3, %v1483_v3  ;;  %2146 = vrot.lane.b32.xlu1 %v4270_v0, %s4370_s16  ;;  %v4298_v0 = vld [vmem:[%s4431_s21 + $0x10] sm:$0xff]  }
 0x14f   : > { %1570 = vrot.lane.b32.xlu0 %v4271_v1, %s4374_s22  ;;  %v4317_v3 = vld [vmem:[%s5292_s1 + $0x74] ss:$28 sps:$4 sm:$0xff]  }
 0x150   : > { %v2339_v6 = vpop.permute.xlu1 %2338  ;;  %2779 = vmatprep.mubr.bf16.mxu1 %v4317_v3 }
 0x151   : > { %2344 = vst.msk [vmem:[#allocation2 + $0x290] sm:$0xff] %vm1860_vm4, %v2339_v6  ;;  %v2051_v7 = vpop.permute.xlu0 %2050 }
 0x152   : > { %2345 = vst.msk [vmem:[#allocation2 + $0x298] sm:$0xff] %vm1862_vm1, %v2339_v6  ;;  %2057 = vst.msk [vmem:[#allocation2 + $0x118] sm:$0xff] %vm1862_vm1, %v2051_v7  ;;  %1039 = vrot.lane.b32.xlu1 %v4272_v4, %s4369_s15  ;;  %v4319_v4 = vld [vmem:[%s5292_s1 + $0x70] ss:$28 sps:$4 sm:$0xff]  }
 0x153   : > { %2056 = vst.msk [vmem:[#allocation2 + $0x110] sm:$0xff] %vm1860_vm4, %v2051_v7  ;;  %488 = vrot.lane.b32.xlu0 %v4273_v5, %s4365_s11  ;;  %v4299_v5 = vld [vmem:[%s4431_s21 + $0x8] sm:$0xff]   ;;  %2780 = vmatmul.mubr.bf16.gmra.mrb[8].mxu1 %v4319_v4 }
 0x154   : > { %v665_v10 = vpop.permute.xlu1 %664  ;;  %v4300_v6 = vld [vmem:[%s4431_s21 + $0x28] sm:$0xff]  }
 0x155   : > { %670 = vst.msk [vmem:[#allocation2 + $0x2a0] sm:$0xff] %vm216_vm0, %v665_v10  ;;  %v401_v11 = vpop.permute.xlu0 %400  ;;  %v4320_v10 = vld [vmem:[%s5292_s1 + $0xac] ss:$28 sps:$4 sm:$0xff]  }
 0x156   : > { %406 = vst.msk [vmem:[#allocation2 + $0x120] sm:$0xff] %vm216_vm0, %v401_v11  ;;  %2168 = vrot.lane.b32.xlu1 %v4277_v8, %s4378_s30  ;;  %v4302_v11 = vld [vmem:[%s4431_s21 + $0x38] sm:$0xff]   ;;  %2789 = vmatprep.mubr.bf16.mxu1 %v4320_v10 }
 0x157   : > { %1590 = vrot.lane.b32.xlu0 %v4278_v9, %s4374_s22  ;;  %v4301_v9 = vld [vmem:[%s4431_s21 + $0x18] sm:$0xff]  }
 0x158   : > { %v1216_v14 = vpop.permute.xlu1 %1215  ;;  %v2556_v16 = vld [vmem:[#allocation2 + $0x290] sm:$0xff] }
 0x159   : > { %v2557_v15 = vld [vmem:[#allocation2 + $0x298] sm:$0xff]  ;;  %1221 = vst.msk [vmem:[#allocation2 + $0x2a0] sm:$0xff] %vm758_vm2, %v1216_v14  ;;  %v952_v17 = vpop.permute.xlu0 %951 }
 0x15a   : > { %2891 = vmatprep.subr.bf16.mxu0 %v2557_v15  ;;  %v2509_v18 = vld [vmem:[#allocation2 + $0x118] sm:$0xff]  ;;  %v2508_v19 = vld [vmem:[#allocation2 + $0x110] sm:$0xff]  ;;  %957 = vst.msk [vmem:[#allocation2 + $0x120] sm:$0xff] %vm758_vm2, %v952_v17  ;;  %1041 = vrot.lane.b32.xlu1 %v4279_v12, %s4369_s15  ;;  %v4303_v15 = vld [vmem:[%s4431_s21 + $0x28] sm:$0xff]  }
 0x15b   : > { %2892 = vmatpush1.bf16.msra.mxu0 %v2556_v16  ;;  %490 = vrot.lane.b32.xlu0 %v4280_v13, %s4365_s11  ;;  %v4324_v13 = vld [vmem:[%s5292_s1 + $0xa8] ss:$28 sps:$4 sm:$0xff]   ;;  %s4388_s11 = smov 56  }
 0x15c   : > { %2802 = vmatprep.subr.bf16.mxu1 %v2509_v18  ;;  %v1767_v22 = vpop.permute.xlu1 %1766  ;;  %v4304_v16 = vld [vmem:[%s4431_s21 + $0x8] sm:$0xff]   ;;  %2790 = vmatmul.mubr.bf16.gmra.mrb[12].mxu1 %v4324_v13 }
 0x15d   : > { %2803 = vmatpush1.bf16.msra.mxu1 %v2508_v19  ;;  %1772 = vst.msk [vmem:[#allocation2 + $0x2a0] sm:$0xff] %vm1309_vm3, %v1767_v22  ;;  %v1503_v23 = vpop.permute.xlu0 %1502 }
 0x15e   : > { %1508 = vst.msk [vmem:[#allocation2 + $0x120] sm:$0xff] %vm1309_vm3, %v1503_v23  ;;  %2170 = vrot.lane.b32.xlu1 %v4281_v20, %s4378_s30  ;;  %v4305_v23 = vld [vmem:[%s4431_s21 + $0x38] sm:$0xff]  }
 0x15f   : > { %1592 = vrot.lane.b32.xlu0 %v4282_v21, %s4374_s22 }
 0x160   : > { %v2361_v26 = vpop.permute.xlu1 %2360 }
 0x161   : > { %2366 = vst.msk [vmem:[#allocation2 + $0x2a0] sm:$0xff] %vm1860_vm4, %v2361_v26  ;;  %v2073_v27 = vpop.permute.xlu0 %2072 }
 0x162   : > { %2367 = vst.msk [vmem:[#allocation2 + $0x2a8] sm:$0xff] %vm1862_vm1, %v2361_v26  ;;  %2079 = vst.msk [vmem:[#allocation2 + $0x128] sm:$0xff] %vm1862_vm1, %v2073_v27  ;;  %1061 = vrot.lane.b32.xlu1 %v4283_v24, %s4369_s15  ;;  %v4306_v24 = vld [vmem:[%s4431_s21 + $0x18] sm:$0xff]  }
 0x163   : > { %2078 = vst.msk [vmem:[#allocation2 + $0x120] sm:$0xff] %vm1860_vm4, %v2073_v27  ;;  %510 = vrot.lane.b32.xlu0 %v4284_v25, %s4372_s19  ;;  %v4328_v25 = vld [vmem:[%s5292_s1 + $0xc] ss:$28 sps:$4 sm:$0xff]   ;;  %v4385_v27 = vmov 0  }
 0x164   : > { %v667_v30 = vpop.permute.xlu1 %666  ;;  %4022 = vset.pattern.permute.xlu0 %v4385_v27  ;;  %2832 = vmatprep.mubr.bf16.mxu1 %v4328_v25 }
 0x165   : > { %671 = vst.msk [vmem:[#allocation2 + $0x2b0] sm:$0xff] %vm216_vm0, %v667_v30  ;;  %v403_v31 = vpop.permute.xlu0 %402  ;;  %4023 = vset.pattern.permute.xlu1 %v4385_v27 }
 0x166   : > { %407 = vst.msk [vmem:[#allocation2 + $0x130] sm:$0xff] %vm216_vm0, %v403_v31  ;;  %2192 = vrot.lane.b32.xlu1 %v4285_v28, %s4378_s30 }
 0x167   : > { %1612 = vrot.lane.b32.xlu0 %v4286_v29, %s4380_s9 }
 0x168   : > { %v1218_v34 = vpop.permute.xlu1 %1217  ;;  %v2558_v36 = vld [vmem:[#allocation2 + $0x2a0] sm:$0xff] }
 0x169   : > { %v2559_v35 = vld [vmem:[#allocation2 + $0x2a8] sm:$0xff]  ;;  %1222 = vst.msk [vmem:[#allocation2 + $0x2b0] sm:$0xff] %vm758_vm2, %v1218_v34  ;;  %v954_v37 = vpop.permute.xlu0 %953 }
 0x16a   : > { %2893 = vmatprep.subr.bf16.mxu0 %v2559_v35  ;;  %v2511_v38 = vld [vmem:[#allocation2 + $0x128] sm:$0xff]  ;;  %v2510_v39 = vld [vmem:[#allocation2 + $0x120] sm:$0xff]  ;;  %958 = vst.msk [vmem:[#allocation2 + $0x130] sm:$0xff] %vm758_vm2, %v954_v37  ;;  %1063 = vrot.lane.b32.xlu1 %v4287_v32, %s4369_s15 }
 0x16b   : > { %2894 = vmatpush1.bf16.msra.mxu0 %v2558_v36  ;;  %512 = vrot.lane.b32.xlu0 %v4288_v33, %s4372_s19 }
 0x16c   : > { %2804 = vmatprep.subr.bf16.mxu1 %v2511_v38  ;;  %v1769_v43 = vpop.permute.xlu1 %1768 }
 0x16d   : > { %2805 = vmatpush1.bf16.msra.mxu1 %v2510_v39  ;;  %1773 = vst.msk [vmem:[#allocation2 + $0x2b0] sm:$0xff] %vm1309_vm3, %v1769_v43  ;;  %v1505_v44 = vpop.permute.xlu0 %1504 }
 0x16e   : > { %1509 = vst.msk [vmem:[#allocation2 + $0x130] sm:$0xff] %vm1309_vm3, %v1505_v44  ;;  %2194 = vrot.lane.b32.xlu1 %v4289_v40, %s4378_s30 }
 0x16f   : > { %1614 = vrot.lane.b32.xlu0 %v4290_v41, %s4380_s9 }
 0x170   : > { %v2363_v47 = vpop.permute.xlu1 %2362 }
 0x171   : > { %2368 = vst.msk [vmem:[#allocation2 + $0x2b0] sm:$0xff] %vm1860_vm4, %v2363_v47  ;;  %v2075_v48 = vpop.permute.xlu0 %2074 }
 0x172   : > { %2369 = vst.msk [vmem:[#allocation2 + $0x2b8] sm:$0xff] %vm1862_vm1, %v2363_v47  ;;  %2081 = vst.msk [vmem:[#allocation2 + $0x138] sm:$0xff] %vm1862_vm1, %v2075_v48  ;;  %730 = vrot.lane.b32.xlu1 %v4291_v45, %s4384_s12  ;;  %v3019_v45 = vld [vmem:[%s5293_s2] sm:$0xff] }
 0x173   : > { %2080 = vst.msk [vmem:[#allocation2 + $0x130] sm:$0xff] %vm1860_vm4, %v2075_v48  ;;  %532 = vrot.lane.b32.xlu0 %v4292_v46, %s4359_s5  ;;  %v3020_v46 = vld [vmem:[%s5293_s2 + $0x8] sm:$0xff] }
 0x174   : > { %v687_v51 = vpop.permute.xlu1 %686 }
 0x175   : > { %692 = vst.msk [vmem:[#allocation2 + $0x2c0] sm:$0xff] %vm216_vm0, %v687_v51  ;;  %v423_v52 = vpop.permute.xlu0 %422 }
 0x176   : > { %428 = vst.msk [vmem:[#allocation2 + $0x140] sm:$0xff] %vm216_vm0, %v423_v52  ;;  %1281 = vrot.lane.b32.xlu1 %v4293_v49, %s4383_s10 }
 0x177   : > { %1083 = vrot.lane.b32.xlu0 %v4294_v50, %s4382_s6  ;;  %v3021_v50 = vld [vmem:[%s5293_s2 + $0x10] sm:$0xff] }
 0x178   : > { %v1238_v57 = vpop.permute.xlu1 %1237  ;;  %v2560_v59 = vld [vmem:[#allocation2 + $0x2b0] sm:$0xff] }
 0x179   : > { %v2561_v58 = vld [vmem:[#allocation2 + $0x2b8] sm:$0xff]  ;;  %1243 = vst.msk [vmem:[#allocation2 + $0x2c0] sm:$0xff] %vm758_vm2, %v1238_v57  ;;  %v974_v60 = vpop.permute.xlu0 %973 }
 0x17a   : > { %2895 = vmatprep.subr.bf16.mxu0 %v2561_v58  ;;  %v2513_v61 = vld [vmem:[#allocation2 + $0x138] sm:$0xff]  ;;  %v2512_v62 = vld [vmem:[#allocation2 + $0x130] sm:$0xff]  ;;  %979 = vst.msk [vmem:[#allocation2 + $0x140] sm:$0xff] %vm758_vm2, %v974_v60  ;;  %1832 = vrot.lane.b32.xlu1 %v4295_v55, %s4373_s20  ;;  %v3024_v58 = vld [vmem:[%s5293_s2 + $0x28] sm:$0xff] }
 0x17b   : > { %2896 = vmatpush1.bf16.msra.mxu0 %v2560_v59  ;;  %1634 = vrot.lane.b32.xlu0 %v4296_v56, %s4362_s8  ;;  %v3023_v56 = vld [vmem:[%s5293_s2 + $0x20] sm:$0xff]  ;;  %v3025_v60 = vld [vmem:[%s5293_s2 + $0x30] sm:$0xff] }
 0x17c   : > { %2806 = vmatprep.subr.bf16.mxu1 %v2513_v61  ;;  %v1789_v1 = vpop.permute.xlu1 %1788 }
 0x17d   : > { %2807 = vmatpush1.bf16.msra.mxu1 %v2512_v62  ;;  %1794 = vst.msk [vmem:[#allocation2 + $0x2c0] sm:$0xff] %vm1309_vm3, %v1789_v1  ;;  %v1525_v2 = vpop.permute.xlu0 %1524  ;;  %v3026_v62 = vld [vmem:[%s5293_s2 + $0x38] sm:$0xff] }
 0x17e   : > { %1530 = vst.msk [vmem:[#allocation2 + $0x140] sm:$0xff] %vm1309_vm3, %v1525_v2  ;;  %2432 = vrot.lane.b32.xlu1 %v4297_v63, %s4371_s3 }
 0x17f   : > { %2216 = vrot.lane.b32.xlu0 %v4298_v0, %s4377_s28 }
 0x180   : > { %v2385_v7 = vpop.permute.xlu1 %2384 }
 0x181   : > { %2390 = vst.msk [vmem:[#allocation2 + $0x2c0] sm:$0xff] %vm1860_vm4, %v2385_v7  ;;  %v2097_v8 = vpop.permute.xlu0 %2096 }
 0x182   : > { %2391 = vst.msk [vmem:[#allocation2 + $0x2c8] sm:$0xff] %vm1862_vm1, %v2385_v7  ;;  %2103 = vst.msk [vmem:[#allocation2 + $0x148] sm:$0xff] %vm1862_vm1, %v2097_v8  ;;  %732 = vrot.lane.b32.xlu1 %v4299_v5, %s4384_s12  ;;  %v4307_v7 = vld [vmem:[%s5292_s1 + $0x10] ss:$28 sps:$4 sm:$0xff]   ;;  %s3918_s12 = sshll.u32 %s5297_s18, 5 }
 0x183   : > { %2102 = vst.msk [vmem:[#allocation2 + $0x140] sm:$0xff] %vm1860_vm4, %v2097_v8  ;;  %534 = vrot.lane.b32.xlu0 %v4300_v6, %s4359_s5  ;;  %v4310_v8 = vld [vmem:[%s5292_s1 + $0x4c] ss:$28 sps:$4 sm:$0xff]   ;;  %s5258_s16 = scalar_lea.vmem %s5295_s4, %s3918_s12 }
 0x184   : > { %v689_v12 = vpop.permute.xlu1 %688 }
 0x185   : > { %693 = vst.msk [vmem:[#allocation2 + $0x2d0] sm:$0xff] %vm216_vm0, %v689_v12  ;;  %v425_v14 = vpop.permute.xlu0 %424  ;;  %v2456_v12 = vld [vmem:[%s5292_s1 + $0x64] sm:$0xff] }
 0x186   : > { %429 = vst.msk [vmem:[#allocation2 + $0x150] sm:$0xff] %vm216_vm0, %v425_v14  ;;  %1283 = vrot.lane.b32.xlu1 %v4301_v9, %s4383_s10 }
 0x187   : > { %1085 = vrot.lane.b32.xlu0 %v4302_v11, %s4382_s6  ;;  %v2452_v11 = vld [vmem:[%s5292_s1 + $0x48] sm:$0xff] }
 0x188   : > { %v1240_v17 = vpop.permute.xlu1 %1239  ;;  %v2562_v19 = vld [vmem:[#allocation2 + $0x2c0] sm:$0xff] }
 0x189   : > { %v2563_v18 = vld [vmem:[#allocation2 + $0x2c8] sm:$0xff]  ;;  %1244 = vst.msk [vmem:[#allocation2 + $0x2d0] sm:$0xff] %vm758_vm2, %v1240_v17  ;;  %v976_v20 = vpop.permute.xlu0 %975 }
 0x18a   : > { %2897 = vmatprep.subr.bf16.mxu0 %v2563_v18  ;;  %v2515_v21 = vld [vmem:[#allocation2 + $0x148] sm:$0xff]  ;;  %v2514_v22 = vld [vmem:[#allocation2 + $0x140] sm:$0xff]  ;;  %980 = vst.msk [vmem:[#allocation2 + $0x150] sm:$0xff] %vm758_vm2, %v976_v20  ;;  %1834 = vrot.lane.b32.xlu1 %v4303_v15, %s4373_s20 }
 0x18b   : > { %2898 = vmatpush1.bf16.msra.mxu0 %v2562_v19  ;;  %1636 = vrot.lane.b32.xlu0 %v4304_v16, %s4362_s8  ;;  %v3886_v16 = vcombine.low %v2452_v11, %v2456_v12  ;;  %v4315_v18 = vld [vmem:[%s5292_s1 + $0x84] ss:$28 sps:$4 sm:$0xff]   ;;  %v4329_v11 = vld [vmem:[%s5292_s1 + $0x18] ss:$28 sps:$4 sm:$0xff]  }
 0x18c   : > { %2808 = vmatprep.subr.bf16.mxu1 %v2515_v21  ;;  %v1791_v26 = vpop.permute.xlu1 %1790  ;;  %v2460_v21 = vld [vmem:[%s5292_s1 + $0x80] sm:$0xff] }
 0x18d   : > { %2809 = vmatpush1.bf16.msra.mxu1 %v2514_v22  ;;  %1795 = vst.msk [vmem:[#allocation2 + $0x2d0] sm:$0xff] %vm1309_vm3, %v1791_v26  ;;  %v1527_v28 = vpop.permute.xlu0 %1526  ;;  %v2464_v22 = vld [vmem:[%s5292_s1 + $0x9c] sm:$0xff]  ;;  %v4326_v12 = vld [vmem:[%s5292_s1 + $0x8] ss:$28 sps:$4 sm:$0xff]  }
 0x18e   : > { %1531 = vst.msk [vmem:[#allocation2 + $0x150] sm:$0xff] %vm1309_vm3, %v1527_v28  ;;  %2434 = vrot.lane.b32.xlu1 %v4305_v23, %s4371_s3  ;;  %v3893_v26 = vcombine.low %v2460_v21, %v2464_v22  ;;  %v4340_v21 = vld [vmem:[%s5292_s1 + $0xb0] ss:$28 sps:$4 sm:$0xff]  }
 0x18f   : > { %2218 = vrot.lane.b32.xlu0 %v4306_v24, %s4377_s28 }
 0x190   : > { %v2387_v29 = vpop.permute.xlu1 %2386 }
 0x191   : > { %2392 = vst.msk [vmem:[#allocation2 + $0x2d0] sm:$0xff] %vm1860_vm4, %v2387_v29  ;;  %v2099_v30 = vpop.permute.xlu0 %2098 }
 0x192   : > { %2393 = vst.msk [vmem:[#allocation2 + $0x2d8] sm:$0xff] %vm1862_vm1, %v2387_v29  ;;  %2105 = vst.msk [vmem:[#allocation2 + $0x158] sm:$0xff] %vm1862_vm1, %v2099_v30  ;;  %3035 = vperm.xlu1 %4023, %v3020_v46   ;;  %v4322_v29 = vld [vmem:[%s5292_s1 + $0xbc] ss:$28 sps:$4 sm:$0xff]  }
 0x193   : > { %2104 = vst.msk [vmem:[#allocation2 + $0x150] sm:$0xff] %vm1860_vm4, %v2099_v30  ;;  %3030 = vperm.xlu0 %4022, %v3019_v45  }
 0x194   : > { %v709_v31 = vpop.permute.xlu1 %708 }
 0x195   : > { %714 = vst.msk [vmem:[#allocation2 + $0x2e0] sm:$0xff] %vm216_vm0, %v709_v31  ;;  %v445_v32 = vpop.permute.xlu0 %444 }
 0x196   : > { %450 = vst.msk [vmem:[#allocation2 + $0x160] sm:$0xff] %vm216_vm0, %v445_v32  ;;  %3040 = vperm.xlu1 %4023, %v3021_v50  }
 0x197   : > { %3045 = vperm.xlu0 %4022, %v3022_v54  }
 0x198   : > { %v1260_v33 = vpop.permute.xlu1 %1259  ;;  %v2564_v35 = vld [vmem:[#allocation2 + $0x2d0] sm:$0xff] }
 0x199   : > { %v2565_v34 = vld [vmem:[#allocation2 + $0x2d8] sm:$0xff]  ;;  %1265 = vst.msk [vmem:[#allocation2 + $0x2e0] sm:$0xff] %vm758_vm2, %v1260_v33  ;;  %v996_v36 = vpop.permute.xlu0 %995 }
 0x19a   : > { %2899 = vmatprep.subr.bf16.mxu0 %v2565_v34  ;;  %v2517_v37 = vld [vmem:[#allocation2 + $0x158] sm:$0xff]  ;;  %v2516_v38 = vld [vmem:[#allocation2 + $0x150] sm:$0xff]  ;;  %1001 = vst.msk [vmem:[#allocation2 + $0x160] sm:$0xff] %vm758_vm2, %v996_v36  ;;  %3050 = vperm.xlu1 %4023, %v3023_v56  }
 0x19b   : > { %2900 = vmatpush1.bf16.msra.mxu0 %v2564_v35  ;;  %2810 = vmatprep.subr.bf16.mxu1 %v2517_v37  ;;  %v4325_v35 = vld [vmem:[%s5292_s1 + $0xb8] ss:$28 sps:$4 sm:$0xff]  }
 0x19c   : > { %2811 = vmatpush1.bf16.msra.mxu1 %v2516_v38  ;;  %v1811_v39 = vpop.permute.xlu1 %1810  ;;  %3055 = vperm.xlu0 %4022, %v3024_v58  }
 0x19d   : > { %1816 = vst.msk [vmem:[#allocation2 + $0x2e0] sm:$0xff] %vm1309_vm3, %v1811_v39  ;;  %v1547_v40 = vpop.permute.xlu0 %1546 }
 0x19e   : > { %1552 = vst.msk [vmem:[#allocation2 + $0x160] sm:$0xff] %vm1309_vm3, %v1547_v40  ;;  %3060 = vperm.xlu1 %4023, %v3025_v60  }
 0x1a0   : > { %v2409_v41 = vpop.permute.xlu1 %2408  ;;  %3065 = vperm.xlu0 %4022, %v3026_v62  }
 0x1a1   : > { %2414 = vst.msk [vmem:[#allocation2 + $0x2e0] sm:$0xff] %vm1860_vm4, %v2409_v41  ;;  %v2121_v42 = vpop.permute.xlu0 %2120 }
 0x1a2   : > { %2415 = vst.msk [vmem:[#allocation2 + $0x2e8] sm:$0xff] %vm1862_vm1, %v2409_v41  ;;  %2127 = vst.msk [vmem:[#allocation2 + $0x168] sm:$0xff] %vm1862_vm1, %v2121_v42 }
 0x1a3   : > { %2126 = vst.msk [vmem:[#allocation2 + $0x160] sm:$0xff] %vm1860_vm4, %v2121_v42 }
 0x1a4   : > { %v711_v43 = vpop.permute.xlu1 %710 }
 0x1a5   : > { %715 = vst.msk [vmem:[#allocation2 + $0x2f0] sm:$0xff] %vm216_vm0, %v711_v43  ;;  %v447_v44 = vpop.permute.xlu0 %446 }
 0x1a6   : > { %451 = vst.msk [vmem:[#allocation2 + $0x170] sm:$0xff] %vm216_vm0, %v447_v44 }
 0x1a8   : > { %v1262_v47 = vpop.permute.xlu1 %1261  ;;  %v2566_v49 = vld [vmem:[#allocation2 + $0x2e0] sm:$0xff] }
 0x1a9   : > { %v2567_v48 = vld [vmem:[#allocation2 + $0x2e8] sm:$0xff]  ;;  %1266 = vst.msk [vmem:[#allocation2 + $0x2f0] sm:$0xff] %vm758_vm2, %v1262_v47  ;;  %v998_v51 = vpop.permute.xlu0 %997 }
 0x1aa   : > { %2901 = vmatprep.subr.bf16.mxu0 %v2567_v48  ;;  %v2519_v52 = vld [vmem:[#allocation2 + $0x168] sm:$0xff]  ;;  %v2518_v53 = vld [vmem:[#allocation2 + $0x160] sm:$0xff]  ;;  %1002 = vst.msk [vmem:[#allocation2 + $0x170] sm:$0xff] %vm758_vm2, %v998_v51 }
 0x1ab   : > { %2902 = vmatpush1.bf16.msra.mxu0 %v2566_v49  ;;  %2812 = vmatprep.subr.bf16.mxu1 %v2519_v52 }
 0x1ac   : > { %2813 = vmatpush1.bf16.msra.mxu1 %v2518_v53  ;;  %v1813_v55 = vpop.permute.xlu1 %1812 }
 0x1ad   : > { %1817 = vst.msk [vmem:[#allocation2 + $0x2f0] sm:$0xff] %vm1309_vm3, %v1813_v55  ;;  %v1549_v57 = vpop.permute.xlu0 %1548 }
 0x1ae   : > { %1553 = vst.msk [vmem:[#allocation2 + $0x170] sm:$0xff] %vm1309_vm3, %v1549_v57 }
 0x1b0   : > { %v2411_v59 = vpop.permute.xlu1 %2410 }
 0x1b1   : > { %2416 = vst.msk [vmem:[#allocation2 + $0x2f0] sm:$0xff] %vm1860_vm4, %v2411_v59  ;;  %v2123_v61 = vpop.permute.xlu0 %2122 }
 0x1b2   : > { %2417 = vst.msk [vmem:[#allocation2 + $0x2f8] sm:$0xff] %vm1862_vm1, %v2411_v59  ;;  %2129 = vst.msk [vmem:[#allocation2 + $0x178] sm:$0xff] %vm1862_vm1, %v2123_v61 }
 0x1b3   : > { %2128 = vst.msk [vmem:[#allocation2 + $0x170] sm:$0xff] %vm1860_vm4, %v2123_v61 }
 0x1b4   : > { %v1018_v63 = vpop.permute.xlu1 %1017 }
 0x1b5   : > { %v467_v0 = vpop.permute.xlu0 %466 }
 0x1b6   : > { %472 = vst.msk [vmem:[#allocation2 + $0x180] sm:$0xff] %vm216_vm0, %v467_v0 }
 0x1b7   : > { %1023 = vst.msk [vmem:[#allocation2 + $0x180] sm:$0xff] %vm758_vm2, %v1018_v63 }
 0x1b8   : > { %v2145_v1 = vpop.permute.xlu1 %2144  ;;  %v2568_v3 = vld [vmem:[#allocation2 + $0x2f0] sm:$0xff] }
 0x1b9   : > { %v2569_v2 = vld [vmem:[#allocation2 + $0x2f8] sm:$0xff]  ;;  %2151 = vst.msk [vmem:[#allocation2 + $0x188] sm:$0xff] %vm1862_vm1, %v2145_v1  ;;  %v1569_v4 = vpop.permute.xlu0 %1568 }
 0x1ba   : > { %2903 = vmatprep.subr.bf16.mxu0 %v2569_v2  ;;  %v2521_v5 = vld [vmem:[#allocation2 + $0x178] sm:$0xff]  ;;  %v2520_v6 = vld [vmem:[#allocation2 + $0x170] sm:$0xff]  ;;  %1574 = vst.msk [vmem:[#allocation2 + $0x180] sm:$0xff] %vm1309_vm3, %v1569_v4 }
 0x1bb   : > { %2904 = vmatpush1.bf16.msra.mxu0 %v2568_v3  ;;  %2814 = vmatprep.subr.bf16.mxu1 %v2521_v5  ;;  %2150 = vst.msk [vmem:[#allocation2 + $0x180] sm:$0xff] %vm1860_vm4, %v2145_v1 }
 0x1bc   : > { %2815 = vmatpush1.bf16.msra.mxu1 %v2520_v6  ;;  %v1020_v9 = vpop.permute.xlu1 %1019 }
 0x1bd   : > { %v469_v10 = vpop.permute.xlu0 %468 }
 0x1be   : > { %2906 = vmatmul.mubr.bf16.vlgmr.msra.gmra.mrb[0].mxu0 %v4307_v7  ;;  %473 = vst.msk [vmem:[#allocation2 + $0x190] sm:$0xff] %vm216_vm0, %v469_v10 }
 0x1bf   : > { %2915 = vmatprep.mubr.bf16.mxu0 %v4310_v8  ;;  %1024 = vst.msk [vmem:[#allocation2 + $0x190] sm:$0xff] %vm758_vm2, %v1020_v9 }
 0x1c0   : > { %v2147_v13 = vpop.permute.xlu1 %2146  ;;  %v2523_v14 = vld [vmem:[#allocation2 + $0x188] sm:$0xff] }
 0x1c1   : > { %2153 = vst.msk [vmem:[#allocation2 + $0x198] sm:$0xff] %vm1862_vm1, %v2147_v13  ;;  %v1571_v15 = vpop.permute.xlu0 %1570  ;;  %2816 = vmatprep.subr.bf16.mxu1 %v2523_v14  ;;  %v4333_v14 = vld [vmem:[%s5292_s1 + $0x50] ss:$28 sps:$4 sm:$0xff]  }
 0x1c2   : > { %1575 = vst.msk [vmem:[#allocation2 + $0x190] sm:$0xff] %vm1309_vm3, %v1571_v15  ;;  %v2522_v17 = vld [vmem:[#allocation2 + $0x180] sm:$0xff] }
 0x1c3   : > { %2152 = vst.msk [vmem:[#allocation2 + $0x190] sm:$0xff] %vm1860_vm4, %v2147_v13  ;;  %2817 = vmatpush1.bf16.msra.mxu1 %v2522_v17  ;;  %v4330_v13 = vld [vmem:[%s5292_s1 + $0x44] ss:$28 sps:$4 sm:$0xff]  }
 0x1c4   : > { %v1040_v19 = vpop.permute.xlu1 %1039  ;;  %v4332_v15 = vld [vmem:[%s5292_s1 + $0x40] ss:$28 sps:$4 sm:$0xff]   ;;  %v4337_v17 = vld [vmem:[%s5292_s1 + $0x88] ss:$28 sps:$4 sm:$0xff]  }
 0x1c5   : > { %v489_v20 = vpop.permute.xlu0 %488 }
 0x1c6   : > { %2916 = vmatmul.mubr.bf16.gmra.mrb[4].mxu0 %v3886_v16  ;;  %494 = vst.msk [vmem:[#allocation2 + $0x1a0] sm:$0xff] %vm216_vm0, %v489_v20  ;;  %v4334_v16 = vld [vmem:[%s5292_s1 + $0x7c] ss:$28 sps:$4 sm:$0xff]  }
 0x1c7   : > { %2925 = vmatprep.mubr.bf16.mxu0 %v4315_v18  ;;  %1045 = vst.msk [vmem:[#allocation2 + $0x1a0] sm:$0xff] %vm758_vm2, %v1040_v19  ;;  %v4336_v18 = vld [vmem:[%s5292_s1 + $0x78] ss:$28 sps:$4 sm:$0xff]   ;;  %v4341_v20 = vld [vmem:[%s5292_s1 + $0xc0] ss:$28 sps:$4 sm:$0xff]  }
 0x1c8   : > { %v2169_v23 = vpop.permute.xlu1 %2168  ;;  %v2525_v24 = vld [vmem:[#allocation2 + $0x198] sm:$0xff]  ;;  %v4338_v19 = vld [vmem:[%s5292_s1 + $0xb4] ss:$28 sps:$4 sm:$0xff]  }
 0x1c9   : > { %2175 = vst.msk [vmem:[#allocation2 + $0x1a8] sm:$0xff] %vm1862_vm1, %v2169_v23  ;;  %v1591_v25 = vpop.permute.xlu0 %1590  ;;  %2818 = vmatprep.subr.bf16.mxu1 %v2525_v24 }
 0x1ca   : > { %1596 = vst.msk [vmem:[#allocation2 + $0x1a0] sm:$0xff] %vm1309_vm3, %v1591_v25  ;;  %v2524_v28 = vld [vmem:[#allocation2 + $0x190] sm:$0xff] }
 0x1cb   : > { %2174 = vst.msk [vmem:[#allocation2 + $0x1a0] sm:$0xff] %vm1860_vm4, %v2169_v23  ;;  %2819 = vmatpush1.bf16.msra.mxu1 %v2524_v28 }
 0x1cc   : > { %v1042_v30 = vpop.permute.xlu1 %1041 }
 0x1cd   : > { %v491_v31 = vpop.permute.xlu0 %490 }
 0x1ce   : > { %2926 = vmatmul.mubr.bf16.gmra.mrb[8].mxu0 %v3893_v26  ;;  %495 = vst.msk [vmem:[#allocation2 + $0x1b0] sm:$0xff] %vm216_vm0, %v491_v31  ;;  %v5183_v31 = vstv %s3027_s13 }
 0x1cf   : > { %2935 = vmatprep.mubr.bf16.mxu0 %v4322_v29  ;;  %1046 = vst.msk [vmem:[#allocation2 + $0x1b0] sm:$0xff] %vm758_vm2, %v1042_v30 }
 0x1d0   : > { %v2171_v32 = vpop.permute.xlu1 %2170  ;;  %v2527_v33 = vld [vmem:[#allocation2 + $0x1a8] sm:$0xff] }
 0x1d1   : > { %2177 = vst.msk [vmem:[#allocation2 + $0x1b8] sm:$0xff] %vm1862_vm1, %v2171_v32  ;;  %v1593_v34 = vpop.permute.xlu0 %1592  ;;  %2820 = vmatprep.subr.bf16.mxu1 %v2527_v33 }
 0x1d2   : > { %1597 = vst.msk [vmem:[#allocation2 + $0x1b0] sm:$0xff] %vm1309_vm3, %v1593_v34  ;;  %v2526_v36 = vld [vmem:[#allocation2 + $0x1a0] sm:$0xff] }
 0x1d3   : > { %2176 = vst.msk [vmem:[#allocation2 + $0x1b0] sm:$0xff] %vm1860_vm4, %v2171_v32  ;;  %2821 = vmatpush1.bf16.msra.mxu1 %v2526_v36 }
 0x1d4   : > { %v1062_v37 = vpop.permute.xlu1 %1061 }
 0x1d5   : > { %v511_v38 = vpop.permute.xlu0 %510 }
 0x1d6   : > { %2936 = vmatmul.mubr.bf16.gmra.mrb[12].mxu0 %v4325_v35  ;;  %516 = vst.msk [vmem:[#allocation2 + $0x1c0] sm:$0xff] %vm216_vm0, %v511_v38 }
 0x1d7   : > { %2978 = vmatprep.mubr.bf16.mxu0 %v4385_v27  ;;  %1067 = vst.msk [vmem:[#allocation2 + $0x1c0] sm:$0xff] %vm758_vm2, %v1062_v37 }
 0x1d8   : > { %v2193_v39 = vpop.permute.xlu1 %2192  ;;  %v2529_v40 = vld [vmem:[#allocation2 + $0x1b8] sm:$0xff] }
 0x1d9   : > { %2199 = vst.msk [vmem:[#allocation2 + $0x1c8] sm:$0xff] %vm1862_vm1, %v2193_v39  ;;  %v1613_v41 = vpop.permute.xlu0 %1612  ;;  %2822 = vmatprep.subr.bf16.mxu1 %v2529_v40 }
 0x1da   : > { %1618 = vst.msk [vmem:[#allocation2 + $0x1c0] sm:$0xff] %vm1309_vm3, %v1613_v41  ;;  %v2528_v42 = vld [vmem:[#allocation2 + $0x1b0] sm:$0xff] }
 0x1db   : > { %2198 = vst.msk [vmem:[#allocation2 + $0x1c0] sm:$0xff] %vm1860_vm4, %v2193_v39  ;;  %2823 = vmatpush1.bf16.msra.mxu1 %v2528_v42 }
 0x1dc   : > { %v1064_v43 = vpop.permute.xlu1 %1063 }
 0x1dd   : > { %v513_v44 = vpop.permute.xlu0 %512 }
 0x1de   : > { %517 = vst.msk [vmem:[#allocation2 + $0x1d0] sm:$0xff] %vm216_vm0, %v513_v44 }
 0x1df   : > { %1068 = vst.msk [vmem:[#allocation2 + $0x1d0] sm:$0xff] %vm758_vm2, %v1064_v43 }
 0x1e0   : > { %v2195_v45 = vpop.permute.xlu1 %2194  ;;  %v2531_v46 = vld [vmem:[#allocation2 + $0x1c8] sm:$0xff] }
 0x1e1   : > { %2201 = vst.msk [vmem:[#allocation2 + $0x1d8] sm:$0xff] %vm1862_vm1, %v2195_v45  ;;  %v1615_v47 = vpop.permute.xlu0 %1614  ;;  %2824 = vmatprep.subr.bf16.mxu1 %v2531_v46 }
 0x1e2   : > { %1619 = vst.msk [vmem:[#allocation2 + $0x1d0] sm:$0xff] %vm1309_vm3, %v1615_v47  ;;  %v2530_v48 = vld [vmem:[#allocation2 + $0x1c0] sm:$0xff] }
 0x1e3   : > { %2200 = vst.msk [vmem:[#allocation2 + $0x1d0] sm:$0xff] %vm1860_vm4, %v2195_v45  ;;  %2825 = vmatpush1.bf16.msra.mxu1 %v2530_v48 }
 0x1e4   : > { %v731_v49 = vpop.permute.xlu1 %730 }
 0x1e5   : > { %736 = vst.msk [vmem:[#allocation2 + $0x300] sm:$0xff] %vm216_vm0, %v731_v49  ;;  %v533_v50 = vpop.permute.xlu0 %532 }
 0x1e6   : > { %538 = vst.msk [vmem:[#allocation2 + $0x1e0] sm:$0xff] %vm216_vm0, %v533_v50 }
 0x1e8   : > { %v1282_v51 = vpop.permute.xlu1 %1281  ;;  %v2533_v52 = vld [vmem:[#allocation2 + $0x1d8] sm:$0xff] }
 0x1e9   : > { %1287 = vst.msk [vmem:[#allocation2 + $0x300] sm:$0xff] %vm758_vm2, %v1282_v51  ;;  %v1084_v53 = vpop.permute.xlu0 %1083  ;;  %2826 = vmatprep.subr.bf16.mxu1 %v2533_v52 }
 0x1ea   : > { %1089 = vst.msk [vmem:[#allocation2 + $0x1e0] sm:$0xff] %vm758_vm2, %v1084_v53  ;;  %v2532_v54 = vld [vmem:[#allocation2 + $0x1d0] sm:$0xff] }
 0x1eb   : > { %2827 = vmatpush1.bf16.msra.mxu1 %v2532_v54 }
 0x1ec   : > { %v1833_v55 = vpop.permute.xlu1 %1832 }
 0x1ed   : > { %1838 = vst.msk [vmem:[#allocation2 + $0x300] sm:$0xff] %vm1309_vm3, %v1833_v55  ;;  %v1635_v56 = vpop.permute.xlu0 %1634 }
 0x1ee   : > { %1640 = vst.msk [vmem:[#allocation2 + $0x1e0] sm:$0xff] %vm1309_vm3, %v1635_v56 }
 0x1f0   : > { %v2433_v57 = vpop.permute.xlu1 %2432 }
 0x1f1   : > { %2438 = vst.msk [vmem:[#allocation2 + $0x300] sm:$0xff] %vm1860_vm4, %v2433_v57  ;;  %v2217_v58 = vpop.permute.xlu0 %2216 }
 0x1f2   : > { %2439 = vst.msk [vmem:[#allocation2 + $0x308] sm:$0xff] %vm1862_vm1, %v2433_v57  ;;  %2223 = vst.msk [vmem:[#allocation2 + $0x1e8] sm:$0xff] %vm1862_vm1, %v2217_v58 }
 0x1f3   : > { %2222 = vst.msk [vmem:[#allocation2 + $0x1e0] sm:$0xff] %vm1860_vm4, %v2217_v58 }
 0x1f4   : > { %v733_v59 = vpop.permute.xlu1 %732 }
 0x1f5   : > { %737 = vst.msk [vmem:[#allocation2 + $0x310] sm:$0xff] %vm216_vm0, %v733_v59  ;;  %v535_v60 = vpop.permute.xlu0 %534 }
 0x1f6   : > { %539 = vst.msk [vmem:[#allocation2 + $0x1f0] sm:$0xff] %vm216_vm0, %v535_v60 }
 0x1f8   : > { %v1284_v61 = vpop.permute.xlu1 %1283  ;;  %v2570_v63 = vld [vmem:[#allocation2 + $0x300] sm:$0xff] }
 0x1f9   : > { %v2571_v62 = vld [vmem:[#allocation2 + $0x308] sm:$0xff]  ;;  %1288 = vst.msk [vmem:[#allocation2 + $0x310] sm:$0xff] %vm758_vm2, %v1284_v61  ;;  %v1086_v0 = vpop.permute.xlu0 %1085 }
 0x1fa   : > { %2946 = vmatprep.subr.bf16.mxu0 %v2571_v62  ;;  %v2535_v1 = vld [vmem:[#allocation2 + $0x1e8] sm:$0xff]  ;;  %v2534_v2 = vld [vmem:[#allocation2 + $0x1e0] sm:$0xff]  ;;  %1090 = vst.msk [vmem:[#allocation2 + $0x1f0] sm:$0xff] %vm758_vm2, %v1086_v0 }
 0x1fb   : > { %2947 = vmatpush1.bf16.msra.mxu0 %v2570_v63  ;;  %2828 = vmatprep.subr.bf16.mxu1 %v2535_v1 }
 0x1fc   : > { %2829 = vmatpush1.bf16.msra.mxu1 %v2534_v2  ;;  %v1835_v3 = vpop.permute.xlu1 %1834 }
 0x1fd   : > { %1839 = vst.msk [vmem:[#allocation2 + $0x310] sm:$0xff] %vm1309_vm3, %v1835_v3  ;;  %v1637_v4 = vpop.permute.xlu0 %1636 }
 0x1fe   : > { %1641 = vst.msk [vmem:[#allocation2 + $0x1f0] sm:$0xff] %vm1309_vm3, %v1637_v4 }
 0x200   : > { %v2435_v5 = vpop.permute.xlu1 %2434 }
 0x201   : > { %2440 = vst.msk [vmem:[#allocation2 + $0x310] sm:$0xff] %vm1860_vm4, %v2435_v5  ;;  %v2219_v6 = vpop.permute.xlu0 %2218 }
 0x202   : > { %2441 = vst.msk [vmem:[#allocation2 + $0x318] sm:$0xff] %vm1862_vm1, %v2435_v5  ;;  %2225 = vst.msk [vmem:[#allocation2 + $0x1f8] sm:$0xff] %vm1862_vm1, %v2219_v6 }
 0x203   : > { %2224 = vst.msk [vmem:[#allocation2 + $0x1f0] sm:$0xff] %vm1860_vm4, %v2219_v6 }
 0x208   : > { %v2572_v8 = vld [vmem:[#allocation2 + $0x310] sm:$0xff] }
 0x209   : > { %v2573_v7 = vld [vmem:[#allocation2 + $0x318] sm:$0xff] }
 0x20a   : > { %v2537_v9 = vld [vmem:[#allocation2 + $0x1f8] sm:$0xff]  ;;  %2948 = vmatprep.subr.bf16.mxu0 %v2573_v7  ;;  %v2536_v10 = vld [vmem:[#allocation2 + $0x1f0] sm:$0xff] }
 0x20b   : > { %2830 = vmatprep.subr.bf16.mxu1 %v2537_v9  ;;  %2949 = vmatpush1.bf16.msra.mxu0 %v2572_v8 }
 0x20c   : > { %2831 = vmatpush1.bf16.msra.mxu1 %v2536_v10 }
 0x20e   : > { %3903 = vmatmul.mubr.msk.bf16.vlgmr.msra.gmra.mrb[0].mxu0 %vm2714_vm5, %v4329_v11 }
 0x20f   : > { %2833 = vmatmul.mubr.bf16.vlgmr.msra.gmra.mrb[0].mxu1 %v4326_v12  ;;  %2988 = vmatprep.mubr.bf16.mxu0 %v4385_v27 }
 0x210   : > { %2842 = vmatprep.mubr.bf16.mxu1 %v4330_v13 }
 0x211   : > { %v3036_v24 = vpop.permute.xlu1 %3035 }
 0x212   : > { %v3031_v22 = vpop.permute.xlu0 %3030 }
 0x215   : > { %v3041_v46 = vpop.permute.xlu1 %3040 }
 0x216   : > { %3904 = vmatmul.mubr.msk.bf16.gmra.mrb[4].mxu0 %vm2714_vm5, %v4333_v14  ;;  %v3046_v2 = vpop.permute.xlu0 %3045 }
 0x217   : > { %2843 = vmatmul.mubr.bf16.gmra.mrb[4].mxu1 %v4332_v15  ;;  %2998 = vmatprep.mubr.bf16.mxu0 %v4385_v27 }
 0x218   : > { %2852 = vmatprep.mubr.bf16.mxu1 %v4334_v16 }
 0x219   : > { %v3051_v10 = vpop.permute.xlu1 %3050 }
 0x21e   : > { %3905 = vmatmul.mubr.msk.bf16.gmra.mrb[8].mxu0 %vm2714_vm5, %v4337_v17 }
 0x21f   : > { %2853 = vmatmul.mubr.bf16.gmra.mrb[8].mxu1 %v4336_v18  ;;  %3008 = vmatprep.mubr.bf16.mxu0 %v4385_v27 }
 0x220   : > { %2862 = vmatprep.mubr.bf16.mxu1 %v4338_v19 }
 0x226   : > { %3906 = vmatmul.mubr.msk.bf16.gmra.mrb[12].mxu0 %vm2714_vm5, %v4341_v20 }
 0x227   : > { %2863 = vmatmul.mubr.bf16.gmra.mrb[12].mxu1 %v4340_v21 }
 0x2e1   : > { %v2980_v23 = vpop.f32.mrb[0].mxu0 }
 0x2e2   : > { %v2834_v25 = vpop.f32.mrb[0].mxu1  ;;  %v2982_v26 = vpop.f32.mrb[1].mxu0 }
 0x2e3   : > { %v3927_v28 = vadd.f32 %v2980_v23, %v2834_v25  ;;  %v2836_v27 = vpop.f32.mrb[1].mxu1  ;;  %v2984_v29 = vpop.f32.mrb[2].mxu0 }
 0x2e4   : > { %v3928_v30 = vadd.f32 %v2982_v26, %v2836_v27  ;;  %v2838_v32 = vpop.f32.mrb[2].mxu1  ;;  %v2986_v33 = vpop.f32.mrb[3].mxu0 }
 0x2e5   : > { %v3068_v34 = vadd.f32 %v3927_v28, %v3031_v22  ;;  %v3929_v35 = vadd.f32 %v2984_v29, %v2838_v32  ;;  %v2840_v36 = vpop.f32.mrb[3].mxu1  ;;  %v3056_v28 = vpop.permute.xlu0 %3055 }
 0x2e6   : > { %v3173_v37 = vadd.f32 %v3928_v30, %v3031_v22  ;;  %v3930_v38 = vadd.f32 %v2986_v33, %v2840_v36 }
 0x2e7   : > { %vm3076_vm6 = vcmp.ge.f32.partialorder %v3068_v34, 0.0  ;;  %v3085_v39 = vmul.f32 %v5183_v31, %v3068_v34  ;;  %v3069_v40 = vadd.f32 %v3929_v35, %v3036_v24 }
 0x2e8   : > { %vm3181_vm7 = vcmp.ge.f32.partialorder %v3173_v37, 0.0  ;;  %v3189_v41 = vmul.f32 %v3173_v37, %v5183_v31  ;;  %v3174_v42 = vadd.f32 %v3930_v38, %v3036_v24 }
 0x2e9   : > { %v5187_v43 = vsel %vm3076_vm6, %v3068_v34, %v3085_v39  ;;  %vm3077_vm8 = vcmp.ge.f32.partialorder %v3069_v40, 0.0  ;;  %v3086_v44 = vmul.f32 %v5183_v31, %v3069_v40  ;;  %v2990_v45 = vpop.f32.mrb[4].mxu0  ;;  %v3061_v39 = vpop.permute.xlu1 %3060  ;;  %vm3245_vm6 = vcmask 162816  }
 0x2ea   : > { %v3197_v47 = vsel %vm3181_vm7, %v3173_v37, %v3189_v41  ;;  %vm3182_vm9 = vcmp.ge.f32.partialorder %v3174_v42, 0.0  ;;  %v3190_v48 = vmul.f32 %v3174_v42, %v5183_v31  ;;  %v2844_v49 = vpop.f32.mrb[4].mxu1  ;;  %v2992_v50 = vpop.f32.mrb[5].mxu0  ;;  %vm3302_vm7 = vcmask 289792  }
 0x2eb   : > { %v4024_v51 = vpack.i.bf16 %v3197_v47, %v5187_v43  ;;  %v5192_v52 = vsel %vm3077_vm8, %v3069_v40, %v3086_v44  ;;  %v3931_v53 = vadd.f32 %v2990_v45, %v2844_v49  ;;  %v2846_v54 = vpop.f32.mrb[5].mxu1  ;;  %v2994_v55 = vpop.f32.mrb[6].mxu0 }
 0x2ec   : > { %v3198_v56 = vsel %vm3182_vm9, %v3174_v42, %v3190_v48  ;;  %v3932_v57 = vadd.f32 %v2992_v50, %v2846_v54  ;;  %v2848_v58 = vpop.f32.mrb[6].mxu1  ;;  %v2996_v59 = vpop.f32.mrb[7].mxu0  ;;  %v4029_v5 = vpack.i.bf16 %v5192_v52, %v5187_v43 }
 0x2ed   : > { %v4039_v60 = vpack.i.bf16 %v3198_v56, %v5192_v52  ;;  %v3070_v61 = vadd.f32 %v3931_v53, %v3041_v46  ;;  %v3933_v62 = vadd.f32 %v2994_v55, %v2848_v58  ;;  %4025 = vrot.lane.b32.xlu1 %v4024_v51, %s4386_s23  ;;  %v2850_v63 = vpop.f32.mrb[7].mxu1 }
 0x2ee   : > { %v3175_v0 = vadd.f32 %v3932_v57, %v3041_v46  ;;  %v3934_v1 = vadd.f32 %v2996_v59, %v2850_v63 }
 0x2ef   : > { %v3087_v3 = vmul.f32 %v5183_v31, %v3070_v61  ;;  %v3071_v4 = vadd.f32 %v3933_v62, %v3046_v2  ;;  %4040 = vrot.lane.b32.xlu0 %v4039_v60, %s4386_s23  ;;  %vm3078_vm10 = vcmp.ge.f32.partialorder %v3070_v61, 0.0  ;;  %v3066_v60 = vpop.permute.xlu0 %3065 }
 0x2f0   : > { %v3191_v6 = vmul.f32 %v3175_v0, %v5183_v31  ;;  %vm3183_vm11 = vcmp.ge.f32.partialorder %v3175_v0, 0.0  ;;  %v3176_v8 = vadd.f32 %v3934_v1, %v3046_v2 }
 0x2f1   : > { %vm3079_vm12 = vcmp.ge.f32.partialorder %v3071_v4, 0.0  ;;  %v3088_v7 = vmul.f32 %v5183_v31, %v3071_v4  ;;  %4030 = vrot.lane.b32.xlu1 %v4029_v5, %s4387_s7  ;;  %v3000_v9 = vpop.f32.mrb[8].mxu0  ;;  %v5203_v13 = vsel %vm3078_vm10, %v3070_v61, %v3087_v3 }
 0x2f2   : > { %v2854_v11 = vpop.f32.mrb[8].mxu1  ;;  %v3002_v12 = vpop.f32.mrb[9].mxu0  ;;  %v3199_v18 = vsel %vm3183_vm11, %v3175_v0, %v3191_v6  ;;  %v3192_v23 = vmul.f32 %v3176_v8, %v5183_v31  ;;  %vm3184_vm13 = vcmp.ge.f32.partialorder %v3176_v8, 0.0 }
 0x2f3   : > { %v5205_v14 = vsel %vm3079_vm12, %v3071_v4, %v3088_v7  ;;  %v3935_v15 = vadd.f32 %v3000_v9, %v2854_v11  ;;  %v2856_v16 = vpop.f32.mrb[9].mxu1  ;;  %v3004_v17 = vpop.f32.mrb[10].mxu0  ;;  %v4044_v30 = vpack.i.bf16 %v3199_v18, %v5203_v13 }
 0x2f4   : > { %v3936_v19 = vadd.f32 %v3002_v12, %v2856_v16  ;;  %v2858_v20 = vpop.f32.mrb[10].mxu1  ;;  %v3006_v21 = vpop.f32.mrb[11].mxu0  ;;  %v4049_v22 = vpack.i.bf16 %v5205_v14, %v5203_v13  ;;  %v3200_v36 = vsel %vm3184_vm13, %v3176_v8, %v3192_v23 }
 0x2f5   : > { %v3072_v24 = vadd.f32 %v3935_v15, %v3051_v10  ;;  %v3937_v25 = vadd.f32 %v3004_v17, %v2858_v20  ;;  %4035 = vrot.lane.b32.xlu1 %v4029_v5, %s4388_s11  ;;  %v2860_v26 = vpop.f32.mrb[11].mxu1  ;;  %v4059_v50 = vpack.i.bf16 %v3200_v36, %v5205_v14 }
 0x2f6   : > { %v3177_v27 = vadd.f32 %v3936_v19, %v3051_v10  ;;  %v3938_v29 = vadd.f32 %v3006_v21, %v2860_v26  ;;  %4050 = vrot.lane.b32.xlu0 %v4049_v22, %s4387_s7 }
 0x2f7   : > { %vm3080_vm14 = vcmp.ge.f32.partialorder %v3072_v24, 0.0  ;;  %v3089_v32 = vmul.f32 %v5183_v31, %v3072_v24  ;;  %v3073_v33 = vadd.f32 %v3937_v25, %v3056_v28 }
 0x2f8   : > { %vm3185_vm15 = vcmp.ge.f32.partialorder %v3177_v27, 0.0  ;;  %v3193_v34 = vmul.f32 %v3177_v27, %v5183_v31  ;;  %v3178_v35 = vadd.f32 %v3938_v29, %v3056_v28 }
 0x2f9   : > { %v5215_v37 = vsel %vm3080_vm14, %v3072_v24, %v3089_v32  ;;  %vm3081_vm0 = vcmp.ge.f32.partialorder %v3073_v33, 0.0  ;;  %v3090_v38 = vmul.f32 %v5183_v31, %v3073_v33  ;;  %4045 = vrot.lane.b32.xlu1 %v4044_v30, %s4386_s23  ;;  %v3010_v40 = vpop.f32.mrb[12].mxu0 }
 0x2fa   : > { %v3201_v41 = vsel %vm3185_vm15, %v3177_v27, %v3193_v34  ;;  %vm3186_vm1 = vcmp.ge.f32.partialorder %v3178_v35, 0.0  ;;  %v3194_v42 = vmul.f32 %v3178_v35, %v5183_v31  ;;  %4055 = vrot.lane.b32.xlu0 %v4049_v22, %s4388_s11  ;;  %v2864_v44 = vpop.f32.mrb[12].mxu1  ;;  %v3012_v45 = vpop.f32.mrb[13].mxu0 }
 0x2fb   : > { %v3939_v46 = vadd.f32 %v3010_v40, %v2864_v44  ;;  %v2866_v47 = vpop.f32.mrb[13].mxu1  ;;  %v3014_v48 = vpop.f32.mrb[14].mxu0  ;;  %v4064_v49 = vpack.i.bf16 %v3201_v41, %v5215_v37  ;;  %v5224_v51 = vsel %vm3081_vm0, %v3073_v33, %v3090_v38 }
 0x2fc   : > { %v3940_v53 = vadd.f32 %v3012_v45, %v2866_v47  ;;  %v2868_v54 = vpop.f32.mrb[14].mxu1  ;;  %v3016_v55 = vpop.f32.mrb[15].mxu0  ;;  %v3202_v56 = vsel %vm3186_vm1, %v3178_v35, %v3194_v42  ;;  %v4069_v1 = vpack.i.bf16 %v5224_v51, %v5215_v37 }
 0x2fd   : > { %v3074_v57 = vadd.f32 %v3939_v46, %v3061_v39  ;;  %v3941_v58 = vadd.f32 %v3014_v48, %v2868_v54  ;;  %4065 = vrot.lane.b32.xlu1 %v4064_v49, %s4386_s23  ;;  %v2870_v59 = vpop.f32.mrb[15].mxu1  ;;  %v4079_v3 = vpack.i.bf16 %v3202_v56, %v5224_v51 }
 0x2fe   : > { %v3179_v61 = vadd.f32 %v3940_v53, %v3061_v39  ;;  %v3942_v62 = vadd.f32 %v3016_v55, %v2870_v59  ;;  %4060 = vrot.lane.b32.xlu0 %v4059_v50, %s4386_s23 }
 0x2ff   : > { %v3091_v63 = vmul.f32 %v5183_v31, %v3074_v57  ;;  %v3075_v0 = vadd.f32 %v3941_v58, %v3066_v60  ;;  %vm3082_vm2 = vcmp.ge.f32.partialorder %v3074_v57, 0.0 }
 0x300   : > { %v3195_v2 = vmul.f32 %v3179_v61, %v5183_v31  ;;  %vm3187_vm3 = vcmp.ge.f32.partialorder %v3179_v61, 0.0  ;;  %v3180_v5 = vadd.f32 %v3942_v62, %v3066_v60 }
 0x301   : > { %vm3083_vm4 = vcmp.ge.f32.partialorder %v3075_v0, 0.0  ;;  %v3092_v4 = vmul.f32 %v5183_v31, %v3075_v0  ;;  %4070 = vrot.lane.b32.xlu1 %v4069_v1, %s4387_s7  ;;  %v5236_v6 = vsel %vm3082_vm2, %v3074_v57, %v3091_v63 }
 0x302   : > { %4080 = vrot.lane.b32.xlu0 %v4079_v3, %s4386_s23  ;;  %v3203_v8 = vsel %vm3187_vm3, %v3179_v61, %v3195_v2  ;;  %v3196_v10 = vmul.f32 %v3180_v5, %v5183_v31  ;;  %vm3188_vm5 = vcmp.ge.f32.partialorder %v3180_v5, 0.0 }
 0x303   : > { %v5238_v7 = vsel %vm3083_vm4, %v3075_v0, %v3092_v4  ;;  %v4094_v11 = vpack.i.bf16 %v3203_v8, %v5236_v6 }
 0x304   : > { %v4084_v9 = vpack.i.bf16 %v5238_v7, %v5236_v6  ;;  %v3204_v12 = vsel %vm3188_vm5, %v3180_v5, %v3196_v10 }
 0x305   : > { %4075 = vrot.lane.b32.xlu1 %v4069_v1, %s4388_s11  ;;  %v4099_v15 = vpack.i.bf16 %v3204_v12, %v5238_v7 }
 0x306   : > { %4085 = vrot.lane.b32.xlu0 %v4084_v9, %s4387_s7 }
 0x309   : > { %4095 = vrot.lane.b32.xlu1 %v4094_v11, %s4386_s23 }
 0x30a   : > { %4090 = vrot.lane.b32.xlu0 %v4084_v9, %s4388_s11 }
 0x30e   : > { %4100 = vrot.lane.b32.xlu0 %v4099_v15, %s4386_s23 }
 0x35f   : > { %v4026_v16 = vpop.permute.xlu1 %4025 }
 0x360   : > { %v4028_v20 = vunpack.i.h.bf16 %v4026_v16  ;;  %v4027_v21 = vunpack.i.l.bf16 %v4026_v16 }
 0x361   : > { %v4041_v31 = vpop.permute.xlu0 %4040 }
 0x362   : > { %v4043_v22 = vunpack.i.h.bf16 %v4041_v31  ;;  %v4042_v23 = vunpack.i.l.bf16 %v4041_v31  ;;  %v3246_v34 = vsel %vm3245_vm6, %v4027_v21, %v4028_v20 }
 0x363   : > { %v4031_v17 = vpop.permute.xlu1 %4030 }
 0x364   : > { %v4033_v18 = vunpack.i.h.bf16 %v4031_v17  ;;  %v4032_v19 = vunpack.i.l.bf16 %v4031_v17  ;;  %v3247_v35 = vsel %vm3245_vm6, %v4042_v23, %v4043_v22 }
 0x366   : > { %v3134_v25 = vmax.f32 %v5192_v52, %v4033_v18  ;;  %v3133_v26 = vmax.f32 %v5187_v43, %v4032_v19 }
 0x367   : > { %v4036_v24 = vpop.permute.xlu1 %4035 }
 0x368   : > { %v4038_v28 = vunpack.i.h.bf16 %v4036_v24  ;;  %v4037_v27 = vunpack.i.l.bf16 %v4036_v24  ;;  %v4051_v29 = vpop.permute.xlu0 %4050 }
 0x369   : > { %v4052_v30 = vunpack.i.l.bf16 %v4051_v29  ;;  %v4053_v36 = vunpack.i.h.bf16 %v4051_v29 }
 0x36a   : > { %v3165_v32 = vmax.f32 %v3133_v26, %v4037_v27  ;;  %v3166_v33 = vmax.f32 %v3134_v25, %v4038_v28 }
 0x36b   : > { %v4046_v38 = vpop.permute.xlu1 %4045  ;;  %v3135_v43 = vmax.f32 %v5203_v13, %v4052_v30  ;;  %v3136_v50 = vmax.f32 %v5205_v14, %v4053_v36 }
 0x36c   : > { %v3262_v39 = vmax.f32 %v3165_v32, %v3246_v34  ;;  %v3263_v40 = vmax.f32 %v3166_v33, %v3247_v35  ;;  %v4048_v41 = vunpack.i.h.bf16 %v4046_v38  ;;  %v4047_v42 = vunpack.i.l.bf16 %v4046_v38  ;;  %v4056_v52 = vpop.permute.xlu0 %4055 }
 0x36d   : > { %v4057_v44 = vunpack.i.l.bf16 %v4056_v52  ;;  %v4058_v47 = vunpack.i.h.bf16 %v4056_v52 }
 0x36e   : > { %v3919_v45 = vpack.c.bf16 %v3262_v39, %v3262_v39  ;;  %v3920_v46 = vpack.c.bf16 %v3263_v40, %v3263_v40  ;;  %v3248_v53 = vsel %vm3245_vm6, %v4047_v42, %v4048_v41 }
 0x36f   : > { %v3167_v48 = vmax.f32 %v3135_v43, %v4057_v44  ;;  %v4066_v49 = vpop.permute.xlu1 %4065  ;;  %v3168_v13 = vmax.f32 %v3136_v50, %v4058_v47 }
 0x370   : > { %3303 = vst.msk [vmem:[%s5258_s16] sm:$0xf] %vm3302_vm7, %v3919_v45  ;;  %3304 = vst.msk [vmem:[%s5258_s16 + $0x4] sm:$0xf] %vm3302_vm7, %v3920_v46  ;;  %v4061_v54 = vpop.permute.xlu0 %4060  ;;  %v4068_v14 = vunpack.i.h.bf16 %v4066_v49  ;;  %v4067_v2 = vunpack.i.l.bf16 %v4066_v49 }
 0x371   : > { %v3264_v55 = vmax.f32 %v3167_v48, %v3248_v53  ;;  %v4063_v56 = vunpack.i.h.bf16 %v4061_v54  ;;  %v4062_v57 = vunpack.i.l.bf16 %v4061_v54 }
 0x372   : > { %v3250_v31 = vsel %vm3245_vm6, %v4067_v2, %v4068_v14 }
 0x373   : > { %v3921_v58 = vpack.c.bf16 %v3264_v55, %v3264_v55  ;;  %v3249_v59 = vsel %vm3245_vm6, %v4062_v57, %v4063_v56  ;;  %v4071_v60 = vpop.permute.xlu1 %4070 }
 0x374   : > { %v3265_v61 = vmax.f32 %v3168_v13, %v3249_v59  ;;  %v4073_v62 = vunpack.i.h.bf16 %v4071_v60  ;;  %v4072_v63 = vunpack.i.l.bf16 %v4071_v60  ;;  %v4081_v0 = vpop.permute.xlu0 %4080 }
 0x375   : > { %3305 = vst.msk [vmem:[%s5258_s16 + $0x8] sm:$0xf] %vm3302_vm7, %v3921_v58  ;;  %v4083_v3 = vunpack.i.h.bf16 %v4081_v0  ;;  %v4082_v4 = vunpack.i.l.bf16 %v4081_v0 }
 0x376   : > { %v3922_v1 = vpack.c.bf16 %v3265_v61, %v3265_v61  ;;  %v3138_v8 = vmax.f32 %v5224_v51, %v4073_v62  ;;  %v3137_v9 = vmax.f32 %v5215_v37, %v4072_v63 }
 0x377   : > { %v4076_v5 = vpop.permute.xlu1 %4075  ;;  %v3251_v18 = vsel %vm3245_vm6, %v4082_v4, %v4083_v3 }
 0x378   : > { %3306 = vst.msk [vmem:[%s5258_s16 + $0xc] sm:$0xf] %vm3302_vm7, %v3922_v1  ;;  %v4078_v10 = vunpack.i.h.bf16 %v4076_v5  ;;  %v4077_v11 = vunpack.i.l.bf16 %v4076_v5  ;;  %v4086_v12 = vpop.permute.xlu0 %4085 }
 0x379   : > { %v4087_v15 = vunpack.i.l.bf16 %v4086_v12  ;;  %v4088_v19 = vunpack.i.h.bf16 %v4086_v12 }
 0x37a   : > { %v3169_v16 = vmax.f32 %v3137_v9, %v4077_v11  ;;  %v3170_v17 = vmax.f32 %v3138_v8, %v4078_v10 }
 0x37b   : > { %v4096_v20 = vpop.permute.xlu1 %4095  ;;  %v3139_v37 = vmax.f32 %v5236_v6, %v4087_v15  ;;  %v3140_v30 = vmax.f32 %v5238_v7, %v4088_v19 }
 0x37c   : > { %v3266_v21 = vmax.f32 %v3169_v16, %v3250_v31  ;;  %v3267_v22 = vmax.f32 %v3170_v17, %v3251_v18  ;;  %v4098_v23 = vunpack.i.h.bf16 %v4096_v20  ;;  %v4097_v51 = vunpack.i.l.bf16 %v4096_v20  ;;  %v4091_v24 = vpop.permute.xlu0 %4090 }
 0x37d   : > { %v4092_v25 = vunpack.i.l.bf16 %v4091_v24  ;;  %v4093_v27 = vunpack.i.h.bf16 %v4091_v24 }
 0x37e   : > { %v3923_v26 = vpack.c.bf16 %v3266_v21, %v3266_v21  ;;  %v3924_v28 = vpack.c.bf16 %v3267_v22, %v3267_v22  ;;  %v3252_v32 = vsel %vm3245_vm6, %v4097_v51, %v4098_v23 }
 0x37f   : > { %v3171_v29 = vmax.f32 %v3139_v37, %v4092_v25  ;;  %v3172_v6 = vmax.f32 %v3140_v30, %v4093_v27 }
 0x380   : > { %3307 = vst.msk [vmem:[%s5258_s16 + $0x10] sm:$0xf] %vm3302_vm7, %v3923_v26  ;;  %3308 = vst.msk [vmem:[%s5258_s16 + $0x14] sm:$0xf] %vm3302_vm7, %v3924_v28  ;;  %v4101_v33 = vpop.permute.xlu0 %4100 }
 0x381   : > { %v3268_v34 = vmax.f32 %v3171_v29, %v3252_v32  ;;  %v4103_v35 = vunpack.i.h.bf16 %v4101_v33  ;;  %v4102_v36 = vunpack.i.l.bf16 %v4101_v33 }
 0x383   : > { %v3925_v38 = vpack.c.bf16 %v3268_v34, %v3268_v34  ;;  %v3253_v39 = vsel %vm3245_vm6, %v4102_v36, %v4103_v35 }
 0x384   : > { %v3269_v40 = vmax.f32 %v3172_v6, %v3253_v39 }
 0x385   : > { %3309 = vst.msk [vmem:[%s5258_s16 + $0x18] sm:$0xf] %vm3302_vm7, %v3925_v38 }
 0x386   : > { %v3926_v41 = vpack.c.bf16 %v3269_v40, %v3269_v40 }
 0x388   : > { %3310 = vst.msk [vmem:[%s5258_s16 + $0x1c] sm:$0xf] %vm3302_vm7, %v3926_v41 }
 0x389 PF: > { %s15_s17 = sadd.s32 1, %s4348_s17  }
 0x38a   : > { %p12_p4 = scmp.ge.s32.totalorder %s15_s17, 4  }
 0x38c   :  { %14 = sbr.rel (!%p12_p4) target bundleno = 2 (0x2), region = 69 }

</bundles_post_ra>
